<compile_context>
chip_gen: v7x
topology: tpu7x:2x2x1
jax: 0.10.0
libtpu: 0.0.40
codegen_flags: <defaults>
</compile_context>

<pallas_src>
import functools

import numpy as np
import jax
import jax.numpy as jnp
from jax.experimental import pallas as pl
from jax.experimental.pallas import tpu as pltpu


# ----------------------------------------------------------------------------
# Helpers
# ----------------------------------------------------------------------------
def _round_up(x, m):
    return ((x + m - 1) // m) * m


def _choose_m_tile(M, target=1024):
    """Pick an M tile: prefer a multiple-of-8 divisor of M <= target."""
    if M <= target:
        return M
    t = max(8, (target // 8) * 8)
    for tm in range(t, 7, -8):
        if M % tm == 0:
            return tm
    if M <= 2 * target:
        return M                      # single full-M block still fits easily
    return t                          # partial last block (OOB writes dropped)


def _choose_k_tile(K, max_tk=3584):
    """Pick a K tile that divides K exactly (K is a multiple of 128)."""
    if K <= max_tk:
        return K
    best = 128
    for tk in range(128, max_tk + 1, 128):
        if K % tk == 0:
            best = tk
    return best


# ----------------------------------------------------------------------------
# Pallas kernels: Y = (relu)(X @ W + b), bf16 operands, f32 MXU accumulate.
# ----------------------------------------------------------------------------
def _mm_bias_act_kernel(x_ref, w_ref, b_ref, o_ref, *, apply_relu):
    # Single-K-tile fast path: no scratch accumulator.
    y = jnp.dot(x_ref[...], w_ref[...], preferred_element_type=jnp.float32)
    y = y + b_ref[...]
    if apply_relu:
        y = jnp.maximum(y, 0.0)
    o_ref[...] = y.astype(o_ref.dtype)


def _mm_bias_act_acc_kernel(x_ref, w_ref, b_ref, o_ref, acc_ref, *, apply_relu):
    k = pl.program_id(1)

    @pl.when(k == 0)
    def _():
        acc_ref[...] = jnp.zeros_like(acc_ref)

    acc_ref[...] += jnp.dot(x_ref[...], w_ref[...],
                            preferred_element_type=jnp.float32)

    @pl.when(k == pl.num_programs(1) - 1)
    def _():
        y = acc_ref[...] + b_ref[...]
        if apply_relu:
            y = jnp.maximum(y, 0.0)
        o_ref[...] = y.astype(o_ref.dtype)


def linear_pallas(x, w, b, *, relu, out_dtype=jnp.bfloat16,
                  tm_target=1024, tk_max=3584):
    """(relu)(x @ w + b). x:(M,K), w:(K,N) bf16 (K multiple of 128), b:(N,)."""
    M, K = x.shape
    Kw, N = w.shape
    assert K == Kw, (K, Kw)
    assert K % 128 == 0, "callers pre-pad K to a multiple of 128"

    x = x.astype(w.dtype)
    b2 = b.reshape(1, N).astype(jnp.float32)

    tm = _choose_m_tile(M, tm_target)
    mt = pl.cdiv(M, tm)
    tk = _choose_k_tile(K, tk_max)
    kt = K // tk

    if kt == 1:
        kernel = functools.partial(_mm_bias_act_kernel, apply_relu=relu)
        return pl.pallas_call(
            kernel,
            out_shape=jax.ShapeDtypeStruct((M, N), out_dtype),
            grid_spec=pltpu.PrefetchScalarGridSpec(
                num_scalar_prefetch=0,
                grid=(mt,),
                in_specs=[
                    pl.BlockSpec((tm, K), lambda m: (m, 0)),
                    pl.BlockSpec((K, N), lambda m: (0, 0)),
                    pl.BlockSpec((1, N), lambda m: (0, 0)),
                ],
                out_specs=pl.BlockSpec((tm, N), lambda m: (m, 0)),
            ),
            compiler_params=pltpu.CompilerParams(
                dimension_semantics=("parallel",)),
        )(x, w, b2)

    kernel = functools.partial(_mm_bias_act_acc_kernel, apply_relu=relu)
    return pl.pallas_call(
        kernel,
        out_shape=jax.ShapeDtypeStruct((M, N), out_dtype),
        grid_spec=pltpu.PrefetchScalarGridSpec(
            num_scalar_prefetch=0,
            grid=(mt, kt),
            in_specs=[
                pl.BlockSpec((tm, tk), lambda m, k: (m, k)),
                pl.BlockSpec((tk, N), lambda m, k: (k, 0)),
                pl.BlockSpec((1, N), lambda m, k: (0, 0)),
            ],
            out_specs=pl.BlockSpec((tm, N), lambda m, k: (m, 0)),
            scratch_shapes=[pltpu.VMEM((tm, N), jnp.float32)],
        ),
        compiler_params=pltpu.CompilerParams(
            dimension_semantics=("parallel", "arbitrary")),
    )(x, w, b2)


# ----------------------------------------------------------------------------
# Fused 3-layer MLP head kernel (inverse / forward model): one pallas_call.
# ----------------------------------------------------------------------------
def _mlp3_kernel(x_ref, w1_ref, b1_ref, w2_ref, b2_ref, w3_ref, b3_ref, o_ref):
    h = jnp.dot(x_ref[...], w1_ref[...],
                preferred_element_type=jnp.float32) + b1_ref[...]
    h = jnp.maximum(h, 0.0).astype(w2_ref.dtype)
    h = jnp.dot(h, w2_ref[...],
                preferred_element_type=jnp.float32) + b2_ref[...]
    h = jnp.maximum(h, 0.0).astype(w3_ref.dtype)
    y = jnp.dot(h, w3_ref[...],
                preferred_element_type=jnp.float32) + b3_ref[...]
    o_ref[...] = y.astype(o_ref.dtype)


def mlp3_pallas(x, w1, b1, w2, b2, w3, b3, *, out_dtype=jnp.float32):
    x = x.astype(w1.dtype)
    M = x.shape[0]
    N = w3.shape[1]
    return pl.pallas_call(
        _mlp3_kernel,
        out_shape=jax.ShapeDtypeStruct((M, N), out_dtype),
    )(x, w1, b1.reshape(1, -1).astype(jnp.float32),
      w2, b2.reshape(1, -1).astype(jnp.float32),
      w3, b3.reshape(1, -1).astype(jnp.float32))


# ----------------------------------------------------------------------------
# Conv2d(k=3, stride=2, pad=1) via im2col (glue) + Pallas GEMM.
# ----------------------------------------------------------------------------
def _im2col_k3_s2_p1(x):
    """Returns cols:(N*Ho*Wo, Kp) in (ky,kx,c) order, K zero-padded to 128·n."""
    n, h, w, c = x.shape
    ho = (h + 2 - 3) // 2 + 1
    wo = (w + 2 - 3) // 2 + 1
    xp = jnp.pad(x, ((0, 0), (1, 1), (1, 1), (0, 0)))
    cols = [xp[:, ky:ky + 2 * ho:2, kx:kx + 2 * wo:2, :]
            for ky in range(3) for kx in range(3)]
    k = 9 * c
    kp = _round_up(k, 128)
    if kp != k:
        cols.append(jnp.zeros((n, ho, wo, kp - k), x.dtype))
    cols = jnp.concatenate(cols, axis=-1)          # (N, Ho, Wo, Kp)
    return cols.reshape(n * ho * wo, kp), (n, ho, wo)


# ----------------------------------------------------------------------------
# Parameters
# ----------------------------------------------------------------------------
def init_params(key, in_ch, feature_dim, action_size):
    """f32 params with 'logical' shapes (convs HWIO, linears (in,out))."""
    keys = jax.random.split(key, 32)
    ki = iter(keys)

    def conv(cin, cout):
        fan_in = 9 * cin
        w = jax.random.normal(next(ki), (3, 3, cin, cout), jnp.float32) / np.sqrt(fan_in)
        b = 0.01 * jax.random.normal(next(ki), (cout,), jnp.float32)
        return w, b

    def lin(fin, fout):
        w = jax.random.normal(next(ki), (fin, fout), jnp.float32) / np.sqrt(fin)
        b = 0.01 * jax.random.normal(next(ki), (fout,), jnp.float32)
        return w, b

    p = {}
    p['conv1_w'], p['conv1_b'] = conv(in_ch, 32)
    p['conv2_w'], p['conv2_b'] = conv(32, 64)
    p['conv3_w'], p['conv3_b'] = conv(64, 128)
    p['fc_w'], p['fc_b'] = lin(128 * 15 * 15, feature_dim)
    p['inv1_w'], p['inv1_b'] = lin(2 * feature_dim, 512)
    p['inv2_w'], p['inv2_b'] = lin(512, 256)
    p['inv3_w'], p['inv3_b'] = lin(256, action_size)
    p['fwd1_w'], p['fwd1_b'] = lin(feature_dim + action_size, 512)
    p['fwd2_w'], p['fwd2_b'] = lin(512, 256)
    p['fwd3_w'], p['fwd3_b'] = lin(256, feature_dim)
    return p


def prepare_params(p):
    """One-time conversion to kernel layout: 2-D, K zero-padded to 128·n,
    bf16 weights + f32 biases (done OUTSIDE the jitted forward)."""
    def prep_w(w2d):
        K, N = w2d.shape
        kp = _round_up(K, 128)
        if kp != K:
            w2d = jnp.pad(w2d, ((0, kp - K), (0, 0)))
        return w2d.astype(jnp.bfloat16)

    q = {}
    for name in ('conv1', 'conv2', 'conv3'):
        w = p[name + '_w']                               # (3,3,Cin,Cout) HWIO
        q[name + '_w'] = prep_w(w.reshape(-1, w.shape[-1]))
        q[name + '_b'] = p[name + '_b'].astype(jnp.float32)
    for name in ('fc', 'inv1', 'inv2', 'inv3', 'fwd1', 'fwd2', 'fwd3'):
        q[name + '_w'] = prep_w(p[name + '_w'])
        q[name + '_b'] = p[name + '_b'].astype(jnp.float32)
    return q


# ----------------------------------------------------------------------------
# ICM forward
# ----------------------------------------------------------------------------
def _feature_extractor(x_nhwc, p, mm):
    h = x_nhwc
    for name in ('conv1', 'conv2', 'conv3'):
        cols, (n, ho, wo) = _im2col_k3_s2_p1(h)
        w = p[name + '_w']
        assert cols.shape[1] == w.shape[0]
        y = mm(cols, w, p[name + '_b'], relu=True, out_dtype=jnp.bfloat16)
        h = y.reshape(n, ho, wo, w.shape[1])
    flat = h.reshape(h.shape[0], -1)                     # NHWC flatten order
    return mm(flat, p['fc_w'], p['fc_b'], relu=True, out_dtype=jnp.bfloat16)


def icm_forward(state_nchw, next_state_nchw, action, p, action_size,
                *, use_ref=False):
    mm = _ref_mm if use_ref else linear_pallas
    mlp3 = _ref_mlp3 if use_ref else mlp3_pallas

    B = state_nchw.shape[0]
    s = jnp.transpose(state_nchw, (0, 2, 3, 1))
    ns = jnp.transpose(next_state_nchw, (0, 2, 3, 1))
    x = jnp.concatenate([s, ns], axis=0).astype(jnp.bfloat16)   # (2B,H,W,C)

    feats = _feature_extractor(x, p, mm)                 # (2B, feature_dim)
    sf, nsf = feats[:B], feats[B:]

    inv_in = jnp.concatenate([sf, nsf], axis=1)
    pred_action = mlp3(inv_in, p['inv1_w'], p['inv1_b'],
                       p['inv2_w'], p['inv2_b'],
                       p['inv3_w'], p['inv3_b'], out_dtype=jnp.float32)

    onehot = jax.nn.one_hot(action, action_size, dtype=jnp.float32)
    fwd_in = jnp.concatenate([sf, onehot.astype(sf.dtype)], axis=1)
    kp = p['fwd1_w'].shape[0]
    if fwd_in.shape[1] != kp:                            # pad K to match padded w
        fwd_in = jnp.pad(fwd_in, ((0, 0), (0, kp - fwd_in.shape[1])))
    pred_next_sf = mlp3(fwd_in, p['fwd1_w'], p['fwd1_b'],
                        p['fwd2_w'], p['fwd2_b'],
                        p['fwd3_w'], p['fwd3_b'], out_dtype=jnp.float32)

    return pred_action, pred_next_sf, nsf.astype(jnp.float32)


# ----------------------------------------------------------------------------
# Pure-JAX reference following the exact same bf16/f32 math path.
# ----------------------------------------------------------------------------
def _ref_mm(x, w, b, *, relu, out_dtype=jnp.bfloat16):
    y = jnp.dot(x.astype(w.dtype), w, preferred_element_type=jnp.float32)
    y = y + b.reshape(1, -1).astype(jnp.float32)
    if relu:
        y = jnp.maximum(y, 0.0)
    return y.astype(out_dtype)


def _ref_mlp3(x, w1, b1, w2, b2, w3, b3, *, out_dtype=jnp.float32):
    h = _ref_mm(x, w1, b1, relu=True, out_dtype=w2.dtype)
    h = _ref_mm(h, w2, b2, relu=True, out_dtype=w3.dtype)
    return _ref_mm(h, w3, b3, relu=False, out_dtype=out_dtype)


if __name__ == "__main__":
    # Linear(128*15*15, ...) in the module implies 120x120 spatial inputs.
    B, C, H, W = 2, 3, 120, 120
    feature_dim, action_size = 256, 6

    key = jax.random.PRNGKey(0)
    k_p, k_s, k_ns, k_a = jax.random.split(key, 4)
    params = prepare_params(init_params(k_p, C, feature_dim, action_size))

    state = jax.random.normal(k_s, (B, C, H, W), jnp.float32)
    next_state = jax.random.normal(k_ns, (B, C, H, W), jnp.float32)
    action = jax.random.randint(k_a, (B,), 0, action_size)

    fwd = jax.jit(functools.partial(icm_forward, action_size=action_size))
    pred_action, pred_next_sf, next_sf = fwd(state, next_state, action, params)
    jax.block_until_ready((pred_action, pred_next_sf, next_sf))

    assert pred_action.shape == (B, action_size)
    assert pred_next_sf.shape == (B, feature_dim)
    assert next_sf.shape == (B, feature_dim)

    # Reference uses the same bf16-operand / f32-accumulate path, so the only
    # differences are summation order + occasional 1-ulp bf16 requantization.
    ra, rf, rn = icm_forward(state, next_state, action, params, action_size,
                             use_ref=True)
    np.testing.assert_allclose(np.asarray(pred_action), np.asarray(ra),
                               rtol=2e-2, atol=2e-2)
    np.testing.assert_allclose(np.asarray(pred_next_sf), np.asarray(rf),
                               rtol=2e-2, atol=2e-2)
    np.testing.assert_allclose(np.asarray(next_sf), np.asarray(rn),
                               rtol=2e-2, atol=2e-2)

    print("KERNEL_OK")
</pallas_src>

<mosaic_0001>
module attributes {stable_mosaic.version = 11 : i64} {
  func.func @_mm_bias_act_kernel(%arg0: i32, %arg1: memref<960x128xbf16, #tpu.memory_space<vmem>>, %arg2: memref<128x32xbf16, #tpu.memory_space<vmem>>, %arg3: memref<1x32xf32, #tpu.memory_space<vmem>>, %arg4: memref<960x32xbf16, #tpu.memory_space<vmem>>) attributes {dimension_semantics = [#tpu.dimension_semantics<parallel>], iteration_bounds = array<i64: 15>, scalar_prefetch = 0 : i64, scratch_operands = 0 : i64, tpu.core_type = #tpu.core_type<tc>, window_params = [{transform_indices = @transform_0, window_bounds = array<i64: 960, 128>}, {pipeline_mode = #tpu.pipeline_mode<synchronous>, transform_indices = @transform_1, window_bounds = array<i64: 128, 32>}, {pipeline_mode = #tpu.pipeline_mode<synchronous>, transform_indices = @transform_2, window_bounds = array<i64: 1, 32>}, {transform_indices = @transform_3, window_bounds = array<i64: 960, 32>}]} {
    %c0 = arith.constant 0 : index
    %c0_0 = arith.constant 0 : index
    %0 = vector.load %arg1[%c0, %c0_0] : memref<960x128xbf16, #tpu.memory_space<vmem>>, vector<960x128xbf16>
    %c0_1 = arith.constant 0 : index
    %c0_2 = arith.constant 0 : index
    %1 = vector.load %arg2[%c0_1, %c0_2] : memref<128x32xbf16, #tpu.memory_space<vmem>>, vector<128x32xbf16>
    %cst = arith.constant dense<0.000000e+00> : vector<960x32xf32>
    %2 = tpu.matmul %0, %1, %cst {dimension_numbers = #tpu.dot_dimension_numbers<[1], [0], [0], [1], [0, 0, 1, 1], [], []>} : vector<960x128xbf16>, vector<128x32xbf16>, vector<960x32xf32> -> vector<960x32xf32>
    %c0_3 = arith.constant 0 : index
    %c0_4 = arith.constant 0 : index
    %3 = vector.load %arg3[%c0_3, %c0_4] : memref<1x32xf32, #tpu.memory_space<vmem>>, vector<1x32xf32>
    %4 = vector.broadcast %3 : vector<1x32xf32> to vector<960x32xf32>
    %5 = arith.addf %2, %4 : vector<960x32xf32>
    %cst_5 = arith.constant 0.000000e+00 : f32
    %6 = vector.broadcast %cst_5 : f32 to vector<960x32xf32>
    %7 = arith.maximumf %5, %6 : vector<960x32xf32>
    %8 = arith.truncf %7 : vector<960x32xf32> to vector<960x32xbf16>
    %c0_6 = arith.constant 0 : index
    %c0_7 = arith.constant 0 : index
    %9 = vector.load %arg4[%c0_6, %c0_7] : memref<960x32xbf16, #tpu.memory_space<vmem>>, vector<960x32xbf16>
    tpu.vector_store %arg4[%c0_6, %c0_7], %8 {strides = array<i32>} : memref<960x32xbf16, #tpu.memory_space<vmem>>, vector<960x32xbf16>,
    return
  }
  func.func @transform_0(%arg0: i32) -> (i32, i32) {
    %c0_i32 = arith.constant 0 : i32
    %c0_i32_0 = arith.constant 0 : i32
    return %arg0, %c0_i32 : i32, i32
  }
  func.func @transform_1(%arg0: i32) -> (i32, i32) {
    %c0_i32 = arith.constant 0 : i32
    %c0_i32_0 = arith.constant 0 : i32
    %c0_i32_1 = arith.constant 0 : i32
    return %c0_i32, %c0_i32_0 : i32, i32
  }
  func.func @transform_2(%arg0: i32) -> (i32, i32) {
    %c0_i32 = arith.constant 0 : i32
    %c0_i32_0 = arith.constant 0 : i32
    %c0_i32_1 = arith.constant 0 : i32
    return %c0_i32, %c0_i32_0 : i32, i32
  }
  func.func @transform_3(%arg0: i32) -> (i32, i32) {
    %c0_i32 = arith.constant 0 : i32
    %c0_i32_0 = arith.constant 0 : i32
    return %arg0, %c0_i32 : i32, i32
  }
}

module attributes {stable_mosaic.version = 11 : i64} {
  func.func @_mm_bias_act_kernel(%arg0: i32, %arg1: memref<720x384xbf16, #tpu.memory_space<vmem>>, %arg2: memref<384x64xbf16, #tpu.memory_space<vmem>>, %arg3: memref<1x64xf32, #tpu.memory_space<vmem>>, %arg4: memref<720x64xbf16, #tpu.memory_space<vmem>>) attributes {dimension_semantics = [#tpu.dimension_semantics<parallel>], iteration_bounds = array<i64: 5>, scalar_prefetch = 0 : i64, scratch_operands = 0 : i64, tpu.core_type = #tpu.core_type<tc>, window_params = [{transform_indices = @transform_0, window_bounds = array<i64: 720, 384>}, {pipeline_mode = #tpu.pipeline_mode<synchronous>, transform_indices = @transform_1, window_bounds = array<i64: 384, 64>}, {pipeline_mode = #tpu.pipeline_mode<synchronous>, transform_indices = @transform_2, window_bounds = array<i64: 1, 64>}, {transform_indices = @transform_3, window_bounds = array<i64: 720, 64>}]} {
    %c0 = arith.constant 0 : index
    %c0_0 = arith.constant 0 : index
    %0 = vector.load %arg1[%c0, %c0_0] : memref<720x384xbf16, #tpu.memory_space<vmem>>, vector<720x384xbf16>
    %c0_1 = arith.constant 0 : index
    %c0_2 = arith.constant 0 : index
    %1 = vector.load %arg2[%c0_1, %c0_2] : memref<384x64xbf16, #tpu.memory_space<vmem>>, vector<384x64xbf16>
    %cst = arith.constant dense<0.000000e+00> : vector<720x64xf32>
    %2 = tpu.matmul %0, %1, %cst {dimension_numbers = #tpu.dot_dimension_numbers<[1], [0], [0], [1], [0, 0, 1, 1], [], []>} : vector<720x384xbf16>, vector<384x64xbf16>, vector<720x64xf32> -> vector<720x64xf32>
    %c0_3 = arith.constant 0 : index
    %c0_4 = arith.constant 0 : index
    %3 = vector.load %arg3[%c0_3, %c0_4] : memref<1x64xf32, #tpu.memory_space<vmem>>, vector<1x64xf32>
    %4 = vector.broadcast %3 : vector<1x64xf32> to vector<720x64xf32>
    %5 = arith.addf %2, %4 : vector<720x64xf32>
    %cst_5 = arith.constant 0.000000e+00 : f32
    %6 = vector.broadcast %cst_5 : f32 to vector<720x64xf32>
    %7 = arith.maximumf %5, %6 : vector<720x64xf32>
    %8 = arith.truncf %7 : vector<720x64xf32> to vector<720x64xbf16>
    %c0_6 = arith.constant 0 : index
    %c0_7 = arith.constant 0 : index
    %9 = vector.load %arg4[%c0_6, %c0_7] : memref<720x64xbf16, #tpu.memory_space<vmem>>, vector<720x64xbf16>
    tpu.vector_store %arg4[%c0_6, %c0_7], %8 {strides = array<i32>} : memref<720x64xbf16, #tpu.memory_space<vmem>>, vector<720x64xbf16>,
    return
  }
  func.func @transform_0(%arg0: i32) -> (i32, i32) {
    %c0_i32 = arith.constant 0 : i32
    %c0_i32_0 = arith.constant 0 : i32
    return %arg0, %c0_i32 : i32, i32
  }
  func.func @transform_1(%arg0: i32) -> (i32, i32) {
    %c0_i32 = arith.constant 0 : i32
    %c0_i32_0 = arith.constant 0 : i32
    %c0_i32_1 = arith.constant 0 : i32
    return %c0_i32, %c0_i32_0 : i32, i32
  }
  func.func @transform_2(%arg0: i32) -> (i32, i32) {
    %c0_i32 = arith.constant 0 : i32
    %c0_i32_0 = arith.constant 0 : i32
    %c0_i32_1 = arith.constant 0 : i32
    return %c0_i32, %c0_i32_0 : i32, i32
  }
  func.func @transform_3(%arg0: i32) -> (i32, i32) {
    %c0_i32 = arith.constant 0 : i32
    %c0_i32_0 = arith.constant 0 : i32
    return %arg0, %c0_i32 : i32, i32
  }
}

module attributes {stable_mosaic.version = 11 : i64} {
  func.func @_mm_bias_act_kernel(%arg0: i32, %arg1: memref<900x640xbf16, #tpu.memory_space<vmem>>, %arg2: memref<640x128xbf16, #tpu.memory_space<vmem>>, %arg3: memref<1x128xf32, #tpu.memory_space<vmem>>, %arg4: memref<900x128xbf16, #tpu.memory_space<vmem>>) attributes {dimension_semantics = [#tpu.dimension_semantics<parallel>], iteration_bounds = array<i64: 1>, scalar_prefetch = 0 : i64, scratch_operands = 0 : i64, tpu.core_type = #tpu.core_type<tc>, window_params = [{transform_indices = @transform_0, window_bounds = array<i64: 900, 640>}, {pipeline_mode = #tpu.pipeline_mode<synchronous>, transform_indices = @transform_1, window_bounds = array<i64: 640, 128>}, {pipeline_mode = #tpu.pipeline_mode<synchronous>, transform_indices = @transform_2, window_bounds = array<i64: 1, 128>}, {transform_indices = @transform_3, window_bounds = array<i64: 900, 128>}]} {
    %c0 = arith.constant 0 : index
    %c0_0 = arith.constant 0 : index
    %0 = vector.load %arg1[%c0, %c0_0] : memref<900x640xbf16, #tpu.memory_space<vmem>>, vector<900x640xbf16>
    %c0_1 = arith.constant 0 : index
    %c0_2 = arith.constant 0 : index
    %1 = vector.load %arg2[%c0_1, %c0_2] : memref<640x128xbf16, #tpu.memory_space<vmem>>, vector<640x128xbf16>
    %cst = arith.constant dense<0.000000e+00> : vector<900x128xf32>
    %2 = tpu.matmul %0, %1, %cst {dimension_numbers = #tpu.dot_dimension_numbers<[1], [0], [0], [1], [0, 0, 1, 1], [], []>} : vector<900x640xbf16>, vector<640x128xbf16>, vector<900x128xf32> -> vector<900x128xf32>
    %c0_3 = arith.constant 0 : index
    %c0_4 = arith.constant 0 : index
    %3 = vector.load %arg3[%c0_3, %c0_4] : memref<1x128xf32, #tpu.memory_space<vmem>>, vector<1x128xf32>
    %4 = vector.broadcast %3 : vector<1x128xf32> to vector<900x128xf32>
    %5 = arith.addf %2, %4 : vector<900x128xf32>
    %cst_5 = arith.constant 0.000000e+00 : f32
    %6 = vector.broadcast %cst_5 : f32 to vector<900x128xf32>
    %7 = arith.maximumf %5, %6 : vector<900x128xf32>
    %8 = arith.truncf %7 : vector<900x128xf32> to vector<900x128xbf16>
    %c0_6 = arith.constant 0 : index
    %c0_7 = arith.constant 0 : index
    %9 = vector.load %arg4[%c0_6, %c0_7] : memref<900x128xbf16, #tpu.memory_space<vmem>>, vector<900x128xbf16>
    tpu.vector_store %arg4[%c0_6, %c0_7], %8 {strides = array<i32>} : memref<900x128xbf16, #tpu.memory_space<vmem>>, vector<900x128xbf16>,
    return
  }
  func.func @transform_0(%arg0: i32) -> (i32, i32) {
    %c0_i32 = arith.constant 0 : i32
    %c0_i32_0 = arith.constant 0 : i32
    return %arg0, %c0_i32 : i32, i32
  }
  func.func @transform_1(%arg0: i32) -> (i32, i32) {
    %c0_i32 = arith.constant 0 : i32
    %c0_i32_0 = arith.constant 0 : i32
    %c0_i32_1 = arith.constant 0 : i32
    return %c0_i32, %c0_i32_0 : i32, i32
  }
  func.func @transform_2(%arg0: i32) -> (i32, i32) {
    %c0_i32 = arith.constant 0 : i32
    %c0_i32_0 = arith.constant 0 : i32
    %c0_i32_1 = arith.constant 0 : i32
    return %c0_i32, %c0_i32_0 : i32, i32
  }
  func.func @transform_3(%arg0: i32) -> (i32, i32) {
    %c0_i32 = arith.constant 0 : i32
    %c0_i32_0 = arith.constant 0 : i32
    return %arg0, %c0_i32 : i32, i32
  }
}

module attributes {stable_mosaic.version = 11 : i64} {
  func.func @_mm_bias_act_acc_kernel(%arg0: i32, %arg1: i32, %arg2: memref<4x3200xbf16, #tpu.memory_space<vmem>>, %arg3: memref<3200x256xbf16, #tpu.memory_space<vmem>>, %arg4: memref<1x256xf32, #tpu.memory_space<vmem>>, %arg5: memref<4x256xbf16, #tpu.memory_space<vmem>>, %arg6: memref<4x256xf32, #tpu.memory_space<vmem>>) attributes {dimension_semantics = [#tpu.dimension_semantics<parallel>, #tpu.dimension_semantics<arbitrary>], iteration_bounds = array<i64: 1, 9>, scalar_prefetch = 0 : i64, scratch_operands = 1 : i64, tpu.core_type = #tpu.core_type<tc>, window_params = [{transform_indices = @transform_0, window_bounds = array<i64: 4, 3200>}, {transform_indices = @transform_1, window_bounds = array<i64: 3200, 256>}, {pipeline_mode = #tpu.pipeline_mode<synchronous>, transform_indices = @transform_2, window_bounds = array<i64: 1, 256>}, {transform_indices = @transform_3, window_bounds = array<i64: 4, 256>}]} {
    %c0_i32 = arith.constant 0 : i32
    %0 = arith.cmpi eq, %arg1, %c0_i32 : i32
    %1 = arith.extui %0 : i1 to i32
    %c0_i32_0 = arith.constant 0 : i32
    %2 = arith.cmpi ne, %1, %c0_i32_0 : i32
    scf.if %2 {
      %cst_9 = arith.constant 0.000000e+00 : f32
      %12 = vector.broadcast %cst_9 : f32 to vector<4x256xf32>
      %c0_10 = arith.constant 0 : index
      %c0_11 = arith.constant 0 : index
      %13 = vector.load %arg6[%c0_10, %c0_11] : memref<4x256xf32, #tpu.memory_space<vmem>>, vector<4x256xf32>
      tpu.vector_store %arg6[%c0_10, %c0_11], %12 {strides = array<i32>} : memref<4x256xf32, #tpu.memory_space<vmem>>, vector<4x256xf32>,
    } else {
    }
    %c0 = arith.constant 0 : index
    %c0_1 = arith.constant 0 : index
    %3 = vector.load %arg6[%c0, %c0_1] : memref<4x256xf32, #tpu.memory_space<vmem>>, vector<4x256xf32>
    %c0_2 = arith.constant 0 : index
    %c0_3 = arith.constant 0 : index
    %4 = vector.load %arg2[%c0_2, %c0_3] : memref<4x3200xbf16, #tpu.memory_space<vmem>>, vector<4x3200xbf16>
    %c0_4 = arith.constant 0 : index
    %c0_5 = arith.constant 0 : index
    %5 = vector.load %arg3[%c0_4, %c0_5] : memref<3200x256xbf16, #tpu.memory_space<vmem>>, vector<3200x256xbf16>
    %cst = arith.constant dense<0.000000e+00> : vector<4x256xf32>
    %6 = tpu.matmul %4, %5, %cst {dimension_numbers = #tpu.dot_dimension_numbers<[1], [0], [0], [1], [0, 0, 1, 1], [], []>} : vector<4x3200xbf16>, vector<3200x256xbf16>, vector<4x256xf32> -> vector<4x256xf32>
    %7 = arith.addf %3, %6 : vector<4x256xf32>
    %c0_6 = arith.constant 0 : index
    %c0_7 = arith.constant 0 : index
    %8 = vector.load %arg6[%c0_6, %c0_7] : memref<4x256xf32, #tpu.memory_space<vmem>>, vector<4x256xf32>
    tpu.vector_store %arg6[%c0_6, %c0_7], %7 {strides = array<i32>} : memref<4x256xf32, #tpu.memory_space<vmem>>, vector<4x256xf32>,
    %c8_i32 = arith.constant 8 : i32
    %9 = arith.cmpi eq, %arg1, %c8_i32 : i32
    %10 = arith.extui %9 : i1 to i32
    %c0_i32_8 = arith.constant 0 : i32
    %11 = arith.cmpi ne, %10, %c0_i32_8 : i32
    scf.if %11 {
      %c0_9 = arith.constant 0 : index
      %c0_10 = arith.constant 0 : index
      %12 = vector.load %arg6[%c0_9, %c0_10] : memref<4x256xf32, #tpu.memory_space<vmem>>, vector<4x256xf32>
      %c0_11 = arith.constant 0 : index
      %c0_12 = arith.constant 0 : index
      %13 = vector.load %arg4[%c0_11, %c0_12] : memref<1x256xf32, #tpu.memory_space<vmem>>, vector<1x256xf32>
      %14 = vector.broadcast %13 : vector<1x256xf32> to vector<4x256xf32>
      %15 = arith.addf %12, %14 : vector<4x256xf32>
      %cst_13 = arith.constant 0.000000e+00 : f32
      %16 = vector.broadcast %cst_13 : f32 to vector<4x256xf32>
      %17 = arith.maximumf %15, %16 : vector<4x256xf32>
      %18 = arith.truncf %17 : vector<4x256xf32> to vector<4x256xbf16>
      %c0_14 = arith.constant 0 : index
      %c0_15 = arith.constant 0 : index
      %19 = vector.load %arg5[%c0_14, %c0_15] : memref<4x256xbf16, #tpu.memory_space<vmem>>, vector<4x256xbf16>
      tpu.vector_store %arg5[%c0_14, %c0_15], %18 {strides = array<i32>} : memref<4x256xbf16, #tpu.memory_space<vmem>>, vector<4x256xbf16>,
    } else {
    }
    return
  }
  func.func @transform_0(%arg0: i32, %arg1: i32) -> (i32, i32) {
    %c0_i32 = arith.constant 0 : i32
    return %arg0, %arg1 : i32, i32
  }
  func.func @transform_1(%arg0: i32, %arg1: i32) -> (i32, i32) {
    %c0_i32 = arith.constant 0 : i32
    %c0_i32_0 = arith.constant 0 : i32
    return %arg1, %c0_i32 : i32, i32
  }
  func.func @transform_2(%arg0: i32, %arg1: i32) -> (i32, i32) {
    %c0_i32 = arith.constant 0 : i32
    %c0_i32_0 = arith.constant 0 : i32
    %c0_i32_1 = arith.constant 0 : i32
    return %c0_i32, %c0_i32_0 : i32, i32
  }
  func.func @transform_3(%arg0: i32, %arg1: i32) -> (i32, i32) {
    %c0_i32 = arith.constant 0 : i32
    %c0_i32_0 = arith.constant 0 : i32
    return %arg0, %c0_i32 : i32, i32
  }
}

module attributes {stable_mosaic.version = 11 : i64} {
  func.func @_mlp3_kernel(%arg0: memref<2x512xbf16, #tpu.memory_space<vmem>>, %arg1: memref<512x512xbf16, #tpu.memory_space<vmem>>, %arg2: memref<1x512xf32, #tpu.memory_space<vmem>>, %arg3: memref<512x256xbf16, #tpu.memory_space<vmem>>, %arg4: memref<1x256xf32, #tpu.memory_space<vmem>>, %arg5: memref<256x6xbf16, #tpu.memory_space<vmem>>, %arg6: memref<1x6xf32, #tpu.memory_space<vmem>>, %arg7: memref<2x6xf32, #tpu.memory_space<vmem>>) attributes {dimension_semantics = [], scalar_prefetch = 0 : i64, scratch_operands = 0 : i64, tpu.core_type = #tpu.core_type<tc>} {
    %c0 = arith.constant 0 : index
    %c0_0 = arith.constant 0 : index
    %0 = vector.load %arg0[%c0, %c0_0] : memref<2x512xbf16, #tpu.memory_space<vmem>>, vector<2x512xbf16>
    %c0_1 = arith.constant 0 : index
    %c0_2 = arith.constant 0 : index
    %1 = vector.load %arg1[%c0_1, %c0_2] : memref<512x512xbf16, #tpu.memory_space<vmem>>, vector<512x512xbf16>
    %cst = arith.constant dense<0.000000e+00> : vector<2x512xf32>
    %2 = tpu.matmul %0, %1, %cst {dimension_numbers = #tpu.dot_dimension_numbers<[1], [0], [0], [1], [0, 0, 1, 1], [], []>} : vector<2x512xbf16>, vector<512x512xbf16>, vector<2x512xf32> -> vector<2x512xf32>
    %c0_3 = arith.constant 0 : index
    %c0_4 = arith.constant 0 : index
    %3 = vector.load %arg2[%c0_3, %c0_4] : memref<1x512xf32, #tpu.memory_space<vmem>>, vector<1x512xf32>
    %4 = vector.broadcast %3 : vector<1x512xf32> to vector<2x512xf32>
    %5 = arith.addf %2, %4 : vector<2x512xf32>
    %cst_5 = arith.constant 0.000000e+00 : f32
    %6 = vector.broadcast %cst_5 : f32 to vector<2x512xf32>
    %7 = arith.maximumf %5, %6 : vector<2x512xf32>
    %8 = arith.truncf %7 : vector<2x512xf32> to vector<2x512xbf16>
    %c0_6 = arith.constant 0 : index
    %c0_7 = arith.constant 0 : index
    %9 = vector.load %arg3[%c0_6, %c0_7] : memref<512x256xbf16, #tpu.memory_space<vmem>>, vector<512x256xbf16>
    %cst_8 = arith.constant dense<0.000000e+00> : vector<2x256xf32>
    %10 = tpu.matmul %8, %9, %cst_8 {dimension_numbers = #tpu.dot_dimension_numbers<[1], [0], [0], [1], [0, 0, 1, 1], [], []>} : vector<2x512xbf16>, vector<512x256xbf16>, vector<2x256xf32> -> vector<2x256xf32>
    %c0_9 = arith.constant 0 : index
    %c0_10 = arith.constant 0 : index
    %11 = vector.load %arg4[%c0_9, %c0_10] : memref<1x256xf32, #tpu.memory_space<vmem>>, vector<1x256xf32>
    %12 = vector.broadcast %11 : vector<1x256xf32> to vector<2x256xf32>
    %13 = arith.addf %10, %12 : vector<2x256xf32>
    %cst_11 = arith.constant 0.000000e+00 : f32
    %14 = vector.broadcast %cst_11 : f32 to vector<2x256xf32>
    %15 = arith.maximumf %13, %14 : vector<2x256xf32>
    %16 = arith.truncf %15 : vector<2x256xf32> to vector<2x256xbf16>
    %c0_12 = arith.constant 0 : index
    %c0_13 = arith.constant 0 : index
    %17 = vector.load %arg5[%c0_12, %c0_13] : memref<256x6xbf16, #tpu.memory_space<vmem>>, vector<256x6xbf16>
    %cst_14 = arith.constant dense<0.000000e+00> : vector<2x6xf32>
    %18 = tpu.matmul %16, %17, %cst_14 {dimension_numbers = #tpu.dot_dimension_numbers<[1], [0], [0], [1], [0, 0, 1, 1], [], []>} : vector<2x256xbf16>, vector<256x6xbf16>, vector<2x6xf32> -> vector<2x6xf32>
    %c0_15 = arith.constant 0 : index
    %c0_16 = arith.constant 0 : index
    %19 = vector.load %arg6[%c0_15, %c0_16] : memref<1x6xf32, #tpu.memory_space<vmem>>, vector<1x6xf32>
    %20 = vector.broadcast %19 : vector<1x6xf32> to vector<2x6xf32>
    %21 = arith.addf %18, %20 : vector<2x6xf32>
    %c0_17 = arith.constant 0 : index
    %c0_18 = arith.constant 0 : index
    %22 = vector.load %arg7[%c0_17, %c0_18] : memref<2x6xf32, #tpu.memory_space<vmem>>, vector<2x6xf32>
    tpu.vector_store %arg7[%c0_17, %c0_18], %21 {strides = array<i32>} : memref<2x6xf32, #tpu.memory_space<vmem>>, vector<2x6xf32>,
    return
  }
}

module attributes {stable_mosaic.version = 11 : i64} {
  func.func @_mlp3_kernel(%arg0: memref<2x384xbf16, #tpu.memory_space<vmem>>, %arg1: memref<384x512xbf16, #tpu.memory_space<vmem>>, %arg2: memref<1x512xf32, #tpu.memory_space<vmem>>, %arg3: memref<512x256xbf16, #tpu.memory_space<vmem>>, %arg4: memref<1x256xf32, #tpu.memory_space<vmem>>, %arg5: memref<256x256xbf16, #tpu.memory_space<vmem>>, %arg6: memref<1x256xf32, #tpu.memory_space<vmem>>, %arg7: memref<2x256xf32, #tpu.memory_space<vmem>>) attributes {dimension_semantics = [], scalar_prefetch = 0 : i64, scratch_operands = 0 : i64, tpu.core_type = #tpu.core_type<tc>} {
    %c0 = arith.constant 0 : index
    %c0_0 = arith.constant 0 : index
    %0 = vector.load %arg0[%c0, %c0_0] : memref<2x384xbf16, #tpu.memory_space<vmem>>, vector<2x384xbf16>
    %c0_1 = arith.constant 0 : index
    %c0_2 = arith.constant 0 : index
    %1 = vector.load %arg1[%c0_1, %c0_2] : memref<384x512xbf16, #tpu.memory_space<vmem>>, vector<384x512xbf16>
    %cst = arith.constant dense<0.000000e+00> : vector<2x512xf32>
    %2 = tpu.matmul %0, %1, %cst {dimension_numbers = #tpu.dot_dimension_numbers<[1], [0], [0], [1], [0, 0, 1, 1], [], []>} : vector<2x384xbf16>, vector<384x512xbf16>, vector<2x512xf32> -> vector<2x512xf32>
    %c0_3 = arith.constant 0 : index
    %c0_4 = arith.constant 0 : index
    %3 = vector.load %arg2[%c0_3, %c0_4] : memref<1x512xf32, #tpu.memory_space<vmem>>, vector<1x512xf32>
    %4 = vector.broadcast %3 : vector<1x512xf32> to vector<2x512xf32>
    %5 = arith.addf %2, %4 : vector<2x512xf32>
    %cst_5 = arith.constant 0.000000e+00 : f32
    %6 = vector.broadcast %cst_5 : f32 to vector<2x512xf32>
    %7 = arith.maximumf %5, %6 : vector<2x512xf32>
    %8 = arith.truncf %7 : vector<2x512xf32> to vector<2x512xbf16>
    %c0_6 = arith.constant 0 : index
    %c0_7 = arith.constant 0 : index
    %9 = vector.load %arg3[%c0_6, %c0_7] : memref<512x256xbf16, #tpu.memory_space<vmem>>, vector<512x256xbf16>
    %cst_8 = arith.constant dense<0.000000e+00> : vector<2x256xf32>
    %10 = tpu.matmul %8, %9, %cst_8 {dimension_numbers = #tpu.dot_dimension_numbers<[1], [0], [0], [1], [0, 0, 1, 1], [], []>} : vector<2x512xbf16>, vector<512x256xbf16>, vector<2x256xf32> -> vector<2x256xf32>
    %c0_9 = arith.constant 0 : index
    %c0_10 = arith.constant 0 : index
    %11 = vector.load %arg4[%c0_9, %c0_10] : memref<1x256xf32, #tpu.memory_space<vmem>>, vector<1x256xf32>
    %12 = vector.broadcast %11 : vector<1x256xf32> to vector<2x256xf32>
    %13 = arith.addf %10, %12 : vector<2x256xf32>
    %cst_11 = arith.constant 0.000000e+00 : f32
    %14 = vector.broadcast %cst_11 : f32 to vector<2x256xf32>
    %15 = arith.maximumf %13, %14 : vector<2x256xf32>
    %16 = arith.truncf %15 : vector<2x256xf32> to vector<2x256xbf16>
    %c0_12 = arith.constant 0 : index
    %c0_13 = arith.constant 0 : index
    %17 = vector.load %arg5[%c0_12, %c0_13] : memref<256x256xbf16, #tpu.memory_space<vmem>>, vector<256x256xbf16>
    %cst_14 = arith.constant dense<0.000000e+00> : vector<2x256xf32>
    %18 = tpu.matmul %16, %17, %cst_14 {dimension_numbers = #tpu.dot_dimension_numbers<[1], [0], [0], [1], [0, 0, 1, 1], [], []>} : vector<2x256xbf16>, vector<256x256xbf16>, vector<2x256xf32> -> vector<2x256xf32>
    %c0_15 = arith.constant 0 : index
    %c0_16 = arith.constant 0 : index
    %19 = vector.load %arg6[%c0_15, %c0_16] : memref<1x256xf32, #tpu.memory_space<vmem>>, vector<1x256xf32>
    %20 = vector.broadcast %19 : vector<1x256xf32> to vector<2x256xf32>
    %21 = arith.addf %18, %20 : vector<2x256xf32>
    %c0_17 = arith.constant 0 : index
    %c0_18 = arith.constant 0 : index
    %22 = vector.load %arg7[%c0_17, %c0_18] : memref<2x256xf32, #tpu.memory_space<vmem>>, vector<2x256xf32>
    tpu.vector_store %arg7[%c0_17, %c0_18], %21 {strides = array<i32>} : memref<2x256xf32, #tpu.memory_space<vmem>>, vector<2x256xf32>,
    return
  }
}

</mosaic_0001>

<bundles_post_ra>
// kernel: icm_forward.6
= control target key start
LH: loop header
LB: loop body
LE: loop exit
PB: predicated region body
PF: predicated region fallthrough
CT: control target
= control target key end

     0   :  { %s2659_s12 = smov 0   ;;  %s3123_s0 = inlined_call_operand.vmem [shape: bf16[14400,128], index: 0, kind: input, shape index: {}]   ;;  %s3124_s1 = inlined_call_operand.vmem [shape: bf16[128,32], index: 1, kind: input, shape index: {}]   ;;  %s3125_s2 = inlined_call_operand.vmem [shape: f32[1,32], index: 2, kind: input, shape index: {}]   ;;  %s3126_s3 = inlined_call_operand.vmem [shape: bf16[14400,32], index: 3, kind: output, shape index: {}]  }
   0x1 LB: > { %s2016_s13 = sadd.s32 4294967295, %s2637_s12   ;;  %p2020_p0 = scmp.ge.s32.totalorder %s2637_s12, 1  ;;  %s2637_s12 = sphi %s2659_s12, %s13_s12  }
   0x2   : > { %p138_p1 = scmp.lt.s32.totalorder %s2637_s12, 16 }
   0x4   : > { %p139_p2 = pnand %p2020_p0, %p138_p1 }
   0x5   : > { %v2562_v0 = vld [vmem:[%s3124_s1] sm:$0xff] (!%p139_p2)   ;;  %s162_s16 = smul.u32 (!%p139_p2), 120, %s2016_s13  ;;  %v2563_v1 = vld [vmem:[%s3124_s1 + $0x8] sm:$0xff] (!%p139_p2)   ;;  %v2564_v2 = vld [vmem:[%s3124_s1 + $0x10] sm:$0xff] (!%p139_p2)   ;;  %vm1839_vm0 = vcmask (!%p139_p2), 257024  }
   0x6   : > { %142 = sbr.rel (%p139_p2) target bundleno = 372 (0x174), region = 32  ;;  %2402 = vmatprep.subr.bf16.mxu0 (!%p139_p2), %v2562_v0  ;;  %2538 = vmatprep.subr.bf16.mxu1 (!%p139_p2), %v2562_v0  ;;  %v2565_v3 = vld [vmem:[%s3124_s1 + $0x18] sm:$0xff] (!%p139_p2)   ;;  %v2566_v6 = vld [vmem:[%s3124_s1 + $0x20] sm:$0xff] (!%p139_p2)   ;;  %v2567_v7 = vld [vmem:[%s3124_s1 + $0x28] sm:$0xff] (!%p139_p2)  }
   0x7   : > { %p163_p3 = scmp.lt.s32.totalorder (!%p139_p2), %s162_s16, 1799  ;;  %2403 = vmatpush3.bf16.msra.mxu0 (!%p139_p2), %v2562_v0  ;;  %2546 = vmatpush3.bf16.msra.mxu1 (!%p139_p2), %v2562_v0  ;;  %v2568_v8 = vld [vmem:[%s3124_s1 + $0x30] sm:$0xff] (!%p139_p2)   ;;  %v2569_v9 = vld [vmem:[%s3124_s1 + $0x38] sm:$0xff] (!%p139_p2)  }
   0x8   : > { %2404 = vmatprep.subr.bf16.mxu0 (!%p139_p2), %v2563_v1  ;;  %2539 = vmatprep.subr.bf16.mxu1 (!%p139_p2), %v2563_v1 }
   0xb   : > { %2405 = vmatpush3.bf16.msra.mxu0 (!%p139_p2), %v2563_v1  ;;  %2547 = vmatpush3.bf16.msra.mxu1 (!%p139_p2), %v2563_v1 }
   0xc   : > { %2406 = vmatprep.subr.bf16.mxu0 (!%p139_p2), %v2564_v2  ;;  %2540 = vmatprep.subr.bf16.mxu1 (!%p139_p2), %v2564_v2 }
   0xd   : > { %s3128_s16 = smov (!%p163_p3, %s162_s16), 1799 }
   0xe   : > { %s2021_s21 = sshll.u32 %s3128_s16, 2 }
   0xf   : > { %s2687_s26 = scalar_lea.vmem %s3123_s0, %s2021_s21  ;;  %2407 = vmatpush3.bf16.msra.mxu0 %v2564_v2  ;;  %2548 = vmatpush3.bf16.msra.mxu1 %v2564_v2  ;;  %s2777_s13 = scalar_lea.vmem %s3126_s3, %s2021_s21 }
  0x10   : > { %v2570_v4 = vld [vmem:[%s2687_s26] sm:$0xff]   ;;  %v2571_v5 = vld [vmem:[%s2687_s26 + $0xf0] sm:$0xff]   ;;  %2408 = vmatprep.subr.bf16.mxu0 %v2565_v3  ;;  %2541 = vmatprep.subr.bf16.mxu1 %v2565_v3  ;;  %v2572_v10 = vld [vmem:[%s2687_s26 + $0x8] sm:$0xff]  }
  0x11   : > { %2418 = vmatprep.mubr.bf16.mxu0 %v2570_v4  ;;  %2478 = vmatprep.mubr.bf16.mxu1 %v2571_v5  ;;  %v2573_v11 = vld [vmem:[%s2687_s26 + $0xf8] sm:$0xff]   ;;  %v2574_v12 = vld [vmem:[%s2687_s26 + $0x10] sm:$0xff]   ;;  %v2575_v13 = vld [vmem:[%s2687_s26 + $0x100] sm:$0xff]  }
  0x12   : > { %v2576_v14 = vld [vmem:[%s2687_s26 + $0x18] sm:$0xff]   ;;  %v2577_v15 = vld [vmem:[%s2687_s26 + $0x108] sm:$0xff]   ;;  %v2578_v16 = vld [vmem:[%s2687_s26 + $0x20] sm:$0xff]  }
  0x13   : > { %2409 = vmatpush3.bf16.msra.mxu0 %v2565_v3  ;;  %2549 = vmatpush3.bf16.msra.mxu1 %v2565_v3  ;;  %v2579_v17 = vld [vmem:[%s2687_s26 + $0x110] sm:$0xff]   ;;  %v2580_v18 = vld [vmem:[%s2687_s26 + $0x28] sm:$0xff]   ;;  %v2581_v19 = vld [vmem:[%s2687_s26 + $0x118] sm:$0xff]  }
  0x14   : > { %2410 = vmatprep.subr.bf16.mxu0 %v2566_v6  ;;  %2542 = vmatprep.subr.bf16.mxu1 %v2566_v6  ;;  %v2582_v20 = vld [vmem:[%s2687_s26 + $0x30] sm:$0xff]   ;;  %v2583_v21 = vld [vmem:[%s2687_s26 + $0x120] sm:$0xff]   ;;  %v2584_v22 = vld [vmem:[%s2687_s26 + $0x38] sm:$0xff]  }
  0x15   : > { %v2585_v23 = vld [vmem:[%s2687_s26 + $0x128] sm:$0xff]   ;;  %v2586_v24 = vld [vmem:[%s2687_s26 + $0x40] sm:$0xff]   ;;  %v2587_v25 = vld [vmem:[%s2687_s26 + $0x130] sm:$0xff]  }
  0x16   : > { %v2588_v26 = vld [vmem:[%s2687_s26 + $0x48] sm:$0xff]   ;;  %v2589_v27 = vld [vmem:[%s2687_s26 + $0x138] sm:$0xff]   ;;  %v2590_v28 = vld [vmem:[%s2687_s26 + $0x50] sm:$0xff]  }
  0x17   : > { %2411 = vmatpush3.bf16.msra.mxu0 %v2566_v6  ;;  %2550 = vmatpush3.bf16.msra.mxu1 %v2566_v6  ;;  %v2591_v29 = vld [vmem:[%s2687_s26 + $0x140] sm:$0xff]   ;;  %v2592_v30 = vld [vmem:[%s2687_s26 + $0x58] sm:$0xff]   ;;  %v2593_v31 = vld [vmem:[%s2687_s26 + $0x148] sm:$0xff]  }
  0x18   : > { %2412 = vmatprep.subr.bf16.mxu0 %v2567_v7  ;;  %2543 = vmatprep.subr.bf16.mxu1 %v2567_v7  ;;  %v2594_v32 = vld [vmem:[%s2687_s26 + $0x60] sm:$0xff]   ;;  %v2595_v33 = vld [vmem:[%s2687_s26 + $0x150] sm:$0xff]   ;;  %v2596_v34 = vld [vmem:[%s2687_s26 + $0x68] sm:$0xff]  }
  0x19   : > { %v2597_v35 = vld [vmem:[%s2687_s26 + $0x158] sm:$0xff]   ;;  %v2598_v36 = vld [vmem:[%s2687_s26 + $0x70] sm:$0xff]   ;;  %v2599_v37 = vld [vmem:[%s2687_s26 + $0x160] sm:$0xff]  }
  0x1a   : > { %v2600_v38 = vld [vmem:[%s2687_s26 + $0x78] sm:$0xff]   ;;  %v2601_v39 = vld [vmem:[%s2687_s26 + $0x168] sm:$0xff]   ;;  %v2602_v40 = vld [vmem:[%s2687_s26 + $0x80] sm:$0xff]  }
  0x1b   : > { %2413 = vmatpush3.bf16.msra.mxu0 %v2567_v7  ;;  %2551 = vmatpush3.bf16.msra.mxu1 %v2567_v7  ;;  %v2603_v41 = vld [vmem:[%s2687_s26 + $0x170] sm:$0xff]   ;;  %v2604_v42 = vld [vmem:[%s2687_s26 + $0x88] sm:$0xff]   ;;  %v2605_v43 = vld [vmem:[%s2687_s26 + $0x178] sm:$0xff]  }
  0x1c   : > { %2414 = vmatprep.subr.bf16.mxu0 %v2568_v8  ;;  %2544 = vmatprep.subr.bf16.mxu1 %v2568_v8  ;;  %v2606_v44 = vld [vmem:[%s2687_s26 + $0x90] sm:$0xff]   ;;  %v2607_v45 = vld [vmem:[%s2687_s26 + $0x180] sm:$0xff]   ;;  %v2608_v46 = vld [vmem:[%s2687_s26 + $0x98] sm:$0xff]  }
  0x1d   : > { %v2609_v47 = vld [vmem:[%s2687_s26 + $0x188] sm:$0xff]   ;;  %v2610_v48 = vld [vmem:[%s2687_s26 + $0xa0] sm:$0xff]   ;;  %v2611_v49 = vld [vmem:[%s2687_s26 + $0x190] sm:$0xff]  }
  0x1e   : > { %v2612_v50 = vld [vmem:[%s2687_s26 + $0xa8] sm:$0xff]   ;;  %v2613_v51 = vld [vmem:[%s2687_s26 + $0x198] sm:$0xff]   ;;  %v2614_v52 = vld [vmem:[%s2687_s26 + $0xb0] sm:$0xff]  }
  0x1f   : > { %2415 = vmatpush3.bf16.msra.mxu0 %v2568_v8  ;;  %2552 = vmatpush3.bf16.msra.mxu1 %v2568_v8  ;;  %v2615_v53 = vld [vmem:[%s2687_s26 + $0x1a0] sm:$0xff]   ;;  %v2616_v54 = vld [vmem:[%s2687_s26 + $0xb8] sm:$0xff]   ;;  %v2617_v55 = vld [vmem:[%s2687_s26 + $0x1a8] sm:$0xff]  }
  0x20   : > { %2416 = vmatprep.subr.bf16.mxu0 %v2569_v9  ;;  %2545 = vmatprep.subr.bf16.mxu1 %v2569_v9  ;;  %v2618_v56 = vld [vmem:[%s2687_s26 + $0xc0] sm:$0xff]   ;;  %v2619_v57 = vld [vmem:[%s2687_s26 + $0x1b0] sm:$0xff]   ;;  %v2620_v58 = vld [vmem:[%s2687_s26 + $0xc8] sm:$0xff]  }
  0x21   : > { %v2621_v59 = vld [vmem:[%s2687_s26 + $0x1b8] sm:$0xff]   ;;  %v2622_v60 = vld [vmem:[%s2687_s26 + $0xd0] sm:$0xff]   ;;  %v2623_v61 = vld [vmem:[%s2687_s26 + $0x1c0] sm:$0xff]  }
  0x22   : > { %v2624_v62 = vld [vmem:[%s2687_s26 + $0xd8] sm:$0xff]   ;;  %v2625_v63 = vld [vmem:[%s2687_s26 + $0x1c8] sm:$0xff]   ;;  %v2626_v0 = vld [vmem:[%s2687_s26 + $0xe0] sm:$0xff]  }
  0x23   : > { %2417 = vmatpush3.bf16.msra.mxu0 %v2569_v9  ;;  %2553 = vmatpush3.bf16.msra.mxu1 %v2569_v9  ;;  %v2627_v1 = vld [vmem:[%s2687_s26 + $0x1d0] sm:$0xff]   ;;  %v2628_v2 = vld [vmem:[%s2687_s26 + $0xe8] sm:$0xff]   ;;  %v2629_v3 = vld [vmem:[%s2687_s26 + $0x1d8] sm:$0xff]  }
  0x24   : > { %v2764_v4 = vld [vmem:[%s3125_s2] ss:$0 sm:$0xff] }
  0x26   : > { %2419 = vmatmul.mubr.bf16.vlgmr.msra.gmra.mrb[0].mxu0 %v2572_v10  ;;  %2479 = vmatmul.mubr.bf16.vlgmr.msra.gmra.mrb[0].mxu1 %v2573_v11 }
  0x27   : > { %2422 = vmatprep.mubr.bf16.mxu0 %v2574_v12  ;;  %2482 = vmatprep.mubr.bf16.mxu1 %v2575_v13 }
  0x2e   : > { %2423 = vmatmul.mubr.bf16.gmra.mrb[4].mxu0 %v2576_v14  ;;  %2483 = vmatmul.mubr.bf16.gmra.mrb[4].mxu1 %v2577_v15 }
  0x2f   : > { %2426 = vmatprep.mubr.bf16.mxu0 %v2578_v16  ;;  %2486 = vmatprep.mubr.bf16.mxu1 %v2579_v17 }
  0x36   : > { %2427 = vmatmul.mubr.bf16.gmra.mrb[8].mxu0 %v2580_v18  ;;  %2487 = vmatmul.mubr.bf16.gmra.mrb[8].mxu1 %v2581_v19 }
  0x37   : > { %2430 = vmatprep.mubr.bf16.mxu0 %v2582_v20  ;;  %2490 = vmatprep.mubr.bf16.mxu1 %v2583_v21 }
  0x3e   : > { %2431 = vmatmul.mubr.bf16.gmra.mrb[12].mxu0 %v2584_v22  ;;  %2491 = vmatmul.mubr.bf16.gmra.mrb[12].mxu1 %v2585_v23 }
  0x3f   : > { %2434 = vmatprep.mubr.bf16.mxu0 %v2586_v24  ;;  %2494 = vmatprep.mubr.bf16.mxu1 %v2587_v25 }
  0x46   : > { %2435 = vmatmul.mubr.bf16.gmra.mrb[16].mxu0 %v2588_v26  ;;  %2495 = vmatmul.mubr.bf16.gmra.mrb[16].mxu1 %v2589_v27 }
  0x47   : > { %2438 = vmatprep.mubr.bf16.mxu0 %v2590_v28  ;;  %2498 = vmatprep.mubr.bf16.mxu1 %v2591_v29 }
  0x4e   : > { %2439 = vmatmul.mubr.bf16.gmra.mrb[20].mxu0 %v2592_v30  ;;  %2499 = vmatmul.mubr.bf16.gmra.mrb[20].mxu1 %v2593_v31 }
  0x4f   : > { %2442 = vmatprep.mubr.bf16.mxu0 %v2594_v32  ;;  %2502 = vmatprep.mubr.bf16.mxu1 %v2595_v33 }
  0x56   : > { %2443 = vmatmul.mubr.bf16.gmra.mrb[24].mxu0 %v2596_v34  ;;  %2503 = vmatmul.mubr.bf16.gmra.mrb[24].mxu1 %v2597_v35 }
  0x57   : > { %2446 = vmatprep.mubr.bf16.mxu0 %v2598_v36  ;;  %2506 = vmatprep.mubr.bf16.mxu1 %v2599_v37 }
  0x5e   : > { %2447 = vmatmul.mubr.bf16.gmra.mrb[28].mxu0 %v2600_v38  ;;  %2507 = vmatmul.mubr.bf16.gmra.mrb[28].mxu1 %v2601_v39 }
  0x5f   : > { %2450 = vmatprep.mubr.bf16.mxu0 %v2602_v40  ;;  %2510 = vmatprep.mubr.bf16.mxu1 %v2603_v41 }
  0x66   : > { %2451 = vmatmul.mubr.bf16.gmra.mrb[32].mxu0 %v2604_v42  ;;  %2511 = vmatmul.mubr.bf16.gmra.mrb[32].mxu1 %v2605_v43 }
  0x67   : > { %2454 = vmatprep.mubr.bf16.mxu0 %v2606_v44  ;;  %2514 = vmatprep.mubr.bf16.mxu1 %v2607_v45 }
  0x6e   : > { %2455 = vmatmul.mubr.bf16.gmra.mrb[36].mxu0 %v2608_v46  ;;  %2515 = vmatmul.mubr.bf16.gmra.mrb[36].mxu1 %v2609_v47 }
  0x6f   : > { %2458 = vmatprep.mubr.bf16.mxu0 %v2610_v48  ;;  %2518 = vmatprep.mubr.bf16.mxu1 %v2611_v49 }
  0x76   : > { %2459 = vmatmul.mubr.bf16.gmra.mrb[40].mxu0 %v2612_v50  ;;  %2519 = vmatmul.mubr.bf16.gmra.mrb[40].mxu1 %v2613_v51 }
  0x77   : > { %2462 = vmatprep.mubr.bf16.mxu0 %v2614_v52  ;;  %2522 = vmatprep.mubr.bf16.mxu1 %v2615_v53 }
  0x7e   : > { %2463 = vmatmul.mubr.bf16.gmra.mrb[44].mxu0 %v2616_v54  ;;  %2523 = vmatmul.mubr.bf16.gmra.mrb[44].mxu1 %v2617_v55 }
  0x7f   : > { %2466 = vmatprep.mubr.bf16.mxu0 %v2618_v56  ;;  %2526 = vmatprep.mubr.bf16.mxu1 %v2619_v57 }
  0x86   : > { %2467 = vmatmul.mubr.bf16.gmra.mrb[48].mxu0 %v2620_v58  ;;  %2527 = vmatmul.mubr.bf16.gmra.mrb[48].mxu1 %v2621_v59 }
  0x87   : > { %2470 = vmatprep.mubr.bf16.mxu0 %v2622_v60  ;;  %2530 = vmatprep.mubr.bf16.mxu1 %v2623_v61 }
  0x8e   : > { %2471 = vmatmul.mubr.bf16.gmra.mrb[52].mxu0 %v2624_v62  ;;  %2531 = vmatmul.mubr.bf16.gmra.mrb[52].mxu1 %v2625_v63 }
  0x8f   : > { %2474 = vmatprep.mubr.bf16.mxu0 %v2626_v0  ;;  %2534 = vmatprep.mubr.bf16.mxu1 %v2627_v1 }
  0x96   : > { %2475 = vmatmul.mubr.bf16.gmra.mrb[56].mxu0 %v2628_v2  ;;  %2535 = vmatmul.mubr.bf16.gmra.mrb[56].mxu1 %v2629_v3 }
  0xf9   : > { %v2420_v5 = vpop.f32.mrb[0].mxu0  ;;  %v2480_v6 = vpop.f32.mrb[0].mxu1 }
  0xfa   : > { %v769_v7 = vadd.f32 %v2420_v5, %v2764_v4  ;;  %v1009_v8 = vadd.f32 %v2480_v6, %v2764_v4  ;;  %v760_v9 = vpop.f32.mrb[1].mxu0  ;;  %v1000_v10 = vpop.f32.mrb[1].mxu1 }
  0xfb   : > { %v761_v11 = vadd.f32 %v2764_v4, %v760_v9  ;;  %v1001_v12 = vadd.f32 %v2764_v4, %v1000_v10  ;;  %v2421_v13 = vpop.f32.mrb[2].mxu0  ;;  %v2481_v14 = vpop.f32.mrb[2].mxu1 }
  0xfc   : > { %v1241_v15 = vmax.f32 %v769_v7, 0.0  ;;  %v1301_v16 = vmax.f32 %v1009_v8, 0.0  ;;  %v772_v17 = vadd.f32 %v2421_v13, %v2764_v4  ;;  %v1012_v18 = vadd.f32 %v2481_v14, %v2764_v4  ;;  %v763_v19 = vpop.f32.mrb[3].mxu0  ;;  %v1003_v20 = vpop.f32.mrb[3].mxu1 }
  0xfd   : > { %v1239_v21 = vmax.f32 %v761_v11, 0.0  ;;  %v1299_v22 = vmax.f32 %v1001_v12, 0.0  ;;  %v764_v23 = vadd.f32 %v2764_v4, %v763_v19  ;;  %v1004_v24 = vadd.f32 %v2764_v4, %v1003_v20 }
  0xfe   : > { %v2216_v25 = vpack.c.bf16 %v1241_v15, %v1241_v15  ;;  %v2276_v26 = vpack.c.bf16 %v1301_v16, %v1301_v16  ;;  %v1242_v27 = vmax.f32 %v772_v17, 0.0  ;;  %v1302_v28 = vmax.f32 %v1012_v18, 0.0 }
  0xff   : > { %v2214_v29 = vpack.c.bf16 %v1239_v21, %v1239_v21  ;;  %v2274_v30 = vpack.c.bf16 %v1299_v22, %v1299_v22  ;;  %v1240_v31 = vmax.f32 %v764_v23, 0.0  ;;  %v1300_v32 = vmax.f32 %v1004_v24, 0.0 }
 0x100   : > { %1842 = vst.msk [vmem:[%s2777_s13 + $0x8] sm:$0xf] %vm1839_vm0, %v2216_v25  ;;  %1902 = vst.msk [vmem:[%s2777_s13 + $0xf8] sm:$0xf] %vm1839_vm0, %v2276_v26  ;;  %v2217_v33 = vpack.c.bf16 %v1242_v27, %v1242_v27  ;;  %v2277_v34 = vpack.c.bf16 %v1302_v28, %v1302_v28 }
 0x101   : > { %1840 = vst.msk [vmem:[%s2777_s13] sm:$0xf] %vm1839_vm0, %v2214_v29  ;;  %1900 = vst.msk [vmem:[%s2777_s13 + $0xf0] sm:$0xf] %vm1839_vm0, %v2274_v30  ;;  %v2215_v35 = vpack.c.bf16 %v1240_v31, %v1240_v31  ;;  %v2275_v36 = vpack.c.bf16 %v1300_v32, %v1300_v32  ;;  %v2424_v37 = vpop.f32.mrb[4].mxu0  ;;  %v2484_v38 = vpop.f32.mrb[4].mxu1 }
 0x102   : > { %1843 = vst.msk [vmem:[%s2777_s13 + $0xc] sm:$0xf] %vm1839_vm0, %v2217_v33  ;;  %1903 = vst.msk [vmem:[%s2777_s13 + $0xfc] sm:$0xf] %vm1839_vm0, %v2277_v34  ;;  %v785_v39 = vadd.f32 %v2424_v37, %v2764_v4  ;;  %v1025_v40 = vadd.f32 %v2484_v38, %v2764_v4  ;;  %v776_v41 = vpop.f32.mrb[5].mxu0  ;;  %v1016_v42 = vpop.f32.mrb[5].mxu1 }
 0x103   : > { %1841 = vst.msk [vmem:[%s2777_s13 + $0x4] sm:$0xf] %vm1839_vm0, %v2215_v35  ;;  %1901 = vst.msk [vmem:[%s2777_s13 + $0xf4] sm:$0xf] %vm1839_vm0, %v2275_v36  ;;  %v777_v43 = vadd.f32 %v2764_v4, %v776_v41  ;;  %v1017_v44 = vadd.f32 %v2764_v4, %v1016_v42  ;;  %v2425_v45 = vpop.f32.mrb[6].mxu0  ;;  %v2485_v46 = vpop.f32.mrb[6].mxu1 }
 0x104   : > { %v1245_v47 = vmax.f32 %v785_v39, 0.0  ;;  %v1305_v48 = vmax.f32 %v1025_v40, 0.0  ;;  %v788_v49 = vadd.f32 %v2425_v45, %v2764_v4  ;;  %v1028_v50 = vadd.f32 %v2485_v46, %v2764_v4  ;;  %v779_v51 = vpop.f32.mrb[7].mxu0  ;;  %v1019_v52 = vpop.f32.mrb[7].mxu1 }
 0x105   : > { %v1243_v53 = vmax.f32 %v777_v43, 0.0  ;;  %v1303_v54 = vmax.f32 %v1017_v44, 0.0  ;;  %v780_v55 = vadd.f32 %v2764_v4, %v779_v51  ;;  %v1020_v56 = vadd.f32 %v2764_v4, %v1019_v52 }
 0x106   : > { %v2220_v57 = vpack.c.bf16 %v1245_v47, %v1245_v47  ;;  %v2280_v58 = vpack.c.bf16 %v1305_v48, %v1305_v48  ;;  %v1246_v59 = vmax.f32 %v788_v49, 0.0  ;;  %v1306_v60 = vmax.f32 %v1028_v50, 0.0 }
 0x107   : > { %v2218_v61 = vpack.c.bf16 %v1243_v53, %v1243_v53  ;;  %v2278_v62 = vpack.c.bf16 %v1303_v54, %v1303_v54  ;;  %v1244_v63 = vmax.f32 %v780_v55, 0.0  ;;  %v1304_v0 = vmax.f32 %v1020_v56, 0.0 }
 0x108   : > { %1846 = vst.msk [vmem:[%s2777_s13 + $0x18] sm:$0xf] %vm1839_vm0, %v2220_v57  ;;  %1906 = vst.msk [vmem:[%s2777_s13 + $0x108] sm:$0xf] %vm1839_vm0, %v2280_v58  ;;  %v2221_v1 = vpack.c.bf16 %v1246_v59, %v1246_v59  ;;  %v2281_v2 = vpack.c.bf16 %v1306_v60, %v1306_v60 }
 0x109   : > { %1844 = vst.msk [vmem:[%s2777_s13 + $0x10] sm:$0xf] %vm1839_vm0, %v2218_v61  ;;  %1904 = vst.msk [vmem:[%s2777_s13 + $0x100] sm:$0xf] %vm1839_vm0, %v2278_v62  ;;  %v2219_v3 = vpack.c.bf16 %v1244_v63, %v1244_v63  ;;  %v2279_v5 = vpack.c.bf16 %v1304_v0, %v1304_v0  ;;  %v2428_v6 = vpop.f32.mrb[8].mxu0  ;;  %v2488_v7 = vpop.f32.mrb[8].mxu1 }
 0x10a   : > { %1847 = vst.msk [vmem:[%s2777_s13 + $0x1c] sm:$0xf] %vm1839_vm0, %v2221_v1  ;;  %1907 = vst.msk [vmem:[%s2777_s13 + $0x10c] sm:$0xf] %vm1839_vm0, %v2281_v2  ;;  %v801_v8 = vadd.f32 %v2428_v6, %v2764_v4  ;;  %v1041_v9 = vadd.f32 %v2488_v7, %v2764_v4  ;;  %v792_v10 = vpop.f32.mrb[9].mxu0  ;;  %v1032_v11 = vpop.f32.mrb[9].mxu1 }
 0x10b   : > { %1845 = vst.msk [vmem:[%s2777_s13 + $0x14] sm:$0xf] %vm1839_vm0, %v2219_v3  ;;  %1905 = vst.msk [vmem:[%s2777_s13 + $0x104] sm:$0xf] %vm1839_vm0, %v2279_v5  ;;  %v793_v12 = vadd.f32 %v2764_v4, %v792_v10  ;;  %v1033_v13 = vadd.f32 %v2764_v4, %v1032_v11  ;;  %v2429_v14 = vpop.f32.mrb[10].mxu0  ;;  %v2489_v15 = vpop.f32.mrb[10].mxu1 }
 0x10c   : > { %v1249_v16 = vmax.f32 %v801_v8, 0.0  ;;  %v1309_v17 = vmax.f32 %v1041_v9, 0.0  ;;  %v804_v18 = vadd.f32 %v2429_v14, %v2764_v4  ;;  %v1044_v19 = vadd.f32 %v2489_v15, %v2764_v4  ;;  %v795_v20 = vpop.f32.mrb[11].mxu0  ;;  %v1035_v21 = vpop.f32.mrb[11].mxu1 }
 0x10d   : > { %v1247_v22 = vmax.f32 %v793_v12, 0.0  ;;  %v1307_v23 = vmax.f32 %v1033_v13, 0.0  ;;  %v796_v24 = vadd.f32 %v2764_v4, %v795_v20  ;;  %v1036_v25 = vadd.f32 %v2764_v4, %v1035_v21 }
 0x10e   : > { %v2224_v26 = vpack.c.bf16 %v1249_v16, %v1249_v16  ;;  %v2284_v27 = vpack.c.bf16 %v1309_v17, %v1309_v17  ;;  %v1250_v28 = vmax.f32 %v804_v18, 0.0  ;;  %v1310_v29 = vmax.f32 %v1044_v19, 0.0 }
 0x10f   : > { %v2222_v30 = vpack.c.bf16 %v1247_v22, %v1247_v22  ;;  %v2282_v31 = vpack.c.bf16 %v1307_v23, %v1307_v23  ;;  %v1248_v32 = vmax.f32 %v796_v24, 0.0  ;;  %v1308_v33 = vmax.f32 %v1036_v25, 0.0 }
 0x110   : > { %1850 = vst.msk [vmem:[%s2777_s13 + $0x28] sm:$0xf] %vm1839_vm0, %v2224_v26  ;;  %1910 = vst.msk [vmem:[%s2777_s13 + $0x118] sm:$0xf] %vm1839_vm0, %v2284_v27  ;;  %v2225_v34 = vpack.c.bf16 %v1250_v28, %v1250_v28  ;;  %v2285_v35 = vpack.c.bf16 %v1310_v29, %v1310_v29 }
 0x111   : > { %1848 = vst.msk [vmem:[%s2777_s13 + $0x20] sm:$0xf] %vm1839_vm0, %v2222_v30  ;;  %1908 = vst.msk [vmem:[%s2777_s13 + $0x110] sm:$0xf] %vm1839_vm0, %v2282_v31  ;;  %v2223_v36 = vpack.c.bf16 %v1248_v32, %v1248_v32  ;;  %v2283_v37 = vpack.c.bf16 %v1308_v33, %v1308_v33  ;;  %v2432_v38 = vpop.f32.mrb[12].mxu0  ;;  %v2492_v39 = vpop.f32.mrb[12].mxu1 }
 0x112   : > { %1851 = vst.msk [vmem:[%s2777_s13 + $0x2c] sm:$0xf] %vm1839_vm0, %v2225_v34  ;;  %1911 = vst.msk [vmem:[%s2777_s13 + $0x11c] sm:$0xf] %vm1839_vm0, %v2285_v35  ;;  %v817_v40 = vadd.f32 %v2432_v38, %v2764_v4  ;;  %v1057_v41 = vadd.f32 %v2492_v39, %v2764_v4  ;;  %v808_v42 = vpop.f32.mrb[13].mxu0  ;;  %v1048_v43 = vpop.f32.mrb[13].mxu1 }
 0x113   : > { %1849 = vst.msk [vmem:[%s2777_s13 + $0x24] sm:$0xf] %vm1839_vm0, %v2223_v36  ;;  %1909 = vst.msk [vmem:[%s2777_s13 + $0x114] sm:$0xf] %vm1839_vm0, %v2283_v37  ;;  %v809_v44 = vadd.f32 %v2764_v4, %v808_v42  ;;  %v1049_v45 = vadd.f32 %v2764_v4, %v1048_v43  ;;  %v2433_v46 = vpop.f32.mrb[14].mxu0  ;;  %v2493_v47 = vpop.f32.mrb[14].mxu1 }
 0x114   : > { %v1253_v48 = vmax.f32 %v817_v40, 0.0  ;;  %v1313_v49 = vmax.f32 %v1057_v41, 0.0  ;;  %v820_v50 = vadd.f32 %v2433_v46, %v2764_v4  ;;  %v1060_v51 = vadd.f32 %v2493_v47, %v2764_v4  ;;  %v811_v52 = vpop.f32.mrb[15].mxu0  ;;  %v1051_v53 = vpop.f32.mrb[15].mxu1 }
 0x115   : > { %v1251_v54 = vmax.f32 %v809_v44, 0.0  ;;  %v1311_v55 = vmax.f32 %v1049_v45, 0.0  ;;  %v812_v56 = vadd.f32 %v2764_v4, %v811_v52  ;;  %v1052_v57 = vadd.f32 %v2764_v4, %v1051_v53 }
 0x116   : > { %v2228_v58 = vpack.c.bf16 %v1253_v48, %v1253_v48  ;;  %v2288_v59 = vpack.c.bf16 %v1313_v49, %v1313_v49  ;;  %v1254_v60 = vmax.f32 %v820_v50, 0.0  ;;  %v1314_v61 = vmax.f32 %v1060_v51, 0.0 }
 0x117   : > { %v2226_v62 = vpack.c.bf16 %v1251_v54, %v1251_v54  ;;  %v2286_v63 = vpack.c.bf16 %v1311_v55, %v1311_v55  ;;  %v1252_v0 = vmax.f32 %v812_v56, 0.0  ;;  %v1312_v1 = vmax.f32 %v1052_v57, 0.0 }
 0x118   : > { %1854 = vst.msk [vmem:[%s2777_s13 + $0x38] sm:$0xf] %vm1839_vm0, %v2228_v58  ;;  %1914 = vst.msk [vmem:[%s2777_s13 + $0x128] sm:$0xf] %vm1839_vm0, %v2288_v59  ;;  %v2229_v2 = vpack.c.bf16 %v1254_v60, %v1254_v60  ;;  %v2289_v3 = vpack.c.bf16 %v1314_v61, %v1314_v61 }
 0x119   : > { %1852 = vst.msk [vmem:[%s2777_s13 + $0x30] sm:$0xf] %vm1839_vm0, %v2226_v62  ;;  %1912 = vst.msk [vmem:[%s2777_s13 + $0x120] sm:$0xf] %vm1839_vm0, %v2286_v63  ;;  %v2227_v5 = vpack.c.bf16 %v1252_v0, %v1252_v0  ;;  %v2287_v6 = vpack.c.bf16 %v1312_v1, %v1312_v1  ;;  %v2436_v7 = vpop.f32.mrb[16].mxu0  ;;  %v2496_v8 = vpop.f32.mrb[16].mxu1 }
 0x11a   : > { %1855 = vst.msk [vmem:[%s2777_s13 + $0x3c] sm:$0xf] %vm1839_vm0, %v2229_v2  ;;  %1915 = vst.msk [vmem:[%s2777_s13 + $0x12c] sm:$0xf] %vm1839_vm0, %v2289_v3  ;;  %v833_v9 = vadd.f32 %v2436_v7, %v2764_v4  ;;  %v1073_v10 = vadd.f32 %v2496_v8, %v2764_v4  ;;  %v824_v11 = vpop.f32.mrb[17].mxu0  ;;  %v1064_v12 = vpop.f32.mrb[17].mxu1 }
 0x11b   : > { %1853 = vst.msk [vmem:[%s2777_s13 + $0x34] sm:$0xf] %vm1839_vm0, %v2227_v5  ;;  %1913 = vst.msk [vmem:[%s2777_s13 + $0x124] sm:$0xf] %vm1839_vm0, %v2287_v6  ;;  %v825_v13 = vadd.f32 %v2764_v4, %v824_v11  ;;  %v1065_v14 = vadd.f32 %v2764_v4, %v1064_v12  ;;  %v2437_v15 = vpop.f32.mrb[18].mxu0  ;;  %v2497_v16 = vpop.f32.mrb[18].mxu1 }
 0x11c   : > { %v1257_v17 = vmax.f32 %v833_v9, 0.0  ;;  %v1317_v18 = vmax.f32 %v1073_v10, 0.0  ;;  %v836_v19 = vadd.f32 %v2437_v15, %v2764_v4  ;;  %v1076_v20 = vadd.f32 %v2497_v16, %v2764_v4  ;;  %v827_v21 = vpop.f32.mrb[19].mxu0  ;;  %v1067_v22 = vpop.f32.mrb[19].mxu1 }
 0x11d   : > { %v1255_v23 = vmax.f32 %v825_v13, 0.0  ;;  %v1315_v24 = vmax.f32 %v1065_v14, 0.0  ;;  %v828_v25 = vadd.f32 %v2764_v4, %v827_v21  ;;  %v1068_v26 = vadd.f32 %v2764_v4, %v1067_v22 }
 0x11e   : > { %v2232_v27 = vpack.c.bf16 %v1257_v17, %v1257_v17  ;;  %v2292_v28 = vpack.c.bf16 %v1317_v18, %v1317_v18  ;;  %v1258_v29 = vmax.f32 %v836_v19, 0.0  ;;  %v1318_v30 = vmax.f32 %v1076_v20, 0.0 }
 0x11f   : > { %v2230_v31 = vpack.c.bf16 %v1255_v23, %v1255_v23  ;;  %v2290_v32 = vpack.c.bf16 %v1315_v24, %v1315_v24  ;;  %v1256_v33 = vmax.f32 %v828_v25, 0.0  ;;  %v1316_v34 = vmax.f32 %v1068_v26, 0.0 }
 0x120   : > { %1858 = vst.msk [vmem:[%s2777_s13 + $0x48] sm:$0xf] %vm1839_vm0, %v2232_v27  ;;  %1918 = vst.msk [vmem:[%s2777_s13 + $0x138] sm:$0xf] %vm1839_vm0, %v2292_v28  ;;  %v2233_v35 = vpack.c.bf16 %v1258_v29, %v1258_v29  ;;  %v2293_v36 = vpack.c.bf16 %v1318_v30, %v1318_v30 }
 0x121   : > { %1856 = vst.msk [vmem:[%s2777_s13 + $0x40] sm:$0xf] %vm1839_vm0, %v2230_v31  ;;  %1916 = vst.msk [vmem:[%s2777_s13 + $0x130] sm:$0xf] %vm1839_vm0, %v2290_v32  ;;  %v2231_v37 = vpack.c.bf16 %v1256_v33, %v1256_v33  ;;  %v2291_v38 = vpack.c.bf16 %v1316_v34, %v1316_v34  ;;  %v2440_v39 = vpop.f32.mrb[20].mxu0  ;;  %v2500_v40 = vpop.f32.mrb[20].mxu1 }
 0x122   : > { %1859 = vst.msk [vmem:[%s2777_s13 + $0x4c] sm:$0xf] %vm1839_vm0, %v2233_v35  ;;  %1919 = vst.msk [vmem:[%s2777_s13 + $0x13c] sm:$0xf] %vm1839_vm0, %v2293_v36  ;;  %v849_v41 = vadd.f32 %v2440_v39, %v2764_v4  ;;  %v1089_v42 = vadd.f32 %v2500_v40, %v2764_v4  ;;  %v840_v43 = vpop.f32.mrb[21].mxu0  ;;  %v1080_v44 = vpop.f32.mrb[21].mxu1 }
 0x123   : > { %1857 = vst.msk [vmem:[%s2777_s13 + $0x44] sm:$0xf] %vm1839_vm0, %v2231_v37  ;;  %1917 = vst.msk [vmem:[%s2777_s13 + $0x134] sm:$0xf] %vm1839_vm0, %v2291_v38  ;;  %v841_v45 = vadd.f32 %v2764_v4, %v840_v43  ;;  %v1081_v46 = vadd.f32 %v2764_v4, %v1080_v44  ;;  %v2441_v47 = vpop.f32.mrb[22].mxu0  ;;  %v2501_v48 = vpop.f32.mrb[22].mxu1 }
 0x124   : > { %v1261_v49 = vmax.f32 %v849_v41, 0.0  ;;  %v1321_v50 = vmax.f32 %v1089_v42, 0.0  ;;  %v852_v51 = vadd.f32 %v2441_v47, %v2764_v4  ;;  %v1092_v52 = vadd.f32 %v2501_v48, %v2764_v4  ;;  %v843_v53 = vpop.f32.mrb[23].mxu0  ;;  %v1083_v54 = vpop.f32.mrb[23].mxu1 }
 0x125   : > { %v1259_v55 = vmax.f32 %v841_v45, 0.0  ;;  %v1319_v56 = vmax.f32 %v1081_v46, 0.0  ;;  %v844_v57 = vadd.f32 %v2764_v4, %v843_v53  ;;  %v1084_v58 = vadd.f32 %v2764_v4, %v1083_v54 }
 0x126   : > { %v2236_v59 = vpack.c.bf16 %v1261_v49, %v1261_v49  ;;  %v2296_v60 = vpack.c.bf16 %v1321_v50, %v1321_v50  ;;  %v1262_v61 = vmax.f32 %v852_v51, 0.0  ;;  %v1322_v62 = vmax.f32 %v1092_v52, 0.0 }
 0x127   : > { %v2234_v63 = vpack.c.bf16 %v1259_v55, %v1259_v55  ;;  %v2294_v0 = vpack.c.bf16 %v1319_v56, %v1319_v56  ;;  %v1260_v1 = vmax.f32 %v844_v57, 0.0  ;;  %v1320_v2 = vmax.f32 %v1084_v58, 0.0 }
 0x128   : > { %1862 = vst.msk [vmem:[%s2777_s13 + $0x58] sm:$0xf] %vm1839_vm0, %v2236_v59  ;;  %1922 = vst.msk [vmem:[%s2777_s13 + $0x148] sm:$0xf] %vm1839_vm0, %v2296_v60  ;;  %v2237_v3 = vpack.c.bf16 %v1262_v61, %v1262_v61  ;;  %v2297_v5 = vpack.c.bf16 %v1322_v62, %v1322_v62 }
 0x129   : > { %1860 = vst.msk [vmem:[%s2777_s13 + $0x50] sm:$0xf] %vm1839_vm0, %v2234_v63  ;;  %1920 = vst.msk [vmem:[%s2777_s13 + $0x140] sm:$0xf] %vm1839_vm0, %v2294_v0  ;;  %v2235_v6 = vpack.c.bf16 %v1260_v1, %v1260_v1  ;;  %v2295_v7 = vpack.c.bf16 %v1320_v2, %v1320_v2  ;;  %v2444_v8 = vpop.f32.mrb[24].mxu0  ;;  %v2504_v9 = vpop.f32.mrb[24].mxu1 }
 0x12a   : > { %1863 = vst.msk [vmem:[%s2777_s13 + $0x5c] sm:$0xf] %vm1839_vm0, %v2237_v3  ;;  %1923 = vst.msk [vmem:[%s2777_s13 + $0x14c] sm:$0xf] %vm1839_vm0, %v2297_v5  ;;  %v865_v10 = vadd.f32 %v2444_v8, %v2764_v4  ;;  %v1105_v11 = vadd.f32 %v2504_v9, %v2764_v4  ;;  %v856_v12 = vpop.f32.mrb[25].mxu0  ;;  %v1096_v13 = vpop.f32.mrb[25].mxu1 }
 0x12b   : > { %1861 = vst.msk [vmem:[%s2777_s13 + $0x54] sm:$0xf] %vm1839_vm0, %v2235_v6  ;;  %1921 = vst.msk [vmem:[%s2777_s13 + $0x144] sm:$0xf] %vm1839_vm0, %v2295_v7  ;;  %v857_v14 = vadd.f32 %v2764_v4, %v856_v12  ;;  %v1097_v15 = vadd.f32 %v2764_v4, %v1096_v13  ;;  %v2445_v16 = vpop.f32.mrb[26].mxu0  ;;  %v2505_v17 = vpop.f32.mrb[26].mxu1 }
 0x12c   : > { %v1265_v18 = vmax.f32 %v865_v10, 0.0  ;;  %v1325_v19 = vmax.f32 %v1105_v11, 0.0  ;;  %v868_v20 = vadd.f32 %v2445_v16, %v2764_v4  ;;  %v1108_v21 = vadd.f32 %v2505_v17, %v2764_v4  ;;  %v859_v22 = vpop.f32.mrb[27].mxu0  ;;  %v1099_v23 = vpop.f32.mrb[27].mxu1 }
 0x12d   : > { %v1263_v24 = vmax.f32 %v857_v14, 0.0  ;;  %v1323_v25 = vmax.f32 %v1097_v15, 0.0  ;;  %v860_v26 = vadd.f32 %v2764_v4, %v859_v22  ;;  %v1100_v27 = vadd.f32 %v2764_v4, %v1099_v23 }
 0x12e   : > { %v2240_v28 = vpack.c.bf16 %v1265_v18, %v1265_v18  ;;  %v2300_v29 = vpack.c.bf16 %v1325_v19, %v1325_v19  ;;  %v1266_v30 = vmax.f32 %v868_v20, 0.0  ;;  %v1326_v31 = vmax.f32 %v1108_v21, 0.0 }
 0x12f   : > { %v2238_v32 = vpack.c.bf16 %v1263_v24, %v1263_v24  ;;  %v2298_v33 = vpack.c.bf16 %v1323_v25, %v1323_v25  ;;  %v1264_v34 = vmax.f32 %v860_v26, 0.0  ;;  %v1324_v35 = vmax.f32 %v1100_v27, 0.0 }
 0x130   : > { %1866 = vst.msk [vmem:[%s2777_s13 + $0x68] sm:$0xf] %vm1839_vm0, %v2240_v28  ;;  %1926 = vst.msk [vmem:[%s2777_s13 + $0x158] sm:$0xf] %vm1839_vm0, %v2300_v29  ;;  %v2241_v36 = vpack.c.bf16 %v1266_v30, %v1266_v30  ;;  %v2301_v37 = vpack.c.bf16 %v1326_v31, %v1326_v31 }
 0x131   : > { %1864 = vst.msk [vmem:[%s2777_s13 + $0x60] sm:$0xf] %vm1839_vm0, %v2238_v32  ;;  %1924 = vst.msk [vmem:[%s2777_s13 + $0x150] sm:$0xf] %vm1839_vm0, %v2298_v33  ;;  %v2239_v38 = vpack.c.bf16 %v1264_v34, %v1264_v34  ;;  %v2299_v39 = vpack.c.bf16 %v1324_v35, %v1324_v35  ;;  %v2448_v40 = vpop.f32.mrb[28].mxu0  ;;  %v2508_v41 = vpop.f32.mrb[28].mxu1 }
 0x132   : > { %1867 = vst.msk [vmem:[%s2777_s13 + $0x6c] sm:$0xf] %vm1839_vm0, %v2241_v36  ;;  %1927 = vst.msk [vmem:[%s2777_s13 + $0x15c] sm:$0xf] %vm1839_vm0, %v2301_v37  ;;  %v881_v42 = vadd.f32 %v2448_v40, %v2764_v4  ;;  %v1121_v43 = vadd.f32 %v2508_v41, %v2764_v4  ;;  %v872_v44 = vpop.f32.mrb[29].mxu0  ;;  %v1112_v45 = vpop.f32.mrb[29].mxu1 }
 0x133   : > { %1865 = vst.msk [vmem:[%s2777_s13 + $0x64] sm:$0xf] %vm1839_vm0, %v2239_v38  ;;  %1925 = vst.msk [vmem:[%s2777_s13 + $0x154] sm:$0xf] %vm1839_vm0, %v2299_v39  ;;  %v873_v46 = vadd.f32 %v2764_v4, %v872_v44  ;;  %v1113_v47 = vadd.f32 %v2764_v4, %v1112_v45  ;;  %v2449_v48 = vpop.f32.mrb[30].mxu0  ;;  %v2509_v49 = vpop.f32.mrb[30].mxu1 }
 0x134   : > { %v1269_v50 = vmax.f32 %v881_v42, 0.0  ;;  %v1329_v51 = vmax.f32 %v1121_v43, 0.0  ;;  %v884_v52 = vadd.f32 %v2449_v48, %v2764_v4  ;;  %v1124_v53 = vadd.f32 %v2509_v49, %v2764_v4  ;;  %v875_v54 = vpop.f32.mrb[31].mxu0  ;;  %v1115_v55 = vpop.f32.mrb[31].mxu1 }
 0x135   : > { %v1267_v56 = vmax.f32 %v873_v46, 0.0  ;;  %v1327_v57 = vmax.f32 %v1113_v47, 0.0  ;;  %v876_v58 = vadd.f32 %v2764_v4, %v875_v54  ;;  %v1116_v59 = vadd.f32 %v2764_v4, %v1115_v55 }
 0x136   : > { %v2244_v60 = vpack.c.bf16 %v1269_v50, %v1269_v50  ;;  %v2304_v61 = vpack.c.bf16 %v1329_v51, %v1329_v51  ;;  %v1270_v62 = vmax.f32 %v884_v52, 0.0  ;;  %v1330_v63 = vmax.f32 %v1124_v53, 0.0 }
 0x137   : > { %v2242_v0 = vpack.c.bf16 %v1267_v56, %v1267_v56  ;;  %v2302_v1 = vpack.c.bf16 %v1327_v57, %v1327_v57  ;;  %v1268_v2 = vmax.f32 %v876_v58, 0.0  ;;  %v1328_v3 = vmax.f32 %v1116_v59, 0.0 }
 0x138   : > { %1870 = vst.msk [vmem:[%s2777_s13 + $0x78] sm:$0xf] %vm1839_vm0, %v2244_v60  ;;  %1930 = vst.msk [vmem:[%s2777_s13 + $0x168] sm:$0xf] %vm1839_vm0, %v2304_v61  ;;  %v2245_v5 = vpack.c.bf16 %v1270_v62, %v1270_v62  ;;  %v2305_v6 = vpack.c.bf16 %v1330_v63, %v1330_v63 }
 0x139   : > { %1868 = vst.msk [vmem:[%s2777_s13 + $0x70] sm:$0xf] %vm1839_vm0, %v2242_v0  ;;  %1928 = vst.msk [vmem:[%s2777_s13 + $0x160] sm:$0xf] %vm1839_vm0, %v2302_v1  ;;  %v2243_v7 = vpack.c.bf16 %v1268_v2, %v1268_v2  ;;  %v2303_v8 = vpack.c.bf16 %v1328_v3, %v1328_v3  ;;  %v2452_v9 = vpop.f32.mrb[32].mxu0  ;;  %v2512_v10 = vpop.f32.mrb[32].mxu1 }
 0x13a   : > { %1871 = vst.msk [vmem:[%s2777_s13 + $0x7c] sm:$0xf] %vm1839_vm0, %v2245_v5  ;;  %1931 = vst.msk [vmem:[%s2777_s13 + $0x16c] sm:$0xf] %vm1839_vm0, %v2305_v6  ;;  %v897_v11 = vadd.f32 %v2452_v9, %v2764_v4  ;;  %v1137_v12 = vadd.f32 %v2512_v10, %v2764_v4  ;;  %v888_v13 = vpop.f32.mrb[33].mxu0  ;;  %v1128_v14 = vpop.f32.mrb[33].mxu1 }
 0x13b   : > { %1869 = vst.msk [vmem:[%s2777_s13 + $0x74] sm:$0xf] %vm1839_vm0, %v2243_v7  ;;  %1929 = vst.msk [vmem:[%s2777_s13 + $0x164] sm:$0xf] %vm1839_vm0, %v2303_v8  ;;  %v889_v15 = vadd.f32 %v2764_v4, %v888_v13  ;;  %v1129_v16 = vadd.f32 %v2764_v4, %v1128_v14  ;;  %v2453_v17 = vpop.f32.mrb[34].mxu0  ;;  %v2513_v18 = vpop.f32.mrb[34].mxu1 }
 0x13c   : > { %v1273_v19 = vmax.f32 %v897_v11, 0.0  ;;  %v1333_v20 = vmax.f32 %v1137_v12, 0.0  ;;  %v900_v21 = vadd.f32 %v2453_v17, %v2764_v4  ;;  %v1140_v22 = vadd.f32 %v2513_v18, %v2764_v4  ;;  %v891_v23 = vpop.f32.mrb[35].mxu0  ;;  %v1131_v24 = vpop.f32.mrb[35].mxu1 }
 0x13d   : > { %v1271_v25 = vmax.f32 %v889_v15, 0.0  ;;  %v1331_v26 = vmax.f32 %v1129_v16, 0.0  ;;  %v892_v27 = vadd.f32 %v2764_v4, %v891_v23  ;;  %v1132_v28 = vadd.f32 %v2764_v4, %v1131_v24 }
 0x13e   : > { %v2248_v29 = vpack.c.bf16 %v1273_v19, %v1273_v19  ;;  %v2308_v30 = vpack.c.bf16 %v1333_v20, %v1333_v20  ;;  %v1274_v31 = vmax.f32 %v900_v21, 0.0  ;;  %v1334_v32 = vmax.f32 %v1140_v22, 0.0 }
 0x13f   : > { %v2246_v33 = vpack.c.bf16 %v1271_v25, %v1271_v25  ;;  %v2306_v34 = vpack.c.bf16 %v1331_v26, %v1331_v26  ;;  %v1272_v35 = vmax.f32 %v892_v27, 0.0  ;;  %v1332_v36 = vmax.f32 %v1132_v28, 0.0 }
 0x140   : > { %1874 = vst.msk [vmem:[%s2777_s13 + $0x88] sm:$0xf] %vm1839_vm0, %v2248_v29  ;;  %1934 = vst.msk [vmem:[%s2777_s13 + $0x178] sm:$0xf] %vm1839_vm0, %v2308_v30  ;;  %v2249_v37 = vpack.c.bf16 %v1274_v31, %v1274_v31  ;;  %v2309_v38 = vpack.c.bf16 %v1334_v32, %v1334_v32 }
 0x141   : > { %1872 = vst.msk [vmem:[%s2777_s13 + $0x80] sm:$0xf] %vm1839_vm0, %v2246_v33  ;;  %1932 = vst.msk [vmem:[%s2777_s13 + $0x170] sm:$0xf] %vm1839_vm0, %v2306_v34  ;;  %v2247_v39 = vpack.c.bf16 %v1272_v35, %v1272_v35  ;;  %v2307_v40 = vpack.c.bf16 %v1332_v36, %v1332_v36  ;;  %v2456_v41 = vpop.f32.mrb[36].mxu0  ;;  %v2516_v42 = vpop.f32.mrb[36].mxu1 }
 0x142   : > { %1875 = vst.msk [vmem:[%s2777_s13 + $0x8c] sm:$0xf] %vm1839_vm0, %v2249_v37  ;;  %1935 = vst.msk [vmem:[%s2777_s13 + $0x17c] sm:$0xf] %vm1839_vm0, %v2309_v38  ;;  %v913_v43 = vadd.f32 %v2456_v41, %v2764_v4  ;;  %v1153_v44 = vadd.f32 %v2516_v42, %v2764_v4  ;;  %v904_v45 = vpop.f32.mrb[37].mxu0  ;;  %v1144_v46 = vpop.f32.mrb[37].mxu1 }
 0x143   : > { %1873 = vst.msk [vmem:[%s2777_s13 + $0x84] sm:$0xf] %vm1839_vm0, %v2247_v39  ;;  %1933 = vst.msk [vmem:[%s2777_s13 + $0x174] sm:$0xf] %vm1839_vm0, %v2307_v40  ;;  %v905_v47 = vadd.f32 %v2764_v4, %v904_v45  ;;  %v1145_v48 = vadd.f32 %v2764_v4, %v1144_v46  ;;  %v2457_v49 = vpop.f32.mrb[38].mxu0  ;;  %v2517_v50 = vpop.f32.mrb[38].mxu1 }
 0x144   : > { %v1277_v51 = vmax.f32 %v913_v43, 0.0  ;;  %v1337_v52 = vmax.f32 %v1153_v44, 0.0  ;;  %v916_v53 = vadd.f32 %v2457_v49, %v2764_v4  ;;  %v1156_v54 = vadd.f32 %v2517_v50, %v2764_v4  ;;  %v907_v55 = vpop.f32.mrb[39].mxu0  ;;  %v1147_v56 = vpop.f32.mrb[39].mxu1 }
 0x145   : > { %v1275_v57 = vmax.f32 %v905_v47, 0.0  ;;  %v1335_v58 = vmax.f32 %v1145_v48, 0.0  ;;  %v908_v59 = vadd.f32 %v2764_v4, %v907_v55  ;;  %v1148_v60 = vadd.f32 %v2764_v4, %v1147_v56 }
 0x146   : > { %v2252_v61 = vpack.c.bf16 %v1277_v51, %v1277_v51  ;;  %v2312_v62 = vpack.c.bf16 %v1337_v52, %v1337_v52  ;;  %v1278_v63 = vmax.f32 %v916_v53, 0.0  ;;  %v1338_v0 = vmax.f32 %v1156_v54, 0.0 }
 0x147   : > { %v2250_v1 = vpack.c.bf16 %v1275_v57, %v1275_v57  ;;  %v2310_v2 = vpack.c.bf16 %v1335_v58, %v1335_v58  ;;  %v1276_v3 = vmax.f32 %v908_v59, 0.0  ;;  %v1336_v5 = vmax.f32 %v1148_v60, 0.0 }
 0x148   : > { %1878 = vst.msk [vmem:[%s2777_s13 + $0x98] sm:$0xf] %vm1839_vm0, %v2252_v61  ;;  %1938 = vst.msk [vmem:[%s2777_s13 + $0x188] sm:$0xf] %vm1839_vm0, %v2312_v62  ;;  %v2253_v6 = vpack.c.bf16 %v1278_v63, %v1278_v63  ;;  %v2313_v7 = vpack.c.bf16 %v1338_v0, %v1338_v0 }
 0x149   : > { %1876 = vst.msk [vmem:[%s2777_s13 + $0x90] sm:$0xf] %vm1839_vm0, %v2250_v1  ;;  %1936 = vst.msk [vmem:[%s2777_s13 + $0x180] sm:$0xf] %vm1839_vm0, %v2310_v2  ;;  %v2251_v8 = vpack.c.bf16 %v1276_v3, %v1276_v3  ;;  %v2311_v9 = vpack.c.bf16 %v1336_v5, %v1336_v5  ;;  %v2460_v10 = vpop.f32.mrb[40].mxu0  ;;  %v2520_v11 = vpop.f32.mrb[40].mxu1 }
 0x14a   : > { %1879 = vst.msk [vmem:[%s2777_s13 + $0x9c] sm:$0xf] %vm1839_vm0, %v2253_v6  ;;  %1939 = vst.msk [vmem:[%s2777_s13 + $0x18c] sm:$0xf] %vm1839_vm0, %v2313_v7  ;;  %v929_v12 = vadd.f32 %v2460_v10, %v2764_v4  ;;  %v1169_v13 = vadd.f32 %v2520_v11, %v2764_v4  ;;  %v920_v14 = vpop.f32.mrb[41].mxu0  ;;  %v1160_v15 = vpop.f32.mrb[41].mxu1 }
 0x14b   : > { %1877 = vst.msk [vmem:[%s2777_s13 + $0x94] sm:$0xf] %vm1839_vm0, %v2251_v8  ;;  %1937 = vst.msk [vmem:[%s2777_s13 + $0x184] sm:$0xf] %vm1839_vm0, %v2311_v9  ;;  %v921_v16 = vadd.f32 %v2764_v4, %v920_v14  ;;  %v1161_v17 = vadd.f32 %v2764_v4, %v1160_v15  ;;  %v2461_v18 = vpop.f32.mrb[42].mxu0  ;;  %v2521_v19 = vpop.f32.mrb[42].mxu1 }
 0x14c   : > { %v1281_v20 = vmax.f32 %v929_v12, 0.0  ;;  %v1341_v21 = vmax.f32 %v1169_v13, 0.0  ;;  %v932_v22 = vadd.f32 %v2461_v18, %v2764_v4  ;;  %v1172_v23 = vadd.f32 %v2521_v19, %v2764_v4  ;;  %v923_v24 = vpop.f32.mrb[43].mxu0  ;;  %v1163_v25 = vpop.f32.mrb[43].mxu1 }
 0x14d   : > { %v1279_v26 = vmax.f32 %v921_v16, 0.0  ;;  %v1339_v27 = vmax.f32 %v1161_v17, 0.0  ;;  %v924_v28 = vadd.f32 %v2764_v4, %v923_v24  ;;  %v1164_v29 = vadd.f32 %v2764_v4, %v1163_v25 }
 0x14e   : > { %v2256_v30 = vpack.c.bf16 %v1281_v20, %v1281_v20  ;;  %v2316_v31 = vpack.c.bf16 %v1341_v21, %v1341_v21  ;;  %v1282_v32 = vmax.f32 %v932_v22, 0.0  ;;  %v1342_v33 = vmax.f32 %v1172_v23, 0.0 }
 0x14f   : > { %v2254_v34 = vpack.c.bf16 %v1279_v26, %v1279_v26  ;;  %v2314_v35 = vpack.c.bf16 %v1339_v27, %v1339_v27  ;;  %v1280_v36 = vmax.f32 %v924_v28, 0.0  ;;  %v1340_v37 = vmax.f32 %v1164_v29, 0.0 }
 0x150   : > { %1882 = vst.msk [vmem:[%s2777_s13 + $0xa8] sm:$0xf] %vm1839_vm0, %v2256_v30  ;;  %1942 = vst.msk [vmem:[%s2777_s13 + $0x198] sm:$0xf] %vm1839_vm0, %v2316_v31  ;;  %v2257_v38 = vpack.c.bf16 %v1282_v32, %v1282_v32  ;;  %v2317_v39 = vpack.c.bf16 %v1342_v33, %v1342_v33 }
 0x151   : > { %1880 = vst.msk [vmem:[%s2777_s13 + $0xa0] sm:$0xf] %vm1839_vm0, %v2254_v34  ;;  %1940 = vst.msk [vmem:[%s2777_s13 + $0x190] sm:$0xf] %vm1839_vm0, %v2314_v35  ;;  %v2255_v40 = vpack.c.bf16 %v1280_v36, %v1280_v36  ;;  %v2315_v41 = vpack.c.bf16 %v1340_v37, %v1340_v37  ;;  %v2464_v42 = vpop.f32.mrb[44].mxu0  ;;  %v2524_v43 = vpop.f32.mrb[44].mxu1 }
 0x152   : > { %1883 = vst.msk [vmem:[%s2777_s13 + $0xac] sm:$0xf] %vm1839_vm0, %v2257_v38  ;;  %1943 = vst.msk [vmem:[%s2777_s13 + $0x19c] sm:$0xf] %vm1839_vm0, %v2317_v39  ;;  %v945_v44 = vadd.f32 %v2464_v42, %v2764_v4  ;;  %v1185_v45 = vadd.f32 %v2524_v43, %v2764_v4  ;;  %v936_v46 = vpop.f32.mrb[45].mxu0  ;;  %v1176_v47 = vpop.f32.mrb[45].mxu1 }
 0x153   : > { %1881 = vst.msk [vmem:[%s2777_s13 + $0xa4] sm:$0xf] %vm1839_vm0, %v2255_v40  ;;  %1941 = vst.msk [vmem:[%s2777_s13 + $0x194] sm:$0xf] %vm1839_vm0, %v2315_v41  ;;  %v937_v48 = vadd.f32 %v2764_v4, %v936_v46  ;;  %v1177_v49 = vadd.f32 %v2764_v4, %v1176_v47  ;;  %v2465_v50 = vpop.f32.mrb[46].mxu0  ;;  %v2525_v51 = vpop.f32.mrb[46].mxu1 }
 0x154   : > { %v1285_v52 = vmax.f32 %v945_v44, 0.0  ;;  %v1345_v53 = vmax.f32 %v1185_v45, 0.0  ;;  %v948_v54 = vadd.f32 %v2465_v50, %v2764_v4  ;;  %v1188_v55 = vadd.f32 %v2525_v51, %v2764_v4  ;;  %v939_v56 = vpop.f32.mrb[47].mxu0  ;;  %v1179_v57 = vpop.f32.mrb[47].mxu1  ;;  %v2630_v44 = vld [vmem:[%s3125_s2] ss:$0 sm:$0xff] }
 0x155   : > { %v1283_v58 = vmax.f32 %v937_v48, 0.0  ;;  %v1343_v59 = vmax.f32 %v1177_v49, 0.0  ;;  %v940_v60 = vadd.f32 %v2764_v4, %v939_v56  ;;  %v1180_v61 = vadd.f32 %v2764_v4, %v1179_v57 }
 0x156   : > { %v2260_v62 = vpack.c.bf16 %v1285_v52, %v1285_v52  ;;  %v2320_v63 = vpack.c.bf16 %v1345_v53, %v1345_v53  ;;  %v1286_v0 = vmax.f32 %v948_v54, 0.0  ;;  %v1346_v1 = vmax.f32 %v1188_v55, 0.0 }
 0x157   : > { %v2258_v2 = vpack.c.bf16 %v1283_v58, %v1283_v58  ;;  %v2318_v3 = vpack.c.bf16 %v1343_v59, %v1343_v59  ;;  %v1284_v5 = vmax.f32 %v940_v60, 0.0  ;;  %v1344_v6 = vmax.f32 %v1180_v61, 0.0 }
 0x158   : > { %1886 = vst.msk [vmem:[%s2777_s13 + $0xb8] sm:$0xf] %vm1839_vm0, %v2260_v62  ;;  %1946 = vst.msk [vmem:[%s2777_s13 + $0x1a8] sm:$0xf] %vm1839_vm0, %v2320_v63  ;;  %v2261_v7 = vpack.c.bf16 %v1286_v0, %v1286_v0  ;;  %v2321_v8 = vpack.c.bf16 %v1346_v1, %v1346_v1 }
 0x159   : > { %1884 = vst.msk [vmem:[%s2777_s13 + $0xb0] sm:$0xf] %vm1839_vm0, %v2258_v2  ;;  %1944 = vst.msk [vmem:[%s2777_s13 + $0x1a0] sm:$0xf] %vm1839_vm0, %v2318_v3  ;;  %v2259_v9 = vpack.c.bf16 %v1284_v5, %v1284_v5  ;;  %v2319_v10 = vpack.c.bf16 %v1344_v6, %v1344_v6  ;;  %v2468_v11 = vpop.f32.mrb[48].mxu0  ;;  %v2528_v12 = vpop.f32.mrb[48].mxu1 }
 0x15a   : > { %1887 = vst.msk [vmem:[%s2777_s13 + $0xbc] sm:$0xf] %vm1839_vm0, %v2261_v7  ;;  %1947 = vst.msk [vmem:[%s2777_s13 + $0x1ac] sm:$0xf] %vm1839_vm0, %v2321_v8  ;;  %v961_v13 = vadd.f32 %v2468_v11, %v2764_v4  ;;  %v1201_v14 = vadd.f32 %v2528_v12, %v2764_v4  ;;  %v952_v15 = vpop.f32.mrb[49].mxu0  ;;  %v1192_v16 = vpop.f32.mrb[49].mxu1 }
 0x15b   : > { %1885 = vst.msk [vmem:[%s2777_s13 + $0xb4] sm:$0xf] %vm1839_vm0, %v2259_v9  ;;  %1945 = vst.msk [vmem:[%s2777_s13 + $0x1a4] sm:$0xf] %vm1839_vm0, %v2319_v10  ;;  %v953_v17 = vadd.f32 %v2764_v4, %v952_v15  ;;  %v1193_v18 = vadd.f32 %v2764_v4, %v1192_v16  ;;  %v2469_v19 = vpop.f32.mrb[50].mxu0  ;;  %v2529_v20 = vpop.f32.mrb[50].mxu1 }
 0x15c   : > { %v1289_v21 = vmax.f32 %v961_v13, 0.0  ;;  %v1349_v22 = vmax.f32 %v1201_v14, 0.0  ;;  %v964_v23 = vadd.f32 %v2469_v19, %v2764_v4  ;;  %v1204_v24 = vadd.f32 %v2529_v20, %v2764_v4  ;;  %v955_v25 = vpop.f32.mrb[51].mxu0  ;;  %v1195_v26 = vpop.f32.mrb[51].mxu1 }
 0x15d   : > { %v1287_v27 = vmax.f32 %v953_v17, 0.0  ;;  %v1347_v28 = vmax.f32 %v1193_v18, 0.0  ;;  %v956_v29 = vadd.f32 %v2764_v4, %v955_v25  ;;  %v1196_v30 = vadd.f32 %v2764_v4, %v1195_v26 }
 0x15e   : > { %v2264_v31 = vpack.c.bf16 %v1289_v21, %v1289_v21  ;;  %v2324_v32 = vpack.c.bf16 %v1349_v22, %v1349_v22  ;;  %v1290_v33 = vmax.f32 %v964_v23, 0.0  ;;  %v1350_v34 = vmax.f32 %v1204_v24, 0.0 }
 0x15f   : > { %v2262_v35 = vpack.c.bf16 %v1287_v27, %v1287_v27  ;;  %v2322_v36 = vpack.c.bf16 %v1347_v28, %v1347_v28  ;;  %v1288_v37 = vmax.f32 %v956_v29, 0.0  ;;  %v1348_v38 = vmax.f32 %v1196_v30, 0.0 }
 0x160   : > { %1890 = vst.msk [vmem:[%s2777_s13 + $0xc8] sm:$0xf] %vm1839_vm0, %v2264_v31  ;;  %1950 = vst.msk [vmem:[%s2777_s13 + $0x1b8] sm:$0xf] %vm1839_vm0, %v2324_v32  ;;  %v2265_v39 = vpack.c.bf16 %v1290_v33, %v1290_v33  ;;  %v2325_v40 = vpack.c.bf16 %v1350_v34, %v1350_v34 }
 0x161   : > { %1888 = vst.msk [vmem:[%s2777_s13 + $0xc0] sm:$0xf] %vm1839_vm0, %v2262_v35  ;;  %1948 = vst.msk [vmem:[%s2777_s13 + $0x1b0] sm:$0xf] %vm1839_vm0, %v2322_v36  ;;  %v2263_v4 = vpack.c.bf16 %v1288_v37, %v1288_v37  ;;  %v2323_v41 = vpack.c.bf16 %v1348_v38, %v1348_v38  ;;  %v2472_v42 = vpop.f32.mrb[52].mxu0  ;;  %v2532_v43 = vpop.f32.mrb[52].mxu1 }
 0x162   : > { %1891 = vst.msk [vmem:[%s2777_s13 + $0xcc] sm:$0xf] %vm1839_vm0, %v2265_v39  ;;  %1951 = vst.msk [vmem:[%s2777_s13 + $0x1bc] sm:$0xf] %vm1839_vm0, %v2325_v40  ;;  %v977_v45 = vadd.f32 %v2630_v44, %v2472_v42  ;;  %v1217_v46 = vadd.f32 %v2630_v44, %v2532_v43  ;;  %v968_v47 = vpop.f32.mrb[53].mxu0  ;;  %v1208_v48 = vpop.f32.mrb[53].mxu1 }
 0x163   : > { %1889 = vst.msk [vmem:[%s2777_s13 + $0xc4] sm:$0xf] %vm1839_vm0, %v2263_v4  ;;  %1949 = vst.msk [vmem:[%s2777_s13 + $0x1b4] sm:$0xf] %vm1839_vm0, %v2323_v41  ;;  %v969_v49 = vadd.f32 %v2630_v44, %v968_v47  ;;  %v1209_v50 = vadd.f32 %v2630_v44, %v1208_v48  ;;  %v2473_v51 = vpop.f32.mrb[54].mxu0  ;;  %v2533_v52 = vpop.f32.mrb[54].mxu1 }
 0x164   : > { %v1293_v53 = vmax.f32 %v977_v45, 0.0  ;;  %v1353_v54 = vmax.f32 %v1217_v46, 0.0  ;;  %v980_v55 = vadd.f32 %v2630_v44, %v2473_v51  ;;  %v1220_v56 = vadd.f32 %v2630_v44, %v2533_v52  ;;  %v971_v57 = vpop.f32.mrb[55].mxu0  ;;  %v1211_v58 = vpop.f32.mrb[55].mxu1 }
 0x165   : > { %v1291_v59 = vmax.f32 %v969_v49, 0.0  ;;  %v1351_v60 = vmax.f32 %v1209_v50, 0.0  ;;  %v972_v61 = vadd.f32 %v2630_v44, %v971_v57  ;;  %v1212_v62 = vadd.f32 %v2630_v44, %v1211_v58 }
 0x166   : > { %v2268_v63 = vpack.c.bf16 %v1293_v53, %v1293_v53  ;;  %v2328_v0 = vpack.c.bf16 %v1353_v54, %v1353_v54  ;;  %v1294_v1 = vmax.f32 %v980_v55, 0.0  ;;  %v1354_v2 = vmax.f32 %v1220_v56, 0.0 }
 0x167   : > { %v2266_v3 = vpack.c.bf16 %v1291_v59, %v1291_v59  ;;  %v2326_v5 = vpack.c.bf16 %v1351_v60, %v1351_v60  ;;  %v1292_v6 = vmax.f32 %v972_v61, 0.0  ;;  %v1352_v7 = vmax.f32 %v1212_v62, 0.0 }
 0x168   : > { %1894 = vst.msk [vmem:[%s2777_s13 + $0xd8] sm:$0xf] %vm1839_vm0, %v2268_v63  ;;  %1954 = vst.msk [vmem:[%s2777_s13 + $0x1c8] sm:$0xf] %vm1839_vm0, %v2328_v0  ;;  %v2269_v8 = vpack.c.bf16 %v1294_v1, %v1294_v1  ;;  %v2329_v9 = vpack.c.bf16 %v1354_v2, %v1354_v2 }
 0x169   : > { %1892 = vst.msk [vmem:[%s2777_s13 + $0xd0] sm:$0xf] %vm1839_vm0, %v2266_v3  ;;  %1952 = vst.msk [vmem:[%s2777_s13 + $0x1c0] sm:$0xf] %vm1839_vm0, %v2326_v5  ;;  %v2267_v10 = vpack.c.bf16 %v1292_v6, %v1292_v6  ;;  %v2327_v11 = vpack.c.bf16 %v1352_v7, %v1352_v7  ;;  %v2476_v12 = vpop.f32.mrb[56].mxu0  ;;  %v2536_v13 = vpop.f32.mrb[56].mxu1 }
 0x16a   : > { %1895 = vst.msk [vmem:[%s2777_s13 + $0xdc] sm:$0xf] %vm1839_vm0, %v2269_v8  ;;  %1955 = vst.msk [vmem:[%s2777_s13 + $0x1cc] sm:$0xf] %vm1839_vm0, %v2329_v9  ;;  %v993_v14 = vadd.f32 %v2630_v44, %v2476_v12  ;;  %v1233_v15 = vadd.f32 %v2630_v44, %v2536_v13  ;;  %v984_v16 = vpop.f32.mrb[57].mxu0  ;;  %v1224_v17 = vpop.f32.mrb[57].mxu1 }
 0x16b   : > { %1893 = vst.msk [vmem:[%s2777_s13 + $0xd4] sm:$0xf] %vm1839_vm0, %v2267_v10  ;;  %1953 = vst.msk [vmem:[%s2777_s13 + $0x1c4] sm:$0xf] %vm1839_vm0, %v2327_v11  ;;  %v985_v18 = vadd.f32 %v2630_v44, %v984_v16  ;;  %v1225_v19 = vadd.f32 %v2630_v44, %v1224_v17  ;;  %v2477_v20 = vpop.f32.mrb[58].mxu0  ;;  %v2537_v21 = vpop.f32.mrb[58].mxu1 }
 0x16c   : > { %v1297_v22 = vmax.f32 %v993_v14, 0.0  ;;  %v1357_v23 = vmax.f32 %v1233_v15, 0.0  ;;  %v996_v24 = vadd.f32 %v2630_v44, %v2477_v20  ;;  %v1236_v25 = vadd.f32 %v2630_v44, %v2537_v21  ;;  %v987_v26 = vpop.f32.mrb[59].mxu0  ;;  %v1227_v27 = vpop.f32.mrb[59].mxu1 }
 0x16d   : > { %v1295_v28 = vmax.f32 %v985_v18, 0.0  ;;  %v1355_v29 = vmax.f32 %v1225_v19, 0.0  ;;  %v988_v30 = vadd.f32 %v2630_v44, %v987_v26  ;;  %v1228_v31 = vadd.f32 %v2630_v44, %v1227_v27 }
 0x16e   : > { %v2272_v32 = vpack.c.bf16 %v1297_v22, %v1297_v22  ;;  %v2332_v33 = vpack.c.bf16 %v1357_v23, %v1357_v23  ;;  %v1298_v34 = vmax.f32 %v996_v24, 0.0  ;;  %v1358_v35 = vmax.f32 %v1236_v25, 0.0 }
 0x16f   : > { %v2270_v36 = vpack.c.bf16 %v1295_v28, %v1295_v28  ;;  %v2330_v37 = vpack.c.bf16 %v1355_v29, %v1355_v29  ;;  %v1296_v38 = vmax.f32 %v988_v30, 0.0  ;;  %v1356_v39 = vmax.f32 %v1228_v31, 0.0 }
 0x170   : > { %1898 = vst.msk [vmem:[%s2777_s13 + $0xe8] sm:$0xf] %vm1839_vm0, %v2272_v32  ;;  %1958 = vst.msk [vmem:[%s2777_s13 + $0x1d8] sm:$0xf] %vm1839_vm0, %v2332_v33  ;;  %v2273_v40 = vpack.c.bf16 %v1298_v34, %v1298_v34  ;;  %v2333_v4 = vpack.c.bf16 %v1358_v35, %v1358_v35 }
 0x171   : > { %1896 = vst.msk [vmem:[%s2777_s13 + $0xe0] sm:$0xf] %vm1839_vm0, %v2270_v36  ;;  %1956 = vst.msk [vmem:[%s2777_s13 + $0x1d0] sm:$0xf] %vm1839_vm0, %v2330_v37  ;;  %v2271_v41 = vpack.c.bf16 %v1296_v38, %v1296_v38  ;;  %v2331_v42 = vpack.c.bf16 %v1356_v39, %v1356_v39 }
 0x172   : > { %1899 = vst.msk [vmem:[%s2777_s13 + $0xec] sm:$0xf] %vm1839_vm0, %v2273_v40  ;;  %1959 = vst.msk [vmem:[%s2777_s13 + $0x1dc] sm:$0xf] %vm1839_vm0, %v2333_v4 }
 0x173   : > { %1897 = vst.msk [vmem:[%s2777_s13 + $0xe4] sm:$0xf] %vm1839_vm0, %v2271_v41  ;;  %1957 = vst.msk [vmem:[%s2777_s13 + $0x1d4] sm:$0xf] %vm1839_vm0, %v2331_v42 }
 0x174 PF: > { %s13_s12 = sadd.s32 1, %s2637_s12  }
 0x175   : > { %p10_p4 = scmp.ge.s32.totalorder %s13_s12, 17  }
 0x177   :  { %12 = sbr.rel (!%p10_p4) target bundleno = 1 (0x1), region = 62 }

// kernel: icm_forward.7
= control target key start
LH: loop header
LB: loop body
LE: loop exit
PB: predicated region body
PF: predicated region fallthrough
CT: control target
= control target key end

     0   :  { %s3686_s12 = smov 0   ;;  %s4486_s0 = inlined_call_operand.vmem [shape: bf16[3600,384], index: 0, kind: input, shape index: {}]   ;;  %s4487_s1 = inlined_call_operand.vmem [shape: bf16[384,64], index: 1, kind: input, shape index: {}]   ;;  %s4488_s2 = inlined_call_operand.vmem [shape: f32[1,64], index: 2, kind: input, shape index: {}]   ;;  %s4489_s3 = inlined_call_operand.vmem [shape: bf16[3600,64], index: 3, kind: output, shape index: {}]  }
   0x1 LB: > { %s2660_s13 = sadd.s32 4294967295, %s3661_s12   ;;  %p2664_p0 = scmp.ge.s32.totalorder %s3661_s12, 1  ;;  %s3661_s12 = sphi %s3686_s12, %s13_s12  }
   0x2   : > { %p139_p1 = scmp.lt.s32.totalorder %s3661_s12, 6 }
   0x4   : > { %p140_p2 = pnand %p2664_p0, %p139_p1 }
   0x5   : > { %v3450_v0 = vld [vmem:[%s4487_s1] sm:$0xff] (!%p140_p2)   ;;  %v3663_v1 = vmov (!%p140_p2), 0   ;;  %v3451_v2 = vld [vmem:[%s4487_s1 + $0x8] sm:$0xff] (!%p140_p2)   ;;  %v3664_v3 = vmov (!%p140_p2), 0.0   ;;  %vm3665_vm0 = vmmov (!%p140_p2), 0   ;;  %v3452_v4 = vld [vmem:[%s4487_s1 + $0x10] sm:$0xff] (!%p140_p2)  }
   0x6   : > { %143 = sbr.rel (%p140_p2) target bundleno = 645 (0x285), region = 32  ;;  %1277 = vmatprep.subr.bf16.mxu1 (!%p140_p2), %v3663_v1  ;;  %3062 = vmatprep.subr.bf16.mxu0 (!%p140_p2), %v3664_v3  ;;  %v3458_v5 = vld [vmem:[%s4487_s1 + $0x80] sm:$0xff] (!%p140_p2)   ;;  %v3453_v6 = vld [vmem:[%s4487_s1 + $0x18] sm:$0xff] (!%p140_p2)   ;;  %v3460_v7 = vld [vmem:[%s4487_s1 + $0x88] sm:$0xff] (!%p140_p2)   ;;  %vm2513_vm1 = vcmask (!%p140_p2), 519168  }
   0x7   : > { %1278 = vmatpush1.bf16.msra.mxu1 (!%p140_p2), %v3450_v0  ;;  %3078 = vmatprep.mubr.msk.bf16.mxu0 (!%p140_p2), %vm3665_vm0, %v3664_v3  ;;  %s164_s20 = smul.u32 (!%p140_p2), 90, %s2660_s13  ;;  %v3454_v8 = vld [vmem:[%s4487_s1 + $0x20] sm:$0xff] (!%p140_p2)   ;;  %v3462_v9 = vld [vmem:[%s4487_s1 + $0x90] sm:$0xff] (!%p140_p2)   ;;  %v3455_v10 = vld [vmem:[%s4487_s1 + $0x28] sm:$0xff] (!%p140_p2)  }
   0x8   : > { %1279 = vmatprep.subr.bf16.mxu1 (!%p140_p2), %v3663_v1  ;;  %3063 = vmatpush3.bf16.msra.mxu0 (!%p140_p2), %v3458_v5  ;;  %v3464_v11 = vld [vmem:[%s4487_s1 + $0x98] sm:$0xff] (!%p140_p2)   ;;  %v3456_v12 = vld [vmem:[%s4487_s1 + $0x30] sm:$0xff] (!%p140_p2)   ;;  %v3466_v13 = vld [vmem:[%s4487_s1 + $0xa0] sm:$0xff] (!%p140_p2)  }
   0x9   : > { %p165_p3 = scmp.lt.s32.totalorder (!%p140_p2), %s164_s20, 449  ;;  %3064 = vmatprep.subr.bf16.mxu0 (!%p140_p2), %v3664_v3  ;;  %v3457_v14 = vld [vmem:[%s4487_s1 + $0x38] sm:$0xff] (!%p140_p2)   ;;  %v3468_v16 = vld [vmem:[%s4487_s1 + $0xa8] sm:$0xff] (!%p140_p2)   ;;  %v3459_v17 = vld [vmem:[%s4487_s1 + $0x40] sm:$0xff] (!%p140_p2)  }
   0xa   : > { %v3470_v18 = vld [vmem:[%s4487_s1 + $0xb0] sm:$0xff] (!%p140_p2)   ;;  %v3461_v19 = vld [vmem:[%s4487_s1 + $0x48] sm:$0xff] (!%p140_p2)   ;;  %v3472_v20 = vld [vmem:[%s4487_s1 + $0xb8] sm:$0xff] (!%p140_p2)  }
   0xb   : > { %1280 = vmatpush1.bf16.msra.mxu1 (!%p140_p2), %v3451_v2  ;;  %v3463_v22 = vld [vmem:[%s4487_s1 + $0x50] sm:$0xff] (!%p140_p2)   ;;  %v3465_v23 = vld [vmem:[%s4487_s1 + $0x58] sm:$0xff] (!%p140_p2)   ;;  %v3467_v25 = vld [vmem:[%s4487_s1 + $0x60] sm:$0xff] (!%p140_p2)  }
   0xc   : > { %1281 = vmatprep.subr.bf16.mxu1 (!%p140_p2), %v3663_v1  ;;  %3065 = vmatpush3.bf16.msra.mxu0 (!%p140_p2), %v3460_v7  ;;  %v3469_v26 = vld [vmem:[%s4487_s1 + $0x68] sm:$0xff] (!%p140_p2)   ;;  %v3471_v28 = vld [vmem:[%s4487_s1 + $0x70] sm:$0xff] (!%p140_p2)   ;;  %v3473_v29 = vld [vmem:[%s4487_s1 + $0x78] sm:$0xff] (!%p140_p2)  }
   0xd   : > { %s4491_s20 = smov (!%p165_p3, %s164_s20), 449  ;;  %3066 = vmatprep.subr.bf16.mxu0 %v3664_v3 }
   0xe   : > { %s3438_s8 = smul.u32 12, %s4491_s20  ;;  %s2666_s19 = sshll.u32 %s4491_s20, 2 }
   0xf   : > { %1282 = vmatpush1.bf16.msra.mxu1 %v3452_v4  ;;  %s3967_s23 = scalar_lea.vmem %s4489_s3, %s2666_s19 }
  0x10   : > { %1283 = vmatprep.subr.bf16.mxu1 %v3663_v1  ;;  %3067 = vmatpush3.bf16.msra.mxu0 %v3462_v9  ;;  %s3748_s16 = scalar_lea.vmem %s4486_s0, %s3438_s8 }
  0x11   : > { %3068 = vmatprep.subr.bf16.mxu0 %v3664_v3  ;;  %v3476_v15 = vld [vmem:[%s3748_s16 + $0x4] ss:$12 sps:$4 sm:$0xff]   ;;  %v3477_v21 = vld [vmem:[%s3748_s16 + $0x8] ss:$12 sps:$4 sm:$0xff]   ;;  %v3480_v24 = vld [vmem:[%s3748_s16 + $0x20] ss:$12 sps:$4 sm:$0xff]  }
  0x12   : > { %1309 = vmatprep.mubr.bf16.mxu1 %v3476_v15  ;;  %v3484_v27 = vld [vmem:[%s3748_s16 + $0x38] ss:$12 sps:$4 sm:$0xff]   ;;  %v3474_v30 = vld [vmem:[%s3748_s16] ss:$12 sps:$4 sm:$0xff]   ;;  %v3488_v31 = vld [vmem:[%s3748_s16 + $0x50] ss:$12 sps:$4 sm:$0xff]  }
  0x13   : > { %1284 = vmatpush1.bf16.msra.mxu1 %v3453_v6  ;;  %v3478_v32 = vld [vmem:[%s3748_s16 + $0x1c] ss:$12 sps:$4 sm:$0xff]   ;;  %v3481_v33 = vld [vmem:[%s3748_s16 + $0x18] ss:$12 sps:$4 sm:$0xff]   ;;  %v3482_v35 = vld [vmem:[%s3748_s16 + $0x34] ss:$12 sps:$4 sm:$0xff]  }
  0x14   : > { %1285 = vmatprep.subr.bf16.mxu1 %v3663_v1  ;;  %3069 = vmatpush3.bf16.msra.mxu0 %v3464_v11  ;;  %v3492_v34 = vld [vmem:[%s3748_s16 + $0x68] ss:$12 sps:$4 sm:$0xff]   ;;  %v3485_v36 = vld [vmem:[%s3748_s16 + $0x30] ss:$12 sps:$4 sm:$0xff]   ;;  %v3496_v37 = vld [vmem:[%s3748_s16 + $0x80] ss:$12 sps:$4 sm:$0xff]  }
  0x15   : > { %3070 = vmatprep.subr.bf16.mxu0 %v3664_v3  ;;  %v3486_v38 = vld [vmem:[%s3748_s16 + $0x4c] ss:$12 sps:$4 sm:$0xff]   ;;  %v3489_v39 = vld [vmem:[%s3748_s16 + $0x48] ss:$12 sps:$4 sm:$0xff]   ;;  %v3490_v41 = vld [vmem:[%s3748_s16 + $0x64] ss:$12 sps:$4 sm:$0xff]  }
  0x16   : > { %v3500_v40 = vld [vmem:[%s3748_s16 + $0x98] ss:$12 sps:$4 sm:$0xff]   ;;  %v3493_v42 = vld [vmem:[%s3748_s16 + $0x60] ss:$12 sps:$4 sm:$0xff]   ;;  %v3504_v43 = vld [vmem:[%s3748_s16 + $0xb0] ss:$12 sps:$4 sm:$0xff]  }
  0x17   : > { %1286 = vmatpush1.bf16.msra.mxu1 %v3454_v8  ;;  %v3494_v44 = vld [vmem:[%s3748_s16 + $0x7c] ss:$12 sps:$4 sm:$0xff]   ;;  %v3497_v45 = vld [vmem:[%s3748_s16 + $0x78] ss:$12 sps:$4 sm:$0xff]   ;;  %v3498_v47 = vld [vmem:[%s3748_s16 + $0x94] ss:$12 sps:$4 sm:$0xff]  }
  0x18   : > { %1287 = vmatprep.subr.bf16.mxu1 %v3663_v1  ;;  %3071 = vmatpush3.bf16.msra.mxu0 %v3466_v13  ;;  %v3508_v46 = vld [vmem:[%s3748_s16 + $0xc8] ss:$12 sps:$4 sm:$0xff]   ;;  %v3501_v48 = vld [vmem:[%s3748_s16 + $0x90] ss:$12 sps:$4 sm:$0xff]   ;;  %v3512_v49 = vld [vmem:[%s3748_s16 + $0xe0] ss:$12 sps:$4 sm:$0xff]  }
  0x19   : > { %3072 = vmatprep.subr.bf16.mxu0 %v3664_v3  ;;  %v3502_v50 = vld [vmem:[%s3748_s16 + $0xac] ss:$12 sps:$4 sm:$0xff]   ;;  %v3505_v51 = vld [vmem:[%s3748_s16 + $0xa8] ss:$12 sps:$4 sm:$0xff]   ;;  %v3506_v53 = vld [vmem:[%s3748_s16 + $0xc4] ss:$12 sps:$4 sm:$0xff]  }
  0x1a   : > { %v3516_v52 = vld [vmem:[%s3748_s16 + $0xf8] ss:$12 sps:$4 sm:$0xff]   ;;  %v3509_v54 = vld [vmem:[%s3748_s16 + $0xc0] ss:$12 sps:$4 sm:$0xff]   ;;  %v3520_v55 = vld [vmem:[%s3748_s16 + $0x110] ss:$12 sps:$4 sm:$0xff]  }
  0x1b   : > { %1288 = vmatpush1.bf16.msra.mxu1 %v3455_v10  ;;  %v3510_v56 = vld [vmem:[%s3748_s16 + $0xdc] ss:$12 sps:$4 sm:$0xff]   ;;  %v3513_v57 = vld [vmem:[%s3748_s16 + $0xd8] ss:$12 sps:$4 sm:$0xff]   ;;  %v3514_v59 = vld [vmem:[%s3748_s16 + $0xf4] ss:$12 sps:$4 sm:$0xff]  }
  0x1c   : > { %1289 = vmatprep.subr.bf16.mxu1 %v3663_v1  ;;  %3073 = vmatpush3.bf16.msra.mxu0 %v3468_v16  ;;  %v3524_v58 = vld [vmem:[%s3748_s16 + $0x128] ss:$12 sps:$4 sm:$0xff]   ;;  %v3517_v60 = vld [vmem:[%s3748_s16 + $0xf0] ss:$12 sps:$4 sm:$0xff]   ;;  %v3528_v61 = vld [vmem:[%s3748_s16 + $0x140] ss:$12 sps:$4 sm:$0xff]  }
  0x1d   : > { %3074 = vmatprep.subr.bf16.mxu0 %v3664_v3  ;;  %v3518_v62 = vld [vmem:[%s3748_s16 + $0x10c] ss:$12 sps:$4 sm:$0xff]   ;;  %v3521_v63 = vld [vmem:[%s3748_s16 + $0x108] ss:$12 sps:$4 sm:$0xff]   ;;  %v3536_v4 = vld [vmem:[%s3748_s16 + $0x170] ss:$12 sps:$4 sm:$0xff]  }
  0x1e   : > { %v3532_v0 = vld [vmem:[%s3748_s16 + $0x158] ss:$12 sps:$4 sm:$0xff]   ;;  %v3525_v2 = vld [vmem:[%s3748_s16 + $0x120] ss:$12 sps:$4 sm:$0xff]   ;;  %v3526_v5 = vld [vmem:[%s3748_s16 + $0x13c] ss:$12 sps:$4 sm:$0xff]  }
  0x1f   : > { %1290 = vmatpush1.bf16.msra.mxu1 %v3456_v12  ;;  %v3529_v6 = vld [vmem:[%s3748_s16 + $0x138] ss:$12 sps:$4 sm:$0xff]   ;;  %v3540_v7 = vld [vmem:[%s3748_s16 + $0x188] ss:$12 sps:$4 sm:$0xff]   ;;  %v3533_v9 = vld [vmem:[%s3748_s16 + $0x150] ss:$12 sps:$4 sm:$0xff]  }
  0x20   : > { %1291 = vmatprep.subr.bf16.mxu1 %v3663_v1  ;;  %3075 = vmatpush3.bf16.msra.mxu0 %v3470_v18  ;;  %v3530_v8 = vld [vmem:[%s3748_s16 + $0x154] ss:$12 sps:$4 sm:$0xff]   ;;  %v3534_v11 = vld [vmem:[%s3748_s16 + $0x16c] ss:$12 sps:$4 sm:$0xff]   ;;  %v3552_v16 = vld [vmem:[%s3748_s16 + $0x1d0] ss:$12 sps:$4 sm:$0xff]  }
  0x21   : > { %3076 = vmatprep.subr.bf16.mxu0 %v3664_v3  ;;  %v3544_v10 = vld [vmem:[%s3748_s16 + $0x1a0] ss:$12 sps:$4 sm:$0xff]   ;;  %v3537_v12 = vld [vmem:[%s3748_s16 + $0x168] ss:$12 sps:$4 sm:$0xff]   ;;  %v3548_v13 = vld [vmem:[%s3748_s16 + $0x1b8] ss:$12 sps:$4 sm:$0xff]  }
  0x22   : > { %v3541_v15 = vld [vmem:[%s3748_s16 + $0x180] ss:$12 sps:$4 sm:$0xff]   ;;  %v3545_v18 = vld [vmem:[%s3748_s16 + $0x198] ss:$12 sps:$4 sm:$0xff]  }
  0x23   : > { %1292 = vmatpush1.bf16.msra.mxu1 %v3457_v14  ;;  %v3538_v14 = vld [vmem:[%s3748_s16 + $0x184] ss:$12 sps:$4 sm:$0xff]  }
  0x24   : > { %1293 = vmatprep.subr.bf16.mxu1 %v3663_v1  ;;  %3077 = vmatpush3.bf16.msra.mxu0 %v3472_v20  ;;  %v3546_v20 = vld [vmem:[%s3748_s16 + $0x1b4] ss:$12 sps:$4 sm:$0xff]  }
  0x27   : > { %1294 = vmatpush1.bf16.msra.mxu1 %v3459_v17  ;;  %3079 = vmatmul.mubr.bf16.vlgmr.msra.gmra.mrb[0].mxu0 %v3477_v21  ;;  %v3542_v17 = vld [vmem:[%s3748_s16 + $0x19c] ss:$12 sps:$4 sm:$0xff]  }
  0x28   : > { %1295 = vmatprep.subr.bf16.mxu1 %v3663_v1  ;;  %3082 = vmatprep.mubr.msk.bf16.mxu0 %vm3665_vm0, %v3664_v3  ;;  %v3549_v21 = vld [vmem:[%s3748_s16 + $0x1b0] ss:$12 sps:$4 sm:$0xff]  }
  0x2b   : > { %1296 = vmatpush1.bf16.msra.mxu1 %v3461_v19  ;;  %v3556_v19 = vld [vmem:[%s3748_s16 + $0x1e8] ss:$12 sps:$4 sm:$0xff]  }
  0x2c   : > { %1297 = vmatprep.subr.bf16.mxu1 %v3663_v1 }
  0x2f   : > { %1298 = vmatpush1.bf16.msra.mxu1 %v3463_v22  ;;  %3083 = vmatmul.mubr.bf16.gmra.mrb[4].mxu0 %v3480_v24  ;;  %v3560_v22 = vld [vmem:[%s3748_s16 + $0x200] ss:$12 sps:$4 sm:$0xff]   ;;  %v3553_v24 = vld [vmem:[%s3748_s16 + $0x1c8] ss:$12 sps:$4 sm:$0xff]  }
  0x30   : > { %1299 = vmatprep.subr.bf16.mxu1 %v3663_v1  ;;  %3086 = vmatprep.mubr.msk.bf16.mxu0 %vm3665_vm0, %v3664_v3 }
  0x33   : > { %1300 = vmatpush1.bf16.msra.mxu1 %v3465_v23  ;;  %v3550_v23 = vld [vmem:[%s3748_s16 + $0x1cc] ss:$12 sps:$4 sm:$0xff]  }
  0x34   : > { %1301 = vmatprep.subr.bf16.mxu1 %v3663_v1 }
  0x37   : > { %1302 = vmatpush1.bf16.msra.mxu1 %v3467_v25  ;;  %3087 = vmatmul.mubr.bf16.gmra.mrb[8].mxu0 %v3484_v27  ;;  %v3564_v25 = vld [vmem:[%s3748_s16 + $0x218] ss:$12 sps:$4 sm:$0xff]   ;;  %v3557_v27 = vld [vmem:[%s3748_s16 + $0x1e0] ss:$12 sps:$4 sm:$0xff]  }
  0x38   : > { %1303 = vmatprep.subr.bf16.mxu1 %v3663_v1  ;;  %3090 = vmatprep.mubr.msk.bf16.mxu0 %vm3665_vm0, %v3664_v3 }
  0x3b   : > { %1304 = vmatpush1.bf16.msra.mxu1 %v3469_v26  ;;  %v3554_v26 = vld [vmem:[%s3748_s16 + $0x1e4] ss:$12 sps:$4 sm:$0xff]  }
  0x3c   : > { %1305 = vmatprep.subr.bf16.mxu1 %v3663_v1 }
  0x3f   : > { %1306 = vmatpush1.bf16.msra.mxu1 %v3471_v28  ;;  %3091 = vmatmul.mubr.bf16.gmra.mrb[12].mxu0 %v3488_v31  ;;  %v3568_v28 = vld [vmem:[%s3748_s16 + $0x230] ss:$12 sps:$4 sm:$0xff]   ;;  %v3572_v31 = vld [vmem:[%s3748_s16 + $0x248] ss:$12 sps:$4 sm:$0xff]  }
  0x40   : > { %1307 = vmatprep.subr.bf16.mxu1 %v3663_v1  ;;  %3094 = vmatprep.mubr.msk.bf16.mxu0 %vm3665_vm0, %v3664_v3  ;;  %v3522_v1 = vld [vmem:[%s3748_s16 + $0x124] ss:$12 sps:$4 sm:$0xff]  }
  0x43   : > { %1308 = vmatpush1.bf16.msra.mxu1 %v3473_v29  ;;  %v3558_v29 = vld [vmem:[%s3748_s16 + $0x1fc] ss:$12 sps:$4 sm:$0xff]  }
  0x46   : > { %1310 = vmatmul.mubr.bf16.vlgmr.msra.gmra.mrb[0].mxu1 %v3474_v30  ;;  %v3561_v30 = vld [vmem:[%s3748_s16 + $0x1f8] ss:$12 sps:$4 sm:$0xff]  }
  0x47   : > { %1317 = vmatprep.mubr.bf16.mxu1 %v3478_v32  ;;  %3095 = vmatmul.mubr.bf16.gmra.mrb[16].mxu0 %v3492_v34  ;;  %v3562_v32 = vld [vmem:[%s3748_s16 + $0x214] ss:$12 sps:$4 sm:$0xff]  }
  0x48   : > { %3098 = vmatprep.mubr.msk.bf16.mxu0 %vm3665_vm0, %v3664_v3  ;;  %v3576_v34 = vld [vmem:[%s3748_s16 + $0x260] ss:$12 sps:$4 sm:$0xff]  }
  0x4e   : > { %1318 = vmatmul.mubr.bf16.gmra.mrb[4].mxu1 %v3481_v33  ;;  %v3565_v33 = vld [vmem:[%s3748_s16 + $0x210] ss:$12 sps:$4 sm:$0xff]  }
  0x4f   : > { %1325 = vmatprep.mubr.bf16.mxu1 %v3482_v35  ;;  %3099 = vmatmul.mubr.bf16.gmra.mrb[20].mxu0 %v3496_v37  ;;  %v3566_v35 = vld [vmem:[%s3748_s16 + $0x22c] ss:$12 sps:$4 sm:$0xff]  }
  0x50   : > { %3102 = vmatprep.mubr.msk.bf16.mxu0 %vm3665_vm0, %v3664_v3  ;;  %v3580_v37 = vld [vmem:[%s3748_s16 + $0x278] ss:$12 sps:$4 sm:$0xff]  }
  0x56   : > { %1326 = vmatmul.mubr.bf16.gmra.mrb[8].mxu1 %v3485_v36  ;;  %v3569_v36 = vld [vmem:[%s3748_s16 + $0x228] ss:$12 sps:$4 sm:$0xff]  }
  0x57   : > { %1333 = vmatprep.mubr.bf16.mxu1 %v3486_v38  ;;  %3103 = vmatmul.mubr.bf16.gmra.mrb[24].mxu0 %v3500_v40  ;;  %v3570_v38 = vld [vmem:[%s3748_s16 + $0x244] ss:$12 sps:$4 sm:$0xff]   ;;  %v3573_v40 = vld [vmem:[%s3748_s16 + $0x240] ss:$12 sps:$4 sm:$0xff]  }
  0x58   : > { %3106 = vmatprep.mubr.msk.bf16.mxu0 %vm3665_vm0, %v3664_v3 }
  0x5e   : > { %1334 = vmatmul.mubr.bf16.gmra.mrb[12].mxu1 %v3489_v39 }
  0x5f   : > { %1341 = vmatprep.mubr.bf16.mxu1 %v3490_v41  ;;  %3107 = vmatmul.mubr.bf16.gmra.mrb[28].mxu0 %v3504_v43  ;;  %v3574_v43 = vld [vmem:[%s3748_s16 + $0x25c] ss:$12 sps:$4 sm:$0xff]  }
  0x60   : > { %3110 = vmatprep.mubr.msk.bf16.mxu0 %vm3665_vm0, %v3664_v3 }
  0x66   : > { %1342 = vmatmul.mubr.bf16.gmra.mrb[16].mxu1 %v3493_v42  ;;  %v3584_v42 = vld [vmem:[%s3748_s16 + $0x290] ss:$12 sps:$4 sm:$0xff]  }
  0x67   : > { %1349 = vmatprep.mubr.bf16.mxu1 %v3494_v44  ;;  %3111 = vmatmul.mubr.bf16.gmra.mrb[32].mxu0 %v3508_v46 }
  0x68   : > { %3114 = vmatprep.mubr.msk.bf16.mxu0 %vm3665_vm0, %v3664_v3 }
  0x6e   : > { %1350 = vmatmul.mubr.bf16.gmra.mrb[20].mxu1 %v3497_v45 }
  0x6f   : > { %1357 = vmatprep.mubr.bf16.mxu1 %v3498_v47  ;;  %3115 = vmatmul.mubr.bf16.gmra.mrb[36].mxu0 %v3512_v49  ;;  %v3577_v47 = vld [vmem:[%s3748_s16 + $0x258] ss:$12 sps:$4 sm:$0xff]   ;;  %v3588_v49 = vld [vmem:[%s3748_s16 + $0x2a8] ss:$12 sps:$4 sm:$0xff]  }
  0x70   : > { %3118 = vmatprep.mubr.msk.bf16.mxu0 %vm3665_vm0, %v3664_v3 }
  0x76   : > { %1358 = vmatmul.mubr.bf16.gmra.mrb[24].mxu1 %v3501_v48 }
  0x77   : > { %1365 = vmatprep.mubr.bf16.mxu1 %v3502_v50  ;;  %3119 = vmatmul.mubr.bf16.gmra.mrb[40].mxu0 %v3516_v52  ;;  %v3578_v50 = vld [vmem:[%s3748_s16 + $0x274] ss:$12 sps:$4 sm:$0xff]  }
  0x78   : > { %3122 = vmatprep.mubr.msk.bf16.mxu0 %vm3665_vm0, %v3664_v3 }
  0x7e   : > { %1366 = vmatmul.mubr.bf16.gmra.mrb[28].mxu1 %v3505_v51 }
  0x7f   : > { %1373 = vmatprep.mubr.bf16.mxu1 %v3506_v53  ;;  %3123 = vmatmul.mubr.bf16.gmra.mrb[44].mxu0 %v3520_v55 }
  0x80   : > { %3126 = vmatprep.mubr.msk.bf16.mxu0 %vm3665_vm0, %v3664_v3 }
  0x86   : > { %1374 = vmatmul.mubr.bf16.gmra.mrb[32].mxu1 %v3509_v54  ;;  %v3581_v54 = vld [vmem:[%s3748_s16 + $0x270] ss:$12 sps:$4 sm:$0xff]  }
  0x87   : > { %1381 = vmatprep.mubr.bf16.mxu1 %v3510_v56  ;;  %3127 = vmatmul.mubr.bf16.gmra.mrb[48].mxu0 %v3524_v58  ;;  %v3592_v56 = vld [vmem:[%s3748_s16 + $0x2c0] ss:$12 sps:$4 sm:$0xff]  }
  0x88   : > { %3130 = vmatprep.mubr.msk.bf16.mxu0 %vm3665_vm0, %v3664_v3 }
  0x8e   : > { %1382 = vmatmul.mubr.bf16.gmra.mrb[36].mxu1 %v3513_v57  ;;  %v3582_v57 = vld [vmem:[%s3748_s16 + $0x28c] ss:$12 sps:$4 sm:$0xff]  }
  0x8f   : > { %1389 = vmatprep.mubr.bf16.mxu1 %v3514_v59  ;;  %3131 = vmatmul.mubr.bf16.gmra.mrb[52].mxu0 %v3528_v61 }
  0x90   : > { %3134 = vmatprep.mubr.msk.bf16.mxu0 %vm3665_vm0, %v3664_v3 }
  0x96   : > { %1390 = vmatmul.mubr.bf16.gmra.mrb[40].mxu1 %v3517_v60  ;;  %v3950_v60 = vld [vmem:[%s4488_s2] ss:$0 sm:$0xff] }
  0x97   : > { %1397 = vmatprep.mubr.bf16.mxu1 %v3518_v62  ;;  %3135 = vmatmul.mubr.bf16.gmra.mrb[56].mxu0 %v3532_v0 }
  0x98   : > { %3138 = vmatprep.mubr.msk.bf16.mxu0 %vm3665_vm0, %v3664_v3 }
  0x9e   : > { %1398 = vmatmul.mubr.bf16.gmra.mrb[44].mxu1 %v3521_v63 }
  0x9f   : > { %1405 = vmatprep.mubr.bf16.mxu1 %v3522_v1  ;;  %3139 = vmatmul.mubr.bf16.gmra.mrb[60].mxu0 %v3536_v4  ;;  %v3585_v1 = vld [vmem:[%s3748_s16 + $0x288] ss:$12 sps:$4 sm:$0xff]   ;;  %v3596_v4 = vld [vmem:[%s3748_s16 + $0x2d8] ss:$12 sps:$4 sm:$0xff]  }
  0xa0   : > { %3142 = vmatprep.mubr.msk.bf16.mxu0 %vm3665_vm0, %v3664_v3 }
  0xa6   : > { %1406 = vmatmul.mubr.bf16.gmra.mrb[48].mxu1 %v3525_v2 }
  0xa7   : > { %1413 = vmatprep.mubr.bf16.mxu1 %v3526_v5  ;;  %3143 = vmatmul.mubr.bf16.gmra.mrb[64].mxu0 %v3540_v7 }
  0xa8   : > { %3146 = vmatprep.mubr.msk.bf16.mxu0 %vm3665_vm0, %v3664_v3 }
  0xae   : > { %1414 = vmatmul.mubr.bf16.gmra.mrb[52].mxu1 %v3529_v6  ;;  %v3586_v6 = vld [vmem:[%s3748_s16 + $0x2a4] ss:$12 sps:$4 sm:$0xff]  }
  0xaf   : > { %1421 = vmatprep.mubr.bf16.mxu1 %v3530_v8  ;;  %3147 = vmatmul.mubr.bf16.gmra.mrb[68].mxu0 %v3544_v10 }
  0xb0   : > { %3150 = vmatprep.mubr.msk.bf16.mxu0 %vm3665_vm0, %v3664_v3 }
  0xb6   : > { %1422 = vmatmul.mubr.bf16.gmra.mrb[56].mxu1 %v3533_v9 }
  0xb7   : > { %1429 = vmatprep.mubr.bf16.mxu1 %v3534_v11  ;;  %3151 = vmatmul.mubr.bf16.gmra.mrb[72].mxu0 %v3548_v13 }
  0xb8   : > { %3154 = vmatprep.mubr.msk.bf16.mxu0 %vm3665_vm0, %v3664_v3 }
  0xbe   : > { %1430 = vmatmul.mubr.bf16.gmra.mrb[60].mxu1 %v3537_v12 }
  0xbf   : > { %1437 = vmatprep.mubr.bf16.mxu1 %v3538_v14  ;;  %3155 = vmatmul.mubr.bf16.gmra.mrb[76].mxu0 %v3552_v16 }
  0xc0   : > { %3158 = vmatprep.mubr.msk.bf16.mxu0 %vm3665_vm0, %v3664_v3 }
  0xc6   : > { %1438 = vmatmul.mubr.bf16.gmra.mrb[64].mxu1 %v3541_v15 }
  0xc7   : > { %1445 = vmatprep.mubr.bf16.mxu1 %v3542_v17  ;;  %3159 = vmatmul.mubr.bf16.gmra.mrb[80].mxu0 %v3556_v19 }
  0xc8   : > { %3162 = vmatprep.mubr.msk.bf16.mxu0 %vm3665_vm0, %v3664_v3 }
  0xce   : > { %1446 = vmatmul.mubr.bf16.gmra.mrb[68].mxu1 %v3545_v18 }
  0xcf   : > { %1453 = vmatprep.mubr.bf16.mxu1 %v3546_v20  ;;  %3163 = vmatmul.mubr.bf16.gmra.mrb[84].mxu0 %v3560_v22 }
  0xd0   : > { %3166 = vmatprep.mubr.msk.bf16.mxu0 %vm3665_vm0, %v3664_v3 }
  0xd6   : > { %1454 = vmatmul.mubr.bf16.gmra.mrb[72].mxu1 %v3549_v21  ;;  %v3589_v21 = vld [vmem:[%s3748_s16 + $0x2a0] ss:$12 sps:$4 sm:$0xff]  }
  0xd7   : > { %1461 = vmatprep.mubr.bf16.mxu1 %v3550_v23  ;;  %3167 = vmatmul.mubr.bf16.gmra.mrb[88].mxu0 %v3564_v25  ;;  %v3600_v23 = vld [vmem:[%s3748_s16 + $0x2f0] ss:$12 sps:$4 sm:$0xff]  }
  0xd8   : > { %3170 = vmatprep.mubr.msk.bf16.mxu0 %vm3665_vm0, %v3664_v3  ;;  %v3590_v25 = vld [vmem:[%s3748_s16 + $0x2bc] ss:$12 sps:$4 sm:$0xff]  }
  0xde   : > { %1462 = vmatmul.mubr.bf16.gmra.mrb[76].mxu1 %v3553_v24 }
  0xdf   : > { %1469 = vmatprep.mubr.bf16.mxu1 %v3554_v26  ;;  %3171 = vmatmul.mubr.bf16.gmra.mrb[92].mxu0 %v3568_v28 }
  0xe0   : > { %3174 = vmatprep.mubr.msk.bf16.mxu0 %vm3665_vm0, %v3664_v3 }
  0xe6   : > { %1470 = vmatmul.mubr.bf16.gmra.mrb[80].mxu1 %v3557_v27 }
  0xe7   : > { %1477 = vmatprep.mubr.bf16.mxu1 %v3558_v29  ;;  %3175 = vmatmul.mubr.bf16.gmra.mrb[96].mxu0 %v3572_v31 }
  0xe8   : > { %3178 = vmatprep.mubr.msk.bf16.mxu0 %vm3665_vm0, %v3664_v3 }
  0xee   : > { %1478 = vmatmul.mubr.bf16.gmra.mrb[84].mxu1 %v3561_v30 }
  0xef   : > { %1485 = vmatprep.mubr.bf16.mxu1 %v3562_v32  ;;  %3179 = vmatmul.mubr.bf16.gmra.mrb[100].mxu0 %v3576_v34 }
  0xf0   : > { %3182 = vmatprep.mubr.msk.bf16.mxu0 %vm3665_vm0, %v3664_v3 }
  0xf6   : > { %1486 = vmatmul.mubr.bf16.gmra.mrb[88].mxu1 %v3565_v33 }
  0xf7   : > { %1493 = vmatprep.mubr.bf16.mxu1 %v3566_v35  ;;  %3183 = vmatmul.mubr.bf16.gmra.mrb[104].mxu0 %v3580_v37 }
  0xf8   : > { %3186 = vmatprep.mubr.msk.bf16.mxu0 %vm3665_vm0, %v3664_v3 }
  0xfa   : > { %v1704_v39 = vpop.f32.mrb[0].mxu0 }
  0xfb   : > { %v3080_v41 = vpop.f32.mrb[1].mxu0 }
  0xfc   : > { %v1707_v44 = vpop.f32.mrb[2].mxu0 }
  0xfd   : > { %v3081_v45 = vpop.f32.mrb[3].mxu0 }
  0xfe   : > { %1494 = vmatmul.mubr.bf16.gmra.mrb[92].mxu1 %v3569_v36 }
  0xff   : > { %1501 = vmatprep.mubr.bf16.mxu1 %v3570_v38  ;;  %3187 = vmatmul.mubr.bf16.gmra.mrb[108].mxu0 %v3584_v42  ;;  %v3604_v42 = vld [vmem:[%s3748_s16 + $0x308] ss:$12 sps:$4 sm:$0xff]  }
 0x100   : > { %3190 = vmatprep.mubr.msk.bf16.mxu0 %vm3665_vm0, %v3664_v3 }
 0x102   : > { %v1712_v46 = vpop.f32.mrb[4].mxu0 }
 0x103   : > { %v3084_v48 = vpop.f32.mrb[5].mxu0 }
 0x104   : > { %v1715_v51 = vpop.f32.mrb[6].mxu0 }
 0x105   : > { %v3085_v52 = vpop.f32.mrb[7].mxu0 }
 0x106   : > { %1502 = vmatmul.mubr.bf16.gmra.mrb[96].mxu1 %v3573_v40  ;;  %v3593_v40 = vld [vmem:[%s3748_s16 + $0x2b8] ss:$12 sps:$4 sm:$0xff]  }
 0x107   : > { %1509 = vmatprep.mubr.bf16.mxu1 %v3574_v43  ;;  %3191 = vmatmul.mubr.bf16.gmra.mrb[112].mxu0 %v3588_v49 }
 0x108   : > { %3194 = vmatprep.mubr.msk.bf16.mxu0 %vm3665_vm0, %v3664_v3 }
 0x10a   : > { %v3940_v53 = vpop.f32.mrb[8].mxu0 }
 0x10b   : > { %v3088_v55 = vpop.f32.mrb[9].mxu0 }
 0x10c   : > { %v3945_v58 = vpop.f32.mrb[10].mxu0 }
 0x10d   : > { %v3089_v59 = vpop.f32.mrb[11].mxu0 }
 0x10e   : > { %1510 = vmatmul.mubr.bf16.gmra.mrb[100].mxu1 %v3577_v47 }
 0x10f   : > { %1517 = vmatprep.mubr.bf16.mxu1 %v3578_v50  ;;  %3195 = vmatmul.mubr.bf16.gmra.mrb[116].mxu0 %v3592_v56 }
 0x110   : > { %3198 = vmatprep.mubr.msk.bf16.mxu0 %vm3665_vm0, %v3664_v3 }
 0x112   : > { %v3954_v62 = vpop.f32.mrb[12].mxu0 }
 0x113   : > { %v3092_v2 = vpop.f32.mrb[13].mxu0 }
 0x114   : > { %v3960_v7 = vpop.f32.mrb[14].mxu0 }
 0x115   : > { %v3093_v11 = vpop.f32.mrb[15].mxu0 }
 0x116   : > { %1518 = vmatmul.mubr.bf16.gmra.mrb[104].mxu1 %v3581_v54 }
 0x117   : > { %1525 = vmatprep.mubr.bf16.mxu1 %v3582_v57  ;;  %3199 = vmatmul.mubr.bf16.gmra.mrb[120].mxu0 %v3596_v4 }
 0x118   : > { %3202 = vmatprep.mubr.msk.bf16.mxu0 %vm3665_vm0, %v3664_v3 }
 0x119   : > { %v1311_v61 = vpop.f32.mrb[0].mxu1 }
 0x11a   : > { %v1312_v63 = vadd.f32 %v3950_v60, %v1311_v61  ;;  %v1313_v0 = vpop.f32.mrb[1].mxu1  ;;  %v3971_v17 = vpop.f32.mrb[16].mxu0 }
 0x11b   : > { %v1314_v5 = vpop.f32.mrb[2].mxu1  ;;  %v3096_v22 = vpop.f32.mrb[17].mxu0 }
 0x11c   : > { %v1705_v8 = vadd.f32 %v1704_v39, %v1312_v63  ;;  %v1315_v9 = vadd.f32 %v3950_v60, %v1314_v5  ;;  %v1316_v10 = vpop.f32.mrb[3].mxu1  ;;  %v3979_v26 = vpop.f32.mrb[18].mxu0  ;;  %v3608_v63 = vld [vmem:[%s3748_s16 + $0x320] ss:$12 sps:$4 sm:$0xff]  }
 0x11d   : > { %v3097_v30 = vpop.f32.mrb[19].mxu0 }
 0x11e   : > { %v2063_v12 = vmax.f32 %v1705_v8, 0.0  ;;  %v1708_v13 = vadd.f32 %v1707_v44, %v1315_v9  ;;  %1526 = vmatmul.mubr.bf16.gmra.mrb[108].mxu1 %v3585_v1  ;;  %v3594_v44 = vld [vmem:[%s3748_s16 + $0x2d4] ss:$12 sps:$4 sm:$0xff]   ;;  %v3598_v1 = vld [vmem:[%s3748_s16 + $0x2ec] ss:$12 sps:$4 sm:$0xff]  }
 0x11f   : > { %1533 = vmatprep.mubr.bf16.mxu1 %v3586_v6  ;;  %3203 = vmatmul.mubr.bf16.gmra.mrb[124].mxu0 %v3600_v23 }
 0x120   : > { %v2919_v14 = vpack.c.bf16 %v2063_v12, %v2063_v12  ;;  %v2064_v15 = vmax.f32 %v1708_v13, 0.0  ;;  %3206 = vmatprep.mubr.msk.bf16.mxu0 %vm3665_vm0, %v3664_v3 }
 0x121   : > { %v1319_v16 = vpop.f32.mrb[4].mxu1 }
 0x122   : > { %2514 = vst.msk [vmem:[%s3967_s23] sm:$0xf] %vm2513_vm1, %v2919_v14  ;;  %v2920_v18 = vpack.c.bf16 %v2064_v15, %v2064_v15  ;;  %v1320_v19 = vadd.f32 %v3950_v60, %v1319_v16  ;;  %v1321_v20 = vpop.f32.mrb[5].mxu1  ;;  %v3986_v36 = vpop.f32.mrb[20].mxu0 }
 0x123   : > { %v1322_v24 = vpop.f32.mrb[6].mxu1  ;;  %v3100_v41 = vpop.f32.mrb[21].mxu0 }
 0x124   : > { %2515 = vst.msk [vmem:[%s3967_s23 + $0x4] sm:$0xf] %vm2513_vm1, %v2920_v18  ;;  %v1713_v27 = vadd.f32 %v1712_v46, %v1320_v19  ;;  %v1323_v28 = vadd.f32 %v3950_v60, %v1322_v24  ;;  %v1324_v29 = vpop.f32.mrb[7].mxu1  ;;  %v3994_v45 = vpop.f32.mrb[22].mxu0  ;;  %v3612_v19 = vld [vmem:[%s3748_s16 + $0x338] ss:$12 sps:$4 sm:$0xff]  }
 0x125   : > { %v3101_v49 = vpop.f32.mrb[23].mxu0 }
 0x126   : > { %v2065_v31 = vmax.f32 %v1713_v27, 0.0  ;;  %v1716_v32 = vadd.f32 %v1715_v51, %v1323_v28  ;;  %1534 = vmatmul.mubr.bf16.gmra.mrb[112].mxu1 %v3589_v21  ;;  %v3602_v21 = vld [vmem:[%s3748_s16 + $0x304] ss:$12 sps:$4 sm:$0xff]  }
 0x127   : > { %1541 = vmatprep.mubr.bf16.mxu1 %v3590_v25  ;;  %3207 = vmatmul.mubr.bf16.gmra.mrb[128].mxu0 %v3604_v42 }
 0x128   : > { %v2921_v33 = vpack.c.bf16 %v2065_v31, %v2065_v31  ;;  %v2066_v34 = vmax.f32 %v1716_v32, 0.0  ;;  %3210 = vmatprep.mubr.msk.bf16.mxu0 %vm3665_vm0, %v3664_v3 }
 0x129   : > { %v1327_v35 = vpop.f32.mrb[8].mxu1 }
 0x12a   : > { %2516 = vst.msk [vmem:[%s3967_s23 + $0x8] sm:$0xf] %vm2513_vm1, %v2921_v33  ;;  %v2922_v37 = vpack.c.bf16 %v2066_v34, %v2066_v34  ;;  %v1328_v38 = vadd.f32 %v3950_v60, %v1327_v35  ;;  %v1329_v39 = vpop.f32.mrb[9].mxu1  ;;  %v4003_v55 = vpop.f32.mrb[24].mxu0 }
 0x12b   : > { %v1330_v43 = vpop.f32.mrb[10].mxu1  ;;  %v3104_v61 = vpop.f32.mrb[25].mxu0 }
 0x12c   : > { %2517 = vst.msk [vmem:[%s3967_s23 + $0xc] sm:$0xf] %vm2513_vm1, %v2922_v37  ;;  %v1721_v46 = vadd.f32 %v3940_v53, %v1328_v38  ;;  %v1331_v47 = vadd.f32 %v3950_v60, %v1330_v43  ;;  %v1332_v48 = vpop.f32.mrb[11].mxu1  ;;  %v4011_v2 = vpop.f32.mrb[26].mxu0  ;;  %v3616_v38 = vld [vmem:[%s3748_s16 + $0x350] ss:$12 sps:$4 sm:$0xff]  }
 0x12d   : > { %v3105_v8 = vpop.f32.mrb[27].mxu0 }
 0x12e   : > { %v2067_v50 = vmax.f32 %v1721_v46, 0.0  ;;  %v1724_v51 = vadd.f32 %v3945_v58, %v1331_v47  ;;  %1542 = vmatmul.mubr.bf16.gmra.mrb[116].mxu1 %v3593_v40  ;;  %v3597_v58 = vld [vmem:[%s3748_s16 + $0x2d0] ss:$12 sps:$4 sm:$0xff]  }
 0x12f   : > { %1549 = vmatprep.mubr.bf16.mxu1 %v3594_v44  ;;  %3211 = vmatmul.mubr.bf16.gmra.mrb[132].mxu0 %v3608_v63  ;;  %v3606_v40 = vld [vmem:[%s3748_s16 + $0x31c] ss:$12 sps:$4 sm:$0xff]  }
 0x130   : > { %v2923_v52 = vpack.c.bf16 %v2067_v50, %v2067_v50  ;;  %v2068_v54 = vmax.f32 %v1724_v51, 0.0  ;;  %3214 = vmatprep.mubr.msk.bf16.mxu0 %vm3665_vm0, %v3664_v3 }
 0x131   : > { %v1335_v53 = vpop.f32.mrb[12].mxu1 }
 0x132   : > { %2518 = vst.msk [vmem:[%s3967_s23 + $0x10] sm:$0xf] %vm2513_vm1, %v2923_v52  ;;  %v2924_v56 = vpack.c.bf16 %v2068_v54, %v2068_v54  ;;  %v1336_v57 = vadd.f32 %v3950_v60, %v1335_v53  ;;  %v1337_v59 = vpop.f32.mrb[13].mxu1  ;;  %v4020_v13 = vpop.f32.mrb[28].mxu0 }
 0x133   : > { %v1338_v0 = vpop.f32.mrb[14].mxu1  ;;  %v3108_v18 = vpop.f32.mrb[29].mxu0 }
 0x134   : > { %2519 = vst.msk [vmem:[%s3967_s23 + $0x14] sm:$0xf] %vm2513_vm1, %v2924_v56  ;;  %v1729_v4 = vadd.f32 %v3954_v62, %v1336_v57  ;;  %v1339_v5 = vadd.f32 %v3950_v60, %v1338_v0  ;;  %v1340_v6 = vpop.f32.mrb[15].mxu1  ;;  %v4028_v22 = vpop.f32.mrb[30].mxu0  ;;  %v3620_v57 = vld [vmem:[%s3748_s16 + $0x368] ss:$12 sps:$4 sm:$0xff]  }
 0x135   : > { %v3109_v27 = vpop.f32.mrb[31].mxu0 }
 0x136   : > { %v2069_v9 = vmax.f32 %v1729_v4, 0.0  ;;  %v1732_v10 = vadd.f32 %v3960_v7, %v1339_v5  ;;  %1550 = vmatmul.mubr.bf16.gmra.mrb[120].mxu1 %v3597_v58  ;;  %v3601_v7 = vld [vmem:[%s3748_s16 + $0x2e8] ss:$12 sps:$4 sm:$0xff]  }
 0x137   : > { %1557 = vmatprep.mubr.bf16.mxu1 %v3598_v1  ;;  %3215 = vmatmul.mubr.bf16.gmra.mrb[136].mxu0 %v3612_v19  ;;  %v3610_v58 = vld [vmem:[%s3748_s16 + $0x334] ss:$12 sps:$4 sm:$0xff]  }
 0x138   : > { %v2925_v11 = vpack.c.bf16 %v2069_v9, %v2069_v9  ;;  %v2070_v12 = vmax.f32 %v1732_v10, 0.0  ;;  %3218 = vmatprep.mubr.msk.bf16.mxu0 %vm3665_vm0, %v3664_v3 }
 0x139   : > { %v1343_v62 = vpop.f32.mrb[16].mxu1 }
 0x13a   : > { %2520 = vst.msk [vmem:[%s3967_s23 + $0x18] sm:$0xf] %vm2513_vm1, %v2925_v11  ;;  %v2926_v14 = vpack.c.bf16 %v2070_v12, %v2070_v12  ;;  %v1344_v15 = vadd.f32 %v3950_v60, %v1343_v62  ;;  %v1345_v16 = vpop.f32.mrb[17].mxu1  ;;  %v4037_v32 = vpop.f32.mrb[32].mxu0 }
 0x13b   : > { %v1346_v20 = vpop.f32.mrb[18].mxu1  ;;  %v3112_v37 = vpop.f32.mrb[33].mxu0 }
 0x13c   : > { %2521 = vst.msk [vmem:[%s3967_s23 + $0x1c] sm:$0xf] %vm2513_vm1, %v2926_v14  ;;  %v1737_v23 = vadd.f32 %v3971_v17, %v1344_v15  ;;  %v1347_v24 = vadd.f32 %v3950_v60, %v1346_v20  ;;  %v1348_v25 = vpop.f32.mrb[19].mxu1  ;;  %v4045_v41 = vpop.f32.mrb[34].mxu0  ;;  %v3624_v15 = vld [vmem:[%s3748_s16 + $0x380] ss:$12 sps:$4 sm:$0xff]  }
 0x13d   : > { %v3113_v46 = vpop.f32.mrb[35].mxu0 }
 0x13e   : > { %v2071_v28 = vmax.f32 %v1737_v23, 0.0  ;;  %v1740_v29 = vadd.f32 %v3979_v26, %v1347_v24  ;;  %1558 = vmatmul.mubr.bf16.gmra.mrb[124].mxu1 %v3601_v7  ;;  %v3605_v26 = vld [vmem:[%s3748_s16 + $0x300] ss:$12 sps:$4 sm:$0xff]  }
 0x13f   : > { %1565 = vmatprep.mubr.bf16.mxu1 %v3602_v21  ;;  %3219 = vmatmul.mubr.bf16.gmra.mrb[140].mxu0 %v3616_v38  ;;  %v3614_v7 = vld [vmem:[%s3748_s16 + $0x34c] ss:$12 sps:$4 sm:$0xff]  }
 0x140   : > { %v2927_v30 = vpack.c.bf16 %v2071_v28, %v2071_v28  ;;  %v2072_v31 = vmax.f32 %v1740_v29, 0.0  ;;  %3222 = vmatprep.mubr.msk.bf16.mxu0 %vm3665_vm0, %v3664_v3 }
 0x141   : > { %v1351_v17 = vpop.f32.mrb[20].mxu1 }
 0x142   : > { %2522 = vst.msk [vmem:[%s3967_s23 + $0x20] sm:$0xf] %vm2513_vm1, %v2927_v30  ;;  %v2928_v33 = vpack.c.bf16 %v2072_v31, %v2072_v31  ;;  %v1352_v34 = vadd.f32 %v3950_v60, %v1351_v17  ;;  %v1353_v35 = vpop.f32.mrb[21].mxu1  ;;  %v4054_v51 = vpop.f32.mrb[36].mxu0 }
 0x143   : > { %v1354_v39 = vpop.f32.mrb[22].mxu1  ;;  %v3116_v56 = vpop.f32.mrb[37].mxu0 }
 0x144   : > { %2523 = vst.msk [vmem:[%s3967_s23 + $0x24] sm:$0xf] %vm2513_vm1, %v2928_v33  ;;  %v1745_v42 = vadd.f32 %v3986_v36, %v1352_v34  ;;  %v1355_v43 = vadd.f32 %v3950_v60, %v1354_v39  ;;  %v1356_v44 = vpop.f32.mrb[23].mxu1  ;;  %v4062_v61 = vpop.f32.mrb[38].mxu0  ;;  %v3628_v34 = vld [vmem:[%s3748_s16 + $0x398] ss:$12 sps:$4 sm:$0xff]  }
 0x145   : > { %v3117_v4 = vpop.f32.mrb[39].mxu0 }
 0x146   : > { %v2073_v47 = vmax.f32 %v1745_v42, 0.0  ;;  %v1748_v48 = vadd.f32 %v3994_v45, %v1355_v43  ;;  %1566 = vmatmul.mubr.bf16.gmra.mrb[128].mxu1 %v3605_v26  ;;  %v3609_v45 = vld [vmem:[%s3748_s16 + $0x318] ss:$12 sps:$4 sm:$0xff]  }
 0x147   : > { %1573 = vmatprep.mubr.bf16.mxu1 %v3606_v40  ;;  %3223 = vmatmul.mubr.bf16.gmra.mrb[144].mxu0 %v3620_v57  ;;  %v3618_v26 = vld [vmem:[%s3748_s16 + $0x364] ss:$12 sps:$4 sm:$0xff]  }
 0x148   : > { %v2929_v49 = vpack.c.bf16 %v2073_v47, %v2073_v47  ;;  %v2074_v50 = vmax.f32 %v1748_v48, 0.0  ;;  %3226 = vmatprep.mubr.msk.bf16.mxu0 %vm3665_vm0, %v3664_v3 }
 0x149   : > { %v1359_v36 = vpop.f32.mrb[24].mxu1 }
 0x14a   : > { %2524 = vst.msk [vmem:[%s3967_s23 + $0x28] sm:$0xf] %vm2513_vm1, %v2929_v49  ;;  %v2930_v52 = vpack.c.bf16 %v2074_v50, %v2074_v50  ;;  %v1360_v54 = vadd.f32 %v3950_v60, %v1359_v36  ;;  %v1361_v53 = vpop.f32.mrb[25].mxu1  ;;  %v4071_v10 = vpop.f32.mrb[40].mxu0 }
 0x14b   : > { %v1362_v59 = vpop.f32.mrb[26].mxu1  ;;  %v3120_v14 = vpop.f32.mrb[41].mxu0 }
 0x14c   : > { %2525 = vst.msk [vmem:[%s3967_s23 + $0x2c] sm:$0xf] %vm2513_vm1, %v2930_v52  ;;  %v1753_v63 = vadd.f32 %v4003_v55, %v1360_v54  ;;  %v1363_v0 = vadd.f32 %v3950_v60, %v1362_v59  ;;  %v1364_v1 = vpop.f32.mrb[27].mxu1  ;;  %v4079_v18 = vpop.f32.mrb[42].mxu0  ;;  %v3632_v54 = vld [vmem:[%s3748_s16 + $0x3b0] ss:$12 sps:$4 sm:$0xff]  }
 0x14d   : > { %v3121_v23 = vpop.f32.mrb[43].mxu0 }
 0x14e   : > { %v2075_v5 = vmax.f32 %v1753_v63, 0.0  ;;  %v1756_v6 = vadd.f32 %v4011_v2, %v1363_v0  ;;  %1574 = vmatmul.mubr.bf16.gmra.mrb[132].mxu1 %v3609_v45  ;;  %v3613_v2 = vld [vmem:[%s3748_s16 + $0x330] ss:$12 sps:$4 sm:$0xff]  }
 0x14f   : > { %1581 = vmatprep.mubr.bf16.mxu1 %v3610_v58  ;;  %3227 = vmatmul.mubr.bf16.gmra.mrb[148].mxu0 %v3624_v15  ;;  %v3622_v45 = vld [vmem:[%s3748_s16 + $0x37c] ss:$12 sps:$4 sm:$0xff]  }
 0x150   : > { %v2931_v8 = vpack.c.bf16 %v2075_v5, %v2075_v5  ;;  %v2076_v9 = vmax.f32 %v1756_v6, 0.0  ;;  %3230 = vmatprep.mubr.msk.bf16.mxu0 %vm3665_vm0, %v3664_v3 }
 0x151   : > { %v1367_v55 = vpop.f32.mrb[28].mxu1 }
 0x152   : > { %2526 = vst.msk [vmem:[%s3967_s23 + $0x30] sm:$0xf] %vm2513_vm1, %v2931_v8  ;;  %v2932_v11 = vpack.c.bf16 %v2076_v9, %v2076_v9  ;;  %v1368_v12 = vadd.f32 %v3950_v60, %v1367_v55  ;;  %v1369_v62 = vpop.f32.mrb[29].mxu1  ;;  %v4088_v29 = vpop.f32.mrb[44].mxu0 }
 0x153   : > { %v1370_v16 = vpop.f32.mrb[30].mxu1  ;;  %v3124_v33 = vpop.f32.mrb[45].mxu0 }
 0x154   : > { %2527 = vst.msk [vmem:[%s3967_s23 + $0x34] sm:$0xf] %vm2513_vm1, %v2932_v11  ;;  %v1761_v19 = vadd.f32 %v4020_v13, %v1368_v12  ;;  %v1371_v20 = vadd.f32 %v3950_v60, %v1370_v16  ;;  %v1372_v21 = vpop.f32.mrb[31].mxu1  ;;  %v4096_v37 = vpop.f32.mrb[46].mxu0  ;;  %v3636_v12 = vld [vmem:[%s3748_s16 + $0x3c8] ss:$12 sps:$4 sm:$0xff]  }
 0x155   : > { %v3125_v42 = vpop.f32.mrb[47].mxu0 }
 0x156   : > { %v2077_v24 = vmax.f32 %v1761_v19, 0.0  ;;  %v1764_v25 = vadd.f32 %v4028_v22, %v1371_v20  ;;  %1582 = vmatmul.mubr.bf16.gmra.mrb[136].mxu1 %v3613_v2  ;;  %v3617_v22 = vld [vmem:[%s3748_s16 + $0x348] ss:$12 sps:$4 sm:$0xff]  }
 0x157   : > { %1589 = vmatprep.mubr.bf16.mxu1 %v3614_v7  ;;  %3231 = vmatmul.mubr.bf16.gmra.mrb[152].mxu0 %v3628_v34  ;;  %v3626_v2 = vld [vmem:[%s3748_s16 + $0x394] ss:$12 sps:$4 sm:$0xff]  }
 0x158   : > { %v2933_v27 = vpack.c.bf16 %v2077_v24, %v2077_v24  ;;  %v2078_v28 = vmax.f32 %v1764_v25, 0.0  ;;  %3234 = vmatprep.mubr.msk.bf16.mxu0 %vm3665_vm0, %v3664_v3 }
 0x159   : > { %v1375_v13 = vpop.f32.mrb[32].mxu1 }
 0x15a   : > { %2528 = vst.msk [vmem:[%s3967_s23 + $0x38] sm:$0xf] %vm2513_vm1, %v2933_v27  ;;  %v2934_v30 = vpack.c.bf16 %v2078_v28, %v2078_v28  ;;  %v1376_v31 = vadd.f32 %v3950_v60, %v1375_v13  ;;  %v1377_v17 = vpop.f32.mrb[33].mxu1  ;;  %v4105_v48 = vpop.f32.mrb[48].mxu0 }
 0x15b   : > { %v1378_v35 = vpop.f32.mrb[34].mxu1  ;;  %v3128_v52 = vpop.f32.mrb[49].mxu0 }
 0x15c   : > { %2529 = vst.msk [vmem:[%s3967_s23 + $0x3c] sm:$0xf] %vm2513_vm1, %v2934_v30  ;;  %v1769_v38 = vadd.f32 %v4037_v32, %v1376_v31  ;;  %v1379_v39 = vadd.f32 %v3950_v60, %v1378_v35  ;;  %v1380_v40 = vpop.f32.mrb[35].mxu1  ;;  %v4113_v56 = vpop.f32.mrb[50].mxu0  ;;  %v3640_v31 = vld [vmem:[%s3748_s16 + $0x3e0] ss:$12 sps:$4 sm:$0xff]  }
 0x15d   : > { %v3129_v63 = vpop.f32.mrb[51].mxu0 }
 0x15e   : > { %v2079_v43 = vmax.f32 %v1769_v38, 0.0  ;;  %v1772_v44 = vadd.f32 %v4045_v41, %v1379_v39  ;;  %1590 = vmatmul.mubr.bf16.gmra.mrb[140].mxu1 %v3617_v22  ;;  %v3621_v41 = vld [vmem:[%s3748_s16 + $0x360] ss:$12 sps:$4 sm:$0xff]  }
 0x15f   : > { %1597 = vmatprep.mubr.bf16.mxu1 %v3618_v26  ;;  %3235 = vmatmul.mubr.bf16.gmra.mrb[156].mxu0 %v3632_v54  ;;  %v3630_v22 = vld [vmem:[%s3748_s16 + $0x3ac] ss:$12 sps:$4 sm:$0xff]  }
 0x160   : > { %v2935_v46 = vpack.c.bf16 %v2079_v43, %v2079_v43  ;;  %v2080_v47 = vmax.f32 %v1772_v44, 0.0  ;;  %3238 = vmatprep.mubr.msk.bf16.mxu0 %vm3665_vm0, %v3664_v3 }
 0x161   : > { %v1383_v32 = vpop.f32.mrb[36].mxu1 }
 0x162   : > { %2530 = vst.msk [vmem:[%s3967_s23 + $0x40] sm:$0xf] %vm2513_vm1, %v2935_v46  ;;  %v2936_v49 = vpack.c.bf16 %v2080_v47, %v2080_v47  ;;  %v1384_v50 = vadd.f32 %v3950_v60, %v1383_v32  ;;  %v1385_v36 = vpop.f32.mrb[37].mxu1  ;;  %v4122_v6 = vpop.f32.mrb[52].mxu0 }
 0x163   : > { %v1386_v53 = vpop.f32.mrb[38].mxu1  ;;  %v3132_v11 = vpop.f32.mrb[53].mxu0 }
 0x164   : > { %2531 = vst.msk [vmem:[%s3967_s23 + $0x44] sm:$0xf] %vm2513_vm1, %v2936_v49  ;;  %v1777_v57 = vadd.f32 %v4054_v51, %v1384_v50  ;;  %v1387_v59 = vadd.f32 %v3950_v60, %v1386_v53  ;;  %v1388_v58 = vpop.f32.mrb[39].mxu1  ;;  %v4130_v14 = vpop.f32.mrb[54].mxu0  ;;  %v3644_v50 = vld [vmem:[%s3748_s16 + $0x3f8] ss:$12 sps:$4 sm:$0xff]  }
 0x165   : > { %v3133_v19 = vpop.f32.mrb[55].mxu0 }
 0x166   : > { %v2081_v0 = vmax.f32 %v1777_v57, 0.0  ;;  %v1780_v1 = vadd.f32 %v4062_v61, %v1387_v59  ;;  %1598 = vmatmul.mubr.bf16.gmra.mrb[144].mxu1 %v3621_v41  ;;  %v3625_v61 = vld [vmem:[%s3748_s16 + $0x378] ss:$12 sps:$4 sm:$0xff]  }
 0x167   : > { %1605 = vmatprep.mubr.bf16.mxu1 %v3622_v45  ;;  %3239 = vmatmul.mubr.bf16.gmra.mrb[160].mxu0 %v3636_v12  ;;  %v3634_v41 = vld [vmem:[%s3748_s16 + $0x3c4] ss:$12 sps:$4 sm:$0xff]  }
 0x168   : > { %v2937_v4 = vpack.c.bf16 %v2081_v0, %v2081_v0  ;;  %v2082_v5 = vmax.f32 %v1780_v1, 0.0  ;;  %3242 = vmatprep.mubr.msk.bf16.mxu0 %vm3665_vm0, %v3664_v3 }
 0x169   : > { %v1391_v51 = vpop.f32.mrb[40].mxu1 }
 0x16a   : > { %2532 = vst.msk [vmem:[%s3967_s23 + $0x48] sm:$0xf] %vm2513_vm1, %v2937_v4  ;;  %v2938_v8 = vpack.c.bf16 %v2082_v5, %v2082_v5  ;;  %v1392_v9 = vadd.f32 %v3950_v60, %v1391_v51  ;;  %v1393_v55 = vpop.f32.mrb[41].mxu1  ;;  %v4139_v25 = vpop.f32.mrb[56].mxu0 }
 0x16b   : > { %v1394_v62 = vpop.f32.mrb[42].mxu1  ;;  %v3136_v30 = vpop.f32.mrb[57].mxu0 }
 0x16c   : > { %2533 = vst.msk [vmem:[%s3967_s23 + $0x4c] sm:$0xf] %vm2513_vm1, %v2938_v8  ;;  %v1785_v15 = vadd.f32 %v4071_v10, %v1392_v9  ;;  %v1395_v16 = vadd.f32 %v3950_v60, %v1394_v62  ;;  %v1396_v7 = vpop.f32.mrb[43].mxu1  ;;  %v4147_v33 = vpop.f32.mrb[58].mxu0  ;;  %v3648_v9 = vld [vmem:[%s3748_s16 + $0x410] ss:$12 sps:$4 sm:$0xff]  }
 0x16d   : > { %v3137_v38 = vpop.f32.mrb[59].mxu0 }
 0x16e   : > { %v2083_v20 = vmax.f32 %v1785_v15, 0.0  ;;  %v1788_v21 = vadd.f32 %v4079_v18, %v1395_v16  ;;  %1606 = vmatmul.mubr.bf16.gmra.mrb[148].mxu1 %v3625_v61  ;;  %v3629_v18 = vld [vmem:[%s3748_s16 + $0x390] ss:$12 sps:$4 sm:$0xff]  }
 0x16f   : > { %1613 = vmatprep.mubr.bf16.mxu1 %v3626_v2  ;;  %3243 = vmatmul.mubr.bf16.gmra.mrb[164].mxu0 %v3640_v31  ;;  %v3638_v61 = vld [vmem:[%s3748_s16 + $0x3dc] ss:$12 sps:$4 sm:$0xff]  }
 0x170   : > { %v2939_v23 = vpack.c.bf16 %v2083_v20, %v2083_v20  ;;  %v2084_v24 = vmax.f32 %v1788_v21, 0.0  ;;  %3246 = vmatprep.mubr.msk.bf16.mxu0 %vm3665_vm0, %v3664_v3 }
 0x171   : > { %v1399_v10 = vpop.f32.mrb[44].mxu1 }
 0x172   : > { %2534 = vst.msk [vmem:[%s3967_s23 + $0x50] sm:$0xf] %vm2513_vm1, %v2939_v23  ;;  %v2940_v27 = vpack.c.bf16 %v2084_v24, %v2084_v24  ;;  %v1400_v28 = vadd.f32 %v3950_v60, %v1399_v10  ;;  %v1401_v13 = vpop.f32.mrb[45].mxu1  ;;  %v4156_v44 = vpop.f32.mrb[60].mxu0 }
 0x173   : > { %v1402_v17 = vpop.f32.mrb[46].mxu1  ;;  %v3140_v49 = vpop.f32.mrb[61].mxu0 }
 0x174   : > { %2535 = vst.msk [vmem:[%s3967_s23 + $0x54] sm:$0xf] %vm2513_vm1, %v2940_v27  ;;  %v1793_v34 = vadd.f32 %v4088_v29, %v1400_v28  ;;  %v1403_v35 = vadd.f32 %v3950_v60, %v1402_v17  ;;  %v1404_v26 = vpop.f32.mrb[47].mxu1  ;;  %v4164_v52 = vpop.f32.mrb[62].mxu0  ;;  %v3652_v28 = vld [vmem:[%s3748_s16 + $0x428] ss:$12 sps:$4 sm:$0xff]  }
 0x175   : > { %v3141_v57 = vpop.f32.mrb[63].mxu0 }
 0x176   : > { %v2085_v39 = vmax.f32 %v1793_v34, 0.0  ;;  %v1796_v40 = vadd.f32 %v4096_v37, %v1403_v35  ;;  %1614 = vmatmul.mubr.bf16.gmra.mrb[152].mxu1 %v3629_v18  ;;  %v3633_v37 = vld [vmem:[%s3748_s16 + $0x3a8] ss:$12 sps:$4 sm:$0xff]  }
 0x177   : > { %1621 = vmatprep.mubr.bf16.mxu1 %v3630_v22  ;;  %3247 = vmatmul.mubr.bf16.gmra.mrb[168].mxu0 %v3644_v50  ;;  %v3642_v18 = vld [vmem:[%s3748_s16 + $0x3f4] ss:$12 sps:$4 sm:$0xff]  }
 0x178   : > { %v2941_v42 = vpack.c.bf16 %v2085_v39, %v2085_v39  ;;  %v2086_v43 = vmax.f32 %v1796_v40, 0.0  ;;  %3250 = vmatprep.mubr.msk.bf16.mxu0 %vm3665_vm0, %v3664_v3 }
 0x179   : > { %v1407_v29 = vpop.f32.mrb[48].mxu1 }
 0x17a   : > { %2536 = vst.msk [vmem:[%s3967_s23 + $0x58] sm:$0xf] %vm2513_vm1, %v2941_v42  ;;  %v2942_v46 = vpack.c.bf16 %v2086_v43, %v2086_v43  ;;  %v1408_v47 = vadd.f32 %v3950_v60, %v1407_v29  ;;  %v1409_v32 = vpop.f32.mrb[49].mxu1  ;;  %v4173_v1 = vpop.f32.mrb[64].mxu0  ;;  %v3645_v29 = vld [vmem:[%s3748_s16 + $0x3f0] ss:$12 sps:$4 sm:$0xff]  }
 0x17b   : > { %v1410_v36 = vpop.f32.mrb[50].mxu1  ;;  %v3144_v8 = vpop.f32.mrb[65].mxu0 }
 0x17c   : > { %2537 = vst.msk [vmem:[%s3967_s23 + $0x5c] sm:$0xf] %vm2513_vm1, %v2942_v46  ;;  %v1801_v54 = vadd.f32 %v4105_v48, %v1408_v47  ;;  %v1411_v53 = vadd.f32 %v3950_v60, %v1410_v36  ;;  %v1412_v45 = vpop.f32.mrb[51].mxu1  ;;  %v4181_v11 = vpop.f32.mrb[66].mxu0 }
 0x17d   : > { %v3145_v15 = vpop.f32.mrb[67].mxu0 }
 0x17e   : > { %v2087_v59 = vmax.f32 %v1801_v54, 0.0  ;;  %v1804_v58 = vadd.f32 %v4113_v56, %v1411_v53  ;;  %1622 = vmatmul.mubr.bf16.gmra.mrb[156].mxu1 %v3633_v37  ;;  %v3637_v56 = vld [vmem:[%s3748_s16 + $0x3c0] ss:$12 sps:$4 sm:$0xff]  }
 0x17f   : > { %1629 = vmatprep.mubr.bf16.mxu1 %v3634_v41  ;;  %3251 = vmatmul.mubr.bf16.gmra.mrb[172].mxu0 %v3648_v9 }
 0x180   : > { %v2943_v63 = vpack.c.bf16 %v2087_v59, %v2087_v59  ;;  %v2088_v0 = vmax.f32 %v1804_v58, 0.0  ;;  %3254 = vmatprep.mubr.msk.bf16.mxu0 %vm3665_vm0, %v3664_v3 }
 0x181   : > { %v1415_v48 = vpop.f32.mrb[52].mxu1 }
 0x182   : > { %2538 = vst.msk [vmem:[%s3967_s23 + $0x60] sm:$0xf] %vm2513_vm1, %v2943_v63  ;;  %v2944_v4 = vpack.c.bf16 %v2088_v0, %v2088_v0  ;;  %v1416_v5 = vadd.f32 %v3950_v60, %v1415_v48  ;;  %v1417_v51 = vpop.f32.mrb[53].mxu1  ;;  %v4190_v21 = vpop.f32.mrb[68].mxu0  ;;  %v3649_v0 = vld [vmem:[%s3748_s16 + $0x408] ss:$12 sps:$4 sm:$0xff]  }
 0x183   : > { %v1418_v55 = vpop.f32.mrb[54].mxu1  ;;  %v3148_v27 = vpop.f32.mrb[69].mxu0 }
 0x184   : > { %2539 = vst.msk [vmem:[%s3967_s23 + $0x64] sm:$0xf] %vm2513_vm1, %v2944_v4  ;;  %v1809_v12 = vadd.f32 %v4122_v6, %v1416_v5  ;;  %v1419_v62 = vadd.f32 %v3950_v60, %v1418_v55  ;;  %v1420_v2 = vpop.f32.mrb[55].mxu1  ;;  %v4198_v30 = vpop.f32.mrb[70].mxu0  ;;  %v3650_v5 = vld [vmem:[%s3748_s16 + $0x424] ss:$12 sps:$4 sm:$0xff]  }
 0x185   : > { %v3149_v22 = vpop.f32.mrb[71].mxu0 }
 0x186   : > { %v2089_v16 = vmax.f32 %v1809_v12, 0.0  ;;  %v1812_v7 = vadd.f32 %v4130_v14, %v1419_v62  ;;  %1630 = vmatmul.mubr.bf16.gmra.mrb[160].mxu1 %v3637_v56  ;;  %v3641_v14 = vld [vmem:[%s3748_s16 + $0x3d8] ss:$12 sps:$4 sm:$0xff]  }
 0x187   : > { %1637 = vmatprep.mubr.bf16.mxu1 %v3638_v61  ;;  %3255 = vmatmul.mubr.bf16.gmra.mrb[176].mxu0 %v3652_v28 }
 0x188   : > { %v2945_v19 = vpack.c.bf16 %v2089_v16, %v2089_v16  ;;  %v2090_v20 = vmax.f32 %v1812_v7, 0.0 }
 0x189   : > { %v1423_v6 = vpop.f32.mrb[56].mxu1 }
 0x18a   : > { %2540 = vst.msk [vmem:[%s3967_s23 + $0x68] sm:$0xf] %vm2513_vm1, %v2945_v19  ;;  %v2946_v23 = vpack.c.bf16 %v2090_v20, %v2090_v20  ;;  %v1424_v24 = vadd.f32 %v3950_v60, %v1423_v6  ;;  %v1425_v10 = vpop.f32.mrb[57].mxu1  ;;  %v4205_v40 = vpop.f32.mrb[72].mxu0  ;;  %v3653_v19 = vld [vmem:[%s3748_s16 + $0x420] ss:$12 sps:$4 sm:$0xff]  }
 0x18b   : > { %v1426_v13 = vpop.f32.mrb[58].mxu1  ;;  %v3152_v46 = vpop.f32.mrb[73].mxu0 }
 0x18c   : > { %2541 = vst.msk [vmem:[%s3967_s23 + $0x6c] sm:$0xf] %vm2513_vm1, %v2946_v23  ;;  %v1817_v3 = vadd.f32 %v4139_v25, %v1424_v24  ;;  %v1427_v31 = vadd.f32 %v3950_v60, %v1426_v13  ;;  %v1428_v17 = vpop.f32.mrb[59].mxu1  ;;  %v4212_v32 = vpop.f32.mrb[74].mxu0 }
 0x18d   : > { %v3153_v36 = vpop.f32.mrb[75].mxu0 }
 0x18e   : > { %v2091_v34 = vmax.f32 %v1817_v3, 0.0  ;;  %v1820_v35 = vadd.f32 %v4147_v33, %v1427_v31  ;;  %1638 = vmatmul.mubr.bf16.gmra.mrb[164].mxu1 %v3641_v14  ;;  %v3646_v33 = vld [vmem:[%s3748_s16 + $0x40c] ss:$12 sps:$4 sm:$0xff]  }
 0x18f   : > { %1645 = vmatprep.mubr.bf16.mxu1 %v3642_v18 }
 0x190   : > { %v2947_v26 = vpack.c.bf16 %v2091_v34, %v2091_v34  ;;  %v2092_v38 = vmax.f32 %v1820_v35, 0.0 }
 0x191   : > { %v1431_v39 = vpop.f32.mrb[60].mxu1 }
 0x192   : > { %2542 = vst.msk [vmem:[%s3967_s23 + $0x70] sm:$0xf] %vm2513_vm1, %v2947_v26  ;;  %v2948_v25 = vpack.c.bf16 %v2092_v38, %v2092_v38  ;;  %v1432_v42 = vadd.f32 %v3950_v60, %v1431_v39  ;;  %v1433_v43 = vpop.f32.mrb[61].mxu1  ;;  %v4219_v59 = vpop.f32.mrb[76].mxu0 }
 0x193   : > { %v1434_v47 = vpop.f32.mrb[62].mxu1  ;;  %v3156_v48 = vpop.f32.mrb[77].mxu0 }
 0x194   : > { %2543 = vst.msk [vmem:[%s3967_s23 + $0x74] sm:$0xf] %vm2513_vm1, %v2948_v25  ;;  %v1825_v37 = vadd.f32 %v4156_v44, %v1432_v42  ;;  %v1435_v49 = vadd.f32 %v3950_v60, %v1434_v47  ;;  %v1436_v50 = vpop.f32.mrb[63].mxu1 }
 0x196   : > { %v2093_v41 = vmax.f32 %v1825_v37, 0.0  ;;  %v1828_v54 = vadd.f32 %v4164_v52, %v1435_v49  ;;  %1646 = vmatmul.mubr.bf16.gmra.mrb[168].mxu1 %v3645_v29  ;;  %v4226_v52 = vpop.f32.mrb[78].mxu0 }
 0x197   : > { %1653 = vmatprep.mubr.bf16.mxu1 %v3646_v33  ;;  %v3157_v9 = vpop.f32.mrb[79].mxu0 }
 0x198   : > { %v2949_v53 = vpack.c.bf16 %v2093_v41, %v2093_v41  ;;  %v2094_v45 = vmax.f32 %v1828_v54, 0.0 }
 0x199   : > { %v1439_v57 = vpop.f32.mrb[64].mxu1 }
 0x19a   : > { %2544 = vst.msk [vmem:[%s3967_s23 + $0x78] sm:$0xf] %vm2513_vm1, %v2949_v53  ;;  %v2950_v44 = vpack.c.bf16 %v2094_v45, %v2094_v45  ;;  %v1440_v58 = vadd.f32 %v3950_v60, %v1439_v57  ;;  %v1441_v63 = vpop.f32.mrb[65].mxu1  ;;  %v4233_v15 = vpop.f32.mrb[80].mxu0 }
 0x19b   : > { %v1442_v4 = vpop.f32.mrb[66].mxu1  ;;  %v3160_v20 = vpop.f32.mrb[81].mxu0 }
 0x19c   : > { %2545 = vst.msk [vmem:[%s3967_s23 + $0x7c] sm:$0xf] %vm2513_vm1, %v2950_v44  ;;  %v1833_v51 = vadd.f32 %v4173_v1, %v1440_v58  ;;  %v1443_v56 = vadd.f32 %v3950_v60, %v1442_v4  ;;  %v1444_v8 = vpop.f32.mrb[67].mxu1  ;;  %v1867_v23 = vpop.f32.mrb[82].mxu0 }
 0x19d   : > { %v3161_v14 = vpop.f32.mrb[83].mxu0 }
 0x19e   : > { %v2095_v55 = vmax.f32 %v1833_v51, 0.0  ;;  %v1836_v61 = vadd.f32 %v4181_v11, %v1443_v56  ;;  %1654 = vmatmul.mubr.bf16.gmra.mrb[172].mxu1 %v3649_v0 }
 0x19f   : > { %1661 = vmatprep.mubr.bf16.mxu1 %v3650_v5 }
 0x1a0   : > { %v2951_v12 = vpack.c.bf16 %v2095_v55, %v2095_v55  ;;  %v2096_v62 = vmax.f32 %v1836_v61, 0.0 }
 0x1a1   : > { %v1447_v2 = vpop.f32.mrb[68].mxu1 }
 0x1a2   : > { %2546 = vst.msk [vmem:[%s3967_s23 + $0x80] sm:$0xf] %vm2513_vm1, %v2951_v12  ;;  %v2952_v16 = vpack.c.bf16 %v2096_v62, %v2096_v62  ;;  %v1448_v1 = vadd.f32 %v3950_v60, %v1447_v2  ;;  %v1449_v7 = vpop.f32.mrb[69].mxu1  ;;  %v4244_v31 = vpop.f32.mrb[84].mxu0 }
 0x1a3   : > { %v1450_v6 = vpop.f32.mrb[70].mxu1  ;;  %v3164_v34 = vpop.f32.mrb[85].mxu0 }
 0x1a4   : > { %2547 = vst.msk [vmem:[%s3967_s23 + $0x84] sm:$0xf] %vm2513_vm1, %v2952_v16  ;;  %v1841_v11 = vadd.f32 %v4190_v21, %v1448_v1  ;;  %v1451_v24 = vadd.f32 %v3950_v60, %v1450_v6  ;;  %v1452_v10 = vpop.f32.mrb[71].mxu1  ;;  %v1875_v26 = vpop.f32.mrb[86].mxu0  ;;  %v4289_v34 = vld [vmem:[%s4488_s2] ss:$0 sm:$0xff] }
 0x1a5   : > { %v3165_v25 = vpop.f32.mrb[87].mxu0 }
 0x1a6   : > { %v2097_v27 = vmax.f32 %v1841_v11, 0.0  ;;  %v1844_v28 = vadd.f32 %v4198_v30, %v1451_v24  ;;  %1662 = vmatmul.mubr.bf16.gmra.mrb[176].mxu1 %v3653_v19 }
 0x1a8   : > { %v2953_v13 = vpack.c.bf16 %v2097_v27, %v2097_v27  ;;  %v2098_v18 = vmax.f32 %v1844_v28, 0.0 }
 0x1a9   : > { %v1455_v3 = vpop.f32.mrb[72].mxu1 }
 0x1aa   : > { %2548 = vst.msk [vmem:[%s3967_s23 + $0x88] sm:$0xf] %vm2513_vm1, %v2953_v13  ;;  %v2954_v17 = vpack.c.bf16 %v2098_v18, %v2098_v18  ;;  %v1456_v22 = vadd.f32 %v3950_v60, %v1455_v3  ;;  %v1457_v21 = vpop.f32.mrb[73].mxu1  ;;  %v4254_v33 = vpop.f32.mrb[88].mxu0 }
 0x1ab   : > { %v1458_v35 = vpop.f32.mrb[74].mxu1  ;;  %v3168_v50 = vpop.f32.mrb[89].mxu0 }
 0x1ac   : > { %2549 = vst.msk [vmem:[%s3967_s23 + $0x8c] sm:$0xf] %vm2513_vm1, %v2954_v17  ;;  %v1849_v30 = vadd.f32 %v4205_v40, %v1456_v22  ;;  %v1459_v38 = vadd.f32 %v3950_v60, %v1458_v35  ;;  %v1460_v39 = vpop.f32.mrb[75].mxu1  ;;  %v1883_v41 = vpop.f32.mrb[90].mxu0 }
 0x1ad   : > { %v3169_v45 = vpop.f32.mrb[91].mxu0 }
 0x1ae   : > { %v2099_v42 = vmax.f32 %v1849_v30, 0.0  ;;  %v1852_v43 = vadd.f32 %v4212_v32, %v1459_v38 }
 0x1b0   : > { %v2955_v29 = vpack.c.bf16 %v2099_v42, %v2099_v42  ;;  %v2100_v46 = vmax.f32 %v1852_v43, 0.0 }
 0x1b1   : > { %v1463_v47 = vpop.f32.mrb[76].mxu1 }
 0x1b2   : > { %2550 = vst.msk [vmem:[%s3967_s23 + $0x90] sm:$0xf] %vm2513_vm1, %v2955_v29  ;;  %v2956_v37 = vpack.c.bf16 %v2100_v46, %v2100_v46  ;;  %v1464_v49 = vadd.f32 %v3950_v60, %v1463_v47  ;;  %v1465_v40 = vpop.f32.mrb[77].mxu1  ;;  %v4264_v48 = vpop.f32.mrb[92].mxu0 }
 0x1b3   : > { %v1466_v36 = vpop.f32.mrb[78].mxu1  ;;  %v3172_v51 = vpop.f32.mrb[93].mxu0 }
 0x1b4   : > { %2551 = vst.msk [vmem:[%s3967_s23 + $0x94] sm:$0xf] %vm2513_vm1, %v2956_v37  ;;  %v1857_v54 = vadd.f32 %v4219_v59, %v1464_v49  ;;  %v1467_v32 = vadd.f32 %v3950_v60, %v1466_v36  ;;  %v1468_v53 = vpop.f32.mrb[79].mxu1  ;;  %v1891_v8 = vpop.f32.mrb[94].mxu0 }
 0x1b5   : > { %v3173_v61 = vpop.f32.mrb[95].mxu0 }
 0x1b6   : > { %v2101_v57 = vmax.f32 %v1857_v54, 0.0  ;;  %v1860_v44 = vadd.f32 %v4226_v52, %v1467_v32 }
 0x1b8   : > { %v2957_v58 = vpack.c.bf16 %v2101_v57, %v2101_v57  ;;  %v2102_v63 = vmax.f32 %v1860_v44, 0.0 }
 0x1b9   : > { %v1471_v0 = vpop.f32.mrb[80].mxu1 }
 0x1ba   : > { %2552 = vst.msk [vmem:[%s3967_s23 + $0x98] sm:$0xf] %vm2513_vm1, %v2957_v58  ;;  %v2958_v4 = vpack.c.bf16 %v2102_v63, %v2102_v63  ;;  %v1472_v5 = vadd.f32 %v3950_v60, %v1471_v0  ;;  %v1473_v59 = vpop.f32.mrb[81].mxu1  ;;  %v4273_v7 = vpop.f32.mrb[96].mxu0 }
 0x1bb   : > { %v1474_v56 = vpop.f32.mrb[82].mxu1 }
 0x1bc   : > { %2553 = vst.msk [vmem:[%s3967_s23 + $0x9c] sm:$0xf] %vm2513_vm1, %v2958_v4  ;;  %v1865_v9 = vadd.f32 %v4233_v15, %v1472_v5  ;;  %v1475_v52 = vadd.f32 %v3950_v60, %v1474_v56  ;;  %v1476_v55 = vpop.f32.mrb[83].mxu1  ;;  %v3176_v15 = vpop.f32.mrb[97].mxu0 }
 0x1bd   : > { %v1899_v24 = vpop.f32.mrb[98].mxu0 }
 0x1be   : > { %v2103_v12 = vmax.f32 %v1865_v9, 0.0  ;;  %v1868_v62 = vadd.f32 %v1867_v23, %v1475_v52  ;;  %v3177_v27 = vpop.f32.mrb[99].mxu0 }
 0x1c0   : > { %v2959_v2 = vpack.c.bf16 %v2103_v12, %v2103_v12  ;;  %v2104_v16 = vmax.f32 %v1868_v62, 0.0 }
 0x1c1   : > { %v1479_v1 = vpop.f32.mrb[84].mxu1 }
 0x1c2   : > { %2554 = vst.msk [vmem:[%s3967_s23 + $0xa0] sm:$0xf] %vm2513_vm1, %v2959_v2  ;;  %v2960_v19 = vpack.c.bf16 %v2104_v16, %v2104_v16  ;;  %v1480_v20 = vadd.f32 %v3950_v60, %v1479_v1  ;;  %v1481_v6 = vpop.f32.mrb[85].mxu1  ;;  %v4282_v22 = vpop.f32.mrb[100].mxu0 }
 0x1c3   : > { %v1482_v11 = vpop.f32.mrb[86].mxu1  ;;  %v3180_v35 = vpop.f32.mrb[101].mxu0 }
 0x1c4   : > { %2555 = vst.msk [vmem:[%s3967_s23 + $0xa4] sm:$0xf] %vm2513_vm1, %v2960_v19  ;;  %v1873_v10 = vadd.f32 %v4244_v31, %v1480_v20  ;;  %v1483_v23 = vadd.f32 %v3950_v60, %v1482_v11  ;;  %v1484_v14 = vpop.f32.mrb[87].mxu1 }
 0x1c6   : > { %v2105_v28 = vmax.f32 %v1873_v10, 0.0  ;;  %v1876_v13 = vadd.f32 %v1875_v26, %v1483_v23  ;;  %v1907_v26 = vpop.f32.mrb[102].mxu0 }
 0x1c7   : > { %v3181_v42 = vpop.f32.mrb[103].mxu0 }
 0x1c8   : > { %v2961_v18 = vpack.c.bf16 %v2105_v28, %v2105_v28  ;;  %v2106_v3 = vmax.f32 %v1876_v13, 0.0 }
 0x1c9   : > { %v1487_v17 = vpop.f32.mrb[88].mxu1 }
 0x1ca   : > { %2556 = vst.msk [vmem:[%s3967_s23 + $0xa8] sm:$0xf] %vm2513_vm1, %v2961_v18  ;;  %v2962_v21 = vpack.c.bf16 %v2106_v3, %v2106_v3  ;;  %v1488_v60 = vadd.f32 %v4289_v34, %v1487_v17  ;;  %v1489_v31 = vpop.f32.mrb[89].mxu1  ;;  %v4296_v49 = vpop.f32.mrb[104].mxu0 }
 0x1cb   : > { %v1490_v30 = vpop.f32.mrb[90].mxu1 }
 0x1cc   : > { %2557 = vst.msk [vmem:[%s3967_s23 + $0xac] sm:$0xf] %vm2513_vm1, %v2962_v21  ;;  %v1881_v38 = vadd.f32 %v4254_v33, %v1488_v60  ;;  %v1491_v39 = vadd.f32 %v4289_v34, %v1490_v30  ;;  %v1492_v25 = vpop.f32.mrb[91].mxu1  ;;  %v3184_v33 = vpop.f32.mrb[105].mxu0 }
 0x1cd   : > { %v1915_v32 = vpop.f32.mrb[106].mxu0 }
 0x1ce   : > { %v2107_v43 = vmax.f32 %v1881_v38, 0.0  ;;  %v1884_v29 = vadd.f32 %v1883_v41, %v1491_v39  ;;  %v3185_v57 = vpop.f32.mrb[107].mxu0 }
 0x1d0   : > { %v2963_v46 = vpack.c.bf16 %v2107_v43, %v2107_v43  ;;  %v2108_v47 = vmax.f32 %v1884_v29, 0.0 }
 0x1d1   : > { %v1495_v37 = vpop.f32.mrb[92].mxu1 }
 0x1d2   : > { %2558 = vst.msk [vmem:[%s3967_s23 + $0xb0] sm:$0xf] %vm2513_vm1, %v2963_v46  ;;  %v2964_v40 = vpack.c.bf16 %v2108_v47, %v2108_v47  ;;  %v1496_v50 = vadd.f32 %v4289_v34, %v1495_v37  ;;  %v1497_v36 = vpop.f32.mrb[93].mxu1  ;;  %v4305_v5 = vpop.f32.mrb[108].mxu0 }
 0x1d3   : > { %v1498_v54 = vpop.f32.mrb[94].mxu1 }
 0x1d4   : > { %2559 = vst.msk [vmem:[%s3967_s23 + $0xb4] sm:$0xf] %vm2513_vm1, %v2964_v40  ;;  %v1889_v53 = vadd.f32 %v4264_v48, %v1496_v50  ;;  %v1499_v41 = vadd.f32 %v4289_v34, %v1498_v54  ;;  %v1500_v45 = vpop.f32.mrb[95].mxu1  ;;  %v3188_v48 = vpop.f32.mrb[109].mxu0 }
 0x1d5   : > { %v1923_v52 = vpop.f32.mrb[110].mxu0 }
 0x1d6   : > { %v2109_v44 = vmax.f32 %v1889_v53, 0.0  ;;  %v1892_v58 = vadd.f32 %v1891_v8, %v1499_v41  ;;  %v3189_v12 = vpop.f32.mrb[111].mxu0 }
 0x1d8   : > { %v2965_v63 = vpack.c.bf16 %v2109_v44, %v2109_v44  ;;  %v2110_v0 = vmax.f32 %v1892_v58, 0.0 }
 0x1d9   : > { %v1503_v4 = vpop.f32.mrb[96].mxu1 }
 0x1da   : > { %2560 = vst.msk [vmem:[%s3967_s23 + $0xb8] sm:$0xf] %vm2513_vm1, %v2965_v63  ;;  %v2966_v59 = vpack.c.bf16 %v2110_v0, %v2110_v0  ;;  %v1504_v51 = vadd.f32 %v4289_v34, %v1503_v4  ;;  %v1505_v56 = vpop.f32.mrb[97].mxu1  ;;  %v4314_v20 = vpop.f32.mrb[112].mxu0 }
 0x1db   : > { %v1506_v9 = vpop.f32.mrb[98].mxu1 }
 0x1dc   : > { %2561 = vst.msk [vmem:[%s3967_s23 + $0xbc] sm:$0xf] %vm2513_vm1, %v2966_v59  ;;  %v1897_v55 = vadd.f32 %v4273_v7, %v1504_v51  ;;  %v1507_v8 = vadd.f32 %v4289_v34, %v1506_v9  ;;  %v1508_v61 = vpop.f32.mrb[99].mxu1  ;;  %v3192_v7 = vpop.f32.mrb[113].mxu0 }
 0x1dd   : > { %v1931_v23 = vpop.f32.mrb[114].mxu0 }
 0x1de   : > { %v2111_v62 = vmax.f32 %v1897_v55, 0.0  ;;  %v1900_v2 = vadd.f32 %v1899_v24, %v1507_v8  ;;  %v3193_v28 = vpop.f32.mrb[115].mxu0 }
 0x1e0   : > { %v2967_v16 = vpack.c.bf16 %v2111_v62, %v2111_v62  ;;  %v2112_v1 = vmax.f32 %v1900_v2, 0.0 }
 0x1e1   : > { %v1511_v19 = vpop.f32.mrb[100].mxu1 }
 0x1e2   : > { %2562 = vst.msk [vmem:[%s3967_s23 + $0xc0] sm:$0xf] %vm2513_vm1, %v2967_v16  ;;  %v2968_v6 = vpack.c.bf16 %v2112_v1, %v2112_v1  ;;  %v1512_v15 = vadd.f32 %v4289_v34, %v1511_v19  ;;  %v1513_v11 = vpop.f32.mrb[101].mxu1  ;;  %v4323_v60 = vpop.f32.mrb[116].mxu0 }
 0x1e3   : > { %v1514_v10 = vpop.f32.mrb[102].mxu1 }
 0x1e4   : > { %2563 = vst.msk [vmem:[%s3967_s23 + $0xc4] sm:$0xf] %vm2513_vm1, %v2968_v6  ;;  %v1905_v14 = vadd.f32 %v4282_v22, %v1512_v15  ;;  %v1515_v24 = vadd.f32 %v4289_v34, %v1514_v10  ;;  %v1516_v27 = vpop.f32.mrb[103].mxu1  ;;  %v3196_v22 = vpop.f32.mrb[117].mxu0 }
 0x1e5   : > { %v1939_v39 = vpop.f32.mrb[118].mxu0 }
 0x1e6   : > { %v2113_v13 = vmax.f32 %v1905_v14, 0.0  ;;  %v1908_v18 = vadd.f32 %v1907_v26, %v1515_v24  ;;  %v3197_v43 = vpop.f32.mrb[119].mxu0 }
 0x1e8   : > { %v2969_v3 = vpack.c.bf16 %v2113_v13, %v2113_v13  ;;  %v2114_v17 = vmax.f32 %v1908_v18, 0.0 }
 0x1e9   : > { %v1519_v21 = vpop.f32.mrb[104].mxu1 }
 0x1ea   : > { %2564 = vst.msk [vmem:[%s3967_s23 + $0xc8] sm:$0xf] %vm2513_vm1, %v2969_v3  ;;  %v2970_v31 = vpack.c.bf16 %v2114_v17, %v2114_v17  ;;  %v1520_v35 = vadd.f32 %v4289_v34, %v1519_v21  ;;  %v1521_v30 = vpop.f32.mrb[105].mxu1  ;;  %v4332_v50 = vpop.f32.mrb[120].mxu0 }
 0x1eb   : > { %v1522_v38 = vpop.f32.mrb[106].mxu1 }
 0x1ec   : > { %2565 = vst.msk [vmem:[%s3967_s23 + $0xcc] sm:$0xf] %vm2513_vm1, %v2970_v31  ;;  %v1913_v25 = vadd.f32 %v4296_v49, %v1520_v35  ;;  %v1523_v26 = vadd.f32 %v4289_v34, %v1522_v38  ;;  %v1524_v42 = vpop.f32.mrb[107].mxu1  ;;  %v3200_v49 = vpop.f32.mrb[121].mxu0 }
 0x1ed   : > { %v1947_v41 = vpop.f32.mrb[122].mxu0 }
 0x1ee   : > { %v2115_v29 = vmax.f32 %v1913_v25, 0.0  ;;  %v1916_v46 = vadd.f32 %v1915_v32, %v1523_v26  ;;  %v3201_v44 = vpop.f32.mrb[123].mxu0 }
 0x1f0   : > { %v2971_v47 = vpack.c.bf16 %v2115_v29, %v2115_v29  ;;  %v2116_v37 = vmax.f32 %v1916_v46, 0.0 }
 0x1f1   : > { %v1527_v40 = vpop.f32.mrb[108].mxu1 }
 0x1f2   : > { %2566 = vst.msk [vmem:[%s3967_s23 + $0xd0] sm:$0xf] %vm2513_vm1, %v2971_v47  ;;  %v2972_v36 = vpack.c.bf16 %v2116_v37, %v2116_v37  ;;  %v1528_v33 = vadd.f32 %v4289_v34, %v1527_v40  ;;  %v1529_v54 = vpop.f32.mrb[109].mxu1  ;;  %v4341_v51 = vpop.f32.mrb[124].mxu0 }
 0x1f3   : > { %v1530_v53 = vpop.f32.mrb[110].mxu1 }
 0x1f4   : > { %2567 = vst.msk [vmem:[%s3967_s23 + $0xd4] sm:$0xf] %vm2513_vm1, %v2972_v36  ;;  %v1921_v45 = vadd.f32 %v4305_v5, %v1528_v33  ;;  %v1531_v32 = vadd.f32 %v4289_v34, %v1530_v53  ;;  %v1532_v57 = vpop.f32.mrb[111].mxu1  ;;  %v3204_v5 = vpop.f32.mrb[125].mxu0 }
 0x1f5   : > { %v1955_v8 = vpop.f32.mrb[126].mxu0 }
 0x1f6   : > { %v2117_v58 = vmax.f32 %v1921_v45, 0.0  ;;  %v1924_v63 = vadd.f32 %v1923_v52, %v1531_v32  ;;  %v3205_v62 = vpop.f32.mrb[127].mxu0 }
 0x1f8   : > { %v2973_v0 = vpack.c.bf16 %v2117_v58, %v2117_v58  ;;  %v2118_v4 = vmax.f32 %v1924_v63, 0.0 }
 0x1f9   : > { %v1535_v59 = vpop.f32.mrb[112].mxu1 }
 0x1fa   : > { %2568 = vst.msk [vmem:[%s3967_s23 + $0xd8] sm:$0xf] %vm2513_vm1, %v2973_v0  ;;  %v2974_v56 = vpack.c.bf16 %v2118_v4, %v2118_v4  ;;  %v1536_v48 = vadd.f32 %v4289_v34, %v1535_v59  ;;  %v1537_v9 = vpop.f32.mrb[113].mxu1  ;;  %v4350_v15 = vpop.f32.mrb[128].mxu0 }
 0x1fb   : > { %v1538_v55 = vpop.f32.mrb[114].mxu1 }
 0x1fc   : > { %2569 = vst.msk [vmem:[%s3967_s23 + $0xdc] sm:$0xf] %vm2513_vm1, %v2974_v56  ;;  %v1929_v61 = vadd.f32 %v4314_v20, %v1536_v48  ;;  %v1539_v52 = vadd.f32 %v4289_v34, %v1538_v55  ;;  %v1540_v12 = vpop.f32.mrb[115].mxu1  ;;  %v3208_v20 = vpop.f32.mrb[129].mxu0 }
 0x1fd   : > { %v1963_v24 = vpop.f32.mrb[130].mxu0 }
 0x1fe   : > { %v2119_v2 = vmax.f32 %v1929_v61, 0.0  ;;  %v1932_v16 = vadd.f32 %v1931_v23, %v1539_v52  ;;  %v3209_v13 = vpop.f32.mrb[131].mxu0 }
 0x200   : > { %v2975_v1 = vpack.c.bf16 %v2119_v2, %v2119_v2  ;;  %v2120_v19 = vmax.f32 %v1932_v16, 0.0 }
 0x201   : > { %v1543_v6 = vpop.f32.mrb[116].mxu1 }
 0x202   : > { %2570 = vst.msk [vmem:[%s3967_s23 + $0xe0] sm:$0xf] %vm2513_vm1, %v2975_v1  ;;  %v2976_v11 = vpack.c.bf16 %v2120_v19, %v2120_v19  ;;  %v1544_v7 = vadd.f32 %v4289_v34, %v1543_v6  ;;  %v1545_v10 = vpop.f32.mrb[117].mxu1  ;;  %v4359_v35 = vpop.f32.mrb[132].mxu0 }
 0x203   : > { %v1546_v14 = vpop.f32.mrb[118].mxu1 }
 0x204   : > { %2571 = vst.msk [vmem:[%s3967_s23 + $0xe4] sm:$0xf] %vm2513_vm1, %v2976_v11  ;;  %v1937_v27 = vadd.f32 %v4323_v60, %v1544_v7  ;;  %v1547_v23 = vadd.f32 %v4289_v34, %v1546_v14  ;;  %v1548_v28 = vpop.f32.mrb[119].mxu1  ;;  %v3212_v60 = vpop.f32.mrb[133].mxu0 }
 0x205   : > { %v1971_v26 = vpop.f32.mrb[134].mxu0 }
 0x206   : > { %v2121_v18 = vmax.f32 %v1937_v27, 0.0  ;;  %v1940_v3 = vadd.f32 %v1939_v39, %v1547_v23  ;;  %v3213_v29 = vpop.f32.mrb[135].mxu0 }
 0x208   : > { %v2977_v17 = vpack.c.bf16 %v2121_v18, %v2121_v18  ;;  %v2122_v21 = vmax.f32 %v1940_v3, 0.0 }
 0x209   : > { %v1551_v31 = vpop.f32.mrb[120].mxu1 }
 0x20a   : > { %2572 = vst.msk [vmem:[%s3967_s23 + $0xe8] sm:$0xf] %vm2513_vm1, %v2977_v17  ;;  %v2978_v30 = vpack.c.bf16 %v2122_v21, %v2122_v21  ;;  %v1552_v22 = vadd.f32 %v4289_v34, %v1551_v31  ;;  %v1553_v38 = vpop.f32.mrb[121].mxu1  ;;  %v4368_v33 = vpop.f32.mrb[136].mxu0 }
 0x20b   : > { %v1554_v25 = vpop.f32.mrb[122].mxu1 }
 0x20c   : > { %2573 = vst.msk [vmem:[%s3967_s23 + $0xec] sm:$0xf] %vm2513_vm1, %v2978_v30  ;;  %v1945_v42 = vadd.f32 %v4332_v50, %v1552_v22  ;;  %v1555_v39 = vadd.f32 %v4289_v34, %v1554_v25  ;;  %v1556_v43 = vpop.f32.mrb[123].mxu1  ;;  %v3216_v50 = vpop.f32.mrb[137].mxu0 }
 0x20d   : > { %v1979_v32 = vpop.f32.mrb[138].mxu0 }
 0x20e   : > { %v2123_v46 = vmax.f32 %v1945_v42, 0.0  ;;  %v1948_v47 = vadd.f32 %v1947_v41, %v1555_v39  ;;  %v3217_v58 = vpop.f32.mrb[139].mxu0 }
 0x210   : > { %v2979_v37 = vpack.c.bf16 %v2123_v46, %v2123_v46  ;;  %v2124_v40 = vmax.f32 %v1948_v47, 0.0 }
 0x211   : > { %v1559_v36 = vpop.f32.mrb[124].mxu1 }
 0x212   : > { %2574 = vst.msk [vmem:[%s3967_s23 + $0xf0] sm:$0xf] %vm2513_vm1, %v2979_v37  ;;  %v2980_v54 = vpack.c.bf16 %v2124_v40, %v2124_v40  ;;  %v1560_v49 = vadd.f32 %v4289_v34, %v1559_v36  ;;  %v1561_v53 = vpop.f32.mrb[125].mxu1  ;;  %v4377_v48 = vpop.f32.mrb[140].mxu0 }
 0x213   : > { %v1562_v45 = vpop.f32.mrb[126].mxu1 }
 0x214   : > { %2575 = vst.msk [vmem:[%s3967_s23 + $0xf4] sm:$0xf] %vm2513_vm1, %v2980_v54  ;;  %v1953_v57 = vadd.f32 %v4341_v51, %v1560_v49  ;;  %v1563_v41 = vadd.f32 %v4289_v34, %v1562_v45  ;;  %v1564_v44 = vpop.f32.mrb[127].mxu1  ;;  %v3220_v51 = vpop.f32.mrb[141].mxu0 }
 0x215   : > { %v1987_v52 = vpop.f32.mrb[142].mxu0 }
 0x216   : > { %v2125_v63 = vmax.f32 %v1953_v57, 0.0  ;;  %v1956_v0 = vadd.f32 %v1955_v8, %v1563_v41  ;;  %v3221_v2 = vpop.f32.mrb[143].mxu0 }
 0x218   : > { %v2981_v4 = vpack.c.bf16 %v2125_v63, %v2125_v63  ;;  %v2126_v59 = vmax.f32 %v1956_v0, 0.0 }
 0x219   : > { %v1567_v56 = vpop.f32.mrb[128].mxu1 }
 0x21a   : > { %2576 = vst.msk [vmem:[%s3967_s23 + $0xf8] sm:$0xf] %vm2513_vm1, %v2981_v4  ;;  %v2982_v9 = vpack.c.bf16 %v2126_v59, %v2126_v59  ;;  %v1568_v5 = vadd.f32 %v4289_v34, %v1567_v56  ;;  %v1569_v55 = vpop.f32.mrb[129].mxu1  ;;  %v4386_v7 = vpop.f32.mrb[144].mxu0 }
 0x21b   : > { %v1570_v61 = vpop.f32.mrb[130].mxu1 }
 0x21c   : > { %2577 = vst.msk [vmem:[%s3967_s23 + $0xfc] sm:$0xf] %vm2513_vm1, %v2982_v9  ;;  %v1961_v12 = vadd.f32 %v4350_v15, %v1568_v5  ;;  %v1571_v8 = vadd.f32 %v4289_v34, %v1570_v61  ;;  %v1572_v62 = vpop.f32.mrb[131].mxu1  ;;  %v3224_v15 = vpop.f32.mrb[145].mxu0 }
 0x21d   : > { %v1995_v23 = vpop.f32.mrb[146].mxu0 }
 0x21e   : > { %v2127_v16 = vmax.f32 %v1961_v12, 0.0  ;;  %v1964_v1 = vadd.f32 %v1963_v24, %v1571_v8  ;;  %v3225_v18 = vpop.f32.mrb[147].mxu0 }
 0x220   : > { %v2983_v19 = vpack.c.bf16 %v2127_v16, %v2127_v16  ;;  %v2128_v6 = vmax.f32 %v1964_v1, 0.0 }
 0x221   : > { %v1575_v11 = vpop.f32.mrb[132].mxu1 }
 0x222   : > { %2578 = vst.msk [vmem:[%s3967_s23 + $0x100] sm:$0xf] %vm2513_vm1, %v2983_v19  ;;  %v2984_v10 = vpack.c.bf16 %v2128_v6, %v2128_v6  ;;  %v1576_v20 = vadd.f32 %v4289_v34, %v1575_v11  ;;  %v1577_v14 = vpop.f32.mrb[133].mxu1  ;;  %v4395_v22 = vpop.f32.mrb[148].mxu0 }
 0x223   : > { %v1578_v27 = vpop.f32.mrb[134].mxu1 }
 0x224   : > { %2579 = vst.msk [vmem:[%s3967_s23 + $0x104] sm:$0xf] %vm2513_vm1, %v2984_v10  ;;  %v1969_v28 = vadd.f32 %v4359_v35, %v1576_v20  ;;  %v1579_v24 = vadd.f32 %v4289_v34, %v1578_v27  ;;  %v1580_v13 = vpop.f32.mrb[135].mxu1  ;;  %v3228_v35 = vpop.f32.mrb[149].mxu0 }
 0x225   : > { %v2003_v39 = vpop.f32.mrb[150].mxu0 }
 0x226   : > { %v2129_v3 = vmax.f32 %v1969_v28, 0.0  ;;  %v1972_v17 = vadd.f32 %v1971_v26, %v1579_v24  ;;  %v3229_v46 = vpop.f32.mrb[151].mxu0 }
 0x228   : > { %v2985_v21 = vpack.c.bf16 %v2129_v3, %v2129_v3  ;;  %v2130_v31 = vmax.f32 %v1972_v17, 0.0 }
 0x229   : > { %v1583_v30 = vpop.f32.mrb[136].mxu1 }
 0x22a   : > { %2580 = vst.msk [vmem:[%s3967_s23 + $0x108] sm:$0xf] %vm2513_vm1, %v2985_v21  ;;  %v2986_v38 = vpack.c.bf16 %v2130_v31, %v2130_v31  ;;  %v1584_v60 = vadd.f32 %v4289_v34, %v1583_v30  ;;  %v1585_v25 = vpop.f32.mrb[137].mxu1  ;;  %v4404_v49 = vpop.f32.mrb[152].mxu0 }
 0x22b   : > { %v1586_v42 = vpop.f32.mrb[138].mxu1 }
 0x22c   : > { %2581 = vst.msk [vmem:[%s3967_s23 + $0x10c] sm:$0xf] %vm2513_vm1, %v2986_v38  ;;  %v1977_v43 = vadd.f32 %v4368_v33, %v1584_v60  ;;  %v1587_v26 = vadd.f32 %v4289_v34, %v1586_v42  ;;  %v1588_v29 = vpop.f32.mrb[139].mxu1  ;;  %v3232_v33 = vpop.f32.mrb[153].mxu0 }
 0x22d   : > { %v2011_v41 = vpop.f32.mrb[154].mxu0 }
 0x22e   : > { %v2131_v47 = vmax.f32 %v1977_v43, 0.0  ;;  %v1980_v37 = vadd.f32 %v1979_v32, %v1587_v26  ;;  %v3233_v63 = vpop.f32.mrb[155].mxu0 }
 0x230   : > { %v2987_v40 = vpack.c.bf16 %v2131_v47, %v2131_v47  ;;  %v2132_v36 = vmax.f32 %v1980_v37, 0.0 }
 0x231   : > { %v1591_v54 = vpop.f32.mrb[140].mxu1 }
 0x232   : > { %2582 = vst.msk [vmem:[%s3967_s23 + $0x110] sm:$0xf] %vm2513_vm1, %v2987_v40  ;;  %v2988_v53 = vpack.c.bf16 %v2132_v36, %v2132_v36  ;;  %v1592_v50 = vadd.f32 %v4289_v34, %v1591_v54  ;;  %v1593_v45 = vpop.f32.mrb[141].mxu1  ;;  %v4413_v5 = vpop.f32.mrb[156].mxu0 }
 0x233   : > { %v1594_v57 = vpop.f32.mrb[142].mxu1 }
 0x234   : > { %2583 = vst.msk [vmem:[%s3967_s23 + $0x114] sm:$0xf] %vm2513_vm1, %v2988_v53  ;;  %v1985_v44 = vadd.f32 %v4377_v48, %v1592_v50  ;;  %v1595_v32 = vadd.f32 %v4289_v34, %v1594_v57  ;;  %v1596_v58 = vpop.f32.mrb[143].mxu1  ;;  %v3236_v48 = vpop.f32.mrb[157].mxu0 }
 0x235   : > { %v2019_v8 = vpop.f32.mrb[158].mxu0 }
 0x236   : > { %v2133_v0 = vmax.f32 %v1985_v44, 0.0  ;;  %v1988_v4 = vadd.f32 %v1987_v52, %v1595_v32  ;;  %v3237_v16 = vpop.f32.mrb[159].mxu0 }
 0x238   : > { %v2989_v59 = vpack.c.bf16 %v2133_v0, %v2133_v0  ;;  %v2134_v56 = vmax.f32 %v1988_v4, 0.0 }
 0x239   : > { %v1599_v9 = vpop.f32.mrb[144].mxu1 }
 0x23a   : > { %2584 = vst.msk [vmem:[%s3967_s23 + $0x118] sm:$0xf] %vm2513_vm1, %v2989_v59  ;;  %v2990_v55 = vpack.c.bf16 %v2134_v56, %v2134_v56  ;;  %v1600_v51 = vadd.f32 %v4289_v34, %v1599_v9  ;;  %v1601_v61 = vpop.f32.mrb[145].mxu1  ;;  %v4422_v20 = vpop.f32.mrb[160].mxu0 }
 0x23b   : > { %v1602_v12 = vpop.f32.mrb[146].mxu1 }
 0x23c   : > { %2585 = vst.msk [vmem:[%s3967_s23 + $0x11c] sm:$0xf] %vm2513_vm1, %v2990_v55  ;;  %v1993_v62 = vadd.f32 %v4386_v7, %v1600_v51  ;;  %v1603_v52 = vadd.f32 %v4289_v34, %v1602_v12  ;;  %v1604_v2 = vpop.f32.mrb[147].mxu1  ;;  %v3240_v7 = vpop.f32.mrb[161].mxu0 }
 0x23d   : > { %v2027_v24 = vpop.f32.mrb[162].mxu0 }
 0x23e   : > { %v2135_v1 = vmax.f32 %v1993_v62, 0.0  ;;  %v1996_v19 = vadd.f32 %v1995_v23, %v1603_v52  ;;  %v3241_v3 = vpop.f32.mrb[163].mxu0 }
 0x240   : > { %v2991_v6 = vpack.c.bf16 %v2135_v1, %v2135_v1  ;;  %v2136_v11 = vmax.f32 %v1996_v19, 0.0 }
 0x241   : > { %v1607_v10 = vpop.f32.mrb[148].mxu1 }
 0x242   : > { %2586 = vst.msk [vmem:[%s3967_s23 + $0x120] sm:$0xf] %vm2513_vm1, %v2991_v6  ;;  %v2992_v14 = vpack.c.bf16 %v2136_v11, %v2136_v11  ;;  %v1608_v15 = vadd.f32 %v4289_v34, %v1607_v10  ;;  %v1609_v27 = vpop.f32.mrb[149].mxu1  ;;  %v4431_v60 = vpop.f32.mrb[164].mxu0 }
 0x243   : > { %v1610_v28 = vpop.f32.mrb[150].mxu1 }
 0x244   : > { %2587 = vst.msk [vmem:[%s3967_s23 + $0x124] sm:$0xf] %vm2513_vm1, %v2992_v14  ;;  %v2001_v13 = vadd.f32 %v4395_v22, %v1608_v15  ;;  %v1611_v23 = vadd.f32 %v4289_v34, %v1610_v28  ;;  %v1612_v18 = vpop.f32.mrb[151].mxu1  ;;  %v3244_v22 = vpop.f32.mrb[165].mxu0 }
 0x245   : > { %v2035_v26 = vpop.f32.mrb[166].mxu0 }
 0x246   : > { %v2137_v17 = vmax.f32 %v2001_v13, 0.0  ;;  %v2004_v21 = vadd.f32 %v2003_v39, %v1611_v23  ;;  %v3245_v47 = vpop.f32.mrb[167].mxu0 }
 0x248   : > { %v2993_v31 = vpack.c.bf16 %v2137_v17, %v2137_v17  ;;  %v2138_v30 = vmax.f32 %v2004_v21, 0.0 }
 0x249   : > { %v1615_v38 = vpop.f32.mrb[152].mxu1 }
 0x24a   : > { %2588 = vst.msk [vmem:[%s3967_s23 + $0x128] sm:$0xf] %vm2513_vm1, %v2993_v31  ;;  %v2994_v25 = vpack.c.bf16 %v2138_v30, %v2138_v30  ;;  %v1616_v35 = vadd.f32 %v4289_v34, %v1615_v38  ;;  %v1617_v42 = vpop.f32.mrb[153].mxu1  ;;  %v2040_v50 = vpop.f32.mrb[168].mxu0 }
 0x24b   : > { %v1618_v43 = vpop.f32.mrb[154].mxu1  ;;  %v3248_v44 = vpop.f32.mrb[169].mxu0 }
 0x24c   : > { %2589 = vst.msk [vmem:[%s3967_s23 + $0x12c] sm:$0xf] %vm2513_vm1, %v2994_v25  ;;  %v2009_v29 = vadd.f32 %v4404_v49, %v1616_v35  ;;  %v1619_v39 = vadd.f32 %v4289_v34, %v1618_v43  ;;  %v1620_v46 = vpop.f32.mrb[155].mxu1  ;;  %v2043_v32 = vpop.f32.mrb[170].mxu0 }
 0x24d   : > { %v3249_v0 = vpop.f32.mrb[171].mxu0 }
 0x24e   : > { %v2139_v37 = vmax.f32 %v2009_v29, 0.0  ;;  %v2012_v40 = vadd.f32 %v2011_v41, %v1619_v39 }
 0x250   : > { %v2995_v36 = vpack.c.bf16 %v2139_v37, %v2139_v37  ;;  %v2140_v54 = vmax.f32 %v2012_v40, 0.0 }
 0x251   : > { %v1623_v53 = vpop.f32.mrb[156].mxu1 }
 0x252   : > { %2590 = vst.msk [vmem:[%s3967_s23 + $0x130] sm:$0xf] %vm2513_vm1, %v2995_v36  ;;  %v2996_v45 = vpack.c.bf16 %v2140_v54, %v2140_v54  ;;  %v1624_v33 = vadd.f32 %v4289_v34, %v1623_v53  ;;  %v1625_v57 = vpop.f32.mrb[157].mxu1  ;;  %v2048_v51 = vpop.f32.mrb[172].mxu0 }
 0x253   : > { %v1626_v49 = vpop.f32.mrb[158].mxu1  ;;  %v3252_v62 = vpop.f32.mrb[173].mxu0 }
 0x254   : > { %2591 = vst.msk [vmem:[%s3967_s23 + $0x134] sm:$0xf] %vm2513_vm1, %v2996_v45  ;;  %v2017_v58 = vadd.f32 %v4413_v5, %v1624_v33  ;;  %v1627_v41 = vadd.f32 %v4289_v34, %v1626_v49  ;;  %v1628_v63 = vpop.f32.mrb[159].mxu1  ;;  %v2051_v52 = vpop.f32.mrb[174].mxu0 }
 0x255   : > { %v3253_v1 = vpop.f32.mrb[175].mxu0 }
 0x256   : > { %v2141_v4 = vmax.f32 %v2017_v58, 0.0  ;;  %v2020_v59 = vadd.f32 %v2019_v8, %v1627_v41 }
 0x258   : > { %v2997_v56 = vpack.c.bf16 %v2141_v4, %v2141_v4  ;;  %v2142_v9 = vmax.f32 %v2020_v59, 0.0 }
 0x259   : > { %v1631_v55 = vpop.f32.mrb[160].mxu1 }
 0x25a   : > { %2592 = vst.msk [vmem:[%s3967_s23 + $0x138] sm:$0xf] %vm2513_vm1, %v2997_v56  ;;  %v2998_v61 = vpack.c.bf16 %v2142_v9, %v2142_v9  ;;  %v1632_v48 = vadd.f32 %v4289_v34, %v1631_v55  ;;  %v1633_v12 = vpop.f32.mrb[161].mxu1  ;;  %v2056_v15 = vpop.f32.mrb[176].mxu0 }
 0x25b   : > { %v1634_v5 = vpop.f32.mrb[162].mxu1  ;;  %v3256_v13 = vpop.f32.mrb[177].mxu0 }
 0x25c   : > { %2593 = vst.msk [vmem:[%s3967_s23 + $0x13c] sm:$0xf] %vm2513_vm1, %v2998_v61  ;;  %v2025_v2 = vadd.f32 %v4422_v20, %v1632_v48  ;;  %v1635_v8 = vadd.f32 %v4289_v34, %v1634_v5  ;;  %v1636_v16 = vpop.f32.mrb[163].mxu1  ;;  %v2059_v23 = vpop.f32.mrb[178].mxu0 }
 0x25d   : > { %v3257_v17 = vpop.f32.mrb[179].mxu0 }
 0x25e   : > { %v2143_v19 = vmax.f32 %v2025_v2, 0.0  ;;  %v2028_v6 = vadd.f32 %v2027_v24, %v1635_v8 }
 0x260   : > { %v2999_v11 = vpack.c.bf16 %v2143_v19, %v2143_v19  ;;  %v2144_v10 = vmax.f32 %v2028_v6, 0.0 }
 0x261   : > { %v1639_v14 = vpop.f32.mrb[164].mxu1 }
 0x262   : > { %2594 = vst.msk [vmem:[%s3967_s23 + $0x140] sm:$0xf] %vm2513_vm1, %v2999_v11  ;;  %v3000_v27 = vpack.c.bf16 %v2144_v10, %v2144_v10  ;;  %v1640_v7 = vadd.f32 %v4289_v34, %v1639_v14  ;;  %v1641_v28 = vpop.f32.mrb[165].mxu1 }
 0x263   : > { %v1642_v20 = vpop.f32.mrb[166].mxu1 }
 0x264   : > { %2595 = vst.msk [vmem:[%s3967_s23 + $0x144] sm:$0xf] %vm2513_vm1, %v3000_v27  ;;  %v2033_v18 = vadd.f32 %v4431_v60, %v1640_v7  ;;  %v1643_v24 = vadd.f32 %v4289_v34, %v1642_v20  ;;  %v1644_v3 = vpop.f32.mrb[167].mxu1 }
 0x266   : > { %v2145_v21 = vmax.f32 %v2033_v18, 0.0  ;;  %v2036_v31 = vadd.f32 %v2035_v26, %v1643_v24 }
 0x268   : > { %v3001_v30 = vpack.c.bf16 %v2145_v21, %v2145_v21  ;;  %v2146_v38 = vmax.f32 %v2036_v31, 0.0 }
 0x269   : > { %v1647_v25 = vpop.f32.mrb[168].mxu1 }
 0x26a   : > { %2596 = vst.msk [vmem:[%s3967_s23 + $0x148] sm:$0xf] %vm2513_vm1, %v3001_v30  ;;  %v3002_v35 = vpack.c.bf16 %v2146_v38, %v2146_v38  ;;  %v1648_v42 = vadd.f32 %v4289_v34, %v1647_v25  ;;  %v1649_v22 = vpop.f32.mrb[169].mxu1 }
 0x26b   : > { %v1650_v43 = vpop.f32.mrb[170].mxu1 }
 0x26c   : > { %2597 = vst.msk [vmem:[%s3967_s23 + $0x14c] sm:$0xf] %vm2513_vm1, %v3002_v35  ;;  %v2041_v60 = vadd.f32 %v2040_v50, %v1648_v42  ;;  %v1651_v29 = vadd.f32 %v4289_v34, %v1650_v43  ;;  %v1652_v39 = vpop.f32.mrb[171].mxu1 }
 0x26e   : > { %v2147_v46 = vmax.f32 %v2041_v60, 0.0  ;;  %v2044_v26 = vadd.f32 %v2043_v32, %v1651_v29 }
 0x270   : > { %v3003_v47 = vpack.c.bf16 %v2147_v46, %v2147_v46  ;;  %v2148_v37 = vmax.f32 %v2044_v26, 0.0 }
 0x271   : > { %v1655_v40 = vpop.f32.mrb[172].mxu1 }
 0x272   : > { %2598 = vst.msk [vmem:[%s3967_s23 + $0x150] sm:$0xf] %vm2513_vm1, %v3003_v47  ;;  %v3004_v36 = vpack.c.bf16 %v2148_v37, %v2148_v37  ;;  %v1656_v54 = vadd.f32 %v4289_v34, %v1655_v40  ;;  %v1657_v53 = vpop.f32.mrb[173].mxu1 }
 0x273   : > { %v1658_v45 = vpop.f32.mrb[174].mxu1 }
 0x274   : > { %2599 = vst.msk [vmem:[%s3967_s23 + $0x154] sm:$0xf] %vm2513_vm1, %v3004_v36  ;;  %v2049_v50 = vadd.f32 %v2048_v51, %v1656_v54  ;;  %v1659_v33 = vadd.f32 %v4289_v34, %v1658_v45  ;;  %v1660_v57 = vpop.f32.mrb[175].mxu1 }
 0x276   : > { %v2149_v44 = vmax.f32 %v2049_v50, 0.0  ;;  %v2052_v49 = vadd.f32 %v2051_v52, %v1659_v33 }
 0x278   : > { %v3005_v32 = vpack.c.bf16 %v2149_v44, %v2149_v44  ;;  %v2150_v58 = vmax.f32 %v2052_v49, 0.0 }
 0x279   : > { %v1663_v41 = vpop.f32.mrb[176].mxu1 }
 0x27a   : > { %2600 = vst.msk [vmem:[%s3967_s23 + $0x158] sm:$0xf] %vm2513_vm1, %v3005_v32  ;;  %v3006_v63 = vpack.c.bf16 %v2150_v58, %v2150_v58  ;;  %v1664_v0 = vadd.f32 %v4289_v34, %v1663_v41  ;;  %v1665_v4 = vpop.f32.mrb[177].mxu1 }
 0x27b   : > { %v1666_v59 = vpop.f32.mrb[178].mxu1 }
 0x27c   : > { %2601 = vst.msk [vmem:[%s3967_s23 + $0x15c] sm:$0xf] %vm2513_vm1, %v3006_v63  ;;  %v2057_v56 = vadd.f32 %v2056_v15, %v1664_v0  ;;  %v1667_v9 = vadd.f32 %v4289_v34, %v1666_v59  ;;  %v1668_v55 = vpop.f32.mrb[179].mxu1 }
 0x27e   : > { %v2151_v51 = vmax.f32 %v2057_v56, 0.0  ;;  %v2060_v61 = vadd.f32 %v2059_v23, %v1667_v9 }
 0x280   : > { %v3007_v48 = vpack.c.bf16 %v2151_v51, %v2151_v51  ;;  %v2152_v12 = vmax.f32 %v2060_v61, 0.0 }
 0x282   : > { %2602 = vst.msk [vmem:[%s3967_s23 + $0x160] sm:$0xf] %vm2513_vm1, %v3007_v48  ;;  %v3008_v62 = vpack.c.bf16 %v2152_v12, %v2152_v12 }
 0x284   : > { %2603 = vst.msk [vmem:[%s3967_s23 + $0x164] sm:$0xf] %vm2513_vm1, %v3008_v62 }
 0x285 PF: > { %s13_s12 = sadd.s32 1, %s3661_s12  }
 0x286   : > { %p10_p4 = scmp.ge.s32.totalorder %s13_s12, 7  }
 0x288   :  { %12 = sbr.rel (!%p10_p4) target bundleno = 1 (0x1), region = 62 }

// kernel: icm_forward.8
= control target key start
LH: loop header
LB: loop body
LE: loop exit
PB: predicated region body
PF: predicated region fallthrough
CT: control target
= control target key end

     0   :  { %v6425_v0 = vmov 0   ;;  %v8123_v39 = vmov 0.0   ;;  %vm6427_vm0 = vmmov 0   ;;  %s8119_s1 = inlined_call_operand.vmem [shape: bf16[640,128], index: 1, kind: input, shape index: {}]   ;;  %s8120_s0 = inlined_call_operand.vmem [shape: bf16[900,640], index: 0, kind: input, shape index: {}]   ;;  %s8121_s2 = inlined_call_operand.vmem [shape: f32[1,128], index: 2, kind: input, shape index: {}]   ;;  %s8122_s3 = inlined_call_operand.vmem [shape: bf16[900,128], index: 3, kind: output, shape index: {}]  }
   0x1   :  { %2155 = vmatprep.subr.bf16.mxu1 %v6425_v0  ;;  %2643 = vmatprep.subr.bf16.mxu0 %v6425_v0  ;;  %v5987_v1 = vld [vmem:[%s8119_s1] sm:$0xff]   ;;  %v5989_v3 = vld [vmem:[%s8119_s1 + $0x8] sm:$0xff]   ;;  %v5991_v5 = vld [vmem:[%s8119_s1 + $0x10] sm:$0xff]  }
   0x2   :  { %v6456_v2 = vld [vmem:[%s8119_s1 + $0x80] sm:$0xff]   ;;  %2156 = vmatpush1.bf16.msra.mxu1 %v5987_v1  ;;  %v6466_v4 = vld [vmem:[%s8119_s1 + $0x88] sm:$0xff]   ;;  %v6477_v6 = vld [vmem:[%s8119_s1 + $0x90] sm:$0xff]  }
   0x3   :  { %2644 = vmatpush1.bf16.msra.mxu0 %v6456_v2  ;;  %2157 = vmatprep.subr.bf16.mxu1 %v6425_v0  ;;  %v5993_v7 = vld [vmem:[%s8119_s1 + $0x18] sm:$0xff]   ;;  %v5995_v9 = vld [vmem:[%s8119_s1 + $0x20] sm:$0xff]   ;;  %v5997_v11 = vld [vmem:[%s8119_s1 + $0x28] sm:$0xff]  }
   0x4   :  { %2645 = vmatprep.subr.bf16.mxu0 %v6425_v0  ;;  %v6488_v8 = vld [vmem:[%s8119_s1 + $0x98] sm:$0xff]   ;;  %v6499_v10 = vld [vmem:[%s8119_s1 + $0xa0] sm:$0xff]   ;;  %v6510_v12 = vld [vmem:[%s8119_s1 + $0xa8] sm:$0xff]  }
   0x5   :  { %v5999_v13 = vld [vmem:[%s8119_s1 + $0x30] sm:$0xff]   ;;  %v6001_v15 = vld [vmem:[%s8119_s1 + $0x38] sm:$0xff]   ;;  %v6003_v17 = vld [vmem:[%s8119_s1 + $0x40] sm:$0xff]  }
   0x6   :  { %2158 = vmatpush1.bf16.msra.mxu1 %v5989_v3  ;;  %v6521_v14 = vld [vmem:[%s8119_s1 + $0xb0] sm:$0xff]   ;;  %v6532_v16 = vld [vmem:[%s8119_s1 + $0xb8] sm:$0xff]   ;;  %v6543_v18 = vld [vmem:[%s8119_s1 + $0xc0] sm:$0xff]  }
   0x7   :  { %2646 = vmatpush1.bf16.msra.mxu0 %v6466_v4  ;;  %2159 = vmatprep.subr.bf16.mxu1 %v6425_v0  ;;  %v6021_v19 = vld [vmem:[%s8120_s0 + $0x4] ss:$20 sps:$4 sm:$0xff]   ;;  %v6005_v20 = vld [vmem:[%s8119_s1 + $0x48] sm:$0xff]   ;;  %v6007_v23 = vld [vmem:[%s8119_s1 + $0x50] sm:$0xff]  }
   0x8   :  { %2647 = vmatprep.subr.bf16.mxu0 %v6425_v0  ;;  %v6024_v21 = vld [vmem:[%s8120_s0 + $0xc] ss:$20 sps:$4 sm:$0xff]   ;;  %2187 = vmatprep.mubr.bf16.mxu1 %v6021_v19  ;;  %v6571_v24 = vld [vmem:[%s8119_s1 + $0xd0] sm:$0xff]   ;;  %v6009_v25 = vld [vmem:[%s8119_s1 + $0x58] sm:$0xff]  }
   0x9   :  { %v6560_v22 = vld [vmem:[%s8119_s1 + $0xc8] sm:$0xff]   ;;  %2675 = vmatprep.mubr.bf16.mxu0 %v6024_v21  ;;  %v6582_v26 = vld [vmem:[%s8119_s1 + $0xd8] sm:$0xff]   ;;  %v6011_v27 = vld [vmem:[%s8119_s1 + $0x60] sm:$0xff]  }
   0xa   :  { %2160 = vmatpush1.bf16.msra.mxu1 %v5991_v5  ;;  %v6593_v28 = vld [vmem:[%s8119_s1 + $0xe0] sm:$0xff]   ;;  %v6013_v29 = vld [vmem:[%s8119_s1 + $0x68] sm:$0xff]   ;;  %v6015_v31 = vld [vmem:[%s8119_s1 + $0x70] sm:$0xff]  }
   0xb   :  { %2648 = vmatpush1.bf16.msra.mxu0 %v6477_v6  ;;  %2161 = vmatprep.subr.bf16.mxu1 %v6425_v0  ;;  %v6604_v30 = vld [vmem:[%s8119_s1 + $0xe8] sm:$0xff]   ;;  %v6615_v32 = vld [vmem:[%s8119_s1 + $0xf0] sm:$0xff]   ;;  %v6017_v33 = vld [vmem:[%s8119_s1 + $0x78] sm:$0xff]  }
   0xc   :  { %2649 = vmatprep.subr.bf16.mxu0 %v6425_v0  ;;  %v6626_v34 = vld [vmem:[%s8119_s1 + $0xf8] sm:$0xff]   ;;  %v6019_v35 = vld [vmem:[%s8120_s0] ss:$20 sps:$4 sm:$0xff]   ;;  %v6044_v41 = vld [vmem:[%s8119_s1 + $0x108] sm:$0xff]  }
   0xd   :  { %v6022_v36 = vld [vmem:[%s8120_s0 + $0x8] ss:$20 sps:$4 sm:$0xff]   ;;  %v6026_v37 = vld [vmem:[%s8120_s0 + $0x2c] ss:$20 sps:$4 sm:$0xff]   ;;  %v6031_v43 = vld [vmem:[%s8120_s0 + $0x30] ss:$20 sps:$4 sm:$0xff]  }
   0xe   :  { %2162 = vmatpush1.bf16.msra.mxu1 %v5993_v7  ;;  %v6025_v38 = vld [vmem:[%s8119_s1 + $0x100] sm:$0xff]   ;;  %v6028_v40 = vld [vmem:[%s8120_s0 + $0x34] ss:$20 sps:$4 sm:$0xff]   ;;  %v6034_v45 = vld [vmem:[%s8120_s0 + $0x5c] ss:$20 sps:$4 sm:$0xff]  }
   0xf   :  { %2650 = vmatpush1.bf16.msra.mxu0 %v6488_v8  ;;  %2163 = vmatprep.subr.bf16.mxu1 %v6425_v0  ;;  %v6030_v42 = vld [vmem:[%s8120_s0 + $0x28] ss:$20 sps:$4 sm:$0xff]   ;;  %v6069_v46 = vld [vmem:[%s8119_s1 + $0x110] sm:$0xff]   ;;  %v6037_v49 = vld [vmem:[%s8120_s0 + $0x58] ss:$20 sps:$4 sm:$0xff]  }
  0x10   :  { %2651 = vmatprep.subr.bf16.mxu0 %v6425_v0  ;;  %v6032_v44 = vld [vmem:[%s8120_s0 + $0x54] ss:$20 sps:$4 sm:$0xff]   ;;  %v6094_v47 = vld [vmem:[%s8119_s1 + $0x118] sm:$0xff]   ;;  %v6036_v48 = vld [vmem:[%s8120_s0 + $0x50] ss:$20 sps:$4 sm:$0xff]  }
  0x11   :  { %v6038_v50 = vld [vmem:[%s8120_s0 + $0x7c] ss:$20 sps:$4 sm:$0xff]   ;;  %v6040_v51 = vld [vmem:[%s8120_s0 + $0x84] ss:$20 sps:$4 sm:$0xff]   ;;  %v6043_v54 = vld [vmem:[%s8120_s0 + $0x80] ss:$20 sps:$4 sm:$0xff]  }
  0x12   :  { %2164 = vmatpush1.bf16.msra.mxu1 %v5995_v9  ;;  %v6113_v52 = vld [vmem:[%s8119_s1 + $0x120] sm:$0xff]   ;;  %v6042_v53 = vld [vmem:[%s8120_s0 + $0x78] ss:$20 sps:$4 sm:$0xff]   ;;  %v6050_v59 = vld [vmem:[%s8120_s0 + $0xa8] ss:$20 sps:$4 sm:$0xff]  }
  0x13   :  { %2652 = vmatpush1.bf16.msra.mxu0 %v6499_v10  ;;  %2165 = vmatprep.subr.bf16.mxu1 %v6425_v0  ;;  %v6045_v55 = vld [vmem:[%s8120_s0 + $0xa4] ss:$20 sps:$4 sm:$0xff]   ;;  %v6047_v56 = vld [vmem:[%s8120_s0 + $0xac] ss:$20 sps:$4 sm:$0xff]   ;;  %v6053_v61 = vld [vmem:[%s8120_s0 + $0xd4] ss:$20 sps:$4 sm:$0xff]  }
  0x14   :  { %2653 = vmatprep.subr.bf16.mxu0 %v6425_v0  ;;  %v6138_v57 = vld [vmem:[%s8119_s1 + $0x128] sm:$0xff]   ;;  %v6049_v58 = vld [vmem:[%s8120_s0 + $0xa0] ss:$20 sps:$4 sm:$0xff]   ;;  %v6056_v63 = vld [vmem:[%s8120_s0 + $0xd0] ss:$20 sps:$4 sm:$0xff]  }
  0x15   :  { %v6051_v60 = vld [vmem:[%s8120_s0 + $0xcc] ss:$20 sps:$4 sm:$0xff]   ;;  %v6055_v62 = vld [vmem:[%s8120_s0 + $0xc8] ss:$20 sps:$4 sm:$0xff]   ;;  %v6061_v3 = vld [vmem:[%s8120_s0 + $0xf0] ss:$20 sps:$4 sm:$0xff]  }
  0x16   :  { %2166 = vmatpush1.bf16.msra.mxu1 %v5997_v11  ;;  %v6057_v1 = vld [vmem:[%s8120_s0 + $0xf4] ss:$20 sps:$4 sm:$0xff]   ;;  %v6062_v5 = vld [vmem:[%s8120_s0 + $0xf8] ss:$20 sps:$4 sm:$0xff]  }
  0x17   :  { %2654 = vmatpush1.bf16.msra.mxu0 %v6510_v12  ;;  %2167 = vmatprep.subr.bf16.mxu1 %v6425_v0  ;;  %v6065_v7 = vld [vmem:[%s8120_s0 + $0x124] ss:$20 sps:$4 sm:$0xff]   ;;  %v6068_v9 = vld [vmem:[%s8120_s0 + $0x120] ss:$20 sps:$4 sm:$0xff]  }
  0x18   :  { %2655 = vmatprep.subr.bf16.mxu0 %v6425_v0  ;;  %v6072_v11 = vld [vmem:[%s8120_s0 + $0x14c] ss:$20 sps:$4 sm:$0xff]   ;;  %v6182_v19 = vld [vmem:[%s8119_s1 + $0x138] sm:$0xff]  }
  0x19   :  { %v6087_v21 = vld [vmem:[%s8120_s0 + $0x198] ss:$20 sps:$4 sm:$0xff]  }
  0x1a   :  { %2168 = vmatpush1.bf16.msra.mxu1 %v5999_v13  ;;  %v6075_v13 = vld [vmem:[%s8120_s0 + $0x148] ss:$20 sps:$4 sm:$0xff]  }
  0x1b   :  { %2656 = vmatpush1.bf16.msra.mxu0 %v6521_v14  ;;  %2169 = vmatprep.subr.bf16.mxu1 %v6425_v0 }
  0x1c   :  { %2657 = vmatprep.subr.bf16.mxu0 %v6425_v0 }
  0x1e   :  { %2170 = vmatpush1.bf16.msra.mxu1 %v6001_v15  ;;  %v6078_v15 = vld [vmem:[%s8120_s0 + $0x174] ss:$20 sps:$4 sm:$0xff]  }
  0x1f   :  { %2658 = vmatpush1.bf16.msra.mxu0 %v6532_v16  ;;  %2171 = vmatprep.subr.bf16.mxu1 %v6425_v0 }
  0x20   :  { %2659 = vmatprep.subr.bf16.mxu0 %v6425_v0 }
  0x22   :  { %2172 = vmatpush1.bf16.msra.mxu1 %v6003_v17  ;;  %v6081_v17 = vld [vmem:[%s8120_s0 + $0x170] ss:$20 sps:$4 sm:$0xff]  }
  0x23   :  { %2660 = vmatpush1.bf16.msra.mxu0 %v6543_v18  ;;  %2173 = vmatprep.subr.bf16.mxu1 %v6425_v0 }
  0x24   :  { %2661 = vmatprep.subr.bf16.mxu0 %v6425_v0 }
  0x26   :  { %2174 = vmatpush1.bf16.msra.mxu1 %v6005_v20  ;;  %v6086_v20 = vld [vmem:[%s8120_s0 + $0x190] ss:$20 sps:$4 sm:$0xff]  }
  0x27   :  { %2662 = vmatpush1.bf16.msra.mxu0 %v6560_v22  ;;  %2175 = vmatprep.subr.bf16.mxu1 %v6425_v0 }
  0x28   :  { %2663 = vmatprep.subr.bf16.mxu0 %v6425_v0 }
  0x2a   :  { %2176 = vmatpush1.bf16.msra.mxu1 %v6007_v23  ;;  %v6090_v23 = vld [vmem:[%s8120_s0 + $0x1c4] ss:$20 sps:$4 sm:$0xff]  }
  0x2b   :  { %2664 = vmatpush1.bf16.msra.mxu0 %v6571_v24  ;;  %2177 = vmatprep.subr.bf16.mxu1 %v6425_v0 }
  0x2c   :  { %2665 = vmatprep.subr.bf16.mxu0 %v6425_v0 }
  0x2e   :  { %2178 = vmatpush1.bf16.msra.mxu1 %v6009_v25  ;;  %v6093_v25 = vld [vmem:[%s8120_s0 + $0x1c0] ss:$20 sps:$4 sm:$0xff]  }
  0x2f   :  { %2666 = vmatpush1.bf16.msra.mxu0 %v6582_v26  ;;  %2179 = vmatprep.subr.bf16.mxu1 %v6425_v0 }
  0x30   :  { %2667 = vmatprep.subr.bf16.mxu0 %v6425_v0 }
  0x32   :  { %2180 = vmatpush1.bf16.msra.mxu1 %v6011_v27  ;;  %v6097_v27 = vld [vmem:[%s8120_s0 + $0x1ec] ss:$20 sps:$4 sm:$0xff]  }
  0x33   :  { %2668 = vmatpush1.bf16.msra.mxu0 %v6593_v28  ;;  %2181 = vmatprep.subr.bf16.mxu1 %v6425_v0 }
  0x34   :  { %2669 = vmatprep.subr.bf16.mxu0 %v6425_v0 }
  0x36   :  { %2182 = vmatpush1.bf16.msra.mxu1 %v6013_v29  ;;  %v6100_v29 = vld [vmem:[%s8120_s0 + $0x1e8] ss:$20 sps:$4 sm:$0xff]  }
  0x37   :  { %2670 = vmatpush1.bf16.msra.mxu0 %v6604_v30  ;;  %2183 = vmatprep.subr.bf16.mxu1 %v6425_v0 }
  0x38   :  { %2671 = vmatprep.subr.bf16.mxu0 %v6425_v0 }
  0x3a   :  { %2184 = vmatpush1.bf16.msra.mxu1 %v6015_v31  ;;  %v6103_v31 = vld [vmem:[%s8120_s0 + $0x214] ss:$20 sps:$4 sm:$0xff]  }
  0x3b   :  { %2672 = vmatpush1.bf16.msra.mxu0 %v6615_v32  ;;  %2185 = vmatprep.subr.bf16.mxu1 %v6425_v0 }
  0x3c   :  { %2673 = vmatprep.subr.bf16.mxu0 %v6425_v0 }
  0x3e   :  { %2186 = vmatpush1.bf16.msra.mxu1 %v6017_v33  ;;  %v6106_v33 = vld [vmem:[%s8120_s0 + $0x210] ss:$20 sps:$4 sm:$0xff]  }
  0x3f   :  { %2674 = vmatpush1.bf16.msra.mxu0 %v6626_v34  ;;  %5498 = vmatprep.subr.bf16.mxu1 %v6425_v0 }
  0x40   :  { %5254 = vmatprep.subr.bf16.mxu0 %v8123_v39 }
  0x41   :  { %2188 = vmatmul.mubr.bf16.vlgmr.msra.gmra.mrb[0].mxu1 %v6019_v35  ;;  %v6109_v35 = vld [vmem:[%s8120_s0 + $0x23c] ss:$20 sps:$4 sm:$0xff]  }
  0x42   :  { %2676 = vmatmul.mubr.bf16.vlgmr.msra.gmra.mrb[0].mxu0 %v6022_v36  ;;  %2195 = vmatprep.mubr.bf16.mxu1 %v6026_v37  ;;  %v6111_v36 = vld [vmem:[%s8120_s0 + $0x230] ss:$20 sps:$4 sm:$0xff]   ;;  %v6112_v37 = vld [vmem:[%s8120_s0 + $0x238] ss:$20 sps:$4 sm:$0xff]  }
  0x43   :  { %5255 = vmatpush3.bf16.msra.mxu0 %v6025_v38  ;;  %5514 = vmatpush1.bf16.msra.mxu1 %v6456_v2  ;;  %v6059_v2 = vld [vmem:[%s8120_s0 + $0xfc] ss:$20 sps:$4 sm:$0xff]  }
  0x44   :  { %2683 = vmatprep.mubr.bf16.mxu0 %v6028_v40  ;;  %5256 = vmatprep.subr.bf16.mxu0 %v8123_v39  ;;  %v6114_v38 = vld [vmem:[%s8120_s0 + $0x25c] ss:$20 sps:$4 sm:$0xff]   ;;  %v6116_v40 = vld [vmem:[%s8120_s0 + $0x264] ss:$20 sps:$4 sm:$0xff]  }
  0x45   :  { %5499 = vmatprep.subr.bf16.mxu1 %v6425_v0 }
  0x47   :  { %5257 = vmatpush3.bf16.msra.mxu0 %v6044_v41  ;;  %5515 = vmatpush1.bf16.msra.mxu1 %v6466_v4  ;;  %v6161_v4 = vld [vmem:[%s8119_s1 + $0x130] sm:$0xff]   ;;  %v6118_v41 = vld [vmem:[%s8120_s0 + $0x258] ss:$20 sps:$4 sm:$0xff]  }
  0x48   :  { %5258 = vmatprep.subr.bf16.mxu0 %v8123_v39  ;;  %5500 = vmatprep.subr.bf16.mxu1 %v6425_v0 }
  0x49   :  { %2196 = vmatmul.mubr.bf16.gmra.mrb[4].mxu1 %v6030_v42  ;;  %v6119_v42 = vld [vmem:[%s8120_s0 + $0x260] ss:$20 sps:$4 sm:$0xff]  }
  0x4a   :  { %2684 = vmatmul.mubr.bf16.gmra.mrb[4].mxu0 %v6031_v43  ;;  %2203 = vmatprep.mubr.bf16.mxu1 %v6032_v44  ;;  %v6120_v43 = vld [vmem:[%s8120_s0 + $0x284] ss:$20 sps:$4 sm:$0xff]   ;;  %v6122_v44 = vld [vmem:[%s8120_s0 + $0x28c] ss:$20 sps:$4 sm:$0xff]  }
  0x4b   :  { %2691 = vmatprep.mubr.bf16.mxu0 %v6034_v45  ;;  %5259 = vmatpush3.bf16.msra.mxu0 %v6069_v46  ;;  %v6124_v45 = vld [vmem:[%s8120_s0 + $0x280] ss:$20 sps:$4 sm:$0xff]   ;;  %v6125_v46 = vld [vmem:[%s8120_s0 + $0x288] ss:$20 sps:$4 sm:$0xff]  }
  0x4c   :  { %5516 = vmatpush1.bf16.msra.mxu1 %v6477_v6  ;;  %5260 = vmatprep.subr.bf16.mxu0 %v8123_v39  ;;  %v6063_v6 = vld [vmem:[%s8120_s0 + $0x11c] ss:$20 sps:$4 sm:$0xff]  }
  0x4d   :  { %5501 = vmatprep.subr.bf16.mxu1 %v6425_v0 }
  0x4f   :  { %5261 = vmatpush3.bf16.msra.mxu0 %v6094_v47  ;;  %v6126_v47 = vld [vmem:[%s8120_s0 + $0x2ac] ss:$20 sps:$4 sm:$0xff]  }
  0x50   :  { %5517 = vmatpush1.bf16.msra.mxu1 %v6488_v8  ;;  %5262 = vmatprep.subr.bf16.mxu0 %v8123_v39  ;;  %v6067_v8 = vld [vmem:[%s8120_s0 + $0x118] ss:$20 sps:$4 sm:$0xff]  }
  0x51   :  { %2204 = vmatmul.mubr.bf16.gmra.mrb[8].mxu1 %v6036_v48  ;;  %5502 = vmatprep.subr.bf16.mxu1 %v6425_v0  ;;  %v6128_v48 = vld [vmem:[%s8120_s0 + $0x2b4] ss:$20 sps:$4 sm:$0xff]  }
  0x52   :  { %2692 = vmatmul.mubr.bf16.gmra.mrb[8].mxu0 %v6037_v49  ;;  %2211 = vmatprep.mubr.bf16.mxu1 %v6038_v50  ;;  %v6130_v49 = vld [vmem:[%s8120_s0 + $0x2a8] ss:$20 sps:$4 sm:$0xff]   ;;  %v6131_v50 = vld [vmem:[%s8120_s0 + $0x2b0] ss:$20 sps:$4 sm:$0xff]  }
  0x53   :  { %2699 = vmatprep.mubr.bf16.mxu0 %v6040_v51  ;;  %5263 = vmatpush3.bf16.msra.mxu0 %v6113_v52  ;;  %v6132_v51 = vld [vmem:[%s8120_s0 + $0x2d4] ss:$20 sps:$4 sm:$0xff]   ;;  %v6134_v52 = vld [vmem:[%s8120_s0 + $0x2dc] ss:$20 sps:$4 sm:$0xff]  }
  0x54   :  { %5518 = vmatpush1.bf16.msra.mxu1 %v6499_v10  ;;  %5264 = vmatprep.subr.bf16.mxu0 %v8123_v39  ;;  %v6070_v10 = vld [vmem:[%s8120_s0 + $0x144] ss:$20 sps:$4 sm:$0xff]  }
  0x55   :  { %5503 = vmatprep.subr.bf16.mxu1 %v6425_v0 }
  0x57   :  { %5265 = vmatpush3.bf16.msra.mxu0 %v6138_v57  ;;  %v6143_v57 = vld [vmem:[%s8120_s0 + $0x2f8] ss:$20 sps:$4 sm:$0xff]  }
  0x58   :  { %5519 = vmatpush1.bf16.msra.mxu1 %v6510_v12  ;;  %5266 = vmatprep.subr.bf16.mxu0 %v8123_v39  ;;  %v6074_v12 = vld [vmem:[%s8120_s0 + $0x140] ss:$20 sps:$4 sm:$0xff]  }
  0x59   :  { %2212 = vmatmul.mubr.bf16.gmra.mrb[12].mxu1 %v6042_v53  ;;  %5504 = vmatprep.subr.bf16.mxu1 %v6425_v0  ;;  %v6136_v53 = vld [vmem:[%s8120_s0 + $0x2d0] ss:$20 sps:$4 sm:$0xff]  }
  0x5a   :  { %2700 = vmatmul.mubr.bf16.gmra.mrb[12].mxu0 %v6043_v54  ;;  %2219 = vmatprep.mubr.bf16.mxu1 %v6045_v55  ;;  %v6137_v54 = vld [vmem:[%s8120_s0 + $0x2d8] ss:$20 sps:$4 sm:$0xff]   ;;  %v6139_v55 = vld [vmem:[%s8120_s0 + $0x2fc] ss:$20 sps:$4 sm:$0xff]  }
  0x5b   :  { %2707 = vmatprep.mubr.bf16.mxu0 %v6047_v56  ;;  %5267 = vmatpush3.bf16.msra.mxu0 %v6161_v4  ;;  %v6141_v56 = vld [vmem:[%s8120_s0 + $0x304] ss:$20 sps:$4 sm:$0xff]   ;;  %v6157_v4 = vld [vmem:[%s8120_s0 + $0x374] ss:$20 sps:$4 sm:$0xff]  }
  0x5c   :  { %5520 = vmatpush1.bf16.msra.mxu1 %v6521_v14  ;;  %5268 = vmatprep.subr.bf16.mxu0 %v8123_v39  ;;  %v6076_v14 = vld [vmem:[%s8120_s0 + $0x16c] ss:$20 sps:$4 sm:$0xff]  }
  0x5d   :  { %5505 = vmatprep.subr.bf16.mxu1 %v6425_v0 }
  0x5f   :  { %5269 = vmatpush3.bf16.msra.mxu0 %v6182_v19  ;;  %v6183_v19 = vld [vmem:[%s8120_s0 + $0x414] ss:$20 sps:$4 sm:$0xff]  }
  0x60   :  { %5521 = vmatpush1.bf16.msra.mxu1 %v6532_v16  ;;  %v6080_v16 = vld [vmem:[%s8120_s0 + $0x168] ss:$20 sps:$4 sm:$0xff]  }
  0x61   :  { %2220 = vmatmul.mubr.bf16.gmra.mrb[16].mxu1 %v6049_v58  ;;  %5506 = vmatprep.subr.bf16.mxu1 %v6425_v0  ;;  %v6144_v58 = vld [vmem:[%s8120_s0 + $0x300] ss:$20 sps:$4 sm:$0xff]  }
  0x62   :  { %2708 = vmatmul.mubr.bf16.gmra.mrb[16].mxu0 %v6050_v59  ;;  %2227 = vmatprep.mubr.bf16.mxu1 %v6051_v60  ;;  %v6145_v59 = vld [vmem:[%s8120_s0 + $0x324] ss:$20 sps:$4 sm:$0xff]   ;;  %v6147_v60 = vld [vmem:[%s8120_s0 + $0x32c] ss:$20 sps:$4 sm:$0xff]  }
  0x63   :  { %2715 = vmatprep.mubr.bf16.mxu0 %v6053_v61  ;;  %v6149_v61 = vld [vmem:[%s8120_s0 + $0x320] ss:$20 sps:$4 sm:$0xff]  }
  0x64   :  { %5522 = vmatpush1.bf16.msra.mxu1 %v6543_v18  ;;  %v6082_v18 = vld [vmem:[%s8120_s0 + $0x194] ss:$20 sps:$4 sm:$0xff]  }
  0x65   :  { %5507 = vmatprep.subr.bf16.mxu1 %v6425_v0 }
  0x68   :  { %5523 = vmatpush1.bf16.msra.mxu1 %v6560_v22  ;;  %v6088_v22 = vld [vmem:[%s8120_s0 + $0x1bc] ss:$20 sps:$4 sm:$0xff]  }
  0x69   :  { %2228 = vmatmul.mubr.bf16.gmra.mrb[20].mxu1 %v6055_v62  ;;  %5508 = vmatprep.subr.bf16.mxu1 %v6425_v0  ;;  %v6150_v62 = vld [vmem:[%s8120_s0 + $0x328] ss:$20 sps:$4 sm:$0xff]  }
  0x6a   :  { %2716 = vmatmul.mubr.bf16.gmra.mrb[20].mxu0 %v6056_v63  ;;  %2235 = vmatprep.mubr.bf16.mxu1 %v6057_v1  ;;  %v6151_v63 = vld [vmem:[%s8120_s0 + $0x34c] ss:$20 sps:$4 sm:$0xff]   ;;  %v6153_v1 = vld [vmem:[%s8120_s0 + $0x354] ss:$20 sps:$4 sm:$0xff]  }
  0x6b   :  { %2723 = vmatprep.mubr.bf16.mxu0 %v6059_v2  ;;  %v6155_v2 = vld [vmem:[%s8120_s0 + $0x348] ss:$20 sps:$4 sm:$0xff]  }
  0x6c   :  { %5524 = vmatpush1.bf16.msra.mxu1 %v6571_v24  ;;  %v6092_v24 = vld [vmem:[%s8120_s0 + $0x1b8] ss:$20 sps:$4 sm:$0xff]  }
  0x6d   :  { %5509 = vmatprep.subr.bf16.mxu1 %v6425_v0 }
  0x70   :  { %5525 = vmatpush1.bf16.msra.mxu1 %v6582_v26  ;;  %v6095_v26 = vld [vmem:[%s8120_s0 + $0x1e4] ss:$20 sps:$4 sm:$0xff]  }
  0x71   :  { %2236 = vmatmul.mubr.bf16.gmra.mrb[24].mxu1 %v6061_v3  ;;  %5510 = vmatprep.subr.bf16.mxu1 %v6425_v0  ;;  %v6156_v3 = vld [vmem:[%s8120_s0 + $0x350] ss:$20 sps:$4 sm:$0xff]  }
  0x72   :  { %2724 = vmatmul.mubr.bf16.gmra.mrb[24].mxu0 %v6062_v5  ;;  %2243 = vmatprep.mubr.bf16.mxu1 %v6063_v6  ;;  %v6159_v5 = vld [vmem:[%s8120_s0 + $0x37c] ss:$20 sps:$4 sm:$0xff]  }
  0x73   :  { %2731 = vmatprep.mubr.bf16.mxu0 %v6065_v7  ;;  %v6162_v6 = vld [vmem:[%s8120_s0 + $0x370] ss:$20 sps:$4 sm:$0xff]   ;;  %v6163_v7 = vld [vmem:[%s8120_s0 + $0x378] ss:$20 sps:$4 sm:$0xff]  }
  0x74   :  { %5526 = vmatpush1.bf16.msra.mxu1 %v6593_v28  ;;  %v6099_v28 = vld [vmem:[%s8120_s0 + $0x1e0] ss:$20 sps:$4 sm:$0xff]  }
  0x75   :  { %5511 = vmatprep.subr.bf16.mxu1 %v6425_v0 }
  0x78   :  { %5527 = vmatpush1.bf16.msra.mxu1 %v6604_v30  ;;  %v6101_v30 = vld [vmem:[%s8120_s0 + $0x20c] ss:$20 sps:$4 sm:$0xff]  }
  0x79   :  { %2244 = vmatmul.mubr.bf16.gmra.mrb[28].mxu1 %v6067_v8  ;;  %5512 = vmatprep.subr.bf16.mxu1 %v6425_v0  ;;  %v6164_v8 = vld [vmem:[%s8120_s0 + $0x39c] ss:$20 sps:$4 sm:$0xff]  }
  0x7a   :  { %2732 = vmatmul.mubr.bf16.gmra.mrb[28].mxu0 %v6068_v9  ;;  %2251 = vmatprep.mubr.bf16.mxu1 %v6070_v10  ;;  %v6166_v9 = vld [vmem:[%s8120_s0 + $0x3a4] ss:$20 sps:$4 sm:$0xff]  }
  0x7b   :  { %2739 = vmatprep.mubr.bf16.mxu0 %v6072_v11  ;;  %v6168_v10 = vld [vmem:[%s8120_s0 + $0x398] ss:$20 sps:$4 sm:$0xff]   ;;  %v6169_v11 = vld [vmem:[%s8120_s0 + $0x3a0] ss:$20 sps:$4 sm:$0xff]  }
  0x7c   :  { %5528 = vmatpush1.bf16.msra.mxu1 %v6615_v32  ;;  %v6105_v32 = vld [vmem:[%s8120_s0 + $0x208] ss:$20 sps:$4 sm:$0xff]  }
  0x7d   :  { %5513 = vmatprep.subr.bf16.mxu1 %v6425_v0  ;;  %v6084_v0 = vld [vmem:[%s8120_s0 + $0x19c] ss:$20 sps:$4 sm:$0xff]  }
  0x80   :  { %5529 = vmatpush1.bf16.msra.mxu1 %v6626_v34  ;;  %v6107_v34 = vld [vmem:[%s8120_s0 + $0x234] ss:$20 sps:$4 sm:$0xff]  }
  0x81   :  { %2252 = vmatmul.mubr.bf16.gmra.mrb[32].mxu1 %v6074_v12  ;;  %v6170_v12 = vld [vmem:[%s8120_s0 + $0x3c4] ss:$20 sps:$4 sm:$0xff]  }
  0x82   :  { %2740 = vmatmul.mubr.bf16.gmra.mrb[32].mxu0 %v6075_v13  ;;  %2259 = vmatprep.mubr.bf16.mxu1 %v6076_v14  ;;  %v6172_v13 = vld [vmem:[%s8120_s0 + $0x3cc] ss:$20 sps:$4 sm:$0xff]  }
  0x83   :  { %2747 = vmatprep.mubr.bf16.mxu0 %v6078_v15  ;;  %v6174_v14 = vld [vmem:[%s8120_s0 + $0x3c0] ss:$20 sps:$4 sm:$0xff]   ;;  %v6175_v15 = vld [vmem:[%s8120_s0 + $0x3c8] ss:$20 sps:$4 sm:$0xff]  }
  0x89   :  { %2260 = vmatmul.mubr.bf16.gmra.mrb[36].mxu1 %v6080_v16  ;;  %v6176_v16 = vld [vmem:[%s8120_s0 + $0x3ec] ss:$20 sps:$4 sm:$0xff]  }
  0x8a   :  { %2748 = vmatmul.mubr.bf16.gmra.mrb[36].mxu0 %v6081_v17  ;;  %2267 = vmatprep.mubr.bf16.mxu1 %v6082_v18  ;;  %v6178_v17 = vld [vmem:[%s8120_s0 + $0x3f4] ss:$20 sps:$4 sm:$0xff]  }
  0x8b   :  { %2755 = vmatprep.mubr.bf16.mxu0 %v6084_v0  ;;  %v6180_v18 = vld [vmem:[%s8120_s0 + $0x3e8] ss:$20 sps:$4 sm:$0xff]   ;;  %v6181_v0 = vld [vmem:[%s8120_s0 + $0x3f0] ss:$20 sps:$4 sm:$0xff]  }
  0x91   :  { %2268 = vmatmul.mubr.bf16.gmra.mrb[40].mxu1 %v6086_v20  ;;  %v6185_v20 = vld [vmem:[%s8120_s0 + $0x41c] ss:$20 sps:$4 sm:$0xff]  }
  0x92   :  { %2756 = vmatmul.mubr.bf16.gmra.mrb[40].mxu0 %v6087_v21  ;;  %2275 = vmatprep.mubr.bf16.mxu1 %v6088_v22  ;;  %v6187_v21 = vld [vmem:[%s8120_s0 + $0x410] ss:$20 sps:$4 sm:$0xff]   ;;  %v6188_v22 = vld [vmem:[%s8120_s0 + $0x418] ss:$20 sps:$4 sm:$0xff]  }
  0x93   :  { %2763 = vmatprep.mubr.bf16.mxu0 %v6090_v23  ;;  %v6189_v23 = vld [vmem:[%s8120_s0 + $0x43c] ss:$20 sps:$4 sm:$0xff]  }
  0x99   :  { %2276 = vmatmul.mubr.bf16.gmra.mrb[44].mxu1 %v6092_v24  ;;  %v6191_v24 = vld [vmem:[%s8120_s0 + $0x444] ss:$20 sps:$4 sm:$0xff]  }
  0x9a   :  { %2764 = vmatmul.mubr.bf16.gmra.mrb[44].mxu0 %v6093_v25  ;;  %2283 = vmatprep.mubr.bf16.mxu1 %v6095_v26 }
  0x9b   :  { %2771 = vmatprep.mubr.bf16.mxu0 %v6097_v27  ;;  %v6193_v27 = vld [vmem:[%s8120_s0 + $0x438] ss:$20 sps:$4 sm:$0xff]  }
  0xa1   :  { %2284 = vmatmul.mubr.bf16.gmra.mrb[48].mxu1 %v6099_v28  ;;  %v6194_v28 = vld [vmem:[%s8120_s0 + $0x440] ss:$20 sps:$4 sm:$0xff]  }
  0xa2   :  { %2772 = vmatmul.mubr.bf16.gmra.mrb[48].mxu0 %v6100_v29  ;;  %2291 = vmatprep.mubr.bf16.mxu1 %v6101_v30  ;;  %v6195_v30 = vld [vmem:[%s8120_s0 + $0x464] ss:$20 sps:$4 sm:$0xff]  }
  0xa3   :  { %2779 = vmatprep.mubr.bf16.mxu0 %v6103_v31 }
  0xa9   :  { %2292 = vmatmul.mubr.bf16.gmra.mrb[52].mxu1 %v6105_v32  ;;  %v6197_v32 = vld [vmem:[%s8120_s0 + $0x46c] ss:$20 sps:$4 sm:$0xff]  }
  0xaa   :  { %2780 = vmatmul.mubr.bf16.gmra.mrb[52].mxu0 %v6106_v33  ;;  %2299 = vmatprep.mubr.bf16.mxu1 %v6107_v34 }
  0xab   :  { %2787 = vmatprep.mubr.bf16.mxu0 %v6109_v35  ;;  %v6199_v35 = vld [vmem:[%s8120_s0 + $0x460] ss:$20 sps:$4 sm:$0xff]  }
  0xb1   :  { %2300 = vmatmul.mubr.bf16.gmra.mrb[56].mxu1 %v6111_v36  ;;  %v6200_v36 = vld [vmem:[%s8120_s0 + $0x468] ss:$20 sps:$4 sm:$0xff]  }
  0xb2   :  { %2788 = vmatmul.mubr.bf16.gmra.mrb[56].mxu0 %v6112_v37  ;;  %2307 = vmatprep.mubr.bf16.mxu1 %v6114_v38  ;;  %v6201_v38 = vld [vmem:[%s8120_s0 + $0x48c] ss:$20 sps:$4 sm:$0xff]  }
  0xb3   :  { %2795 = vmatprep.mubr.bf16.mxu0 %v6116_v40 }
  0xb9   :  { %2308 = vmatmul.mubr.bf16.gmra.mrb[60].mxu1 %v6118_v41 }
  0xba   :  { %2796 = vmatmul.mubr.bf16.gmra.mrb[60].mxu0 %v6119_v42  ;;  %2315 = vmatprep.mubr.bf16.mxu1 %v6120_v43  ;;  %v6203_v43 = vld [vmem:[%s8120_s0 + $0x488] ss:$20 sps:$4 sm:$0xff]  }
  0xbb   :  { %2803 = vmatprep.mubr.bf16.mxu0 %v6122_v44  ;;  %v6204_v44 = vld [vmem:[%s8120_s0 + $0x10] ss:$20 sps:$4 sm:$0xff]  }
  0xc1   :  { %2316 = vmatmul.mubr.bf16.gmra.mrb[64].mxu1 %v6124_v45 }
  0xc2   :  { %2804 = vmatmul.mubr.bf16.gmra.mrb[64].mxu0 %v6125_v46  ;;  %2323 = vmatprep.mubr.bf16.mxu1 %v6126_v47  ;;  %v6205_v46 = vld [vmem:[%s8120_s0 + $0x4b4] ss:$20 sps:$4 sm:$0xff]  }
  0xc3   :  { %2811 = vmatprep.mubr.bf16.mxu0 %v6128_v48 }
  0xc9   :  { %2324 = vmatmul.mubr.bf16.gmra.mrb[68].mxu1 %v6130_v49 }
  0xca   :  { %2812 = vmatmul.mubr.bf16.gmra.mrb[68].mxu0 %v6131_v50  ;;  %2331 = vmatprep.mubr.bf16.mxu1 %v6132_v51  ;;  %v6207_v50 = vld [vmem:[%s8120_s0 + $0x4b0] ss:$20 sps:$4 sm:$0xff]   ;;  %v6208_v51 = vld [vmem:[%s8120_s0 + $0x38] ss:$20 sps:$4 sm:$0xff]  }
  0xcb   :  { %2819 = vmatprep.mubr.bf16.mxu0 %v6134_v52 }
  0xd1   :  { %2332 = vmatmul.mubr.bf16.gmra.mrb[72].mxu1 %v6136_v53  ;;  %v6209_v53 = vld [vmem:[%s8120_s0 + $0x4dc] ss:$20 sps:$4 sm:$0xff]  }
  0xd2   :  { %2820 = vmatmul.mubr.bf16.gmra.mrb[72].mxu0 %v6137_v54  ;;  %2339 = vmatprep.mubr.bf16.mxu1 %v6139_v55 }
  0xd3   :  { %2827 = vmatprep.mubr.bf16.mxu0 %v6141_v56 }
  0xd9   :  { %2340 = vmatmul.mubr.bf16.gmra.mrb[76].mxu1 %v6143_v57  ;;  %v6211_v57 = vld [vmem:[%s8120_s0 + $0x4d8] ss:$20 sps:$4 sm:$0xff]  }
  0xda   :  { %2828 = vmatmul.mubr.bf16.gmra.mrb[76].mxu0 %v6144_v58  ;;  %2347 = vmatprep.mubr.bf16.mxu1 %v6145_v59  ;;  %v6212_v58 = vld [vmem:[%s8120_s0 + $0x60] ss:$20 sps:$4 sm:$0xff]  }
  0xdb   :  { %2835 = vmatprep.mubr.bf16.mxu0 %v6147_v60  ;;  %v6213_v60 = vld [vmem:[%s8120_s0 + $0x504] ss:$20 sps:$4 sm:$0xff]  }
  0xe1   :  { %2348 = vmatmul.mubr.bf16.gmra.mrb[80].mxu1 %v6149_v61 }
  0xe2   :  { %2836 = vmatmul.mubr.bf16.gmra.mrb[80].mxu0 %v6150_v62  ;;  %2355 = vmatprep.mubr.bf16.mxu1 %v6151_v63 }
  0xe3   :  { %2843 = vmatprep.mubr.bf16.mxu0 %v6153_v1  ;;  %v6215_v1 = vld [vmem:[%s8120_s0 + $0x500] ss:$20 sps:$4 sm:$0xff]  }
  0xe9   :  { %2356 = vmatmul.mubr.bf16.gmra.mrb[84].mxu1 %v6155_v2  ;;  %v6216_v2 = vld [vmem:[%s8120_s0 + $0x88] ss:$20 sps:$4 sm:$0xff]  }
  0xea   :  { %2844 = vmatmul.mubr.bf16.gmra.mrb[84].mxu0 %v6156_v3  ;;  %2363 = vmatprep.mubr.bf16.mxu1 %v6157_v4  ;;  %v6217_v4 = vld [vmem:[%s8120_s0 + $0x52c] ss:$20 sps:$4 sm:$0xff]  }
  0xeb   :  { %2851 = vmatprep.mubr.bf16.mxu0 %v6159_v5 }
  0xf1   :  { %2364 = vmatmul.mubr.bf16.gmra.mrb[88].mxu1 %v6162_v6 }
  0xf2   :  { %2852 = vmatmul.mubr.bf16.gmra.mrb[88].mxu0 %v6163_v7  ;;  %2371 = vmatprep.mubr.bf16.mxu1 %v6164_v8  ;;  %v6219_v8 = vld [vmem:[%s8120_s0 + $0x528] ss:$20 sps:$4 sm:$0xff]  }
  0xf3   :  { %2859 = vmatprep.mubr.bf16.mxu0 %v6166_v9  ;;  %v6220_v9 = vld [vmem:[%s8120_s0 + $0xb0] ss:$20 sps:$4 sm:$0xff]  }
  0xf9   :  { %2372 = vmatmul.mubr.bf16.gmra.mrb[92].mxu1 %v6168_v10 }
  0xfa   :  { %2860 = vmatmul.mubr.bf16.gmra.mrb[92].mxu0 %v6169_v11  ;;  %2379 = vmatprep.mubr.bf16.mxu1 %v6170_v12  ;;  %v6221_v11 = vld [vmem:[%s8120_s0 + $0x554] ss:$20 sps:$4 sm:$0xff]  }
  0xfb   :  { %2867 = vmatprep.mubr.bf16.mxu0 %v6172_v13 }
 0x101   :  { %2380 = vmatmul.mubr.bf16.gmra.mrb[96].mxu1 %v6174_v14 }
 0x102   :  { %2868 = vmatmul.mubr.bf16.gmra.mrb[96].mxu0 %v6175_v15  ;;  %2387 = vmatprep.mubr.bf16.mxu1 %v6176_v16  ;;  %v6223_v15 = vld [vmem:[%s8120_s0 + $0x550] ss:$20 sps:$4 sm:$0xff]   ;;  %v6224_v16 = vld [vmem:[%s8120_s0 + $0xd8] ss:$20 sps:$4 sm:$0xff]  }
 0x103   :  { %2875 = vmatprep.mubr.bf16.mxu0 %v6178_v17 }
 0x109   :  { %2388 = vmatmul.mubr.bf16.gmra.mrb[100].mxu1 %v6180_v18  ;;  %v6225_v18 = vld [vmem:[%s8120_s0 + $0x57c] ss:$20 sps:$4 sm:$0xff]  }
 0x10a   :  { %2876 = vmatmul.mubr.bf16.gmra.mrb[100].mxu0 %v6181_v0  ;;  %2395 = vmatprep.mubr.bf16.mxu1 %v6183_v19 }
 0x10b   :  { %2883 = vmatprep.mubr.bf16.mxu0 %v6185_v20 }
 0x111   :  { %2396 = vmatmul.mubr.bf16.gmra.mrb[104].mxu1 %v6187_v21  ;;  %v6227_v21 = vld [vmem:[%s8120_s0 + $0x578] ss:$20 sps:$4 sm:$0xff]  }
 0x112   :  { %2884 = vmatmul.mubr.bf16.gmra.mrb[104].mxu0 %v6188_v22  ;;  %2403 = vmatprep.mubr.bf16.mxu1 %v6189_v23  ;;  %v6228_v22 = vld [vmem:[%s8120_s0 + $0x100] ss:$20 sps:$4 sm:$0xff]  }
 0x113   :  { %2891 = vmatprep.mubr.bf16.mxu0 %v6191_v24  ;;  %v6229_v24 = vld [vmem:[%s8120_s0 + $0x5a4] ss:$20 sps:$4 sm:$0xff]  }
 0x114   :  { %v7018_v25 = vpop.f32.mrb[0].mxu1 }
 0x115   :  { %v2191_v26 = vpop.f32.mrb[1].mxu1 }
 0x116   :  { %v7026_v29 = vpop.f32.mrb[2].mxu1 }
 0x117   :  { %v2194_v31 = vpop.f32.mrb[3].mxu1 }
 0x118   :  { %v6232_v31 = vld [vmem:[%s8120_s0 + $0x128] ss:$20 sps:$4 sm:$0xff]  }
 0x119   :  { %2404 = vmatmul.mubr.bf16.gmra.mrb[108].mxu1 %v6193_v27 }
 0x11a   :  { %2892 = vmatmul.mubr.bf16.gmra.mrb[108].mxu0 %v6194_v28  ;;  %2411 = vmatprep.mubr.bf16.mxu1 %v6195_v30  ;;  %v6231_v30 = vld [vmem:[%s8120_s0 + $0x5a0] ss:$20 sps:$4 sm:$0xff]  }
 0x11b   :  { %2899 = vmatprep.mubr.bf16.mxu0 %v6197_v32 }
 0x11c   :  { %v7034_v33 = vpop.f32.mrb[4].mxu1 }
 0x11d   :  { %v2199_v34 = vpop.f32.mrb[5].mxu1 }
 0x11e   :  { %v7042_v37 = vpop.f32.mrb[6].mxu1  ;;  %v6233_v34 = vld [vmem:[%s8120_s0 + $0x5cc] ss:$20 sps:$4 sm:$0xff]  }
 0x11f   :  { %v2202_v40 = vpop.f32.mrb[7].mxu1 }
 0x120   :  { %v6235_v40 = vld [vmem:[%s8120_s0 + $0x5c8] ss:$20 sps:$4 sm:$0xff]  }
 0x121   :  { %2412 = vmatmul.mubr.bf16.gmra.mrb[112].mxu1 %v6199_v35 }
 0x122   :  { %2900 = vmatmul.mubr.bf16.gmra.mrb[112].mxu0 %v6200_v36  ;;  %2419 = vmatprep.mubr.bf16.mxu1 %v6201_v38 }
 0x123   :  { %5270 = vmatprep.mubr.msk.bf16.mxu0 %vm6427_vm0, %v8123_v39 }
 0x124   :  { %v7049_v41 = vpop.f32.mrb[8].mxu1 }
 0x125   :  { %v2207_v42 = vpop.f32.mrb[9].mxu1 }
 0x126   :  { %v7057_v45 = vpop.f32.mrb[10].mxu1  ;;  %v6236_v42 = vld [vmem:[%s8120_s0 + $0x150] ss:$20 sps:$4 sm:$0xff]  }
 0x127   :  { %v2210_v47 = vpop.f32.mrb[11].mxu1 }
 0x129   :  { %2420 = vmatmul.mubr.bf16.gmra.mrb[116].mxu1 %v6203_v43 }
 0x12a   :  { %5271 = vmatmul.mubr.bf16.vlgmr.msra.gmra.mrb[0].mxu0 %v6204_v44  ;;  %2427 = vmatprep.mubr.bf16.mxu1 %v6205_v46  ;;  %v6237_v44 = vld [vmem:[%s8120_s0 + $0x5f4] ss:$20 sps:$4 sm:$0xff]  }
 0x12b   :  { %5274 = vmatprep.mubr.msk.bf16.mxu0 %vm6427_vm0, %v8123_v39 }
 0x12c   :  { %v7064_v48 = vpop.f32.mrb[12].mxu1 }
 0x12d   :  { %v2215_v49 = vpop.f32.mrb[13].mxu1 }
 0x12e   :  { %v7072_v52 = vpop.f32.mrb[14].mxu1 }
 0x12f   :  { %v2218_v54 = vpop.f32.mrb[15].mxu1 }
 0x130   :  { %v6241_v54 = vld [vmem:[%s8120_s0 + $0x61c] ss:$20 sps:$4 sm:$0xff]  }
 0x131   :  { %2428 = vmatmul.mubr.bf16.gmra.mrb[120].mxu1 %v6207_v50  ;;  %v6239_v50 = vld [vmem:[%s8120_s0 + $0x5f0] ss:$20 sps:$4 sm:$0xff]  }
 0x132   :  { %5275 = vmatmul.mubr.bf16.gmra.mrb[4].mxu0 %v6208_v51  ;;  %2435 = vmatprep.mubr.bf16.mxu1 %v6209_v53  ;;  %v6240_v51 = vld [vmem:[%s8120_s0 + $0x178] ss:$20 sps:$4 sm:$0xff]  }
 0x133   :  { %5278 = vmatprep.mubr.msk.bf16.mxu0 %vm6427_vm0, %v8123_v39 }
 0x134   :  { %v7079_v55 = vpop.f32.mrb[16].mxu1 }
 0x135   :  { %v2223_v56 = vpop.f32.mrb[17].mxu1 }
 0x136   :  { %v7087_v59 = vpop.f32.mrb[18].mxu1 }
 0x137   :  { %v2226_v61 = vpop.f32.mrb[19].mxu1 }
 0x138   :  { %v6244_v61 = vld [vmem:[%s8120_s0 + $0x1a0] ss:$20 sps:$4 sm:$0xff]  }
 0x139   :  { %2436 = vmatmul.mubr.bf16.gmra.mrb[124].mxu1 %v6211_v57 }
 0x13a   :  { %5279 = vmatmul.mubr.bf16.gmra.mrb[8].mxu0 %v6212_v58  ;;  %2443 = vmatprep.mubr.bf16.mxu1 %v6213_v60  ;;  %v6243_v60 = vld [vmem:[%s8120_s0 + $0x618] ss:$20 sps:$4 sm:$0xff]  }
 0x13b   :  { %5282 = vmatprep.mubr.msk.bf16.mxu0 %vm6427_vm0, %v8123_v39 }
 0x13c   :  { %v7094_v62 = vpop.f32.mrb[20].mxu1 }
 0x13d   :  { %v2231_v63 = vpop.f32.mrb[21].mxu1 }
 0x13e   :  { %v7102_v3 = vpop.f32.mrb[22].mxu1 }
 0x13f   :  { %v2234_v5 = vpop.f32.mrb[23].mxu1 }
 0x141   :  { %2444 = vmatmul.mubr.bf16.gmra.mrb[128].mxu1 %v6215_v1  ;;  %v6245_v1 = vld [vmem:[%s8120_s0 + $0x644] ss:$20 sps:$4 sm:$0xff]  }
 0x142   :  { %5283 = vmatmul.mubr.bf16.gmra.mrb[12].mxu0 %v6216_v2  ;;  %2451 = vmatprep.mubr.bf16.mxu1 %v6217_v4 }
 0x143   :  { %5286 = vmatprep.mubr.msk.bf16.mxu0 %vm6427_vm0, %v8123_v39 }
 0x144   :  { %v7109_v6 = vpop.f32.mrb[24].mxu1 }
 0x145   :  { %v2239_v7 = vpop.f32.mrb[25].mxu1 }
 0x146   :  { %v7117_v10 = vpop.f32.mrb[26].mxu1  ;;  %v6247_v7 = vld [vmem:[%s8120_s0 + $0x640] ss:$20 sps:$4 sm:$0xff]  }
 0x147   :  { %v2242_v12 = vpop.f32.mrb[27].mxu1 }
 0x149   :  { %2452 = vmatmul.mubr.bf16.gmra.mrb[132].mxu1 %v6219_v8  ;;  %v6248_v8 = vld [vmem:[%s8120_s0 + $0x1c8] ss:$20 sps:$4 sm:$0xff]  }
 0x14a   :  { %5287 = vmatmul.mubr.bf16.gmra.mrb[16].mxu0 %v6220_v9  ;;  %2459 = vmatprep.mubr.bf16.mxu1 %v6221_v11  ;;  %v6249_v11 = vld [vmem:[%s8120_s0 + $0x66c] ss:$20 sps:$4 sm:$0xff]  }
 0x14b   :  { %5290 = vmatprep.mubr.msk.bf16.mxu0 %vm6427_vm0, %v8123_v39 }
 0x14c   :  { %v7124_v13 = vpop.f32.mrb[28].mxu1 }
 0x14d   :  { %v2247_v14 = vpop.f32.mrb[29].mxu1 }
 0x14e   :  { %v7132_v17 = vpop.f32.mrb[30].mxu1 }
 0x14f   :  { %v2250_v0 = vpop.f32.mrb[31].mxu1 }
 0x151   :  { %2460 = vmatmul.mubr.bf16.gmra.mrb[136].mxu1 %v6223_v15 }
 0x152   :  { %5291 = vmatmul.mubr.bf16.gmra.mrb[20].mxu0 %v6224_v16  ;;  %2467 = vmatprep.mubr.bf16.mxu1 %v6225_v18  ;;  %v6251_v16 = vld [vmem:[%s8120_s0 + $0x668] ss:$20 sps:$4 sm:$0xff]   ;;  %v6252_v18 = vld [vmem:[%s8120_s0 + $0x1f0] ss:$20 sps:$4 sm:$0xff]  }
 0x153   :  { %5294 = vmatprep.mubr.msk.bf16.mxu0 %vm6427_vm0, %v8123_v39 }
 0x154   :  { %v7139_v19 = vpop.f32.mrb[32].mxu1 }
 0x155   :  { %v2255_v20 = vpop.f32.mrb[33].mxu1 }
 0x156   :  { %v7147_v23 = vpop.f32.mrb[34].mxu1  ;;  %v6253_v20 = vld [vmem:[%s8120_s0 + $0x694] ss:$20 sps:$4 sm:$0xff]  }
 0x157   :  { %v2258_v26 = vpop.f32.mrb[35].mxu1 }
 0x158   :  { %v6255_v26 = vld [vmem:[%s8120_s0 + $0x690] ss:$20 sps:$4 sm:$0xff]  }
 0x159   :  { %2468 = vmatmul.mubr.bf16.gmra.mrb[140].mxu1 %v6227_v21 }
 0x15a   :  { %5295 = vmatmul.mubr.bf16.gmra.mrb[24].mxu0 %v6228_v22  ;;  %2475 = vmatprep.mubr.bf16.mxu1 %v6229_v24 }
 0x15b   :  { %5298 = vmatprep.mubr.msk.bf16.mxu0 %vm6427_vm0, %v8123_v39 }
 0x15c   :  { %v7154_v27 = vpop.f32.mrb[36].mxu1 }
 0x15d   :  { %v2263_v28 = vpop.f32.mrb[37].mxu1 }
 0x15e   :  { %v7162_v32 = vpop.f32.mrb[38].mxu1  ;;  %v6256_v28 = vld [vmem:[%s8120_s0 + $0x218] ss:$20 sps:$4 sm:$0xff]  }
 0x15f   :  { %v2266_v35 = vpop.f32.mrb[39].mxu1 }
 0x161   :  { %2476 = vmatmul.mubr.bf16.gmra.mrb[144].mxu1 %v6231_v30 }
 0x162   :  { %5299 = vmatmul.mubr.bf16.gmra.mrb[28].mxu0 %v6232_v31  ;;  %2483 = vmatprep.mubr.bf16.mxu1 %v6233_v34  ;;  %v6257_v31 = vld [vmem:[%s8120_s0 + $0x6bc] ss:$20 sps:$4 sm:$0xff]  }
 0x163   :  { %5302 = vmatprep.mubr.msk.bf16.mxu0 %vm6427_vm0, %v8123_v39 }
 0x164   :  { %v7169_v36 = vpop.f32.mrb[40].mxu1 }
 0x165   :  { %v2271_v38 = vpop.f32.mrb[41].mxu1 }
 0x166   :  { %v7177_v43 = vpop.f32.mrb[42].mxu1 }
 0x167   :  { %v2274_v46 = vpop.f32.mrb[43].mxu1 }
 0x168   :  { %v6261_v46 = vld [vmem:[%s8120_s0 + $0x6e4] ss:$20 sps:$4 sm:$0xff]  }
 0x169   :  { %2484 = vmatmul.mubr.bf16.gmra.mrb[148].mxu1 %v6235_v40  ;;  %v6259_v40 = vld [vmem:[%s8120_s0 + $0x6b8] ss:$20 sps:$4 sm:$0xff]  }
 0x16a   :  { %5303 = vmatmul.mubr.bf16.gmra.mrb[32].mxu0 %v6236_v42  ;;  %2491 = vmatprep.mubr.bf16.mxu1 %v6237_v44  ;;  %v6260_v42 = vld [vmem:[%s8120_s0 + $0x240] ss:$20 sps:$4 sm:$0xff]  }
 0x16b   :  { %5306 = vmatprep.mubr.msk.bf16.mxu0 %vm6427_vm0, %v8123_v39 }
 0x16c   :  { %v7184_v47 = vpop.f32.mrb[44].mxu1 }
 0x16d   :  { %v2279_v49 = vpop.f32.mrb[45].mxu1 }
 0x16e   :  { %v7192_v53 = vpop.f32.mrb[46].mxu1 }
 0x16f   :  { %v2282_v56 = vpop.f32.mrb[47].mxu1 }
 0x170   :  { %v6264_v56 = vld [vmem:[%s8120_s0 + $0x268] ss:$20 sps:$4 sm:$0xff]  }
 0x171   :  { %2492 = vmatmul.mubr.bf16.gmra.mrb[152].mxu1 %v6239_v50 }
 0x172   :  { %5307 = vmatmul.mubr.bf16.gmra.mrb[36].mxu0 %v6240_v51  ;;  %2499 = vmatprep.mubr.bf16.mxu1 %v6241_v54  ;;  %v6263_v54 = vld [vmem:[%s8120_s0 + $0x6e0] ss:$20 sps:$4 sm:$0xff]  }
 0x173   :  { %5310 = vmatprep.mubr.msk.bf16.mxu0 %vm6427_vm0, %v8123_v39 }
 0x174   :  { %v7199_v57 = vpop.f32.mrb[48].mxu1 }
 0x175   :  { %v2287_v58 = vpop.f32.mrb[49].mxu1 }
 0x176   :  { %v7207_v63 = vpop.f32.mrb[50].mxu1 }
 0x177   :  { %v2290_v2 = vpop.f32.mrb[51].mxu1 }
 0x179   :  { %2500 = vmatmul.mubr.bf16.gmra.mrb[156].mxu1 %v6243_v60  ;;  %v6265_v60 = vld [vmem:[%s8120_s0 + $0x70c] ss:$20 sps:$4 sm:$0xff]  }
 0x17a   :  { %5311 = vmatmul.mubr.bf16.gmra.mrb[40].mxu0 %v6244_v61  ;;  %2507 = vmatprep.mubr.bf16.mxu1 %v6245_v1 }
 0x17b   :  { %5314 = vmatprep.mubr.msk.bf16.mxu0 %vm6427_vm0, %v8123_v39 }
 0x17c   :  { %v7214_v4 = vpop.f32.mrb[52].mxu1 }
 0x17d   :  { %v2295_v5 = vpop.f32.mrb[53].mxu1 }
 0x17e   :  { %v7222_v9 = vpop.f32.mrb[54].mxu1  ;;  %v6267_v5 = vld [vmem:[%s8120_s0 + $0x708] ss:$20 sps:$4 sm:$0xff]  }
 0x17f   :  { %v2298_v12 = vpop.f32.mrb[55].mxu1 }
 0x181   :  { %2508 = vmatmul.mubr.bf16.gmra.mrb[160].mxu1 %v6247_v7  ;;  %v6268_v7 = vld [vmem:[%s8120_s0 + $0x290] ss:$20 sps:$4 sm:$0xff]  }
 0x182   :  { %5315 = vmatmul.mubr.bf16.gmra.mrb[44].mxu0 %v6248_v8  ;;  %2515 = vmatprep.mubr.bf16.mxu1 %v6249_v11  ;;  %v6269_v11 = vld [vmem:[%s8120_s0 + $0x734] ss:$20 sps:$4 sm:$0xff]  }
 0x183   :  { %5318 = vmatprep.mubr.msk.bf16.mxu0 %vm6427_vm0, %v8123_v39 }
 0x184   :  { %v7229_v14 = vpop.f32.mrb[56].mxu1 }
 0x185   :  { %v2303_v15 = vpop.f32.mrb[57].mxu1 }
 0x186   :  { %v7237_v0 = vpop.f32.mrb[58].mxu1 }
 0x187   :  { %v2306_v21 = vpop.f32.mrb[59].mxu1 }
 0x189   :  { %2516 = vmatmul.mubr.bf16.gmra.mrb[164].mxu1 %v6251_v16 }
 0x18a   :  { %5319 = vmatmul.mubr.bf16.gmra.mrb[48].mxu0 %v6252_v18  ;;  %2523 = vmatprep.mubr.bf16.mxu1 %v6253_v20  ;;  %v6271_v18 = vld [vmem:[%s8120_s0 + $0x730] ss:$20 sps:$4 sm:$0xff]   ;;  %v6272_v20 = vld [vmem:[%s8120_s0 + $0x2b8] ss:$20 sps:$4 sm:$0xff]  }
 0x18b   :  { %5322 = vmatprep.mubr.msk.bf16.mxu0 %vm6427_vm0, %v8123_v39 }
 0x18c   :  { %v7244_v22 = vpop.f32.mrb[60].mxu1 }
 0x18d   :  { %v2311_v24 = vpop.f32.mrb[61].mxu1 }
 0x18e   :  { %v7252_v30 = vpop.f32.mrb[62].mxu1  ;;  %v6273_v24 = vld [vmem:[%s8120_s0 + $0x75c] ss:$20 sps:$4 sm:$0xff]  }
 0x18f   :  { %v2314_v34 = vpop.f32.mrb[63].mxu1 }
 0x190   :  { %v6275_v34 = vld [vmem:[%s8120_s0 + $0x758] ss:$20 sps:$4 sm:$0xff]  }
 0x191   :  { %2524 = vmatmul.mubr.bf16.gmra.mrb[168].mxu1 %v6255_v26 }
 0x192   :  { %5323 = vmatmul.mubr.bf16.gmra.mrb[52].mxu0 %v6256_v28  ;;  %2531 = vmatprep.mubr.bf16.mxu1 %v6257_v31 }
 0x193   :  { %5326 = vmatprep.mubr.msk.bf16.mxu0 %vm6427_vm0, %v8123_v39 }
 0x194   :  { %v7259_v35 = vpop.f32.mrb[64].mxu1 }
 0x195   :  { %v2319_v38 = vpop.f32.mrb[65].mxu1 }
 0x196   :  { %v7267_v44 = vpop.f32.mrb[66].mxu1  ;;  %v6276_v38 = vld [vmem:[%s8120_s0 + $0x2e0] ss:$20 sps:$4 sm:$0xff]  }
 0x197   :  { %v2322_v49 = vpop.f32.mrb[67].mxu1 }
 0x199   :  { %2532 = vmatmul.mubr.bf16.gmra.mrb[172].mxu1 %v6259_v40 }
 0x19a   :  { %5327 = vmatmul.mubr.bf16.gmra.mrb[56].mxu0 %v6260_v42  ;;  %2539 = vmatprep.mubr.bf16.mxu1 %v6261_v46  ;;  %v6277_v42 = vld [vmem:[%s8120_s0 + $0x784] ss:$20 sps:$4 sm:$0xff]  }
 0x19b   :  { %5330 = vmatprep.mubr.msk.bf16.mxu0 %vm6427_vm0, %v8123_v39 }
 0x19c   :  { %v7274_v50 = vpop.f32.mrb[68].mxu1 }
 0x19d   :  { %v2327_v51 = vpop.f32.mrb[69].mxu1 }
 0x19e   :  { %v7282_v58 = vpop.f32.mrb[70].mxu1 }
 0x19f   :  { %v2330_v61 = vpop.f32.mrb[71].mxu1 }
 0x1a0   :  { %v6281_v61 = vld [vmem:[%s8120_s0 + $0x7ac] ss:$20 sps:$4 sm:$0xff]  }
 0x1a1   :  { %2540 = vmatmul.mubr.bf16.gmra.mrb[176].mxu1 %v6263_v54  ;;  %v6279_v54 = vld [vmem:[%s8120_s0 + $0x780] ss:$20 sps:$4 sm:$0xff]  }
 0x1a2   :  { %5331 = vmatmul.mubr.bf16.gmra.mrb[60].mxu0 %v6264_v56  ;;  %2547 = vmatprep.mubr.bf16.mxu1 %v6265_v60  ;;  %v6280_v56 = vld [vmem:[%s8120_s0 + $0x308] ss:$20 sps:$4 sm:$0xff]  }
 0x1a3   :  { %5334 = vmatprep.mubr.msk.bf16.mxu0 %vm6427_vm0, %v8123_v39 }
 0x1a4   :  { %v7289_v1 = vpop.f32.mrb[72].mxu1 }
 0x1a5   :  { %v2335_v2 = vpop.f32.mrb[73].mxu1 }
 0x1a6   :  { %v7297_v8 = vpop.f32.mrb[74].mxu1 }
 0x1a7   :  { %v2338_v12 = vpop.f32.mrb[75].mxu1 }
 0x1a8   :  { %v6284_v12 = vld [vmem:[%s8120_s0 + $0x330] ss:$20 sps:$4 sm:$0xff]  }
 0x1a9   :  { %2548 = vmatmul.mubr.bf16.gmra.mrb[180].mxu1 %v6267_v5 }
 0x1aa   :  { %5335 = vmatmul.mubr.bf16.gmra.mrb[64].mxu0 %v6268_v7  ;;  %2555 = vmatprep.mubr.bf16.mxu1 %v6269_v11  ;;  %v6283_v11 = vld [vmem:[%s8120_s0 + $0x7a8] ss:$20 sps:$4 sm:$0xff]  }
 0x1ab   :  { %5338 = vmatprep.mubr.msk.bf16.mxu0 %vm6427_vm0, %v8123_v39 }
 0x1ac   :  { %v7304_v15 = vpop.f32.mrb[76].mxu1 }
 0x1ad   :  { %v2343_v16 = vpop.f32.mrb[77].mxu1 }
 0x1ae   :  { %v7312_v21 = vpop.f32.mrb[78].mxu1 }
 0x1af   :  { %v2346_v26 = vpop.f32.mrb[79].mxu1 }
 0x1b1   :  { %2556 = vmatmul.mubr.bf16.gmra.mrb[184].mxu1 %v6271_v18  ;;  %v6285_v18 = vld [vmem:[%s8120_s0 + $0x7d4] ss:$20 sps:$4 sm:$0xff]  }
 0x1b2   :  { %5339 = vmatmul.mubr.bf16.gmra.mrb[68].mxu0 %v6272_v20  ;;  %2563 = vmatprep.mubr.bf16.mxu1 %v6273_v24 }
 0x1b3   :  { %5342 = vmatprep.mubr.msk.bf16.mxu0 %vm6427_vm0, %v8123_v39 }
 0x1b4   :  { %v7319_v28 = vpop.f32.mrb[80].mxu1 }
 0x1b5   :  { %v2351_v31 = vpop.f32.mrb[81].mxu1 }
 0x1b6   :  { %v7327_v40 = vpop.f32.mrb[82].mxu1  ;;  %v6287_v31 = vld [vmem:[%s8120_s0 + $0x7d0] ss:$20 sps:$4 sm:$0xff]  }
 0x1b7   :  { %v2354_v46 = vpop.f32.mrb[83].mxu1 }
 0x1b9   :  { %2564 = vmatmul.mubr.bf16.gmra.mrb[188].mxu1 %v6275_v34  ;;  %v6288_v34 = vld [vmem:[%s8120_s0 + $0x358] ss:$20 sps:$4 sm:$0xff]  }
 0x1ba   :  { %5343 = vmatmul.mubr.bf16.gmra.mrb[72].mxu0 %v6276_v38  ;;  %2571 = vmatprep.mubr.bf16.mxu1 %v6277_v42  ;;  %v6289_v42 = vld [vmem:[%s8120_s0 + $0x7fc] ss:$20 sps:$4 sm:$0xff]  }
 0x1bb   :  { %5346 = vmatprep.mubr.msk.bf16.mxu0 %vm6427_vm0, %v8123_v39 }
 0x1bc   :  { %v7334_v49 = vpop.f32.mrb[84].mxu1 }
 0x1bd   :  { %v2359_v51 = vpop.f32.mrb[85].mxu1 }
 0x1be   :  { %v7342_v60 = vpop.f32.mrb[86].mxu1 }
 0x1bf   :  { %v2362_v2 = vpop.f32.mrb[87].mxu1 }
 0x1c1   :  { %2572 = vmatmul.mubr.bf16.gmra.mrb[192].mxu1 %v6279_v54 }
 0x1c2   :  { %5347 = vmatmul.mubr.bf16.gmra.mrb[76].mxu0 %v6280_v56  ;;  %2579 = vmatprep.mubr.bf16.mxu1 %v6281_v61  ;;  %v6291_v56 = vld [vmem:[%s8120_s0 + $0x7f8] ss:$20 sps:$4 sm:$0xff]   ;;  %v6292_v61 = vld [vmem:[%s8120_s0 + $0x380] ss:$20 sps:$4 sm:$0xff]  }
 0x1c3   :  { %5350 = vmatprep.mubr.msk.bf16.mxu0 %vm6427_vm0, %v8123_v39 }
 0x1c4   :  { %v7349_v5 = vpop.f32.mrb[88].mxu1 }
 0x1c5   :  { %v2367_v7 = vpop.f32.mrb[89].mxu1 }
 0x1c6   :  { %v7357_v16 = vpop.f32.mrb[90].mxu1  ;;  %v6293_v7 = vld [vmem:[%s8120_s0 + $0x824] ss:$20 sps:$4 sm:$0xff]  }
 0x1c7   :  { %v2370_v20 = vpop.f32.mrb[91].mxu1 }
 0x1c8   :  { %v6295_v20 = vld [vmem:[%s8120_s0 + $0x820] ss:$20 sps:$4 sm:$0xff]  }
 0x1c9   :  { %2580 = vmatmul.mubr.bf16.gmra.mrb[196].mxu1 %v6283_v11 }
 0x1ca   :  { %5351 = vmatmul.mubr.bf16.gmra.mrb[80].mxu0 %v6284_v12  ;;  %2587 = vmatprep.mubr.bf16.mxu1 %v6285_v18 }
 0x1cb   :  { %5354 = vmatprep.mubr.msk.bf16.mxu0 %vm6427_vm0, %v8123_v39 }
 0x1cc   :  { %v7364_v24 = vpop.f32.mrb[92].mxu1 }
 0x1cd   :  { %v2375_v26 = vpop.f32.mrb[93].mxu1 }
 0x1ce   :  { %v7372_v38 = vpop.f32.mrb[94].mxu1  ;;  %v6296_v26 = vld [vmem:[%s8120_s0 + $0x3a8] ss:$20 sps:$4 sm:$0xff]  }
 0x1cf   :  { %v2378_v46 = vpop.f32.mrb[95].mxu1 }
 0x1d1   :  { %2588 = vmatmul.mubr.bf16.gmra.mrb[200].mxu1 %v6287_v31 }
 0x1d2   :  { %5355 = vmatmul.mubr.bf16.gmra.mrb[84].mxu0 %v6288_v34  ;;  %2595 = vmatprep.mubr.bf16.mxu1 %v6289_v42  ;;  %v6297_v34 = vld [vmem:[%s8120_s0 + $0x84c] ss:$20 sps:$4 sm:$0xff]  }
 0x1d3   :  { %5358 = vmatprep.mubr.msk.bf16.mxu0 %vm6427_vm0, %v8123_v39 }
 0x1d4   :  { %v7379_v51 = vpop.f32.mrb[96].mxu1 }
 0x1d5   :  { %v2383_v54 = vpop.f32.mrb[97].mxu1 }
 0x1d6   :  { %v7387_v2 = vpop.f32.mrb[98].mxu1 }
 0x1d7   :  { %8125 = vst [vmem:[#allocation2_spill] sm:$0xff] %v7387_v2  ;;  %v2386_v11 = vpop.f32.mrb[99].mxu1 }
 0x1d8   :  { %v6301_v11 = vld [vmem:[%s8120_s0 + $0x874] ss:$20 sps:$4 sm:$0xff]  }
 0x1d9   :  { %2596 = vmatmul.mubr.bf16.gmra.mrb[204].mxu1 %v6291_v56  ;;  %v6299_v56 = vld [vmem:[%s8120_s0 + $0x848] ss:$20 sps:$4 sm:$0xff]  }
 0x1da   :  { %5359 = vmatmul.mubr.bf16.gmra.mrb[88].mxu0 %v6292_v61  ;;  %2603 = vmatprep.mubr.bf16.mxu1 %v6293_v7  ;;  %v6300_v61 = vld [vmem:[%s8120_s0 + $0x3d0] ss:$20 sps:$4 sm:$0xff]  }
 0x1db   :  { %5362 = vmatprep.mubr.msk.bf16.mxu0 %vm6427_vm0, %v8123_v39 }
 0x1dc   :  { %v7394_v12 = vpop.f32.mrb[100].mxu1 }
 0x1dd   :  { %8126 = vst [vmem:[#allocation3_spill] sm:$0xff] %v7394_v12  ;;  %v2391_v18 = vpop.f32.mrb[101].mxu1 }
 0x1de   :  { %v7402_v31 = vpop.f32.mrb[102].mxu1 }
 0x1df   :  { %8127 = vst [vmem:[#allocation4_spill] sm:$0xff] %v7402_v31  ;;  %v2394_v42 = vpop.f32.mrb[103].mxu1  ;;  %v6311_v31 = vld [vmem:[%s8120_s0 + $0x448] ss:$20 sps:$4 sm:$0xff]  }
 0x1e0   :  { %v6304_v42 = vld [vmem:[%s8120_s0 + $0x3f8] ss:$20 sps:$4 sm:$0xff]  }
 0x1e1   :  { %2604 = vmatmul.mubr.bf16.gmra.mrb[208].mxu1 %v6295_v20 }
 0x1e2   :  { %5363 = vmatmul.mubr.bf16.gmra.mrb[92].mxu0 %v6296_v26  ;;  %2611 = vmatprep.mubr.bf16.mxu1 %v6297_v34  ;;  %v6303_v34 = vld [vmem:[%s8120_s0 + $0x870] ss:$20 sps:$4 sm:$0xff]  }
 0x1e3   :  { %5366 = vmatprep.mubr.msk.bf16.mxu0 %vm6427_vm0, %v8123_v39 }
 0x1e4   :  { %v7409_v46 = vpop.f32.mrb[104].mxu1 }
 0x1e5   :  { %8128 = vst [vmem:[#allocation5_spill] sm:$0xff] %v7409_v46  ;;  %v2399_v54 = vpop.f32.mrb[105].mxu1 }
 0x1e6   :  { %v7417_v7 = vpop.f32.mrb[106].mxu1 }
 0x1e7   :  { %8129 = vst [vmem:[#allocation6_spill] sm:$0xff] %v7417_v7  ;;  %v2402_v18 = vpop.f32.mrb[107].mxu1 }
 0x1e9   :  { %2612 = vmatmul.mubr.bf16.gmra.mrb[212].mxu1 %v6299_v56  ;;  %v6305_v56 = vld [vmem:[%s8120_s0 + $0x89c] ss:$20 sps:$4 sm:$0xff]  }
 0x1ea   :  { %5367 = vmatmul.mubr.bf16.gmra.mrb[96].mxu0 %v6300_v61  ;;  %2619 = vmatprep.mubr.bf16.mxu1 %v6301_v11  ;;  %v351_v11 = vld [vmem:[%s8120_s0 + $0x8c0] sm:$0x33] }
 0x1eb   :  { %5370 = vmatprep.mubr.msk.bf16.mxu0 %vm6427_vm0, %v8123_v39  ;;  %v4583_v7 = vcombine.low %v351_v11, %v351_v11 }
 0x1ec   :  { %v7424_v20 = vpop.f32.mrb[108].mxu1 }
 0x1ed   :  { %8130 = vst [vmem:[#allocation7_spill] sm:$0xff] %v7424_v20  ;;  %v2407_v26 = vpop.f32.mrb[109].mxu1 }
 0x1ee   :  { %v7432_v54 = vpop.f32.mrb[110].mxu1 }
 0x1ef   :  { %8131 = vst [vmem:[#allocation8_spill] sm:$0xff] %v7432_v54  ;;  %v2410_v61 = vpop.f32.mrb[111].mxu1  ;;  %v6307_v54 = vld [vmem:[%s8120_s0 + $0x898] ss:$20 sps:$4 sm:$0xff]  }
 0x1f1   :  { %2620 = vmatmul.mubr.bf16.gmra.mrb[216].mxu1 %v6303_v34  ;;  %v6308_v34 = vld [vmem:[%s8120_s0 + $0x420] ss:$20 sps:$4 sm:$0xff]  }
 0x1f2   :  { %5371 = vmatmul.mubr.bf16.gmra.mrb[100].mxu0 %v6304_v42  ;;  %2627 = vmatprep.mubr.bf16.mxu1 %v6305_v56  ;;  %v4584_v56 = vcombine.high %v351_v11, %v351_v11  ;;  %v6312_v11 = vld [vmem:[%s8120_s0 + $0x490] ss:$20 sps:$4 sm:$0xff]  }
 0x1f3   :  { %5374 = vmatprep.mubr.msk.bf16.mxu0 %vm6427_vm0, %v8123_v39  ;;  %v7455_v39 = vld [vmem:[%s8121_s2] ss:$0 sm:$0xff] }
 0x1f4   :  { %v7442_v18 = vpop.f32.mrb[112].mxu1 }
 0x1f5   :  { %8132 = vst [vmem:[#allocation9_spill] sm:$0xff] %v7442_v18  ;;  %v2415_v26 = vpop.f32.mrb[113].mxu1  ;;  %v2190_v18 = vadd.f32 %v7455_v39, %v7018_v25 }
 0x1f6   :  { %v7450_v42 = vpop.f32.mrb[114].mxu1  ;;  %v8134_v26 = vmov 0.0  }
 0x1f7   :  { %8133 = vst [vmem:[#allocation10_spill] sm:$0xff] %v7450_v42  ;;  %v2418_v61 = vpop.f32.mrb[115].mxu1  ;;  %v2193_v42 = vadd.f32 %v7455_v39, %v7026_v29  ;;  %v2198_v29 = vadd.f32 %v7455_v39, %v7034_v33  ;;  %v6316_v33 = vld [vmem:[%s8120_s0 + $0x4bc] ss:$20 sps:$4 sm:$0xff]  }
 0x1f9   :  { %2628 = vmatmul.mubr.bf16.gmra.mrb[220].mxu1 %v6307_v54  ;;  %v6314_v54 = vld [vmem:[%s8120_s0 + $0x494] ss:$20 sps:$4 sm:$0xff]  }
 0x1fa   :  { %5375 = vmatmul.mubr.bf16.gmra.mrb[104].mxu0 %v6308_v34  ;;  %2635 = vmatprep.mubr.bf16.mxu1 %v4584_v56 }
 0x1fb   :  { %5378 = vmatprep.mubr.msk.bf16.mxu0 %vm6427_vm0, %v8134_v26 }
 0x1fd   :  { %v3165_v20 = vpop.f32.mrb[0].mxu0 }
 0x1fe   :  { %v5531_v61 = vadd.f32 %v3165_v20, %v2190_v18  ;;  %v5272_v46 = vpop.f32.mrb[1].mxu0  ;;  %v6315_v18 = vld [vmem:[%s8120_s0 + $0x470] ss:$20 sps:$4 sm:$0xff]  }
 0x1ff   :  { %v3168_v34 = vpop.f32.mrb[2].mxu0 }
 0x200   :  { %v5533_v56 = vadd.f32 %v3168_v34, %v2193_v42  ;;  %v5273_v12 = vpop.f32.mrb[3].mxu0  ;;  %v3619_v25 = vmax.f32 %v5531_v61, 0.0  ;;  %v2206_v34 = vadd.f32 %v7455_v39, %v7049_v41  ;;  %v6320_v41 = vld [vmem:[%s8120_s0 + $0x4e4] ss:$20 sps:$4 sm:$0xff]  }
 0x201   :  { %2636 = vmatmul.mubr.bf16.gmra.mrb[224].mxu1 %v4583_v7  ;;  %v2201_v12 = vadd.f32 %v7455_v39, %v7042_v37 }
 0x202   :  { %v3620_v2 = vmax.f32 %v5533_v56, 0.0  ;;  %5379 = vmatmul.mubr.bf16.gmra.mrb[108].mxu0 %v6311_v31  ;;  %2907 = vmatprep.mubr.bf16.mxu1 %v6314_v54 }
 0x203   :  { %5382 = vmatprep.mubr.msk.bf16.mxu0 %vm6427_vm0, %v8134_v26 }
 0x204   :  { %v4857_v46 = vpack.c.bf16 %v3620_v2, %v3619_v25 }
 0x205   :  { %v3173_v20 = vpop.f32.mrb[4].mxu0 }
 0x206   :  { %4858 = vst [vmem:[%s8122_s3] sm:$0xff] %v4857_v46   ;;  %v5535_v31 = vadd.f32 %v3173_v20, %v2198_v29  ;;  %v5276_v7 = vpop.f32.mrb[5].mxu0  ;;  %v6318_v29 = vld [vmem:[%s8120_s0 + $0x4b8] ss:$20 sps:$4 sm:$0xff]   ;;  %v2209_v46 = vadd.f32 %v7455_v39, %v7057_v45 }
 0x207   :  { %v3176_v2 = vpop.f32.mrb[6].mxu0 }
 0x208   :  { %v5537_v42 = vadd.f32 %v3176_v2, %v2201_v12  ;;  %v5277_v61 = vpop.f32.mrb[7].mxu0  ;;  %v3621_v54 = vmax.f32 %v5535_v31, 0.0  ;;  %v6319_v12 = vld [vmem:[%s8120_s0 + $0x498] ss:$20 sps:$4 sm:$0xff]   ;;  %v2214_v2 = vadd.f32 %v7455_v39, %v7064_v48 }
 0x209   :  { %2908 = vmatmul.mubr.bf16.vlgmr.msra.gmra.mrb[116].mxu1 %v6312_v11  ;;  %v6324_v48 = vld [vmem:[%s8120_s0 + $0x50c] ss:$20 sps:$4 sm:$0xff]  }
 0x20a   :  { %v3622_v37 = vmax.f32 %v5537_v42, 0.0  ;;  %5383 = vmatmul.mubr.bf16.gmra.mrb[112].mxu0 %v6315_v18  ;;  %2915 = vmatprep.mubr.bf16.mxu1 %v6316_v33 }
 0x20b   :  { %5386 = vmatprep.mubr.msk.bf16.mxu0 %vm6427_vm0, %v8134_v26 }
 0x20c   :  { %v4862_v56 = vpack.c.bf16 %v3622_v37, %v3621_v54  ;;  %v6322_v54 = vld [vmem:[%s8120_s0 + $0x4e0] ss:$20 sps:$4 sm:$0xff]   ;;  %v2217_v37 = vadd.f32 %v7455_v39, %v7072_v52 }
 0x20d   :  { %v3181_v25 = vpop.f32.mrb[8].mxu0 }
 0x20e   :  { %5134 = vst [vmem:[%s8122_s3 + $0x8] sm:$0xff] %v4862_v56   ;;  %v5539_v20 = vadd.f32 %v3181_v25, %v2206_v34  ;;  %v5280_v11 = vpop.f32.mrb[9].mxu0  ;;  %v6323_v25 = vld [vmem:[%s8120_s0 + $0x4c0] ss:$20 sps:$4 sm:$0xff]  }
 0x20f   :  { %v3184_v31 = vpop.f32.mrb[10].mxu0 }
 0x210   :  { %v5541_v7 = vadd.f32 %v3184_v31, %v2209_v46  ;;  %v5281_v18 = vpop.f32.mrb[11].mxu0  ;;  %v3623_v33 = vmax.f32 %v5539_v20, 0.0 }
 0x211   :  { %2916 = vmatmul.mubr.bf16.gmra.mrb[120].mxu1 %v6318_v29  ;;  %v2225_v18 = vadd.f32 %v7455_v39, %v7087_v59 }
 0x212   :  { %v3624_v45 = vmax.f32 %v5541_v7, 0.0  ;;  %5387 = vmatmul.mubr.bf16.gmra.mrb[116].mxu0 %v6319_v12  ;;  %2923 = vmatprep.mubr.bf16.mxu1 %v6320_v41  ;;  %v2222_v12 = vadd.f32 %v7455_v39, %v7079_v55  ;;  %v6326_v7 = vld [vmem:[%s8120_s0 + $0x508] ss:$20 sps:$4 sm:$0xff]  }
 0x213   :  { %5390 = vmatprep.mubr.msk.bf16.mxu0 %vm6427_vm0, %v8134_v26  ;;  %v6328_v55 = vld [vmem:[%s8120_s0 + $0x534] ss:$20 sps:$4 sm:$0xff]  }
 0x214   :  { %v4867_v42 = vpack.c.bf16 %v3624_v45, %v3623_v33 }
 0x215   :  { %v3189_v61 = vpop.f32.mrb[12].mxu0 }
 0x216   :  { %5135 = vst [vmem:[%s8122_s3 + $0x10] sm:$0xff] %v4867_v42   ;;  %v5543_v34 = vadd.f32 %v3189_v61, %v2214_v2  ;;  %v5284_v56 = vpop.f32.mrb[13].mxu0  ;;  %v6327_v2 = vld [vmem:[%s8120_s0 + $0x4e8] ss:$20 sps:$4 sm:$0xff]  }
 0x217   :  { %v3192_v29 = vpop.f32.mrb[14].mxu0 }
 0x218   :  { %v5545_v46 = vadd.f32 %v3192_v29, %v2217_v37  ;;  %v5285_v20 = vpop.f32.mrb[15].mxu0  ;;  %v3625_v11 = vmax.f32 %v5543_v34, 0.0  ;;  %v2230_v34 = vadd.f32 %v7455_v39, %v7094_v62  ;;  %v2233_v29 = vadd.f32 %v7455_v39, %v7102_v3  ;;  %v6332_v62 = vld [vmem:[%s8120_s0 + $0x55c] ss:$20 sps:$4 sm:$0xff]  }
 0x219   :  { %2924 = vmatmul.mubr.bf16.gmra.mrb[124].mxu1 %v6322_v54 }
 0x21a   :  { %v3626_v52 = vmax.f32 %v5545_v46, 0.0  ;;  %5391 = vmatmul.mubr.bf16.gmra.mrb[120].mxu0 %v6323_v25  ;;  %2931 = vmatprep.mubr.bf16.mxu1 %v6324_v48  ;;  %v6330_v48 = vld [vmem:[%s8120_s0 + $0x530] ss:$20 sps:$4 sm:$0xff]  }
 0x21b   :  { %5394 = vmatprep.mubr.msk.bf16.mxu0 %vm6427_vm0, %v8134_v26 }
 0x21c   :  { %v4872_v41 = vpack.c.bf16 %v3626_v52, %v3625_v11  ;;  %v6331_v11 = vld [vmem:[%s8120_s0 + $0x510] ss:$20 sps:$4 sm:$0xff]  }
 0x21d   :  { %v3197_v31 = vpop.f32.mrb[16].mxu0 }
 0x21e   :  { %5136 = vst [vmem:[%s8122_s3 + $0x18] sm:$0xff] %v4872_v41   ;;  %v5547_v33 = vadd.f32 %v3197_v31, %v2222_v12  ;;  %v5288_v45 = vpop.f32.mrb[17].mxu0 }
 0x21f   :  { %v3200_v42 = vpop.f32.mrb[18].mxu0  ;;  %v6334_v45 = vld [vmem:[%s8120_s0 + $0x558] ss:$20 sps:$4 sm:$0xff]  }
 0x220   :  { %v5549_v61 = vadd.f32 %v3200_v42, %v2225_v18  ;;  %v5289_v54 = vpop.f32.mrb[19].mxu0  ;;  %v3627_v37 = vmax.f32 %v5547_v33, 0.0 }
 0x221   :  { %2932 = vmatmul.mubr.bf16.gmra.mrb[128].mxu1 %v6326_v7  ;;  %v2238_v7 = vadd.f32 %v7455_v39, %v7109_v6  ;;  %v6336_v6 = vld [vmem:[%s8120_s0 + $0x584] ss:$20 sps:$4 sm:$0xff]  }
 0x222   :  { %v3628_v59 = vmax.f32 %v5549_v61, 0.0  ;;  %5395 = vmatmul.mubr.bf16.gmra.mrb[124].mxu0 %v6327_v2  ;;  %2939 = vmatprep.mubr.bf16.mxu1 %v6328_v55  ;;  %v2241_v2 = vadd.f32 %v7455_v39, %v7117_v10  ;;  %v6335_v61 = vld [vmem:[%s8120_s0 + $0x538] ss:$20 sps:$4 sm:$0xff]  }
 0x223   :  { %5398 = vmatprep.mubr.msk.bf16.mxu0 %vm6427_vm0, %v8134_v26 }
 0x224   :  { %v4877_v56 = vpack.c.bf16 %v3628_v59, %v3627_v37 }
 0x225   :  { %v3205_v25 = vpop.f32.mrb[20].mxu0 }
 0x226   :  { %5137 = vst [vmem:[%s8122_s3 + $0x20] sm:$0xff] %v4877_v56   ;;  %v5551_v46 = vadd.f32 %v3205_v25, %v2230_v34  ;;  %v5292_v20 = vpop.f32.mrb[21].mxu0  ;;  %v2246_v56 = vadd.f32 %v7455_v39, %v7124_v13  ;;  %v6340_v13 = vld [vmem:[%s8120_s0 + $0x5ac] ss:$20 sps:$4 sm:$0xff]  }
 0x227   :  { %v3208_v52 = vpop.f32.mrb[22].mxu0 }
 0x228   :  { %v5553_v12 = vadd.f32 %v3208_v52, %v2233_v29  ;;  %v5293_v41 = vpop.f32.mrb[23].mxu0  ;;  %v3629_v31 = vmax.f32 %v5551_v46, 0.0  ;;  %v6338_v29 = vld [vmem:[%s8120_s0 + $0x580] ss:$20 sps:$4 sm:$0xff]   ;;  %v2249_v46 = vadd.f32 %v7455_v39, %v7132_v17 }
 0x229   :  { %2940 = vmatmul.mubr.bf16.gmra.mrb[132].mxu1 %v6330_v48 }
 0x22a   :  { %v3630_v3 = vmax.f32 %v5553_v12, 0.0  ;;  %5399 = vmatmul.mubr.bf16.gmra.mrb[128].mxu0 %v6331_v11  ;;  %2947 = vmatprep.mubr.bf16.mxu1 %v6332_v62  ;;  %v6339_v62 = vld [vmem:[%s8120_s0 + $0x560] ss:$20 sps:$4 sm:$0xff]  }
 0x22b   :  { %5402 = vmatprep.mubr.msk.bf16.mxu0 %vm6427_vm0, %v8134_v26 }
 0x22c   :  { %v4882_v18 = vpack.c.bf16 %v3630_v3, %v3629_v31  ;;  %v2254_v3 = vadd.f32 %v7455_v39, %v7139_v19  ;;  %v6344_v19 = vld [vmem:[%s8120_s0 + $0x5d4] ss:$20 sps:$4 sm:$0xff]  }
 0x22d   :  { %v3213_v33 = vpop.f32.mrb[24].mxu0 }
 0x22e   :  { %5138 = vst [vmem:[%s8122_s3 + $0x28] sm:$0xff] %v4882_v18   ;;  %v5555_v55 = vadd.f32 %v3213_v33, %v2238_v7  ;;  %v5296_v42 = vpop.f32.mrb[25].mxu0  ;;  %v6342_v33 = vld [vmem:[%s8120_s0 + $0x5a8] ss:$20 sps:$4 sm:$0xff]  }
 0x22f   :  { %v3216_v54 = vpop.f32.mrb[26].mxu0  ;;  %v6343_v42 = vld [vmem:[%s8120_s0 + $0x588] ss:$20 sps:$4 sm:$0xff]  }
 0x230   :  { %v5557_v37 = vadd.f32 %v3216_v54, %v2241_v2  ;;  %v5297_v59 = vpop.f32.mrb[27].mxu0  ;;  %v3631_v34 = vmax.f32 %v5555_v55, 0.0 }
 0x231   :  { %2948 = vmatmul.mubr.bf16.gmra.mrb[136].mxu1 %v6334_v45  ;;  %v2257_v45 = vadd.f32 %v7455_v39, %v7147_v23  ;;  %v2262_v59 = vadd.f32 %v7455_v39, %v7154_v27  ;;  %v6348_v27 = vld [vmem:[%s8120_s0 + $0x5fc] ss:$20 sps:$4 sm:$0xff]  }
 0x232   :  { %v3632_v10 = vmax.f32 %v5557_v37, 0.0  ;;  %5403 = vmatmul.mubr.bf16.gmra.mrb[132].mxu0 %v6335_v61  ;;  %2955 = vmatprep.mubr.bf16.mxu1 %v6336_v6 }
 0x233   :  { %5406 = vmatprep.mubr.msk.bf16.mxu0 %vm6427_vm0, %v8134_v26 }
 0x234   :  { %v4887_v25 = vpack.c.bf16 %v3632_v10, %v3631_v34 }
 0x235   :  { %v3221_v48 = vpop.f32.mrb[28].mxu0 }
 0x236   :  { %5139 = vst [vmem:[%s8122_s3 + $0x30] sm:$0xff] %v4887_v25   ;;  %v5559_v20 = vadd.f32 %v3221_v48, %v2246_v56  ;;  %v5300_v11 = vpop.f32.mrb[29].mxu0  ;;  %v6346_v56 = vld [vmem:[%s8120_s0 + $0x5d0] ss:$20 sps:$4 sm:$0xff]   ;;  %v2265_v25 = vadd.f32 %v7455_v39, %v7162_v32 }
 0x237   :  { %v3224_v52 = vpop.f32.mrb[30].mxu0 }
 0x238   :  { %v5561_v12 = vadd.f32 %v3224_v52, %v2249_v46  ;;  %v5301_v41 = vpop.f32.mrb[31].mxu0  ;;  %v3633_v31 = vmax.f32 %v5559_v20, 0.0  ;;  %v6347_v46 = vld [vmem:[%s8120_s0 + $0x5b0] ss:$20 sps:$4 sm:$0xff]   ;;  %v2270_v52 = vadd.f32 %v7455_v39, %v7169_v36 }
 0x239   :  { %2956 = vmatmul.mubr.bf16.gmra.mrb[140].mxu1 %v6338_v29  ;;  %v6352_v36 = vld [vmem:[%s8120_s0 + $0x624] ss:$20 sps:$4 sm:$0xff]  }
 0x23a   :  { %v3634_v17 = vmax.f32 %v5561_v12, 0.0  ;;  %5407 = vmatmul.mubr.bf16.gmra.mrb[136].mxu0 %v6339_v62  ;;  %2963 = vmatprep.mubr.bf16.mxu1 %v6340_v13 }
 0x23b   :  { %5410 = vmatprep.mubr.msk.bf16.mxu0 %vm6427_vm0, %v8134_v26 }
 0x23c   :  { %v4892_v7 = vpack.c.bf16 %v3634_v17, %v3633_v31  ;;  %v6350_v31 = vld [vmem:[%s8120_s0 + $0x5f8] ss:$20 sps:$4 sm:$0xff]   ;;  %v2273_v17 = vadd.f32 %v7455_v39, %v7177_v43 }
 0x23d   :  { %v3229_v18 = vpop.f32.mrb[32].mxu0 }
 0x23e   :  { %5140 = vst [vmem:[%s8122_s3 + $0x38] sm:$0xff] %v4892_v7   ;;  %v5563_v2 = vadd.f32 %v3229_v18, %v2254_v3  ;;  %v5304_v55 = vpop.f32.mrb[33].mxu0  ;;  %v6351_v18 = vld [vmem:[%s8120_s0 + $0x5d8] ss:$20 sps:$4 sm:$0xff]  }
 0x23f   :  { %v3232_v61 = vpop.f32.mrb[34].mxu0 }
 0x240   :  { %v5565_v6 = vadd.f32 %v3232_v61, %v2257_v45  ;;  %v5305_v54 = vpop.f32.mrb[35].mxu0  ;;  %v3635_v37 = vmax.f32 %v5563_v2, 0.0 }
 0x241   :  { %2964 = vmatmul.mubr.bf16.gmra.mrb[144].mxu1 %v6342_v33  ;;  %v2281_v54 = vadd.f32 %v7455_v39, %v7192_v53 }
 0x242   :  { %v3636_v23 = vmax.f32 %v5565_v6, 0.0  ;;  %5411 = vmatmul.mubr.bf16.gmra.mrb[140].mxu0 %v6343_v42  ;;  %2971 = vmatprep.mubr.bf16.mxu1 %v6344_v19  ;;  %v2278_v42 = vadd.f32 %v7455_v39, %v7184_v47  ;;  %v6354_v6 = vld [vmem:[%s8120_s0 + $0x620] ss:$20 sps:$4 sm:$0xff]  }
 0x243   :  { %5414 = vmatprep.mubr.msk.bf16.mxu0 %vm6427_vm0, %v8134_v26  ;;  %v6356_v47 = vld [vmem:[%s8120_s0 + $0x64c] ss:$20 sps:$4 sm:$0xff]  }
 0x244   :  { %v4897_v34 = vpack.c.bf16 %v3636_v23, %v3635_v37 }
 0x245   :  { %v3237_v10 = vpop.f32.mrb[36].mxu0 }
 0x246   :  { %5141 = vst [vmem:[%s8122_s3 + $0x40] sm:$0xff] %v4897_v34   ;;  %v5567_v48 = vadd.f32 %v3237_v10, %v2262_v59  ;;  %v5308_v29 = vpop.f32.mrb[37].mxu0  ;;  %v6355_v59 = vld [vmem:[%s8120_s0 + $0x600] ss:$20 sps:$4 sm:$0xff]  }
 0x247   :  { %v3240_v20 = vpop.f32.mrb[38].mxu0 }
 0x248   :  { %v5569_v11 = vadd.f32 %v3240_v20, %v2265_v25  ;;  %v5309_v62 = vpop.f32.mrb[39].mxu0  ;;  %v3637_v13 = vmax.f32 %v5567_v48, 0.0  ;;  %v2286_v48 = vadd.f32 %v7455_v39, %v7199_v57  ;;  %v2289_v20 = vadd.f32 %v7455_v39, %v7207_v63  ;;  %v6360_v57 = vld [vmem:[%s8120_s0 + $0x674] ss:$20 sps:$4 sm:$0xff]  }
 0x249   :  { %2972 = vmatmul.mubr.bf16.gmra.mrb[148].mxu1 %v6346_v56 }
 0x24a   :  { %v3638_v32 = vmax.f32 %v5569_v11, 0.0  ;;  %5415 = vmatmul.mubr.bf16.gmra.mrb[144].mxu0 %v6347_v46  ;;  %2979 = vmatprep.mubr.bf16.mxu1 %v6348_v27  ;;  %v6358_v27 = vld [vmem:[%s8120_s0 + $0x648] ss:$20 sps:$4 sm:$0xff]  }
 0x24b   :  { %5418 = vmatprep.mubr.msk.bf16.mxu0 %vm6427_vm0, %v8134_v26 }
 0x24c   :  { %v4902_v12 = vpack.c.bf16 %v3638_v32, %v3637_v13  ;;  %v6359_v13 = vld [vmem:[%s8120_s0 + $0x628] ss:$20 sps:$4 sm:$0xff]  }
 0x24d   :  { %v3245_v41 = vpop.f32.mrb[40].mxu0 }
 0x24e   :  { %5142 = vst [vmem:[%s8122_s3 + $0x48] sm:$0xff] %v4902_v12   ;;  %v5571_v3 = vadd.f32 %v3245_v41, %v2270_v52  ;;  %v5312_v7 = vpop.f32.mrb[41].mxu0 }
 0x24f   :  { %v3248_v33 = vpop.f32.mrb[42].mxu0  ;;  %v6362_v7 = vld [vmem:[%s8120_s0 + $0x670] ss:$20 sps:$4 sm:$0xff]  }
 0x250   :  { %v5573_v45 = vadd.f32 %v3248_v33, %v2273_v17  ;;  %v5313_v2 = vpop.f32.mrb[43].mxu0  ;;  %v3639_v55 = vmax.f32 %v5571_v3, 0.0 }
 0x251   :  { %2980 = vmatmul.mubr.bf16.gmra.mrb[152].mxu1 %v6350_v31  ;;  %v2294_v31 = vadd.f32 %v7455_v39, %v7214_v4  ;;  %v6364_v4 = vld [vmem:[%s8120_s0 + $0x69c] ss:$20 sps:$4 sm:$0xff]  }
 0x252   :  { %v3640_v43 = vmax.f32 %v5573_v45, 0.0  ;;  %5419 = vmatmul.mubr.bf16.gmra.mrb[148].mxu0 %v6351_v18  ;;  %2987 = vmatprep.mubr.bf16.mxu1 %v6352_v36  ;;  %v2297_v18 = vadd.f32 %v7455_v39, %v7222_v9  ;;  %v6363_v45 = vld [vmem:[%s8120_s0 + $0x650] ss:$20 sps:$4 sm:$0xff]  }
 0x253   :  { %5422 = vmatprep.mubr.msk.bf16.mxu0 %vm6427_vm0, %v8134_v26 }
 0x254   :  { %v4907_v19 = vpack.c.bf16 %v3640_v43, %v3639_v55 }
 0x255   :  { %v3253_v61 = vpop.f32.mrb[44].mxu0 }
 0x256   :  { %5143 = vst [vmem:[%s8122_s3 + $0x50] sm:$0xff] %v4907_v19   ;;  %v5575_v37 = vadd.f32 %v3253_v61, %v2278_v42  ;;  %v5316_v23 = vpop.f32.mrb[45].mxu0  ;;  %v2302_v19 = vadd.f32 %v7455_v39, %v7229_v14  ;;  %v6368_v14 = vld [vmem:[%s8120_s0 + $0x6c4] ss:$20 sps:$4 sm:$0xff]  }
 0x257   :  { %v3256_v34 = vpop.f32.mrb[46].mxu0 }
 0x258   :  { %v5577_v10 = vadd.f32 %v3256_v34, %v2281_v54  ;;  %v5317_v56 = vpop.f32.mrb[47].mxu0  ;;  %v3641_v25 = vmax.f32 %v5575_v37, 0.0  ;;  %v6366_v54 = vld [vmem:[%s8120_s0 + $0x698] ss:$20 sps:$4 sm:$0xff]   ;;  %v2305_v37 = vadd.f32 %v7455_v39, %v7237_v0 }
 0x259   :  { %2988 = vmatmul.mubr.bf16.gmra.mrb[156].mxu1 %v6354_v6 }
 0x25a   :  { %v3642_v53 = vmax.f32 %v5577_v10, 0.0  ;;  %5423 = vmatmul.mubr.bf16.gmra.mrb[152].mxu0 %v6355_v59  ;;  %2995 = vmatprep.mubr.bf16.mxu1 %v6356_v47  ;;  %v6367_v47 = vld [vmem:[%s8120_s0 + $0x678] ss:$20 sps:$4 sm:$0xff]  }
 0x25b   :  { %5426 = vmatprep.mubr.msk.bf16.mxu0 %vm6427_vm0, %v8134_v26 }
 0x25c   :  { %v4912_v29 = vpack.c.bf16 %v3642_v53, %v3641_v25  ;;  %v2310_v53 = vadd.f32 %v7455_v39, %v7244_v22  ;;  %v6372_v22 = vld [vmem:[%s8120_s0 + $0x6ec] ss:$20 sps:$4 sm:$0xff]  }
 0x25d   :  { %v3261_v46 = vpop.f32.mrb[48].mxu0 }
 0x25e   :  { %5144 = vst [vmem:[%s8122_s3 + $0x58] sm:$0xff] %v4912_v29   ;;  %v5579_v11 = vadd.f32 %v3261_v46, %v2286_v48  ;;  %v5320_v62 = vpop.f32.mrb[49].mxu0  ;;  %v6370_v46 = vld [vmem:[%s8120_s0 + $0x6c0] ss:$20 sps:$4 sm:$0xff]  }
 0x25f   :  { %v3264_v32 = vpop.f32.mrb[50].mxu0  ;;  %v6371_v62 = vld [vmem:[%s8120_s0 + $0x6a0] ss:$20 sps:$4 sm:$0xff]  }
 0x260   :  { %v5581_v52 = vadd.f32 %v3264_v32, %v2289_v20  ;;  %v5321_v12 = vpop.f32.mrb[51].mxu0  ;;  %v3643_v41 = vmax.f32 %v5579_v11, 0.0 }
 0x261   :  { %2996 = vmatmul.mubr.bf16.gmra.mrb[160].mxu1 %v6358_v27  ;;  %v2313_v27 = vadd.f32 %v7455_v39, %v7252_v30  ;;  %v2318_v12 = vadd.f32 %v7455_v39, %v7259_v35  ;;  %v6376_v35 = vld [vmem:[%s8120_s0 + $0x714] ss:$20 sps:$4 sm:$0xff]  }
 0x262   :  { %v3644_v63 = vmax.f32 %v5581_v52, 0.0  ;;  %5427 = vmatmul.mubr.bf16.gmra.mrb[156].mxu0 %v6359_v13  ;;  %3003 = vmatprep.mubr.bf16.mxu1 %v6360_v57 }
 0x263   :  { %5430 = vmatprep.mubr.msk.bf16.mxu0 %vm6427_vm0, %v8134_v26 }
 0x264   :  { %v4917_v17 = vpack.c.bf16 %v3644_v63, %v3643_v41 }
 0x265   :  { %v3269_v3 = vpop.f32.mrb[52].mxu0 }
 0x266   :  { %5145 = vst [vmem:[%s8122_s3 + $0x60] sm:$0xff] %v4917_v17   ;;  %v5583_v36 = vadd.f32 %v3269_v3, %v2294_v31  ;;  %v5324_v33 = vpop.f32.mrb[53].mxu0  ;;  %v6374_v31 = vld [vmem:[%s8120_s0 + $0x6e8] ss:$20 sps:$4 sm:$0xff]   ;;  %v2321_v17 = vadd.f32 %v7455_v39, %v7267_v44 }
 0x267   :  { %v3272_v2 = vpop.f32.mrb[54].mxu0 }
 0x268   :  { %v5585_v55 = vadd.f32 %v3272_v2, %v2297_v18  ;;  %v5325_v43 = vpop.f32.mrb[55].mxu0  ;;  %v3645_v42 = vmax.f32 %v5583_v36, 0.0  ;;  %v6375_v18 = vld [vmem:[%s8120_s0 + $0x6c8] ss:$20 sps:$4 sm:$0xff]   ;;  %v2326_v2 = vadd.f32 %v7455_v39, %v7274_v50 }
 0x269   :  { %3004 = vmatmul.mubr.bf16.gmra.mrb[164].mxu1 %v6362_v7  ;;  %v6380_v50 = vld [vmem:[%s8120_s0 + $0x73c] ss:$20 sps:$4 sm:$0xff]  }
 0x26a   :  { %v3646_v9 = vmax.f32 %v5585_v55, 0.0  ;;  %5431 = vmatmul.mubr.bf16.gmra.mrb[160].mxu0 %v6363_v45  ;;  %3011 = vmatprep.mubr.bf16.mxu1 %v6364_v4 }
 0x26b   :  { %5434 = vmatprep.mubr.msk.bf16.mxu0 %vm6427_vm0, %v8134_v26 }
 0x26c   :  { %v4922_v61 = vpack.c.bf16 %v3646_v9, %v3645_v42  ;;  %v6378_v42 = vld [vmem:[%s8120_s0 + $0x710] ss:$20 sps:$4 sm:$0xff]   ;;  %v2329_v9 = vadd.f32 %v7455_v39, %v7282_v58 }
 0x26d   :  { %v3277_v6 = vpop.f32.mrb[56].mxu0 }
 0x26e   :  { %5146 = vst [vmem:[%s8122_s3 + $0x68] sm:$0xff] %v4922_v61   ;;  %v5587_v23 = vadd.f32 %v3277_v6, %v2302_v19  ;;  %v5328_v59 = vpop.f32.mrb[57].mxu0  ;;  %v6379_v6 = vld [vmem:[%s8120_s0 + $0x6f0] ss:$20 sps:$4 sm:$0xff]  }
 0x26f   :  { %v3280_v34 = vpop.f32.mrb[58].mxu0 }
 0x270   :  { %v5589_v10 = vadd.f32 %v3280_v34, %v2305_v37  ;;  %v5329_v56 = vpop.f32.mrb[59].mxu0  ;;  %v3647_v25 = vmax.f32 %v5587_v23, 0.0 }
 0x271   :  { %3012 = vmatmul.mubr.bf16.gmra.mrb[168].mxu1 %v6366_v54  ;;  %v2337_v56 = vadd.f32 %v7455_v39, %v7297_v8 }
 0x272   :  { %v3648_v0 = vmax.f32 %v5589_v10, 0.0  ;;  %5435 = vmatmul.mubr.bf16.gmra.mrb[164].mxu0 %v6367_v47  ;;  %3019 = vmatprep.mubr.bf16.mxu1 %v6368_v14  ;;  %v2334_v47 = vadd.f32 %v7455_v39, %v7289_v1  ;;  %v6382_v10 = vld [vmem:[%s8120_s0 + $0x738] ss:$20 sps:$4 sm:$0xff]  }
 0x273   :  { %5438 = vmatprep.mubr.msk.bf16.mxu0 %vm6427_vm0, %v8134_v26  ;;  %v6384_v1 = vld [vmem:[%s8120_s0 + $0x764] ss:$20 sps:$4 sm:$0xff]  }
 0x274   :  { %v4927_v48 = vpack.c.bf16 %v3648_v0, %v3647_v25 }
 0x275   :  { %v3285_v29 = vpop.f32.mrb[60].mxu0 }
 0x276   :  { %5147 = vst [vmem:[%s8122_s3 + $0x70] sm:$0xff] %v4927_v48   ;;  %v5591_v20 = vadd.f32 %v3285_v29, %v2310_v53  ;;  %v5332_v11 = vpop.f32.mrb[61].mxu0  ;;  %v6383_v53 = vld [vmem:[%s8120_s0 + $0x718] ss:$20 sps:$4 sm:$0xff]  }
 0x277   :  { %v3288_v13 = vpop.f32.mrb[62].mxu0 }
 0x278   :  { %v5593_v57 = vadd.f32 %v3288_v13, %v2313_v27  ;;  %v5333_v32 = vpop.f32.mrb[63].mxu0  ;;  %v3649_v52 = vmax.f32 %v5591_v20, 0.0  ;;  %v2342_v20 = vadd.f32 %v7455_v39, %v7304_v15  ;;  %v2345_v13 = vadd.f32 %v7455_v39, %v7312_v21  ;;  %v6388_v15 = vld [vmem:[%s8120_s0 + $0x78c] ss:$20 sps:$4 sm:$0xff]  }
 0x279   :  { %3020 = vmatmul.mubr.bf16.gmra.mrb[172].mxu1 %v6370_v46 }
 0x27a   :  { %v3650_v30 = vmax.f32 %v5593_v57, 0.0  ;;  %5439 = vmatmul.mubr.bf16.gmra.mrb[168].mxu0 %v6371_v62  ;;  %3027 = vmatprep.mubr.bf16.mxu1 %v6372_v22  ;;  %v6386_v22 = vld [vmem:[%s8120_s0 + $0x760] ss:$20 sps:$4 sm:$0xff]  }
 0x27b   :  { %5442 = vmatprep.mubr.msk.bf16.mxu0 %vm6427_vm0, %v8134_v26 }
 0x27c   :  { %v4932_v41 = vpack.c.bf16 %v3650_v30, %v3649_v52  ;;  %v6387_v52 = vld [vmem:[%s8120_s0 + $0x740] ss:$20 sps:$4 sm:$0xff]  }
 0x27d   :  { %v3293_v63 = vpop.f32.mrb[64].mxu0 }
 0x27e   :  { %5148 = vst [vmem:[%s8122_s3 + $0x78] sm:$0xff] %v4932_v41   ;;  %v5595_v3 = vadd.f32 %v3293_v63, %v2318_v12  ;;  %v5336_v7 = vpop.f32.mrb[65].mxu0 }
 0x27f   :  { %v3296_v36 = vpop.f32.mrb[66].mxu0  ;;  %v6390_v7 = vld [vmem:[%s8120_s0 + $0x788] ss:$20 sps:$4 sm:$0xff]  }
 0x280   :  { %v5597_v33 = vadd.f32 %v3296_v36, %v2321_v17  ;;  %v5337_v45 = vpop.f32.mrb[67].mxu0  ;;  %v3651_v4 = vmax.f32 %v5595_v3, 0.0 }
 0x281   :  { %3028 = vmatmul.mubr.bf16.gmra.mrb[176].mxu1 %v6374_v31  ;;  %v2350_v31 = vadd.f32 %v7455_v39, %v7319_v28  ;;  %v6392_v28 = vld [vmem:[%s8120_s0 + $0x7b4] ss:$20 sps:$4 sm:$0xff]  }
 0x282   :  { %v3652_v44 = vmax.f32 %v5597_v33, 0.0  ;;  %5443 = vmatmul.mubr.bf16.gmra.mrb[172].mxu0 %v6375_v18  ;;  %3035 = vmatprep.mubr.bf16.mxu1 %v6376_v35  ;;  %v2353_v18 = vadd.f32 %v7455_v39, %v7327_v40  ;;  %v6391_v33 = vld [vmem:[%s8120_s0 + $0x768] ss:$20 sps:$4 sm:$0xff]  }
 0x283   :  { %5446 = vmatprep.mubr.msk.bf16.mxu0 %vm6427_vm0, %v8134_v26 }
 0x284   :  { %v4937_v55 = vpack.c.bf16 %v3652_v44, %v3651_v4 }
 0x285   :  { %v3301_v43 = vpop.f32.mrb[68].mxu0 }
 0x286   :  { %5149 = vst [vmem:[%s8122_s3 + $0x80] sm:$0xff] %v4937_v55   ;;  %v5599_v19 = vadd.f32 %v3301_v43, %v2326_v2  ;;  %v5340_v61 = vpop.f32.mrb[69].mxu0  ;;  %v2358_v55 = vadd.f32 %v7455_v39, %v7334_v49  ;;  %v6396_v49 = vld [vmem:[%s8120_s0 + $0x7dc] ss:$20 sps:$4 sm:$0xff]  }
 0x287   :  { %v3304_v54 = vpop.f32.mrb[70].mxu0 }
 0x288   :  { %v5601_v37 = vadd.f32 %v3304_v54, %v2329_v9  ;;  %v5341_v23 = vpop.f32.mrb[71].mxu0  ;;  %v3653_v59 = vmax.f32 %v5599_v19, 0.0  ;;  %v6394_v9 = vld [vmem:[%s8120_s0 + $0x7b0] ss:$20 sps:$4 sm:$0xff]   ;;  %v2361_v19 = vadd.f32 %v7455_v39, %v7342_v60 }
 0x289   :  { %3036 = vmatmul.mubr.bf16.gmra.mrb[180].mxu1 %v6378_v42 }
 0x28a   :  { %v3654_v58 = vmax.f32 %v5601_v37, 0.0  ;;  %5447 = vmatmul.mubr.bf16.gmra.mrb[176].mxu0 %v6379_v6  ;;  %3043 = vmatprep.mubr.bf16.mxu1 %v6380_v50  ;;  %v6395_v50 = vld [vmem:[%s8120_s0 + $0x790] ss:$20 sps:$4 sm:$0xff]  }
 0x28b   :  { %5450 = vmatprep.mubr.msk.bf16.mxu0 %vm6427_vm0, %v8134_v26 }
 0x28c   :  { %v4942_v14 = vpack.c.bf16 %v3654_v58, %v3653_v59  ;;  %v2366_v58 = vadd.f32 %v7455_v39, %v7349_v5  ;;  %v6400_v5 = vld [vmem:[%s8120_s0 + $0x804] ss:$20 sps:$4 sm:$0xff]  }
 0x28d   :  { %v3309_v34 = vpop.f32.mrb[72].mxu0 }
 0x28e   :  { %5150 = vst [vmem:[%s8122_s3 + $0x88] sm:$0xff] %v4942_v14   ;;  %v5603_v25 = vadd.f32 %v3309_v34, %v2334_v47  ;;  %v5344_v0 = vpop.f32.mrb[73].mxu0  ;;  %v6398_v34 = vld [vmem:[%s8120_s0 + $0x7d8] ss:$20 sps:$4 sm:$0xff]  }
 0x28f   :  { %v3312_v48 = vpop.f32.mrb[74].mxu0  ;;  %v6399_v0 = vld [vmem:[%s8120_s0 + $0x7b8] ss:$20 sps:$4 sm:$0xff]  }
 0x290   :  { %v5605_v29 = vadd.f32 %v3312_v48, %v2337_v56  ;;  %v5345_v46 = vpop.f32.mrb[75].mxu0  ;;  %v3655_v27 = vmax.f32 %v5603_v25, 0.0 }
 0x291   :  { %3044 = vmatmul.mubr.bf16.gmra.mrb[184].mxu1 %v6382_v10  ;;  %v2369_v10 = vadd.f32 %v7455_v39, %v7357_v16  ;;  %v2374_v46 = vadd.f32 %v7455_v39, %v7364_v24  ;;  %v6404_v24 = vld [vmem:[%s8120_s0 + $0x82c] ss:$20 sps:$4 sm:$0xff]  }
 0x292   :  { %v3656_v8 = vmax.f32 %v5605_v29, 0.0  ;;  %5451 = vmatmul.mubr.bf16.gmra.mrb[180].mxu0 %v6383_v53  ;;  %3051 = vmatprep.mubr.bf16.mxu1 %v6384_v1 }
 0x293   :  { %5454 = vmatprep.mubr.msk.bf16.mxu0 %vm6427_vm0, %v8134_v26 }
 0x294   :  { %v4947_v11 = vpack.c.bf16 %v3656_v8, %v3655_v27 }
 0x295   :  { %v3317_v62 = vpop.f32.mrb[76].mxu0 }
 0x296   :  { %5151 = vst [vmem:[%s8122_s3 + $0x90] sm:$0xff] %v4947_v11   ;;  %v5607_v57 = vadd.f32 %v3317_v62, %v2342_v20  ;;  %v5348_v32 = vpop.f32.mrb[77].mxu0  ;;  %v6402_v20 = vld [vmem:[%s8120_s0 + $0x800] ss:$20 sps:$4 sm:$0xff]   ;;  %v2377_v11 = vadd.f32 %v7455_v39, %v7372_v38 }
 0x297   :  { %v3320_v30 = vpop.f32.mrb[78].mxu0 }
 0x298   :  { %v5609_v12 = vadd.f32 %v3320_v30, %v2345_v13  ;;  %v5349_v41 = vpop.f32.mrb[79].mxu0  ;;  %v3657_v63 = vmax.f32 %v5607_v57, 0.0  ;;  %v6403_v13 = vld [vmem:[%s8120_s0 + $0x7e0] ss:$20 sps:$4 sm:$0xff]   ;;  %v2382_v30 = vadd.f32 %v7455_v39, %v7379_v51 }
 0x299   :  { %3052 = vmatmul.mubr.bf16.gmra.mrb[188].mxu1 %v6386_v22  ;;  %v6408_v51 = vld [vmem:[%s8120_s0 + $0x854] ss:$20 sps:$4 sm:$0xff]  }
 0x29a   :  { %v3658_v21 = vmax.f32 %v5609_v12, 0.0  ;;  %5455 = vmatmul.mubr.bf16.gmra.mrb[184].mxu0 %v6387_v52  ;;  %3059 = vmatprep.mubr.bf16.mxu1 %v6388_v15 }
 0x29b   :  { %5458 = vmatprep.mubr.msk.bf16.mxu0 %vm6427_vm0, %v8134_v26 }
 0x29c   :  { %v4952_v17 = vpack.c.bf16 %v3658_v21, %v3657_v63  ;;  %v6406_v63 = vld [vmem:[%s8120_s0 + $0x828] ss:$20 sps:$4 sm:$0xff]   ;;  %v8135_v21 = vld [vmem:[#allocation2_spill] sm:$0xff] }
 0x29d   :  { %v3325_v3 = vpop.f32.mrb[80].mxu0 }
 0x29e   :  { %5152 = vst [vmem:[%s8122_s3 + $0x98] sm:$0xff] %v4952_v17   ;;  %v5611_v35 = vadd.f32 %v3325_v3, %v2350_v31  ;;  %v5352_v36 = vpop.f32.mrb[81].mxu0  ;;  %v2385_v31 = vadd.f32 %v7455_v39, %v8135_v21 }
 0x29f   :  { %v3328_v45 = vpop.f32.mrb[82].mxu0 }
 0x2a0   :  { %v5613_v4 = vadd.f32 %v3328_v45, %v2353_v18  ;;  %v5353_v44 = vpop.f32.mrb[83].mxu0  ;;  %v3659_v2 = vmax.f32 %v5611_v35, 0.0  ;;  %v8136_v45 = vld [vmem:[#allocation3_spill] sm:$0xff] }
 0x2a1   :  { %3060 = vmatmul.mubr.bf16.gmra.mrb[192].mxu1 %v6390_v7  ;;  %v6407_v7 = vld [vmem:[%s8120_s0 + $0x808] ss:$20 sps:$4 sm:$0xff]  }
 0x2a2   :  { %v3660_v40 = vmax.f32 %v5613_v4, 0.0  ;;  %5459 = vmatmul.mubr.bf16.gmra.mrb[188].mxu0 %v6391_v33  ;;  %3067 = vmatprep.mubr.bf16.mxu1 %v6392_v28  ;;  %v2390_v4 = vadd.f32 %v7455_v39, %v8136_v45 }
 0x2a3   :  { %5462 = vmatprep.mubr.msk.bf16.mxu0 %vm6427_vm0, %v8134_v26 }
 0x2a4   :  { %v4957_v43 = vpack.c.bf16 %v3660_v40, %v3659_v2  ;;  %v6410_v40 = vld [vmem:[%s8120_s0 + $0x850] ss:$20 sps:$4 sm:$0xff]  }
 0x2a5   :  { %v3333_v42 = vpop.f32.mrb[84].mxu0 }
 0x2a6   :  { %5153 = vst [vmem:[%s8122_s3 + $0xa0] sm:$0xff] %v4957_v43   ;;  %v5615_v61 = vadd.f32 %v3333_v42, %v2358_v55  ;;  %v5356_v6 = vpop.f32.mrb[85].mxu0  ;;  %v8137_v55 = vld [vmem:[#allocation4_spill] sm:$0xff] }
 0x2a7   :  { %v3336_v54 = vpop.f32.mrb[86].mxu0  ;;  %v2393_v43 = vadd.f32 %v7455_v39, %v8137_v55 }
 0x2a8   :  { %v5617_v37 = vadd.f32 %v3336_v54, %v2361_v19  ;;  %v5357_v23 = vpop.f32.mrb[87].mxu0  ;;  %v3661_v59 = vmax.f32 %v5615_v61, 0.0  ;;  %v6411_v19 = vld [vmem:[%s8120_s0 + $0x830] ss:$20 sps:$4 sm:$0xff]  }
 0x2a9   :  { %3068 = vmatmul.mubr.bf16.gmra.mrb[196].mxu1 %v6394_v9  ;;  %v6412_v61 = vld [vmem:[%s8120_s0 + $0x87c] ss:$20 sps:$4 sm:$0xff]  }
 0x2aa   :  { %v3662_v60 = vmax.f32 %v5617_v37, 0.0  ;;  %5463 = vmatmul.mubr.bf16.gmra.mrb[192].mxu0 %v6395_v50  ;;  %3075 = vmatprep.mubr.bf16.mxu1 %v6396_v49  ;;  %v8138_v23 = vld [vmem:[#allocation5_spill] sm:$0xff] }
 0x2ab   :  { %5466 = vmatprep.mubr.msk.bf16.mxu0 %vm6427_vm0, %v8134_v26 }
 0x2ac   :  { %v4962_v47 = vpack.c.bf16 %v3662_v60, %v3661_v59  ;;  %v2398_v59 = vadd.f32 %v7455_v39, %v8138_v23 }
 0x2ad   :  { %v3341_v14 = vpop.f32.mrb[88].mxu0 }
 0x2ae   :  { %5154 = vst [vmem:[%s8122_s3 + $0xa8] sm:$0xff] %v4962_v47   ;;  %v5619_v56 = vadd.f32 %v3341_v14, %v2366_v58  ;;  %v5360_v25 = vpop.f32.mrb[89].mxu0  ;;  %v6414_v47 = vld [vmem:[%s8120_s0 + $0x878] ss:$20 sps:$4 sm:$0xff]   ;;  %v8139_v14 = vld [vmem:[#allocation6_spill] sm:$0xff] }
 0x2af   :  { %v3344_v53 = vpop.f32.mrb[90].mxu0  ;;  %v6415_v25 = vld [vmem:[%s8120_s0 + $0x858] ss:$20 sps:$4 sm:$0xff]  }
 0x2b0   :  { %v5621_v1 = vadd.f32 %v3344_v53, %v2369_v10  ;;  %v5361_v48 = vpop.f32.mrb[91].mxu0  ;;  %v3663_v29 = vmax.f32 %v5619_v56, 0.0 }
 0x2b1   :  { %3076 = vmatmul.mubr.bf16.gmra.mrb[200].mxu1 %v6398_v34  ;;  %v2401_v34 = vadd.f32 %v7455_v39, %v8139_v14 }
 0x2b2   :  { %v3664_v16 = vmax.f32 %v5621_v1, 0.0  ;;  %5467 = vmatmul.mubr.bf16.gmra.mrb[196].mxu0 %v6399_v0  ;;  %3083 = vmatprep.mubr.bf16.mxu1 %v6400_v5  ;;  %v6416_v0 = vld [vmem:[%s8120_s0 + $0x8a4] ss:$20 sps:$4 sm:$0xff]  }
 0x2b3   :  { %5470 = vmatprep.mubr.msk.bf16.mxu0 %vm6427_vm0, %v8134_v26 }
 0x2b4   :  { %v4967_v27 = vpack.c.bf16 %v3664_v16, %v3663_v29  ;;  %v352_v29 = vld [vmem:[%s8120_s0 + $0x8c8] sm:$0x33]  ;;  %v7945_v16 = vld [vmem:[%s8121_s2] ss:$0 sm:$0xff] }
 0x2b5   :  { %v3349_v8 = vpop.f32.mrb[92].mxu0 }
 0x2b6   :  { %5155 = vst [vmem:[%s8122_s3 + $0xb0] sm:$0xff] %v4967_v27   ;;  %v5623_v62 = vadd.f32 %v3349_v8, %v2374_v46  ;;  %v5364_v22 = vpop.f32.mrb[93].mxu0  ;;  %v8140_v46 = vld [vmem:[#allocation7_spill] sm:$0xff] }
 0x2b7   :  { %v3352_v57 = vpop.f32.mrb[94].mxu0  ;;  %v2406_v27 = vadd.f32 %v7945_v16, %v8140_v46 }
 0x2b8   :  { %v5625_v32 = vadd.f32 %v3352_v57, %v2377_v11  ;;  %v5365_v52 = vpop.f32.mrb[95].mxu0  ;;  %v3665_v15 = vmax.f32 %v5623_v62, 0.0  ;;  %v6418_v11 = vld [vmem:[%s8120_s0 + $0x8a0] ss:$20 sps:$4 sm:$0xff]  }
 0x2b9   :  { %3084 = vmatmul.mubr.bf16.gmra.mrb[204].mxu1 %v6402_v20  ;;  %v8141_v62 = vld [vmem:[#allocation8_spill] sm:$0xff] }
 0x2ba   :  { %v3666_v38 = vmax.f32 %v5625_v32, 0.0  ;;  %5471 = vmatmul.mubr.bf16.gmra.mrb[200].mxu0 %v6403_v13  ;;  %3091 = vmatprep.mubr.bf16.mxu1 %v6404_v24  ;;  %v2409_v22 = vadd.f32 %v7945_v16, %v8141_v62  ;;  %v6419_v57 = vld [vmem:[%s8120_s0 + $0x880] ss:$20 sps:$4 sm:$0xff]   ;;  %v4586_v32 = vcombine.high %v352_v29, %v352_v29 }
 0x2bb   :  { %5474 = vmatprep.mubr.msk.bf16.mxu0 %vm6427_vm0, %v8134_v26 }
 0x2bc   :  { %v4972_v12 = vpack.c.bf16 %v3666_v38, %v3665_v15 }
 0x2bd   :  { %v3357_v41 = vpop.f32.mrb[96].mxu0 }
 0x2be   :  { %5156 = vst [vmem:[%s8122_s3 + $0xb8] sm:$0xff] %v4972_v12   ;;  %v5627_v17 = vadd.f32 %v3357_v41, %v2382_v30  ;;  %v5368_v3 = vpop.f32.mrb[97].mxu0  ;;  %v8142_v41 = vld [vmem:[#allocation9_spill] sm:$0xff] }
 0x2bf   :  { %v3360_v18 = vpop.f32.mrb[98].mxu0 }
 0x2c0   :  { %v5629_v35 = vadd.f32 %v3360_v18, %v2385_v31  ;;  %v5369_v36 = vpop.f32.mrb[99].mxu0  ;;  %v3667_v33 = vmax.f32 %v5627_v17, 0.0 }
 0x2c1   :  { %3092 = vmatmul.mubr.bf16.gmra.mrb[208].mxu1 %v6406_v63  ;;  %v2414_v63 = vadd.f32 %v7945_v16, %v8142_v41 }
 0x2c2   :  { %v3668_v28 = vmax.f32 %v5629_v35, 0.0  ;;  %5475 = vmatmul.mubr.bf16.gmra.mrb[204].mxu0 %v6407_v7  ;;  %3099 = vmatprep.mubr.bf16.mxu1 %v6408_v51  ;;  %v4585_v7 = vcombine.low %v352_v29, %v352_v29  ;;  %v8143_v51 = vld [vmem:[#allocation10_spill] sm:$0xff] }
 0x2c3   :  { %5478 = vmatprep.mubr.msk.bf16.mxu0 %vm6427_vm0, %v8134_v26  ;;  %v2417_v18 = vadd.f32 %v7945_v16, %v8143_v51 }
 0x2c4   :  { %v4977_v44 = vpack.c.bf16 %v3668_v28, %v3667_v33  ;;  %v6422_v28 = vld [vmem:[%s8120_s0 + $0x8a8] ss:$20 sps:$4 sm:$0xff]  }
 0x2c5   :  { %v3365_v2 = vpop.f32.mrb[100].mxu0 }
 0x2c6   :  { %5157 = vst [vmem:[%s8122_s3 + $0xc0] sm:$0xff] %v4977_v44   ;;  %v5631_v42 = vadd.f32 %v3365_v2, %v2390_v4  ;;  %v5372_v9 = vpop.f32.mrb[101].mxu0 }
 0x2c7   :  { %v3368_v6 = vpop.f32.mrb[102].mxu0 }
 0x2c8   :  { %v5633_v50 = vadd.f32 %v3368_v6, %v2393_v43  ;;  %v5373_v49 = vpop.f32.mrb[103].mxu0  ;;  %v3669_v54 = vmax.f32 %v5631_v42, 0.0 }
 0x2c9   :  { %3100 = vmatmul.mubr.bf16.gmra.mrb[212].mxu1 %v6410_v40 }
 0x2ca   :  { %v3670_v37 = vmax.f32 %v5633_v50, 0.0  ;;  %5479 = vmatmul.mubr.bf16.gmra.mrb[208].mxu0 %v6411_v19  ;;  %3107 = vmatprep.mubr.bf16.mxu1 %v6412_v61 }
 0x2cb   :  { %5482 = vmatprep.mubr.msk.bf16.mxu0 %vm6427_vm0, %v8134_v26 }
 0x2cc   :  { %v4982_v60 = vpack.c.bf16 %v3670_v37, %v3669_v54  ;;  %v6423_v37 = vld [vmem:[%s8120_s0 + $0x8d0] ss:$0 sps:$4 sm:$0x33]  }
 0x2cd   :  { %v3373_v58 = vpop.f32.mrb[104].mxu0 }
 0x2ce   :  { %5158 = vst [vmem:[%s8122_s3 + $0xc8] sm:$0xff] %v4982_v60   ;;  %v5635_v10 = vadd.f32 %v3373_v58, %v2398_v59  ;;  %v5376_v56 = vpop.f32.mrb[105].mxu0 }
 0x2cf   :  { %v3376_v5 = vpop.f32.mrb[106].mxu0 }
 0x2d0   :  { %v5637_v53 = vadd.f32 %v3376_v5, %v2401_v34  ;;  %v5377_v1 = vpop.f32.mrb[107].mxu0  ;;  %v3671_v48 = vmax.f32 %v5635_v10, 0.0 }
 0x2d1   :  { %3108 = vmatmul.mubr.bf16.gmra.mrb[216].mxu1 %v6414_v47 }
 0x2d2   :  { %v3672_v39 = vmax.f32 %v5637_v53, 0.0  ;;  %5483 = vmatmul.mubr.bf16.gmra.mrb[212].mxu0 %v6415_v25  ;;  %3115 = vmatprep.mubr.bf16.mxu1 %v6416_v0 }
 0x2d3   :  { %5486 = vmatprep.mubr.msk.bf16.mxu0 %vm6427_vm0, %v8134_v26 }
 0x2d4   :  { %v4987_v8 = vpack.c.bf16 %v3672_v39, %v3671_v48 }
 0x2d5   :  { %v3381_v20 = vpop.f32.mrb[108].mxu0 }
 0x2d6   :  { %5159 = vst [vmem:[%s8122_s3 + $0xd0] sm:$0xff] %v4987_v8   ;;  %v5639_v13 = vadd.f32 %v3381_v20, %v2406_v27  ;;  %v5380_v24 = vpop.f32.mrb[109].mxu0 }
 0x2d7   :  { %v3384_v52 = vpop.f32.mrb[110].mxu0 }
 0x2d8   :  { %v5641_v15 = vadd.f32 %v3384_v52, %v2409_v22  ;;  %v5381_v38 = vpop.f32.mrb[111].mxu0  ;;  %v3673_v30 = vmax.f32 %v5639_v13, 0.0 }
 0x2d9   :  { %3116 = vmatmul.mubr.bf16.gmra.mrb[220].mxu1 %v6418_v11 }
 0x2da   :  { %v3674_v12 = vmax.f32 %v5641_v15, 0.0  ;;  %5487 = vmatmul.mubr.bf16.gmra.mrb[216].mxu0 %v6419_v57  ;;  %3123 = vmatprep.mubr.bf16.mxu1 %v4586_v32 }
 0x2db   :  { %5490 = vmatprep.mubr.msk.bf16.mxu0 %vm6427_vm0, %v8134_v26 }
 0x2dc   :  { %v4992_v21 = vpack.c.bf16 %v3674_v12, %v3673_v30  ;;  %v2909_v31 = vpop.f32.mrb[116].mxu1 }
 0x2dd   :  { %v3389_v17 = vpop.f32.mrb[112].mxu0  ;;  %v2911_v3 = vpop.f32.mrb[117].mxu1  ;;  %v5646_v43 = vadd.f32 %v7945_v16, %v2909_v31 }
 0x2de   :  { %5160 = vst [vmem:[%s8122_s3 + $0xd8] sm:$0xff] %v4992_v21   ;;  %v5643_v35 = vadd.f32 %v3389_v17, %v2414_v63  ;;  %v5384_v36 = vpop.f32.mrb[113].mxu0  ;;  %v2912_v33 = vpop.f32.mrb[118].mxu1 }
 0x2df   :  { %v3392_v45 = vpop.f32.mrb[114].mxu0  ;;  %v2914_v4 = vpop.f32.mrb[119].mxu1  ;;  %v5648_v6 = vadd.f32 %v7945_v16, %v2912_v33 }
 0x2e0   :  { %v5645_v44 = vadd.f32 %v3392_v45, %v2417_v18  ;;  %v5385_v2 = vpop.f32.mrb[115].mxu0  ;;  %v3675_v40 = vmax.f32 %v5643_v35, 0.0 }
 0x2e1   :  { %3124 = vmatmul.mubr.bf16.gmra.mrb[224].mxu1 %v4585_v7 }
 0x2e2   :  { %v3676_v55 = vmax.f32 %v5645_v44, 0.0  ;;  %5491 = vmatmul.mubr.bf16.gmra.mrb[220].mxu0 %v6422_v28 }
 0x2e3   :  { %5494 = vmatprep.mubr.msk.bf16.mxu0 %vm6427_vm0, %v8134_v26 }
 0x2e4   :  { %v4997_v42 = vpack.c.bf16 %v3676_v55, %v3675_v40  ;;  %v2917_v9 = vpop.f32.mrb[120].mxu1 }
 0x2e5   :  { %v3397_v19 = vpop.f32.mrb[116].mxu0  ;;  %v2919_v61 = vpop.f32.mrb[121].mxu1  ;;  %v5650_v14 = vadd.f32 %v7945_v16, %v2917_v9 }
 0x2e6   :  { %5161 = vst [vmem:[%s8122_s3 + $0xe0] sm:$0xff] %v4997_v42   ;;  %v5647_v50 = vadd.f32 %v5646_v43, %v3397_v19  ;;  %v5388_v49 = vpop.f32.mrb[117].mxu0  ;;  %v2920_v54 = vpop.f32.mrb[122].mxu1 }
 0x2e7   :  { %v3400_v26 = vpop.f32.mrb[118].mxu0  ;;  %v2922_v23 = vpop.f32.mrb[123].mxu1  ;;  %v5652_v0 = vadd.f32 %v7945_v16, %v2920_v54 }
 0x2e8   :  { %v5649_v59 = vadd.f32 %v5648_v6, %v3400_v26  ;;  %v5389_v60 = vpop.f32.mrb[119].mxu0  ;;  %v3677_v58 = vmax.f32 %v5647_v50, 0.0 }
 0x2ea   :  { %v3678_v47 = vmax.f32 %v5649_v59, 0.0  ;;  %5495 = vmatmul.mubr.bf16.gmra.mrb[224].mxu0 %v6423_v37 }
 0x2ec   :  { %v5002_v34 = vpack.c.bf16 %v3678_v47, %v3677_v58  ;;  %v2925_v10 = vpop.f32.mrb[124].mxu1 }
 0x2ed   :  { %v3405_v56 = vpop.f32.mrb[120].mxu0  ;;  %v2927_v25 = vpop.f32.mrb[125].mxu1  ;;  %v5654_v20 = vadd.f32 %v7945_v16, %v2925_v10 }
 0x2ee   :  { %5162 = vst [vmem:[%s8122_s3 + $0xe8] sm:$0xff] %v5002_v34   ;;  %v5651_v5 = vadd.f32 %v5650_v14, %v3405_v56  ;;  %v5392_v53 = vpop.f32.mrb[121].mxu0  ;;  %v2928_v1 = vpop.f32.mrb[126].mxu1 }
 0x2ef   :  { %v3408_v48 = vpop.f32.mrb[122].mxu0  ;;  %v2930_v39 = vpop.f32.mrb[127].mxu1  ;;  %v5656_v24 = vadd.f32 %v7945_v16, %v2928_v1 }
 0x2f0   :  { %v5653_v29 = vadd.f32 %v5652_v0, %v3408_v48  ;;  %v5393_v46 = vpop.f32.mrb[123].mxu0  ;;  %v3679_v27 = vmax.f32 %v5651_v5, 0.0 }
 0x2f2   :  { %v3680_v8 = vmax.f32 %v5653_v29, 0.0 }
 0x2f4   :  { %v5007_v11 = vpack.c.bf16 %v3680_v8, %v3679_v27  ;;  %v2933_v62 = vpop.f32.mrb[128].mxu1 }
 0x2f5   :  { %v3413_v22 = vpop.f32.mrb[124].mxu0  ;;  %v2935_v13 = vpop.f32.mrb[129].mxu1  ;;  %v5658_v21 = vadd.f32 %v7945_v16, %v2933_v62 }
 0x2f6   :  { %5163 = vst [vmem:[%s8122_s3 + $0xf0] sm:$0xff] %v5007_v11   ;;  %v5655_v57 = vadd.f32 %v5654_v20, %v3413_v22  ;;  %v5396_v32 = vpop.f32.mrb[125].mxu0  ;;  %v2936_v52 = vpop.f32.mrb[130].mxu1 }
 0x2f7   :  { %v3416_v15 = vpop.f32.mrb[126].mxu0  ;;  %v2938_v38 = vpop.f32.mrb[131].mxu1  ;;  %v5660_v51 = vadd.f32 %v7945_v16, %v2936_v52 }
 0x2f8   :  { %v5657_v30 = vadd.f32 %v5656_v24, %v3416_v15  ;;  %v5397_v12 = vpop.f32.mrb[127].mxu0  ;;  %v3681_v41 = vmax.f32 %v5655_v57, 0.0 }
 0x2fa   :  { %v3682_v63 = vmax.f32 %v5657_v30, 0.0 }
 0x2fc   :  { %v5012_v31 = vpack.c.bf16 %v3682_v63, %v3681_v41  ;;  %v2941_v17 = vpop.f32.mrb[132].mxu1 }
 0x2fd   :  { %v3421_v3 = vpop.f32.mrb[128].mxu0  ;;  %v2943_v7 = vpop.f32.mrb[133].mxu1  ;;  %v5662_v40 = vadd.f32 %v7945_v16, %v2941_v17 }
 0x2fe   :  { %5164 = vst [vmem:[%s8122_s3 + $0xf8] sm:$0xff] %v5012_v31   ;;  %v5659_v18 = vadd.f32 %v5658_v21, %v3421_v3  ;;  %v5400_v35 = vpop.f32.mrb[129].mxu0  ;;  %v2944_v36 = vpop.f32.mrb[134].mxu1 }
 0x2ff   :  { %v3424_v33 = vpop.f32.mrb[130].mxu0  ;;  %v2946_v28 = vpop.f32.mrb[135].mxu1  ;;  %v5664_v19 = vadd.f32 %v7945_v16, %v2944_v36 }
 0x300   :  { %v5661_v45 = vadd.f32 %v5660_v51, %v3424_v33  ;;  %v5401_v4 = vpop.f32.mrb[131].mxu0  ;;  %v3683_v44 = vmax.f32 %v5659_v18, 0.0 }
 0x302   :  { %v3684_v2 = vmax.f32 %v5661_v45, 0.0 }
 0x304   :  { %v5017_v55 = vpack.c.bf16 %v3684_v2, %v3683_v44  ;;  %v2949_v43 = vpop.f32.mrb[136].mxu1 }
 0x305   :  { %v3429_v42 = vpop.f32.mrb[132].mxu0  ;;  %v2951_v9 = vpop.f32.mrb[137].mxu1  ;;  %v5666_v60 = vadd.f32 %v7945_v16, %v2949_v43 }
 0x306   :  { %5165 = vst [vmem:[%s8122_s3 + $0x100] sm:$0xff] %v5017_v55   ;;  %v5663_v61 = vadd.f32 %v5662_v40, %v3429_v42  ;;  %v5404_v6 = vpop.f32.mrb[133].mxu0  ;;  %v2952_v50 = vpop.f32.mrb[138].mxu1 }
 0x307   :  { %v3432_v49 = vpop.f32.mrb[134].mxu0  ;;  %v2954_v54 = vpop.f32.mrb[139].mxu1  ;;  %v5668_v10 = vadd.f32 %v7945_v16, %v2952_v50 }
 0x308   :  { %v5665_v37 = vadd.f32 %v5664_v19, %v3432_v49  ;;  %v5405_v26 = vpop.f32.mrb[135].mxu0  ;;  %v3685_v23 = vmax.f32 %v5663_v61, 0.0 }
 0x30a   :  { %v3686_v59 = vmax.f32 %v5665_v37, 0.0 }
 0x30c   :  { %v5022_v58 = vpack.c.bf16 %v3686_v59, %v3685_v23  ;;  %v2957_v47 = vpop.f32.mrb[140].mxu1 }
 0x30d   :  { %v3437_v14 = vpop.f32.mrb[136].mxu0  ;;  %v2959_v34 = vpop.f32.mrb[141].mxu1  ;;  %v5670_v46 = vadd.f32 %v7945_v16, %v2957_v47 }
 0x30e   :  { %5166 = vst [vmem:[%s8122_s3 + $0x108] sm:$0xff] %v5022_v58   ;;  %v5667_v56 = vadd.f32 %v5666_v60, %v3437_v14  ;;  %v5408_v25 = vpop.f32.mrb[137].mxu0  ;;  %v2960_v0 = vpop.f32.mrb[142].mxu1 }
 0x30f   :  { %v3440_v5 = vpop.f32.mrb[138].mxu0  ;;  %v2962_v53 = vpop.f32.mrb[143].mxu1  ;;  %v5672_v62 = vadd.f32 %v7945_v16, %v2960_v0 }
 0x310   :  { %v5669_v1 = vadd.f32 %v5668_v10, %v3440_v5  ;;  %v5409_v48 = vpop.f32.mrb[139].mxu0  ;;  %v3687_v39 = vmax.f32 %v5667_v56, 0.0 }
 0x312   :  { %v3688_v29 = vmax.f32 %v5669_v1, 0.0 }
 0x314   :  { %v5027_v27 = vpack.c.bf16 %v3688_v29, %v3687_v39  ;;  %v2965_v8 = vpop.f32.mrb[144].mxu1 }
 0x315   :  { %v3445_v20 = vpop.f32.mrb[140].mxu0  ;;  %v2967_v11 = vpop.f32.mrb[145].mxu1  ;;  %v5674_v12 = vadd.f32 %v7945_v16, %v2965_v8 }
 0x316   :  { %5167 = vst [vmem:[%s8122_s3 + $0x110] sm:$0xff] %v5027_v27   ;;  %v5671_v22 = vadd.f32 %v5670_v46, %v3445_v20  ;;  %v5412_v13 = vpop.f32.mrb[141].mxu0  ;;  %v2968_v24 = vpop.f32.mrb[146].mxu1 }
 0x317   :  { %v3448_v57 = vpop.f32.mrb[142].mxu0  ;;  %v2970_v32 = vpop.f32.mrb[147].mxu1  ;;  %v5676_v17 = vadd.f32 %v7945_v16, %v2968_v24 }
 0x318   :  { %v5673_v52 = vadd.f32 %v5672_v62, %v3448_v57  ;;  %v5413_v15 = vpop.f32.mrb[143].mxu0  ;;  %v3689_v38 = vmax.f32 %v5671_v22, 0.0 }
 0x31a   :  { %v3690_v30 = vmax.f32 %v5673_v52, 0.0 }
 0x31c   :  { %v5032_v41 = vpack.c.bf16 %v3690_v30, %v3689_v38  ;;  %v2973_v63 = vpop.f32.mrb[148].mxu1 }
 0x31d   :  { %v3453_v21 = vpop.f32.mrb[144].mxu0  ;;  %v2975_v31 = vpop.f32.mrb[149].mxu1  ;;  %v5678_v4 = vadd.f32 %v7945_v16, %v2973_v63 }
 0x31e   :  { %5168 = vst [vmem:[%s8122_s3 + $0x118] sm:$0xff] %v5032_v41   ;;  %v5675_v3 = vadd.f32 %v5674_v12, %v3453_v21  ;;  %v5416_v7 = vpop.f32.mrb[145].mxu0  ;;  %v2976_v51 = vpop.f32.mrb[150].mxu1 }
 0x31f   :  { %v3456_v18 = vpop.f32.mrb[146].mxu0  ;;  %v2978_v35 = vpop.f32.mrb[151].mxu1  ;;  %v5680_v43 = vadd.f32 %v7945_v16, %v2976_v51 }
 0x320   :  { %v5677_v36 = vadd.f32 %v5676_v17, %v3456_v18  ;;  %v5417_v33 = vpop.f32.mrb[147].mxu0  ;;  %v3691_v28 = vmax.f32 %v5675_v3, 0.0 }
 0x322   :  { %v3692_v45 = vmax.f32 %v5677_v36, 0.0 }
 0x324   :  { %v5037_v44 = vpack.c.bf16 %v3692_v45, %v3691_v28  ;;  %v2981_v2 = vpop.f32.mrb[152].mxu1 }
 0x325   :  { %v3461_v40 = vpop.f32.mrb[148].mxu0  ;;  %v2983_v55 = vpop.f32.mrb[153].mxu1  ;;  %v5682_v26 = vadd.f32 %v7945_v16, %v2981_v2 }
 0x326   :  { %5169 = vst [vmem:[%s8122_s3 + $0x120] sm:$0xff] %v5037_v44   ;;  %v5679_v42 = vadd.f32 %v5678_v4, %v3461_v40  ;;  %v5420_v9 = vpop.f32.mrb[149].mxu0  ;;  %v2984_v19 = vpop.f32.mrb[154].mxu1 }
 0x327   :  { %v3464_v61 = vpop.f32.mrb[150].mxu0  ;;  %v2986_v6 = vpop.f32.mrb[155].mxu1  ;;  %v5684_v47 = vadd.f32 %v7945_v16, %v2984_v19 }
 0x328   :  { %v5681_v50 = vadd.f32 %v5680_v43, %v3464_v61  ;;  %v5421_v49 = vpop.f32.mrb[151].mxu0  ;;  %v3693_v54 = vmax.f32 %v5679_v42, 0.0 }
 0x32a   :  { %v3694_v37 = vmax.f32 %v5681_v50, 0.0 }
 0x32c   :  { %v5042_v23 = vpack.c.bf16 %v3694_v37, %v3693_v54  ;;  %v2989_v59 = vpop.f32.mrb[156].mxu1 }
 0x32d   :  { %v3469_v60 = vpop.f32.mrb[152].mxu0  ;;  %v2991_v58 = vpop.f32.mrb[157].mxu1  ;;  %v5686_v48 = vadd.f32 %v7945_v16, %v2989_v59 }
 0x32e   :  { %5170 = vst [vmem:[%s8122_s3 + $0x128] sm:$0xff] %v5042_v23   ;;  %v5683_v14 = vadd.f32 %v5682_v26, %v3469_v60  ;;  %v5424_v34 = vpop.f32.mrb[153].mxu0  ;;  %v2992_v10 = vpop.f32.mrb[158].mxu1 }
 0x32f   :  { %v3472_v56 = vpop.f32.mrb[154].mxu0  ;;  %v2994_v25 = vpop.f32.mrb[159].mxu1  ;;  %v5688_v8 = vadd.f32 %v7945_v16, %v2992_v10 }
 0x330   :  { %v5685_v0 = vadd.f32 %v5684_v47, %v3472_v56  ;;  %v5425_v5 = vpop.f32.mrb[155].mxu0  ;;  %v3695_v53 = vmax.f32 %v5683_v14, 0.0 }
 0x332   :  { %v3696_v1 = vmax.f32 %v5685_v0, 0.0 }
 0x334   :  { %v5047_v39 = vpack.c.bf16 %v3696_v1, %v3695_v53  ;;  %v2997_v29 = vpop.f32.mrb[160].mxu1 }
 0x335   :  { %v3477_v46 = vpop.f32.mrb[156].mxu0  ;;  %v2999_v27 = vpop.f32.mrb[161].mxu1  ;;  %v5690_v15 = vadd.f32 %v7945_v16, %v2997_v29 }
 0x336   :  { %5171 = vst [vmem:[%s8122_s3 + $0x130] sm:$0xff] %v5047_v39   ;;  %v5687_v20 = vadd.f32 %v5686_v48, %v3477_v46  ;;  %v5428_v11 = vpop.f32.mrb[157].mxu0  ;;  %v3000_v62 = vpop.f32.mrb[162].mxu1 }
 0x337   :  { %v3480_v22 = vpop.f32.mrb[158].mxu0  ;;  %v3002_v13 = vpop.f32.mrb[163].mxu1  ;;  %v5692_v63 = vadd.f32 %v7945_v16, %v3000_v62 }
 0x338   :  { %v5689_v24 = vadd.f32 %v5688_v8, %v3480_v22  ;;  %v5429_v57 = vpop.f32.mrb[159].mxu0  ;;  %v3697_v32 = vmax.f32 %v5687_v20, 0.0 }
 0x33a   :  { %v3698_v52 = vmax.f32 %v5689_v24, 0.0 }
 0x33c   :  { %v5052_v38 = vpack.c.bf16 %v3698_v52, %v3697_v32  ;;  %v3005_v30 = vpop.f32.mrb[164].mxu1 }
 0x33d   :  { %v3485_v12 = vpop.f32.mrb[160].mxu0  ;;  %v3007_v41 = vpop.f32.mrb[165].mxu1  ;;  %v5694_v33 = vadd.f32 %v7945_v16, %v3005_v30 }
 0x33e   :  { %5172 = vst [vmem:[%s8122_s3 + $0x138] sm:$0xff] %v5052_v38   ;;  %v5691_v21 = vadd.f32 %v5690_v15, %v3485_v12  ;;  %v5432_v31 = vpop.f32.mrb[161].mxu0  ;;  %v3008_v17 = vpop.f32.mrb[166].mxu1 }
 0x33f   :  { %v3488_v3 = vpop.f32.mrb[162].mxu0  ;;  %v3010_v7 = vpop.f32.mrb[167].mxu1  ;;  %v5696_v2 = vadd.f32 %v7945_v16, %v3008_v17 }
 0x340   :  { %v5693_v51 = vadd.f32 %v5692_v63, %v3488_v3  ;;  %v5433_v18 = vpop.f32.mrb[163].mxu0  ;;  %v3699_v35 = vmax.f32 %v5691_v21, 0.0 }
 0x342   :  { %v3700_v36 = vmax.f32 %v5693_v51, 0.0 }
 0x344   :  { %v5057_v28 = vpack.c.bf16 %v3700_v36, %v3699_v35  ;;  %v3013_v45 = vpop.f32.mrb[168].mxu1 }
 0x345   :  { %v3493_v4 = vpop.f32.mrb[164].mxu0  ;;  %v3015_v44 = vpop.f32.mrb[169].mxu1  ;;  %v5698_v49 = vadd.f32 %v7945_v16, %v3013_v45 }
 0x346   :  { %5173 = vst [vmem:[%s8122_s3 + $0x140] sm:$0xff] %v5057_v28   ;;  %v5695_v40 = vadd.f32 %v5694_v33, %v3493_v4  ;;  %v5436_v55 = vpop.f32.mrb[165].mxu0  ;;  %v3016_v43 = vpop.f32.mrb[170].mxu1 }
 0x347   :  { %v3496_v42 = vpop.f32.mrb[166].mxu0  ;;  %v3018_v9 = vpop.f32.mrb[171].mxu1  ;;  %v5700_v59 = vadd.f32 %v7945_v16, %v3016_v43 }
 0x348   :  { %v5697_v19 = vadd.f32 %v5696_v2, %v3496_v42  ;;  %v5437_v61 = vpop.f32.mrb[167].mxu0  ;;  %v3701_v6 = vmax.f32 %v5695_v40, 0.0 }
 0x34a   :  { %v3702_v50 = vmax.f32 %v5697_v19, 0.0 }
 0x34c   :  { %v5062_v54 = vpack.c.bf16 %v3702_v50, %v3701_v6  ;;  %v3021_v37 = vpop.f32.mrb[172].mxu1 }
 0x34d   :  { %v3501_v26 = vpop.f32.mrb[168].mxu0  ;;  %v3023_v23 = vpop.f32.mrb[173].mxu1  ;;  %v5702_v5 = vadd.f32 %v7945_v16, %v3021_v37 }
 0x34e   :  { %5174 = vst [vmem:[%s8122_s3 + $0x148] sm:$0xff] %v5062_v54   ;;  %v5699_v60 = vadd.f32 %v5698_v49, %v3501_v26  ;;  %v5440_v58 = vpop.f32.mrb[169].mxu0  ;;  %v3024_v47 = vpop.f32.mrb[174].mxu1 }
 0x34f   :  { %v3504_v14 = vpop.f32.mrb[170].mxu0  ;;  %v3026_v34 = vpop.f32.mrb[175].mxu1  ;;  %v5704_v29 = vadd.f32 %v7945_v16, %v3024_v47 }
 0x350   :  { %v5701_v10 = vadd.f32 %v5700_v59, %v3504_v14  ;;  %v5441_v56 = vpop.f32.mrb[171].mxu0  ;;  %v3703_v25 = vmax.f32 %v5699_v60, 0.0 }
 0x352   :  { %v3704_v0 = vmax.f32 %v5701_v10, 0.0 }
 0x354   :  { %v5067_v53 = vpack.c.bf16 %v3704_v0, %v3703_v25  ;;  %v3029_v1 = vpop.f32.mrb[176].mxu1 }
 0x355   :  { %v3509_v48 = vpop.f32.mrb[172].mxu0  ;;  %v3031_v39 = vpop.f32.mrb[177].mxu1  ;;  %v5706_v57 = vadd.f32 %v7945_v16, %v3029_v1 }
 0x356   :  { %5175 = vst [vmem:[%s8122_s3 + $0x150] sm:$0xff] %v5067_v53   ;;  %v5703_v46 = vadd.f32 %v5702_v5, %v3509_v48  ;;  %v5444_v27 = vpop.f32.mrb[173].mxu0  ;;  %v3032_v8 = vpop.f32.mrb[178].mxu1 }
 0x357   :  { %v3512_v20 = vpop.f32.mrb[174].mxu0  ;;  %v3034_v11 = vpop.f32.mrb[179].mxu1  ;;  %v5708_v30 = vadd.f32 %v7945_v16, %v3032_v8 }
 0x358   :  { %v5705_v62 = vadd.f32 %v5704_v29, %v3512_v20  ;;  %v5445_v22 = vpop.f32.mrb[175].mxu0  ;;  %v3705_v13 = vmax.f32 %v5703_v46, 0.0 }
 0x35a   :  { %v3706_v24 = vmax.f32 %v5705_v62, 0.0 }
 0x35c   :  { %v5072_v32 = vpack.c.bf16 %v3706_v24, %v3705_v13  ;;  %v3037_v52 = vpop.f32.mrb[180].mxu1 }
 0x35d   :  { %v3517_v15 = vpop.f32.mrb[176].mxu0  ;;  %v3039_v38 = vpop.f32.mrb[181].mxu1  ;;  %v5710_v18 = vadd.f32 %v7945_v16, %v3037_v52 }
 0x35e   :  { %5176 = vst [vmem:[%s8122_s3 + $0x158] sm:$0xff] %v5072_v32   ;;  %v5707_v12 = vadd.f32 %v5706_v57, %v3517_v15  ;;  %v5448_v41 = vpop.f32.mrb[177].mxu0  ;;  %v3040_v63 = vpop.f32.mrb[182].mxu1 }
 0x35f   :  { %v3520_v21 = vpop.f32.mrb[178].mxu0  ;;  %v3042_v31 = vpop.f32.mrb[183].mxu1  ;;  %v5712_v45 = vadd.f32 %v7945_v16, %v3040_v63 }
 0x360   :  { %v5709_v17 = vadd.f32 %v5708_v30, %v3520_v21  ;;  %v5449_v3 = vpop.f32.mrb[179].mxu0  ;;  %v3707_v7 = vmax.f32 %v5707_v12, 0.0 }
 0x362   :  { %v3708_v51 = vmax.f32 %v5709_v17, 0.0 }
 0x364   :  { %v5077_v35 = vpack.c.bf16 %v3708_v51, %v3707_v7  ;;  %v3045_v36 = vpop.f32.mrb[184].mxu1 }
 0x365   :  { %v3525_v33 = vpop.f32.mrb[180].mxu0  ;;  %v3047_v28 = vpop.f32.mrb[185].mxu1  ;;  %v5714_v61 = vadd.f32 %v7945_v16, %v3045_v36 }
 0x366   :  { %5177 = vst [vmem:[%s8122_s3 + $0x160] sm:$0xff] %v5077_v35   ;;  %v5711_v4 = vadd.f32 %v5710_v18, %v3525_v33  ;;  %v5452_v44 = vpop.f32.mrb[181].mxu0  ;;  %v3048_v2 = vpop.f32.mrb[186].mxu1 }
 0x367   :  { %v3528_v40 = vpop.f32.mrb[182].mxu0  ;;  %v3050_v55 = vpop.f32.mrb[187].mxu1  ;;  %v5716_v37 = vadd.f32 %v7945_v16, %v3048_v2 }
 0x368   :  { %v5713_v43 = vadd.f32 %v5712_v45, %v3528_v40  ;;  %v5453_v42 = vpop.f32.mrb[183].mxu0  ;;  %v3709_v9 = vmax.f32 %v5711_v4, 0.0 }
 0x36a   :  { %v3710_v19 = vmax.f32 %v5713_v43, 0.0 }
 0x36c   :  { %v5082_v6 = vpack.c.bf16 %v3710_v19, %v3709_v9  ;;  %v3053_v50 = vpop.f32.mrb[188].mxu1 }
 0x36d   :  { %v3533_v49 = vpop.f32.mrb[184].mxu0  ;;  %v3055_v54 = vpop.f32.mrb[189].mxu1  ;;  %v5718_v56 = vadd.f32 %v7945_v16, %v3053_v50 }
 0x36e   :  { %5178 = vst [vmem:[%s8122_s3 + $0x168] sm:$0xff] %v5082_v6   ;;  %v5715_v26 = vadd.f32 %v5714_v61, %v3533_v49  ;;  %v5456_v23 = vpop.f32.mrb[185].mxu0  ;;  %v3056_v59 = vpop.f32.mrb[190].mxu1 }
 0x36f   :  { %v3536_v60 = vpop.f32.mrb[186].mxu0  ;;  %v3058_v58 = vpop.f32.mrb[191].mxu1  ;;  %v5720_v1 = vadd.f32 %v7945_v16, %v3056_v59 }
 0x370   :  { %v5717_v47 = vadd.f32 %v5716_v37, %v3536_v60  ;;  %v5457_v14 = vpop.f32.mrb[187].mxu0  ;;  %v3711_v34 = vmax.f32 %v5715_v26, 0.0 }
 0x372   :  { %v3712_v10 = vmax.f32 %v5717_v47, 0.0 }
 0x374   :  { %v5087_v25 = vpack.c.bf16 %v3712_v10, %v3711_v34  ;;  %v3061_v0 = vpop.f32.mrb[192].mxu1 }
 0x375   :  { %v3541_v5 = vpop.f32.mrb[188].mxu0  ;;  %v3063_v53 = vpop.f32.mrb[193].mxu1  ;;  %v5722_v22 = vadd.f32 %v7945_v16, %v3061_v0 }
 0x376   :  { %5179 = vst [vmem:[%s8122_s3 + $0x170] sm:$0xff] %v5087_v25   ;;  %v5719_v48 = vadd.f32 %v5718_v56, %v3541_v5  ;;  %v5460_v39 = vpop.f32.mrb[189].mxu0  ;;  %v3064_v29 = vpop.f32.mrb[194].mxu1 }
 0x377   :  { %v3544_v46 = vpop.f32.mrb[190].mxu0  ;;  %v3066_v27 = vpop.f32.mrb[195].mxu1  ;;  %v5724_v52 = vadd.f32 %v7945_v16, %v3064_v29 }
 0x378   :  { %v5721_v8 = vadd.f32 %v5720_v1, %v3544_v46  ;;  %v5461_v20 = vpop.f32.mrb[191].mxu0  ;;  %v3713_v11 = vmax.f32 %v5719_v48, 0.0 }
 0x37a   :  { %v3714_v62 = vmax.f32 %v5721_v8, 0.0 }
 0x37c   :  { %v5092_v13 = vpack.c.bf16 %v3714_v62, %v3713_v11  ;;  %v3069_v24 = vpop.f32.mrb[196].mxu1 }
 0x37d   :  { %v3549_v57 = vpop.f32.mrb[192].mxu0  ;;  %v3071_v32 = vpop.f32.mrb[197].mxu1  ;;  %v5726_v3 = vadd.f32 %v7945_v16, %v3069_v24 }
 0x37e   :  { %5180 = vst [vmem:[%s8122_s3 + $0x178] sm:$0xff] %v5092_v13   ;;  %v5723_v15 = vadd.f32 %v5722_v22, %v3549_v57  ;;  %v5464_v38 = vpop.f32.mrb[193].mxu0  ;;  %v3072_v30 = vpop.f32.mrb[198].mxu1 }
 0x37f   :  { %v3552_v12 = vpop.f32.mrb[194].mxu0  ;;  %v3074_v41 = vpop.f32.mrb[199].mxu1  ;;  %v5728_v36 = vadd.f32 %v7945_v16, %v3072_v30 }
 0x380   :  { %v5725_v63 = vadd.f32 %v5724_v52, %v3552_v12  ;;  %v5465_v21 = vpop.f32.mrb[195].mxu0  ;;  %v3715_v31 = vmax.f32 %v5723_v15, 0.0 }
 0x382   :  { %v3716_v17 = vmax.f32 %v5725_v63, 0.0 }
 0x384   :  { %v5097_v7 = vpack.c.bf16 %v3716_v17, %v3715_v31  ;;  %v3077_v51 = vpop.f32.mrb[200].mxu1 }
 0x385   :  { %v3557_v18 = vpop.f32.mrb[196].mxu0  ;;  %v3079_v35 = vpop.f32.mrb[201].mxu1  ;;  %v5730_v42 = vadd.f32 %v7945_v16, %v3077_v51 }
 0x386   :  { %5181 = vst [vmem:[%s8122_s3 + $0x180] sm:$0xff] %v5097_v7   ;;  %v5727_v33 = vadd.f32 %v5726_v3, %v3557_v18  ;;  %v5468_v28 = vpop.f32.mrb[197].mxu0  ;;  %v3080_v45 = vpop.f32.mrb[202].mxu1 }
 0x387   :  { %v3560_v4 = vpop.f32.mrb[198].mxu0  ;;  %v3082_v44 = vpop.f32.mrb[203].mxu1  ;;  %v5732_v50 = vadd.f32 %v7945_v16, %v3080_v45 }
 0x388   :  { %v5729_v2 = vadd.f32 %v5728_v36, %v3560_v4  ;;  %v5469_v40 = vpop.f32.mrb[199].mxu0  ;;  %v3717_v55 = vmax.f32 %v5727_v33, 0.0 }
 0x38a   :  { %v3718_v43 = vmax.f32 %v5729_v2, 0.0 }
 0x38c   :  { %v5102_v9 = vpack.c.bf16 %v3718_v43, %v3717_v55  ;;  %v3085_v19 = vpop.f32.mrb[204].mxu1 }
 0x38d   :  { %v3565_v61 = vpop.f32.mrb[200].mxu0  ;;  %v3087_v6 = vpop.f32.mrb[205].mxu1  ;;  %v5734_v14 = vadd.f32 %v7945_v16, %v3085_v19 }
 0x38e   :  { %5182 = vst [vmem:[%s8122_s3 + $0x188] sm:$0xff] %v5102_v9   ;;  %v5731_v49 = vadd.f32 %v5730_v42, %v3565_v61  ;;  %v5472_v54 = vpop.f32.mrb[201].mxu0  ;;  %v3088_v37 = vpop.f32.mrb[206].mxu1 }
 0x38f   :  { %v3568_v26 = vpop.f32.mrb[202].mxu0  ;;  %v3090_v23 = vpop.f32.mrb[207].mxu1  ;;  %v5736_v0 = vadd.f32 %v7945_v16, %v3088_v37 }
 0x390   :  { %v5733_v59 = vadd.f32 %v5732_v50, %v3568_v26  ;;  %v5473_v60 = vpop.f32.mrb[203].mxu0  ;;  %v3719_v58 = vmax.f32 %v5731_v49, 0.0 }
 0x392   :  { %v3720_v47 = vmax.f32 %v5733_v59, 0.0 }
 0x394   :  { %v5107_v34 = vpack.c.bf16 %v3720_v47, %v3719_v58  ;;  %v3093_v10 = vpop.f32.mrb[208].mxu1 }
 0x395   :  { %v3573_v56 = vpop.f32.mrb[204].mxu0  ;;  %v3095_v25 = vpop.f32.mrb[209].mxu1  ;;  %v5738_v20 = vadd.f32 %v7945_v16, %v3093_v10 }
 0x396   :  { %5183 = vst [vmem:[%s8122_s3 + $0x190] sm:$0xff] %v5107_v34   ;;  %v5735_v5 = vadd.f32 %v5734_v14, %v3573_v56  ;;  %v5476_v53 = vpop.f32.mrb[205].mxu0  ;;  %v3096_v1 = vpop.f32.mrb[210].mxu1 }
 0x397   :  { %v3576_v48 = vpop.f32.mrb[206].mxu0  ;;  %v3098_v39 = vpop.f32.mrb[211].mxu1  ;;  %v5740_v24 = vadd.f32 %v7945_v16, %v3096_v1 }
 0x398   :  { %v5737_v29 = vadd.f32 %v5736_v0, %v3576_v48  ;;  %v5477_v46 = vpop.f32.mrb[207].mxu0  ;;  %v3721_v27 = vmax.f32 %v5735_v5, 0.0 }
 0x39a   :  { %v3722_v8 = vmax.f32 %v5737_v29, 0.0 }
 0x39c   :  { %v5112_v11 = vpack.c.bf16 %v3722_v8, %v3721_v27  ;;  %v3101_v62 = vpop.f32.mrb[212].mxu1 }
 0x39d   :  { %v3581_v22 = vpop.f32.mrb[208].mxu0  ;;  %v3103_v13 = vpop.f32.mrb[213].mxu1  ;;  %v5742_v21 = vadd.f32 %v7945_v16, %v3101_v62 }
 0x39e   :  { %5184 = vst [vmem:[%s8122_s3 + $0x198] sm:$0xff] %v5112_v11   ;;  %v5739_v57 = vadd.f32 %v5738_v20, %v3581_v22  ;;  %v5480_v32 = vpop.f32.mrb[209].mxu0  ;;  %v3104_v52 = vpop.f32.mrb[214].mxu1 }
 0x39f   :  { %v3584_v15 = vpop.f32.mrb[210].mxu0  ;;  %v3106_v38 = vpop.f32.mrb[215].mxu1  ;;  %v5744_v51 = vadd.f32 %v7945_v16, %v3104_v52 }
 0x3a0   :  { %v5741_v30 = vadd.f32 %v5740_v24, %v3584_v15  ;;  %v5481_v12 = vpop.f32.mrb[211].mxu0  ;;  %v3723_v41 = vmax.f32 %v5739_v57, 0.0 }
 0x3a2   :  { %v3724_v63 = vmax.f32 %v5741_v30, 0.0 }
 0x3a4   :  { %v5117_v31 = vpack.c.bf16 %v3724_v63, %v3723_v41  ;;  %v3109_v17 = vpop.f32.mrb[216].mxu1 }
 0x3a5   :  { %v3589_v3 = vpop.f32.mrb[212].mxu0  ;;  %v3111_v7 = vpop.f32.mrb[217].mxu1  ;;  %v5746_v40 = vadd.f32 %v7945_v16, %v3109_v17 }
 0x3a6   :  { %5185 = vst [vmem:[%s8122_s3 + $0x1a0] sm:$0xff] %v5117_v31   ;;  %v5743_v18 = vadd.f32 %v5742_v21, %v3589_v3  ;;  %v5484_v35 = vpop.f32.mrb[213].mxu0  ;;  %v3112_v36 = vpop.f32.mrb[218].mxu1 }
 0x3a7   :  { %v3592_v33 = vpop.f32.mrb[214].mxu0  ;;  %v3114_v28 = vpop.f32.mrb[219].mxu1  ;;  %v5748_v19 = vadd.f32 %v7945_v16, %v3112_v36 }
 0x3a8   :  { %v5745_v45 = vadd.f32 %v5744_v51, %v3592_v33  ;;  %v5485_v4 = vpop.f32.mrb[215].mxu0  ;;  %v3725_v44 = vmax.f32 %v5743_v18, 0.0 }
 0x3aa   :  { %v3726_v2 = vmax.f32 %v5745_v45, 0.0 }
 0x3ac   :  { %v5122_v55 = vpack.c.bf16 %v3726_v2, %v3725_v44  ;;  %v3117_v43 = vpop.f32.mrb[220].mxu1 }
 0x3ad   :  { %v3597_v42 = vpop.f32.mrb[216].mxu0  ;;  %v3119_v9 = vpop.f32.mrb[221].mxu1  ;;  %v5750_v60 = vadd.f32 %v7945_v16, %v3117_v43 }
 0x3ae   :  { %5186 = vst [vmem:[%s8122_s3 + $0x1a8] sm:$0xff] %v5122_v55   ;;  %v5747_v61 = vadd.f32 %v5746_v40, %v3597_v42  ;;  %v5488_v6 = vpop.f32.mrb[217].mxu0  ;;  %v3120_v50 = vpop.f32.mrb[222].mxu1 }
 0x3af   :  { %v3600_v49 = vpop.f32.mrb[218].mxu0  ;;  %v3122_v54 = vpop.f32.mrb[223].mxu1  ;;  %v5752_v10 = vadd.f32 %v7945_v16, %v3120_v50 }
 0x3b0   :  { %v5749_v37 = vadd.f32 %v5748_v19, %v3600_v49  ;;  %v5489_v26 = vpop.f32.mrb[219].mxu0  ;;  %v3727_v23 = vmax.f32 %v5747_v61, 0.0 }
 0x3b2   :  { %v3728_v59 = vmax.f32 %v5749_v37, 0.0 }
 0x3b4   :  { %v5127_v58 = vpack.c.bf16 %v3728_v59, %v3727_v23  ;;  %v3125_v47 = vpop.f32.mrb[224].mxu1 }
 0x3b5   :  { %v3605_v14 = vpop.f32.mrb[220].mxu0  ;;  %v3127_v34 = vpop.f32.mrb[225].mxu1  ;;  %v5754_v46 = vadd.f32 %v7945_v16, %v3125_v47 }
 0x3b6   :  { %5187 = vst [vmem:[%s8122_s3 + $0x1b0] sm:$0xff] %v5127_v58   ;;  %v5751_v56 = vadd.f32 %v5750_v60, %v3605_v14  ;;  %v5492_v25 = vpop.f32.mrb[221].mxu0  ;;  %v3128_v0 = vpop.f32.mrb[226].mxu1 }
 0x3b7   :  { %v3608_v5 = vpop.f32.mrb[222].mxu0  ;;  %v3129_v53 = vpop.f32.mrb[227].mxu1 }
 0x3b8   :  { %v5753_v1 = vadd.f32 %v5752_v10, %v3608_v5  ;;  %v5493_v48 = vpop.f32.mrb[223].mxu0  ;;  %v3729_v39 = vmax.f32 %v5751_v56, 0.0 }
 0x3ba   :  { %v3730_v29 = vmax.f32 %v5753_v1, 0.0 }
 0x3bc   :  { %v5132_v27 = vpack.c.bf16 %v3730_v29, %v3729_v39 }
 0x3bd   :  { %v3613_v8 = vpop.f32.mrb[224].mxu0 }
 0x3be   :  { %5188 = vst [vmem:[%s8122_s3 + $0x1b8] sm:$0xff] %v5132_v27   ;;  %v5755_v20 = vadd.f32 %v5754_v46, %v3613_v8  ;;  %v5496_v11 = vpop.f32.mrb[225].mxu0 }
 0x3bf   :  { %v3616_v62 = vpop.f32.mrb[226].mxu0 }
 0x3c0   :  { %v3731_v22 = vmax.f32 %v5755_v20, 0.0  ;;  %v5497_v13 = vpop.f32.mrb[227].mxu0 }
 0x3c2   :  { %v4853_v24 = vpack.c.bf16 %v3731_v22, %v3731_v22 }
 0x3c4   :  { %4297 = vst [vmem:[%s8122_s3 + $0x1c0] sm:$0x3] %v4853_v24 }

// kernel: icm_forward.10
= control target key start
LH: loop header
LB: loop body
LE: loop exit
PB: predicated region body
PF: predicated region fallthrough
CT: control target
= control target key end

     0   :  { %v159_v37 = vlaneseq  ;;  %v2271_v38 = vmov 1966171168   ;;  %s2996_s0 = inlined_call_operand.vmem [shape: bf16[2,512], index: 0, kind: input, shape index: {}]   ;;  %s2997_s1 = inlined_call_operand.vmem [shape: bf16[512,512], index: 1, kind: input, shape index: {}]   ;;  %s2998_s2 = inlined_call_operand.vmem [shape: f32[1,512], index: 2, kind: input, shape index: {}]   ;;  %s2999_s3 = inlined_call_operand.vmem [shape: bf16[512,256], index: 3, kind: input, shape index: {}]   ;;  %s3000_s4 = inlined_call_operand.vmem [shape: f32[1,256], index: 4, kind: input, shape index: {}]   ;;  %s3001_s5 = inlined_call_operand.vmem [shape: bf16[256,6], index: 5, kind: input, shape index: {}]   ;;  %s3002_s6 = inlined_call_operand.vmem [shape: f32[1,6], index: 6, kind: input, shape index: {}]   ;;  %s3003_s7 = inlined_call_operand.hbm [shape: f32[2,6], index: 7, kind: output, shape index: {}]  }
   0x1   :  { %v1943_v0 = vld [vmem:[%s2997_s1 + $0x4] ss:$16 sps:$4 sm:$0xff]   ;;  %v1945_v1 = vld [vmem:[%s2997_s1] ss:$16 sps:$4 sm:$0xff]   ;;  %v189_v39 = vunpack.c.l.s4 %v2271_v38  ;;  %v2066_v38 = vld [vmem:[%s2997_s1 + $0x128] ss:$16 sps:$4 sm:$0xff]  }
   0x2   :  { %848 = vmatprep.subr.bf16.mxu1 %v1943_v0  ;;  %v1946_v2 = vld [vmem:[%s2997_s1 + $0x204] ss:$16 sps:$4 sm:$0xff]   ;;  %v1948_v3 = vld [vmem:[%s2997_s1 + $0x200] ss:$16 sps:$4 sm:$0xff]   ;;  %v2436_v44 = vshrl.u32 %v159_v37, 7 }
   0x3   :  { %849 = vmatpush1.bf16.msra.mxu1 %v1945_v1  ;;  %v1949_v4 = vld [vmem:[%s2997_s1 + $0x24] ss:$16 sps:$4 sm:$0xff]   ;;  %v1951_v5 = vld [vmem:[%s2997_s1 + $0x20] ss:$16 sps:$4 sm:$0xff]   ;;  %889 = vmatprep.subr.bf16.mxu0 %v1946_v2  ;;  %v190_v45 = vunpack.c.0.s8 %v189_v39  ;;  %v2068_v37 = vld [vmem:[%s2997_s1 + $0x12c] ss:$16 sps:$4 sm:$0xff]  }
   0x4   :  { %v1952_v6 = vld [vmem:[%s2997_s1 + $0x224] ss:$16 sps:$4 sm:$0xff]   ;;  %890 = vmatpush1.bf16.msra.mxu0 %v1948_v3  ;;  %850 = vmatprep.subr.bf16.mxu1 %v1949_v4  ;;  %v1954_v7 = vld [vmem:[%s2997_s1 + $0x220] ss:$16 sps:$4 sm:$0xff]  }
   0x5   :  { %891 = vmatprep.subr.bf16.mxu0 %v1952_v6  ;;  %v1955_v8 = vld [vmem:[%s2997_s1 + $0x44] ss:$16 sps:$4 sm:$0xff]   ;;  %v1957_v9 = vld [vmem:[%s2997_s1 + $0x40] ss:$16 sps:$4 sm:$0xff]   ;;  %v193_v50 = vsub.s32 %v190_v45, %v2436_v44 }
   0x6   :  { %v1958_v10 = vld [vmem:[%s2997_s1 + $0x244] ss:$16 sps:$4 sm:$0xff]   ;;  %v1960_v12 = vld [vmem:[%s2997_s1 + $0x240] ss:$16 sps:$4 sm:$0xff]  }
   0x7   :  { %851 = vmatpush1.bf16.msra.mxu1 %v1951_v5  ;;  %v1961_v11 = vld [vmem:[%s2997_s1 + $0x64] ss:$16 sps:$4 sm:$0xff]   ;;  %v1963_v14 = vld [vmem:[%s2997_s1 + $0x60] ss:$16 sps:$4 sm:$0xff]  }
   0x8   :  { %852 = vmatprep.subr.bf16.mxu1 %v1955_v8  ;;  %892 = vmatpush1.bf16.msra.mxu0 %v1954_v7  ;;  %v1964_v13 = vld [vmem:[%s2997_s1 + $0x264] ss:$16 sps:$4 sm:$0xff]   ;;  %v1966_v16 = vld [vmem:[%s2997_s1 + $0x260] ss:$16 sps:$4 sm:$0xff]  }
   0x9   :  { %893 = vmatprep.subr.bf16.mxu0 %v1958_v10  ;;  %v1967_v15 = vld [vmem:[%s2997_s1 + $0x84] ss:$16 sps:$4 sm:$0xff]   ;;  %v1969_v18 = vld [vmem:[%s2997_s1 + $0x80] ss:$16 sps:$4 sm:$0xff]   ;;  %v2041_v10 = vld [vmem:[%s2997_s1 + $0xc] ss:$16 sps:$4 sm:$0xff]  }
   0xa   :  { %v1970_v17 = vld [vmem:[%s2997_s1 + $0x284] ss:$16 sps:$4 sm:$0xff]   ;;  %v1972_v20 = vld [vmem:[%s2997_s1 + $0x280] ss:$16 sps:$4 sm:$0xff]  }
   0xb   :  { %853 = vmatpush1.bf16.msra.mxu1 %v1957_v9  ;;  %v1973_v19 = vld [vmem:[%s2997_s1 + $0xa4] ss:$16 sps:$4 sm:$0xff]   ;;  %v1975_v22 = vld [vmem:[%s2997_s1 + $0xa0] ss:$16 sps:$4 sm:$0xff]  }
   0xc   :  { %854 = vmatprep.subr.bf16.mxu1 %v1961_v11  ;;  %894 = vmatpush1.bf16.msra.mxu0 %v1960_v12  ;;  %v1976_v21 = vld [vmem:[%s2997_s1 + $0x2a4] ss:$16 sps:$4 sm:$0xff]   ;;  %v1978_v24 = vld [vmem:[%s2997_s1 + $0x2a0] ss:$16 sps:$4 sm:$0xff]   ;;  %v2039_v12 = vld [vmem:[%s2997_s1 + $0x8] ss:$16 sps:$4 sm:$0xff]  }
   0xd   :  { %895 = vmatprep.subr.bf16.mxu0 %v1964_v13  ;;  %v1979_v23 = vld [vmem:[%s2997_s1 + $0xc4] ss:$16 sps:$4 sm:$0xff]   ;;  %v1981_v26 = vld [vmem:[%s2997_s1 + $0xc0] ss:$16 sps:$4 sm:$0xff]  }
   0xe   :  { %v1982_v25 = vld [vmem:[%s2997_s1 + $0x2c4] ss:$16 sps:$4 sm:$0xff]   ;;  %v1984_v28 = vld [vmem:[%s2997_s1 + $0x2c0] ss:$16 sps:$4 sm:$0xff]  }
   0xf   :  { %855 = vmatpush1.bf16.msra.mxu1 %v1963_v14  ;;  %v1985_v27 = vld [vmem:[%s2997_s1 + $0xe4] ss:$16 sps:$4 sm:$0xff]   ;;  %v1987_v30 = vld [vmem:[%s2997_s1 + $0xe0] ss:$16 sps:$4 sm:$0xff]   ;;  %v2044_v14 = vld [vmem:[%s2997_s1 + $0x2c] ss:$16 sps:$4 sm:$0xff]  }
  0x10   :  { %856 = vmatprep.subr.bf16.mxu1 %v1967_v15  ;;  %896 = vmatpush1.bf16.msra.mxu0 %v1966_v16  ;;  %v1988_v29 = vld [vmem:[%s2997_s1 + $0x2e4] ss:$16 sps:$4 sm:$0xff]   ;;  %v1990_v32 = vld [vmem:[%s2997_s1 + $0x2e0] ss:$16 sps:$4 sm:$0xff]   ;;  %v2042_v15 = vld [vmem:[%s2997_s1 + $0x28] ss:$16 sps:$4 sm:$0xff]  }
  0x11   :  { %897 = vmatprep.subr.bf16.mxu0 %v1970_v17  ;;  %v1991_v31 = vld [vmem:[%s2997_s1 + $0x104] ss:$16 sps:$4 sm:$0xff]   ;;  %v1993_v34 = vld [vmem:[%s2997_s1 + $0x100] ss:$16 sps:$4 sm:$0xff]   ;;  %v2047_v16 = vld [vmem:[%s2997_s1 + $0x4c] ss:$16 sps:$4 sm:$0xff]  }
  0x12   :  { %v1994_v33 = vld [vmem:[%s2997_s1 + $0x304] ss:$16 sps:$4 sm:$0xff]   ;;  %v1996_v36 = vld [vmem:[%s2997_s1 + $0x300] ss:$16 sps:$4 sm:$0xff]   ;;  %v2045_v17 = vld [vmem:[%s2997_s1 + $0x48] ss:$16 sps:$4 sm:$0xff]  }
  0x13   :  { %857 = vmatpush1.bf16.msra.mxu1 %v1969_v18  ;;  %v1997_v35 = vld [vmem:[%s2997_s1 + $0x124] ss:$16 sps:$4 sm:$0xff]   ;;  %v1999_v41 = vld [vmem:[%s2997_s1 + $0x120] ss:$16 sps:$4 sm:$0xff]   ;;  %v2050_v18 = vld [vmem:[%s2997_s1 + $0x6c] ss:$16 sps:$4 sm:$0xff]  }
  0x14   :  { %858 = vmatprep.subr.bf16.mxu1 %v1973_v19  ;;  %898 = vmatpush1.bf16.msra.mxu0 %v1972_v20  ;;  %v2000_v40 = vld [vmem:[%s2997_s1 + $0x324] ss:$16 sps:$4 sm:$0xff]   ;;  %v2002_v43 = vld [vmem:[%s2997_s1 + $0x320] ss:$16 sps:$4 sm:$0xff]   ;;  %v2048_v19 = vld [vmem:[%s2997_s1 + $0x68] ss:$16 sps:$4 sm:$0xff]  }
  0x15   :  { %899 = vmatprep.subr.bf16.mxu0 %v1976_v21  ;;  %v2003_v42 = vld [vmem:[%s2997_s1 + $0x144] ss:$16 sps:$4 sm:$0xff]   ;;  %v2005_v47 = vld [vmem:[%s2997_s1 + $0x140] ss:$16 sps:$4 sm:$0xff]   ;;  %v2053_v20 = vld [vmem:[%s2997_s1 + $0x8c] ss:$16 sps:$4 sm:$0xff]  }
  0x16   :  { %v2006_v46 = vld [vmem:[%s2997_s1 + $0x344] ss:$16 sps:$4 sm:$0xff]   ;;  %v2008_v49 = vld [vmem:[%s2997_s1 + $0x340] ss:$16 sps:$4 sm:$0xff]   ;;  %v2051_v21 = vld [vmem:[%s2997_s1 + $0x88] ss:$16 sps:$4 sm:$0xff]  }
  0x17   :  { %859 = vmatpush1.bf16.msra.mxu1 %v1975_v22  ;;  %v2009_v48 = vld [vmem:[%s2997_s1 + $0x164] ss:$16 sps:$4 sm:$0xff]   ;;  %v1693_v52 = vld.sshfl [vmem:[%s2996_s0] sm:$0x33 pattern:$0x75316420] }
  0x18   :  { %860 = vmatprep.subr.bf16.mxu1 %v1979_v23  ;;  %900 = vmatpush1.bf16.msra.mxu0 %v1978_v24  ;;  %v2012_v51 = vld [vmem:[%s2997_s1 + $0x364] ss:$16 sps:$4 sm:$0xff]   ;;  %v2011_v53 = vld [vmem:[%s2997_s1 + $0x160] ss:$16 sps:$4 sm:$0xff]   ;;  %v187_v54 = vcombine.high %v1693_v52, %v1693_v52  ;;  %v2511_v9 = vrot.slane %v1693_v52, %v193_v50  ;;  %v2056_v22 = vld [vmem:[%s2997_s1 + $0xac] ss:$16 sps:$4 sm:$0xff]  }
  0x19   :  { %901 = vmatprep.subr.bf16.mxu0 %v1982_v25  ;;  %v2015_v55 = vld [vmem:[%s2997_s1 + $0x184] ss:$16 sps:$4 sm:$0xff]   ;;  %v2014_v56 = vld [vmem:[%s2997_s1 + $0x360] ss:$16 sps:$4 sm:$0xff]   ;;  %v2054_v23 = vld [vmem:[%s2997_s1 + $0xa8] ss:$16 sps:$4 sm:$0xff]  }
  0x1a   :  { %v201_v57 = vrot.slane %v187_v54, %v193_v50  ;;  %v2018_v58 = vld [vmem:[%s2997_s1 + $0x384] ss:$16 sps:$4 sm:$0xff]   ;;  %v2017_v59 = vld [vmem:[%s2997_s1 + $0x180] ss:$16 sps:$4 sm:$0xff]   ;;  %v2524_v13 = vcombine.high %v2511_v9, %v2511_v9  ;;  %v2059_v24 = vld [vmem:[%s2997_s1 + $0xcc] ss:$16 sps:$4 sm:$0xff]  }
  0x1b   :  { %861 = vmatpush1.bf16.msra.mxu1 %v1981_v26  ;;  %v2021_v61 = vld [vmem:[%s2997_s1 + $0x1a4] ss:$16 sps:$4 sm:$0xff]   ;;  %v2020_v62 = vld [vmem:[%s2997_s1 + $0x380] ss:$16 sps:$4 sm:$0xff]   ;;  %v2057_v25 = vld [vmem:[%s2997_s1 + $0xc8] ss:$16 sps:$4 sm:$0xff]  }
  0x1c   :  { %862 = vmatprep.subr.bf16.mxu1 %v1985_v27  ;;  %902 = vmatpush1.bf16.msra.mxu0 %v1984_v28  ;;  %v2472_v60 = vcombine.high %v201_v57, %v201_v57  ;;  %v2024_v63 = vld [vmem:[%s2997_s1 + $0x3a4] ss:$16 sps:$4 sm:$0xff]   ;;  %v2023_v0 = vld [vmem:[%s2997_s1 + $0x1a0] ss:$16 sps:$4 sm:$0xff]   ;;  %v2062_v28 = vld [vmem:[%s2997_s1 + $0xec] ss:$16 sps:$4 sm:$0xff]  }
  0x1d   :  { %903 = vmatprep.subr.bf16.mxu0 %v1988_v29  ;;  %880 = vmatprep.mubr.bf16.mxu1 %v201_v57  ;;  %v2027_v1 = vld [vmem:[%s2997_s1 + $0x1c4] ss:$16 sps:$4 sm:$0xff]   ;;  %v2026_v2 = vld [vmem:[%s2997_s1 + $0x3a0] ss:$16 sps:$4 sm:$0xff]   ;;  %v2077_v50 = vld [vmem:[%s2997_s1 + $0x18c] ss:$16 sps:$4 sm:$0xff]  }
  0x1e   :  { %921 = vmatprep.mubr.bf16.mxu0 %v2472_v60  ;;  %v2030_v3 = vld [vmem:[%s2997_s1 + $0x3c4] ss:$16 sps:$4 sm:$0xff]   ;;  %v2029_v4 = vld [vmem:[%s2997_s1 + $0x1c0] ss:$16 sps:$4 sm:$0xff]   ;;  %v2075_v52 = vld [vmem:[%s2997_s1 + $0x188] ss:$16 sps:$4 sm:$0xff]  }
  0x1f   :  { %863 = vmatpush1.bf16.msra.mxu1 %v1987_v30  ;;  %v2033_v5 = vld [vmem:[%s2997_s1 + $0x1e4] ss:$16 sps:$4 sm:$0xff]   ;;  %v2032_v6 = vld [vmem:[%s2997_s1 + $0x3c0] ss:$16 sps:$4 sm:$0xff]   ;;  %v2060_v30 = vld [vmem:[%s2997_s1 + $0xe8] ss:$16 sps:$4 sm:$0xff]  }
  0x20   :  { %864 = vmatprep.subr.bf16.mxu1 %v1991_v31  ;;  %904 = vmatpush1.bf16.msra.mxu0 %v1990_v32  ;;  %v2036_v7 = vld [vmem:[%s2997_s1 + $0x3e4] ss:$16 sps:$4 sm:$0xff]   ;;  %v2035_v8 = vld [vmem:[%s2997_s1 + $0x1e0] ss:$16 sps:$4 sm:$0xff]   ;;  %v2080_v54 = vld [vmem:[%s2997_s1 + $0x1ac] ss:$16 sps:$4 sm:$0xff]  }
  0x21   :  { %905 = vmatprep.subr.bf16.mxu0 %v1994_v33  ;;  %v2038_v11 = vld [vmem:[%s2997_s1 + $0x3e0] ss:$16 sps:$4 sm:$0xff]   ;;  %v2137_v27 = vld [vmem:[%s2999_s3 + $0x4] ss:$8 sps:$4 sm:$0xff]   ;;  %v2140_v29 = vld [vmem:[%s2999_s3 + $0x14] ss:$8 sps:$4 sm:$0xff]  }
  0x22   :  { %v2135_v26 = vld [vmem:[%s2999_s3] ss:$8 sps:$4 sm:$0xff]   ;;  %v2138_v31 = vld [vmem:[%s2999_s3 + $0x10] ss:$8 sps:$4 sm:$0xff]   ;;  %v2143_v32 = vld [vmem:[%s2999_s3 + $0x24] ss:$8 sps:$4 sm:$0xff]  }
  0x23   :  { %865 = vmatpush1.bf16.msra.mxu1 %v1993_v34  ;;  %v2065_v33 = vld [vmem:[%s2997_s1 + $0x10c] ss:$16 sps:$4 sm:$0xff]   ;;  %v2063_v34 = vld [vmem:[%s2997_s1 + $0x108] ss:$16 sps:$4 sm:$0xff]  }
  0x24   :  { %866 = vmatprep.subr.bf16.mxu1 %v1997_v35  ;;  %906 = vmatpush1.bf16.msra.mxu0 %v1996_v36  ;;  %v2141_v35 = vld [vmem:[%s2999_s3 + $0x20] ss:$8 sps:$4 sm:$0xff]   ;;  %v2146_v36 = vld [vmem:[%s2999_s3 + $0x34] ss:$8 sps:$4 sm:$0xff]   ;;  %v2144_v39 = vld [vmem:[%s2999_s3 + $0x30] ss:$8 sps:$4 sm:$0xff]  }
  0x25   :  { %907 = vmatprep.subr.bf16.mxu0 %v2000_v40  ;;  %v2149_v40 = vld [vmem:[%s2999_s3 + $0x44] ss:$8 sps:$4 sm:$0xff]   ;;  %v2152_v45 = vld [vmem:[%s2999_s3 + $0x54] ss:$8 sps:$4 sm:$0xff]  }
  0x27   :  { %867 = vmatpush1.bf16.msra.mxu1 %v1999_v41  ;;  %v2071_v41 = vld [vmem:[%s2997_s1 + $0x14c] ss:$16 sps:$4 sm:$0xff]  }
  0x28   :  { %868 = vmatprep.subr.bf16.mxu1 %v2003_v42  ;;  %908 = vmatpush1.bf16.msra.mxu0 %v2002_v43  ;;  %v2069_v42 = vld [vmem:[%s2997_s1 + $0x148] ss:$16 sps:$4 sm:$0xff]  }
  0x29   :  { %909 = vmatprep.subr.bf16.mxu0 %v2006_v46  ;;  %v2147_v43 = vld [vmem:[%s2999_s3 + $0x40] ss:$8 sps:$4 sm:$0xff]   ;;  %v2074_v46 = vld [vmem:[%s2997_s1 + $0x16c] ss:$16 sps:$4 sm:$0xff]  }
  0x2b   :  { %869 = vmatpush1.bf16.msra.mxu1 %v2005_v47  ;;  %v2150_v47 = vld [vmem:[%s2999_s3 + $0x50] ss:$8 sps:$4 sm:$0xff]  }
  0x2c   :  { %870 = vmatprep.subr.bf16.mxu1 %v2009_v48  ;;  %910 = vmatpush1.bf16.msra.mxu0 %v2008_v49  ;;  %v2072_v48 = vld [vmem:[%s2997_s1 + $0x168] ss:$16 sps:$4 sm:$0xff]   ;;  %v2155_v49 = vld [vmem:[%s2999_s3 + $0x64] ss:$8 sps:$4 sm:$0xff]  }
  0x2d   :  { %911 = vmatprep.subr.bf16.mxu0 %v2012_v51  ;;  %v2153_v51 = vld [vmem:[%s2999_s3 + $0x60] ss:$8 sps:$4 sm:$0xff]  }
  0x2f   :  { %871 = vmatpush1.bf16.msra.mxu1 %v2011_v53  ;;  %v2158_v53 = vld [vmem:[%s2999_s3 + $0x74] ss:$8 sps:$4 sm:$0xff]  }
  0x30   :  { %872 = vmatprep.subr.bf16.mxu1 %v2015_v55  ;;  %912 = vmatpush1.bf16.msra.mxu0 %v2014_v56  ;;  %v2156_v55 = vld [vmem:[%s2999_s3 + $0x70] ss:$8 sps:$4 sm:$0xff]  }
  0x31   :  { %913 = vmatprep.subr.bf16.mxu0 %v2018_v58  ;;  %v2078_v56 = vld [vmem:[%s2997_s1 + $0x1a8] ss:$16 sps:$4 sm:$0xff]   ;;  %v2083_v58 = vld [vmem:[%s2997_s1 + $0x1cc] ss:$16 sps:$4 sm:$0xff]  }
  0x33   :  { %873 = vmatpush1.bf16.msra.mxu1 %v2017_v59  ;;  %v2159_v59 = vld [vmem:[%s2999_s3 + $0x80] ss:$8 sps:$4 sm:$0xff]  }
  0x34   :  { %874 = vmatprep.subr.bf16.mxu1 %v2021_v61  ;;  %914 = vmatpush1.bf16.msra.mxu0 %v2020_v62  ;;  %v2081_v61 = vld [vmem:[%s2997_s1 + $0x1c8] ss:$16 sps:$4 sm:$0xff]   ;;  %v2164_v62 = vld [vmem:[%s2999_s3 + $0x94] ss:$8 sps:$4 sm:$0xff]  }
  0x35   :  { %915 = vmatprep.subr.bf16.mxu0 %v2024_v63  ;;  %v2086_v63 = vld [vmem:[%s2997_s1 + $0x1ec] ss:$16 sps:$4 sm:$0xff]  }
  0x37   :  { %875 = vmatpush1.bf16.msra.mxu1 %v2023_v0  ;;  %v2162_v0 = vld [vmem:[%s2999_s3 + $0x90] ss:$8 sps:$4 sm:$0xff]  }
  0x38   :  { %876 = vmatprep.subr.bf16.mxu1 %v2027_v1  ;;  %916 = vmatpush1.bf16.msra.mxu0 %v2026_v2  ;;  %v2084_v1 = vld [vmem:[%s2997_s1 + $0x1e8] ss:$16 sps:$4 sm:$0xff]   ;;  %v2167_v2 = vld [vmem:[%s2999_s3 + $0xa4] ss:$8 sps:$4 sm:$0xff]  }
  0x39   :  { %917 = vmatprep.subr.bf16.mxu0 %v2030_v3  ;;  %v2089_v3 = vld [vmem:[%s2997_s1 + $0x20c] ss:$16 sps:$4 sm:$0xff]  }
  0x3b   :  { %877 = vmatpush1.bf16.msra.mxu1 %v2029_v4  ;;  %v2165_v4 = vld [vmem:[%s2999_s3 + $0xa0] ss:$8 sps:$4 sm:$0xff]  }
  0x3c   :  { %878 = vmatprep.subr.bf16.mxu1 %v2033_v5  ;;  %918 = vmatpush1.bf16.msra.mxu0 %v2032_v6  ;;  %v2087_v5 = vld [vmem:[%s2997_s1 + $0x208] ss:$16 sps:$4 sm:$0xff]  }
  0x3d   :  { %919 = vmatprep.subr.bf16.mxu0 %v2036_v7 }
  0x3f   :  { %879 = vmatpush1.bf16.msra.mxu1 %v2035_v8 }
  0x40   :  { %930 = vmatprep.subr.bf16.mxu1 %v2041_v10  ;;  %920 = vmatpush1.bf16.msra.mxu0 %v2038_v11 }
  0x41   :  { %1416 = vmatprep.subr.bf16.mxu0 %v2137_v27 }
  0x42   :  { %881 = vmatmul.mubr.bf16.vlgmr.msra.gmra.mrb[0].mxu1 %v2511_v9 }
  0x43   :  { %931 = vmatpush1.bf16.msra.mxu1 %v2039_v12  ;;  %962 = vmatprep.mubr.bf16.mxu1 %v201_v57  ;;  %v2161_v57 = vld [vmem:[%s2999_s3 + $0x84] ss:$8 sps:$4 sm:$0xff]  }
  0x44   :  { %922 = vmatmul.mubr.bf16.vlgmr.msra.gmra.mrb[0].mxu0 %v2524_v13  ;;  %932 = vmatprep.subr.bf16.mxu1 %v2044_v14 }
  0x45   :  { %1417 = vmatpush1.bf16.msra.mxu0 %v2135_v26 }
  0x46   :  { %1418 = vmatprep.subr.bf16.mxu0 %v2140_v29 }
  0x47   :  { %933 = vmatpush1.bf16.msra.mxu1 %v2042_v15 }
  0x48   :  { %934 = vmatprep.subr.bf16.mxu1 %v2047_v16 }
  0x49   :  { %1419 = vmatpush1.bf16.msra.mxu0 %v2138_v31 }
  0x4a   :  { %1420 = vmatprep.subr.bf16.mxu0 %v2143_v32 }
  0x4b   :  { %935 = vmatpush1.bf16.msra.mxu1 %v2045_v17 }
  0x4c   :  { %936 = vmatprep.subr.bf16.mxu1 %v2050_v18 }
  0x4d   :  { %1421 = vmatpush1.bf16.msra.mxu0 %v2141_v35 }
  0x4e   :  { %1422 = vmatprep.subr.bf16.mxu0 %v2146_v36 }
  0x4f   :  { %937 = vmatpush1.bf16.msra.mxu1 %v2048_v19 }
  0x50   :  { %938 = vmatprep.subr.bf16.mxu1 %v2053_v20 }
  0x51   :  { %1423 = vmatpush1.bf16.msra.mxu0 %v2144_v39 }
  0x52   :  { %1424 = vmatprep.subr.bf16.mxu0 %v2149_v40 }
  0x53   :  { %939 = vmatpush1.bf16.msra.mxu1 %v2051_v21 }
  0x54   :  { %940 = vmatprep.subr.bf16.mxu1 %v2056_v22 }
  0x55   :  { %1425 = vmatpush1.bf16.msra.mxu0 %v2147_v43 }
  0x56   :  { %1426 = vmatprep.subr.bf16.mxu0 %v2152_v45 }
  0x57   :  { %941 = vmatpush1.bf16.msra.mxu1 %v2054_v23 }
  0x58   :  { %942 = vmatprep.subr.bf16.mxu1 %v2059_v24 }
  0x59   :  { %1427 = vmatpush1.bf16.msra.mxu0 %v2150_v47 }
  0x5a   :  { %1428 = vmatprep.subr.bf16.mxu0 %v2155_v49 }
  0x5b   :  { %943 = vmatpush1.bf16.msra.mxu1 %v2057_v25 }
  0x5c   :  { %944 = vmatprep.subr.bf16.mxu1 %v2062_v28 }
  0x5d   :  { %1429 = vmatpush1.bf16.msra.mxu0 %v2153_v51 }
  0x5e   :  { %1430 = vmatprep.subr.bf16.mxu0 %v2158_v53 }
  0x5f   :  { %945 = vmatpush1.bf16.msra.mxu1 %v2060_v30 }
  0x60   :  { %946 = vmatprep.subr.bf16.mxu1 %v2065_v33 }
  0x61   :  { %1431 = vmatpush1.bf16.msra.mxu0 %v2156_v55 }
  0x62   :  { %1432 = vmatprep.subr.bf16.mxu0 %v2161_v57 }
  0x63   :  { %947 = vmatpush1.bf16.msra.mxu1 %v2063_v34 }
  0x64   :  { %948 = vmatprep.subr.bf16.mxu1 %v2068_v37 }
  0x65   :  { %1433 = vmatpush1.bf16.msra.mxu0 %v2159_v59 }
  0x66   :  { %1434 = vmatprep.subr.bf16.mxu0 %v2164_v62 }
  0x67   :  { %949 = vmatpush1.bf16.msra.mxu1 %v2066_v38 }
  0x68   :  { %950 = vmatprep.subr.bf16.mxu1 %v2071_v41 }
  0x69   :  { %1435 = vmatpush1.bf16.msra.mxu0 %v2162_v0 }
  0x6a   :  { %1436 = vmatprep.subr.bf16.mxu0 %v2167_v2 }
  0x6b   :  { %951 = vmatpush1.bf16.msra.mxu1 %v2069_v42 }
  0x6c   :  { %952 = vmatprep.subr.bf16.mxu1 %v2074_v46 }
  0x6f   :  { %953 = vmatpush1.bf16.msra.mxu1 %v2072_v48 }
  0x70   :  { %954 = vmatprep.subr.bf16.mxu1 %v2077_v50 }
  0x73   :  { %955 = vmatpush1.bf16.msra.mxu1 %v2075_v52 }
  0x74   :  { %956 = vmatprep.subr.bf16.mxu1 %v2080_v54 }
  0x77   :  { %957 = vmatpush1.bf16.msra.mxu1 %v2078_v56 }
  0x78   :  { %958 = vmatprep.subr.bf16.mxu1 %v2083_v58 }
  0x7b   :  { %959 = vmatpush1.bf16.msra.mxu1 %v2081_v61 }
  0x7c   :  { %960 = vmatprep.subr.bf16.mxu1 %v2086_v63 }
  0x7f   :  { %961 = vmatpush1.bf16.msra.mxu1 %v2084_v1 }
  0x80   :  { %12 = vsyncpa [#allocation3], 0  ;;  %971 = vmatprep.subr.bf16.mxu1 %v2089_v3  ;;  %v2092_v6 = vld [vmem:[%s2997_s1 + $0x22c] ss:$16 sps:$4 sm:$0xff]   ;;  %1437 = vmatpush1.bf16.msra.mxu0 %v2165_v4  ;;  %v2168_v8 = vld [vmem:[%s2999_s3 + $0xb0] ss:$8 sps:$4 sm:$0xff]  }
  0x81   :  { %v2170_v7 = vld [vmem:[%s2999_s3 + $0xb4] ss:$8 sps:$4 sm:$0xff]   ;;  %v2090_v10 = vld [vmem:[%s2997_s1 + $0x228] ss:$16 sps:$4 sm:$0xff]   ;;  %v2173_v11 = vld [vmem:[%s2999_s3 + $0xc4] ss:$8 sps:$4 sm:$0xff]  }
  0x82   :  { %963 = vmatmul.mubr.bf16.vlgmr.msra.gmra.mrb[4].mxu1 %v2511_v9  ;;  %v2095_v9 = vld [vmem:[%s2997_s1 + $0x24c] ss:$16 sps:$4 sm:$0xff]   ;;  %1438 = vmatprep.subr.bf16.mxu0 %v2170_v7  ;;  %v2171_v12 = vld [vmem:[%s2999_s3 + $0xc0] ss:$8 sps:$4 sm:$0xff]   ;;  %v2174_v16 = vld [vmem:[%s2999_s3 + $0xd0] ss:$8 sps:$4 sm:$0xff]  }
  0x83   :  { %972 = vmatpush1.bf16.msra.mxu1 %v2087_v5  ;;  %1003 = vmatprep.mubr.bf16.mxu1 %v2472_v60  ;;  %v2093_v60 = vld [vmem:[%s2997_s1 + $0x248] ss:$16 sps:$4 sm:$0xff]   ;;  %v2176_v14 = vld [vmem:[%s2999_s3 + $0xd4] ss:$8 sps:$4 sm:$0xff]   ;;  %v2179_v23 = vld [vmem:[%s2999_s3 + $0xe4] ss:$8 sps:$4 sm:$0xff]  }
  0x84   :  { %973 = vmatprep.subr.bf16.mxu1 %v2092_v6  ;;  %1439 = vmatpush1.bf16.msra.mxu0 %v2168_v8  ;;  %v2098_v15 = vld [vmem:[%s2997_s1 + $0x26c] ss:$16 sps:$4 sm:$0xff]   ;;  %v2096_v17 = vld [vmem:[%s2997_s1 + $0x268] ss:$16 sps:$4 sm:$0xff]   ;;  %v161_v48 = vsub.s32 0, %v2436_v44  ;;  %v165_v50 = vsub.s32 1, %v2436_v44 }
  0x85   :  { %1440 = vmatprep.subr.bf16.mxu0 %v2173_v11  ;;  %v2101_v18 = vld [vmem:[%s2997_s1 + $0x28c] ss:$16 sps:$4 sm:$0xff]   ;;  %v2099_v19 = vld [vmem:[%s2997_s1 + $0x288] ss:$16 sps:$4 sm:$0xff]   ;;  %v2820_v49 = vld [vmem:[%s2998_s2] sm:$0xf] }
  0x86   :  { %v2104_v20 = vld [vmem:[%s2997_s1 + $0x2ac] ss:$16 sps:$4 sm:$0xff]   ;;  %v2102_v21 = vld [vmem:[%s2997_s1 + $0x2a8] ss:$16 sps:$4 sm:$0xff]   ;;  %v162_v51 = vrot.slane %v2820_v49, %v161_v48  ;;  %v166_v52 = vrot.slane %v2820_v49, %v165_v50  ;;  %v2231_v7 = vld [vmem:[%s3001_s5 + $0x40] sm:$0xff]   ;;  %s2272_s0 = smov [#allocation2]  }
  0x87   :  { %974 = vmatpush1.bf16.msra.mxu1 %v2090_v10  ;;  %v2107_v22 = vld [vmem:[%s2997_s1 + $0x2cc] ss:$16 sps:$4 sm:$0xff]   ;;  %v2105_v24 = vld [vmem:[%s2997_s1 + $0x2c8] ss:$16 sps:$4 sm:$0xff]   ;;  %v2232_v8 = vld [vmem:[%s3001_s5] sm:$0xff]   ;;  %s1685_s10 = sshll.u32 %s2272_s0, 4  ;;  %s1686_s10 = int_to_ptr.vmem [resolvable:$true] %s1685_s10 }
  0x88   :  { %975 = vmatprep.subr.bf16.mxu1 %v2095_v9  ;;  %1441 = vmatpush1.bf16.msra.mxu0 %v2171_v12  ;;  %v2177_v25 = vld [vmem:[%s2999_s3 + $0xe0] ss:$8 sps:$4 sm:$0xff]   ;;  %v2110_v26 = vld [vmem:[%s2997_s1 + $0x2ec] ss:$16 sps:$4 sm:$0xff]   ;;  %v2180_v29 = vld [vmem:[%s2999_s3 + $0xf0] ss:$8 sps:$4 sm:$0xff]   ;;  %p2252_p1 = scmp.lt.s32.totalorder %s1686_s10, %s1686_s10 }
  0x89   :  { %1442 = vmatprep.subr.bf16.mxu0 %v2176_v14  ;;  %v2182_v27 = vld [vmem:[%s2999_s3 + $0xf4] ss:$8 sps:$4 sm:$0xff]   ;;  %v2108_v28 = vld [vmem:[%s2997_s1 + $0x2e8] ss:$16 sps:$4 sm:$0xff]   ;;  %v2185_v33 = vld [vmem:[%s2999_s3 + $0x104] ss:$8 sps:$4 sm:$0xff]  }
  0x8a   :  { %v2113_v30 = vld [vmem:[%s2997_s1 + $0x30c] ss:$16 sps:$4 sm:$0xff]   ;;  %v2111_v31 = vld [vmem:[%s2997_s1 + $0x308] ss:$16 sps:$4 sm:$0xff]   ;;  %vm1677_vm0 = vcmask 41984   ;;  %s2247_s11 = scalar_lea.vmem %s1686_s10, 32 }
  0x8b   :  { %976 = vmatpush1.bf16.msra.mxu1 %v2093_v60  ;;  %v2116_v32 = vld [vmem:[%s2997_s1 + $0x32c] ss:$16 sps:$4 sm:$0xff]   ;;  %v2114_v34 = vld [vmem:[%s2997_s1 + $0x328] ss:$16 sps:$4 sm:$0xff]   ;;  %v2235_v60 = vld [vmem:[%s3001_s5 + $0x50] sm:$0xff]   ;;  %p2248_p0 = scmp.ne.s32.totalorder %s1686_s10, %s2247_s11  ;;  %p2253_p2 = scmp.lt.s32.totalorder %s2247_s11, %s2247_s11 }
  0x8c   :  { %977 = vmatprep.subr.bf16.mxu1 %v2098_v15  ;;  %1443 = vmatpush1.bf16.msra.mxu0 %v2174_v16  ;;  %v2119_v35 = vld [vmem:[%s2997_s1 + $0x34c] ss:$16 sps:$4 sm:$0xff]   ;;  %v2117_v36 = vld [vmem:[%s2997_s1 + $0x348] ss:$16 sps:$4 sm:$0xff]   ;;  %v2236_v15 = vld [vmem:[%s3001_s5 + $0x10] sm:$0xff]  }
  0x8d   :  { %1444 = vmatprep.subr.bf16.mxu0 %v2179_v23  ;;  %v2122_v37 = vld [vmem:[%s2997_s1 + $0x36c] ss:$16 sps:$4 sm:$0xff]   ;;  %v2120_v38 = vld [vmem:[%s2997_s1 + $0x368] ss:$16 sps:$4 sm:$0xff]   ;;  %v2240_v23 = vld [vmem:[%s3001_s5 + $0x20] sm:$0xff]   ;;  %p2254_p3 = por %p2253_p2, %p2252_p1 }
  0x8e   :  { %v2125_v39 = vld [vmem:[%s2997_s1 + $0x38c] ss:$16 sps:$4 sm:$0xff]   ;;  %v2123_v40 = vld [vmem:[%s2997_s1 + $0x388] ss:$16 sps:$4 sm:$0xff]  }
  0x8f   :  { %978 = vmatpush1.bf16.msra.mxu1 %v2096_v17  ;;  %v2128_v41 = vld [vmem:[%s2997_s1 + $0x3ac] ss:$16 sps:$4 sm:$0xff]   ;;  %v2126_v42 = vld [vmem:[%s2997_s1 + $0x3a8] ss:$16 sps:$4 sm:$0xff]   ;;  %p2255_p4 = pnand %p2254_p3, %p2248_p0 }
  0x90   :  { %979 = vmatprep.subr.bf16.mxu1 %v2101_v18  ;;  %1445 = vmatpush1.bf16.msra.mxu0 %v2177_v25  ;;  %v2131_v43 = vld [vmem:[%s2997_s1 + $0x3cc] ss:$16 sps:$4 sm:$0xff]   ;;  %v2129_v45 = vld [vmem:[%s2997_s1 + $0x3c8] ss:$16 sps:$4 sm:$0xff]  }
  0x91   :  { %1446 = vmatprep.subr.bf16.mxu0 %v2182_v27  ;;  %v2134_v46 = vld [vmem:[%s2997_s1 + $0x3ec] ss:$16 sps:$4 sm:$0xff]   ;;  %v2132_v47 = vld [vmem:[%s2997_s1 + $0x3e8] ss:$16 sps:$4 sm:$0xff]  }
  0x92   :  { %v2183_v5 = vld [vmem:[%s2999_s3 + $0x100] ss:$8 sps:$4 sm:$0xff]   ;;  %v2188_v6 = vld [vmem:[%s2999_s3 + $0x114] ss:$8 sps:$4 sm:$0xff]   ;;  %v2186_v11 = vld [vmem:[%s2999_s3 + $0x110] ss:$8 sps:$4 sm:$0xff]  }
  0x93   :  { %980 = vmatpush1.bf16.msra.mxu1 %v2099_v19  ;;  %v2233_v10 = vld [vmem:[%s3001_s5 + $0x48] sm:$0xff]   ;;  %v2194_v16 = vld [vmem:[%s2999_s3 + $0x134] ss:$8 sps:$4 sm:$0xff]   ;;  %v2192_v18 = vld [vmem:[%s2999_s3 + $0x130] ss:$8 sps:$4 sm:$0xff]  }
  0x94   :  { %981 = vmatprep.subr.bf16.mxu1 %v2104_v20  ;;  %1447 = vmatpush1.bf16.msra.mxu0 %v2180_v29  ;;  %v2234_v9 = vld [vmem:[%s3001_s5 + $0x8] sm:$0xff]   ;;  %v2237_v17 = vld [vmem:[%s3001_s5 + $0x58] sm:$0xff]  }
  0x95   :  { %1457 = vmatprep.subr.bf16.mxu0 %v2185_v33  ;;  %v2191_v12 = vld [vmem:[%s2999_s3 + $0x124] ss:$8 sps:$4 sm:$0xff]   ;;  %v2189_v14 = vld [vmem:[%s2999_s3 + $0x120] ss:$8 sps:$4 sm:$0xff]   ;;  %v2238_v19 = vld [vmem:[%s3001_s5 + $0x18] sm:$0xff]  }
  0x96   :  { %v2197_v20 = vld [vmem:[%s2999_s3 + $0x144] ss:$8 sps:$4 sm:$0xff]   ;;  %v2201_v29 = vld [vmem:[%s2999_s3 + $0x160] ss:$8 sps:$4 sm:$0xff]  }
  0x97   :  { %982 = vmatpush1.bf16.msra.mxu1 %v2102_v21  ;;  %v2239_v21 = vld [vmem:[%s3001_s5 + $0x60] sm:$0xff]   ;;  %v2241_v25 = vld [vmem:[%s3001_s5 + $0x68] sm:$0xff]  }
  0x98   :  { %983 = vmatprep.subr.bf16.mxu1 %v2107_v22  ;;  %v2195_v22 = vld [vmem:[%s2999_s3 + $0x140] ss:$8 sps:$4 sm:$0xff]  }
  0x99   :  { %v2242_v27 = vld [vmem:[%s3001_s5 + $0x28] sm:$0xff]  }
  0x9a   :  { %v2207_v33 = vld [vmem:[%s2999_s3 + $0x180] ss:$8 sps:$4 sm:$0xff]  }
  0x9b   :  { %984 = vmatpush1.bf16.msra.mxu1 %v2105_v24  ;;  %v2200_v24 = vld [vmem:[%s2999_s3 + $0x154] ss:$8 sps:$4 sm:$0xff]  }
  0x9c   :  { %985 = vmatprep.subr.bf16.mxu1 %v2110_v26  ;;  %v2198_v26 = vld [vmem:[%s2999_s3 + $0x150] ss:$8 sps:$4 sm:$0xff]  }
  0x9f   :  { %986 = vmatpush1.bf16.msra.mxu1 %v2108_v28  ;;  %v2203_v28 = vld [vmem:[%s2999_s3 + $0x164] ss:$8 sps:$4 sm:$0xff]  }
  0xa0   :  { %987 = vmatprep.subr.bf16.mxu1 %v2113_v30  ;;  %v2206_v30 = vld [vmem:[%s2999_s3 + $0x174] ss:$8 sps:$4 sm:$0xff]  }
  0xa3   :  { %988 = vmatpush1.bf16.msra.mxu1 %v2111_v31  ;;  %v2204_v31 = vld [vmem:[%s2999_s3 + $0x170] ss:$8 sps:$4 sm:$0xff]  }
  0xa4   :  { %989 = vmatprep.subr.bf16.mxu1 %v2116_v32  ;;  %v2209_v32 = vld [vmem:[%s2999_s3 + $0x184] ss:$8 sps:$4 sm:$0xff]  }
  0xa7   :  { %990 = vmatpush1.bf16.msra.mxu1 %v2114_v34  ;;  %v2212_v34 = vld [vmem:[%s2999_s3 + $0x194] ss:$8 sps:$4 sm:$0xff]  }
  0xa8   :  { %991 = vmatprep.subr.bf16.mxu1 %v2119_v35  ;;  %v2210_v35 = vld [vmem:[%s2999_s3 + $0x190] ss:$8 sps:$4 sm:$0xff]  }
  0xab   :  { %992 = vmatpush1.bf16.msra.mxu1 %v2117_v36  ;;  %v2215_v36 = vld [vmem:[%s2999_s3 + $0x1a4] ss:$8 sps:$4 sm:$0xff]  }
  0xac   :  { %993 = vmatprep.subr.bf16.mxu1 %v2122_v37  ;;  %v2213_v37 = vld [vmem:[%s2999_s3 + $0x1a0] ss:$8 sps:$4 sm:$0xff]  }
  0xaf   :  { %994 = vmatpush1.bf16.msra.mxu1 %v2120_v38  ;;  %v2218_v38 = vld [vmem:[%s2999_s3 + $0x1b4] ss:$8 sps:$4 sm:$0xff]  }
  0xb0   :  { %995 = vmatprep.subr.bf16.mxu1 %v2125_v39  ;;  %v2216_v39 = vld [vmem:[%s2999_s3 + $0x1b0] ss:$8 sps:$4 sm:$0xff]  }
  0xb3   :  { %996 = vmatpush1.bf16.msra.mxu1 %v2123_v40  ;;  %v2221_v40 = vld [vmem:[%s2999_s3 + $0x1c4] ss:$8 sps:$4 sm:$0xff]  }
  0xb4   :  { %997 = vmatprep.subr.bf16.mxu1 %v2128_v41  ;;  %v2219_v41 = vld [vmem:[%s2999_s3 + $0x1c0] ss:$8 sps:$4 sm:$0xff]  }
  0xb7   :  { %998 = vmatpush1.bf16.msra.mxu1 %v2126_v42  ;;  %v2224_v42 = vld [vmem:[%s2999_s3 + $0x1d4] ss:$8 sps:$4 sm:$0xff]  }
  0xb8   :  { %999 = vmatprep.subr.bf16.mxu1 %v2131_v43  ;;  %v2222_v43 = vld [vmem:[%s2999_s3 + $0x1d0] ss:$8 sps:$4 sm:$0xff]  }
  0xbb   :  { %1000 = vmatpush1.bf16.msra.mxu1 %v2129_v45  ;;  %v2227_v45 = vld [vmem:[%s2999_s3 + $0x1e4] ss:$8 sps:$4 sm:$0xff]  }
  0xbc   :  { %1001 = vmatprep.subr.bf16.mxu1 %v2134_v46  ;;  %v2225_v46 = vld [vmem:[%s2999_s3 + $0x1e0] ss:$8 sps:$4 sm:$0xff]  }
  0xbf   :  { %1002 = vmatpush1.bf16.msra.mxu1 %v2132_v47  ;;  %v2230_v47 = vld [vmem:[%s2999_s3 + $0x1f4] ss:$8 sps:$4 sm:$0xff]  }
  0xc0   :  { %1903 = vmatprep.subr.bf16.mxu1 %v2231_v7 }
  0xc2   :  { %1004 = vmatmul.mubr.bf16.vlgmr.msra.gmra.mrb[4].mxu1 %v2524_v13 }
  0xc3   :  { %1904 = vmatpush3.bf16.msra.mxu1 %v2232_v8 }
  0xc4   :  { %1905 = vmatprep.subr.bf16.mxu1 %v2233_v10 }
  0xc7   :  { %1906 = vmatpush3.bf16.msra.mxu1 %v2234_v9 }
  0xc8   :  { %1907 = vmatprep.subr.bf16.mxu1 %v2235_v60 }
  0xcb   :  { %1908 = vmatpush3.bf16.msra.mxu1 %v2236_v15 }
  0xcc   :  { %1909 = vmatprep.subr.bf16.mxu1 %v2237_v17 }
  0xcf   :  { %1910 = vmatpush3.bf16.msra.mxu1 %v2238_v19 }
  0xd0   :  { %1911 = vmatprep.subr.bf16.mxu1 %v2239_v21 }
  0xd3   :  { %1912 = vmatpush3.bf16.msra.mxu1 %v2240_v23 }
  0xd4   :  { %1913 = vmatprep.subr.bf16.mxu1 %v2241_v25 }
  0xd7   :  { %1914 = vmatpush3.bf16.msra.mxu1 %v2242_v27 }
 0x115   :  { %v882_v53 = vpop.f32.mrb[0].mxu1 }
 0x116   :  { %v883_v54 = vadd.f32 %v882_v53, %v162_v51  ;;  %v884_v13 = vpop.f32.mrb[1].mxu1  ;;  %v2228_v51 = vld [vmem:[%s2999_s3 + $0x1f0] ss:$8 sps:$4 sm:$0xff]   ;;  %v173_v53 = vsub.s32 3, %v2436_v44 }
 0x117   :  { %v885_v55 = vadd.f32 %v884_v13, %v166_v52  ;;  %v886_v56 = vpop.f32.mrb[2].mxu1  ;;  %v923_v57 = vpop.f32.mrb[0].mxu0  ;;  %v169_v52 = vsub.s32 2, %v2436_v44 }
 0x118   :  { %v924_v58 = vadd.f32 %v923_v57, %v883_v54  ;;  %v887_v59 = vpop.f32.mrb[3].mxu1  ;;  %v925_v61 = vpop.f32.mrb[1].mxu0  ;;  %v174_v13 = vrot.slane %v2820_v49, %v173_v53 }
 0x119   :  { %v926_v62 = vadd.f32 %v925_v61, %v885_v55  ;;  %v927_v63 = vpop.f32.mrb[2].mxu0  ;;  %v170_v54 = vrot.slane %v2820_v49, %v169_v52  ;;  %v2244_v49 = vld [vmem:[%s3001_s5 + $0x30] sm:$0xff]  }
 0x11a   :  { %v1012_v0 = vmax.f32 %v924_v58, 0.0  ;;  %v928_v1 = vpop.f32.mrb[3].mxu0 }
 0x11b   :  { %v1013_v2 = vmax.f32 %v926_v62, 0.0 }
 0x11c   :  { %v1016_v3 = vpack.c.bf16 %v1012_v0, %v1012_v0 }
 0x11d   :  { %v1017_v4 = vpack.c.bf16 %v1013_v2, %v1013_v2  ;;  %v2243_v2 = vld [vmem:[%s3001_s5 + $0x70] sm:$0xff]  }
 0x11e   :  { %1915 = vmatprep.subr.bf16.mxu1 %v2243_v2 }
 0x11f   :  { %1448 = vmatprep.mubr.bf16.mxu0 %v1017_v4  ;;  %1916 = vmatpush3.bf16.msra.mxu1 %v2244_v49  ;;  %v2246_v4 = vld [vmem:[%s3001_s5 + $0x38] sm:$0xff]  }
 0x120   :  { %1449 = vmatmul.mubr.bf16.vlgmr.msra.gmra.mrb[4].mxu0 %v1016_v3  ;;  %v2245_v3 = vld [vmem:[%s3001_s5 + $0x78] sm:$0xff]  }
 0x121   :  { %1458 = vmatpush1.bf16.msra.mxu0 %v2183_v5  ;;  %1917 = vmatprep.subr.bf16.mxu1 %v2245_v3  ;;  %v1084_v5 = vld [vmem:[%s3000_s4] sm:$0x3] }
 0x122   :  { %1459 = vmatprep.subr.bf16.mxu0 %v2188_v6  ;;  %v1089_v6 = vrot.slane %v1084_v5, %v161_v48  ;;  %v1093_v7 = vrot.slane %v1084_v5, %v165_v50  ;;  %v1886_v48 = vld [vmem:[%s3002_s6] ss:$0 sm:$0xff] }
 0x123   :  { %1918 = vmatpush3.bf16.msra.mxu1 %v2246_v4 }
 0x125   :  { %1460 = vmatpush1.bf16.msra.mxu0 %v2186_v11 }
 0x126   :  { %1461 = vmatprep.subr.bf16.mxu0 %v2191_v12 }
 0x129   :  { %1462 = vmatpush1.bf16.msra.mxu0 %v2189_v14 }
 0x12a   :  { %1463 = vmatprep.subr.bf16.mxu0 %v2194_v16 }
 0x12d   :  { %1464 = vmatpush1.bf16.msra.mxu0 %v2192_v18 }
 0x12e   :  { %1465 = vmatprep.subr.bf16.mxu0 %v2197_v20 }
 0x131   :  { %1466 = vmatpush1.bf16.msra.mxu0 %v2195_v22 }
 0x132   :  { %1467 = vmatprep.subr.bf16.mxu0 %v2200_v24 }
 0x135   :  { %1468 = vmatpush1.bf16.msra.mxu0 %v2198_v26 }
 0x136   :  { %1469 = vmatprep.subr.bf16.mxu0 %v2203_v28 }
 0x139   :  { %1470 = vmatpush1.bf16.msra.mxu0 %v2201_v29 }
 0x13a   :  { %1471 = vmatprep.subr.bf16.mxu0 %v2206_v30 }
 0x13d   :  { %1472 = vmatpush1.bf16.msra.mxu0 %v2204_v31 }
 0x13e   :  { %1473 = vmatprep.subr.bf16.mxu0 %v2209_v32 }
 0x141   :  { %1474 = vmatpush1.bf16.msra.mxu0 %v2207_v33 }
 0x142   :  { %1475 = vmatprep.subr.bf16.mxu0 %v2212_v34 }
 0x145   :  { %1476 = vmatpush1.bf16.msra.mxu0 %v2210_v35 }
 0x146   :  { %1477 = vmatprep.subr.bf16.mxu0 %v2215_v36 }
 0x149   :  { %1478 = vmatpush1.bf16.msra.mxu0 %v2213_v37 }
 0x14a   :  { %1479 = vmatprep.subr.bf16.mxu0 %v2218_v38 }
 0x14d   :  { %1480 = vmatpush1.bf16.msra.mxu0 %v2216_v39 }
 0x14e   :  { %1481 = vmatprep.subr.bf16.mxu0 %v2221_v40 }
 0x151   :  { %1482 = vmatpush1.bf16.msra.mxu0 %v2219_v41 }
 0x152   :  { %1483 = vmatprep.subr.bf16.mxu0 %v2224_v42 }
 0x155   :  { %1484 = vmatpush1.bf16.msra.mxu0 %v2222_v43 }
 0x156   :  { %1485 = vmatprep.subr.bf16.mxu0 %v2227_v45 }
 0x159   :  { %1486 = vmatpush1.bf16.msra.mxu0 %v2225_v46 }
 0x15a   :  { %1487 = vmatprep.subr.bf16.mxu0 %v2230_v47 }
 0x15d   :  { %1488 = vmatpush1.bf16.msra.mxu0 %v2228_v51 }
 0x195   :  { %v1005_v55 = vpop.f32.mrb[4].mxu1 }
 0x196   :  { %v1929_v56 = vadd.f32 %v1005_v55, %v170_v54  ;;  %v1007_v57 = vpop.f32.mrb[5].mxu1 }
 0x197   :  { %v1930_v58 = vadd.f32 %v1007_v57, %v174_v13  ;;  %v1009_v59 = vpop.f32.mrb[6].mxu1 }
 0x198   :  { %v1014_v61 = vmax.f32 %v1929_v56, 0.0  ;;  %v1010_v62 = vpop.f32.mrb[7].mxu1 }
 0x199   :  { %v1015_v63 = vmax.f32 %v1930_v58, 0.0 }
 0x19a   :  { %v1018_v1 = vpack.c.bf16 %v1014_v61, %v1014_v61 }
 0x19b   :  { %v1019_v0 = vpack.c.bf16 %v1015_v63, %v1015_v63 }
 0x19d   :  { %1489 = vmatprep.mubr.bf16.mxu0 %v1019_v0 }
 0x19e   :  { %1490 = vmatmul.mubr.bf16.vlgmr.msra.gmra.mrb[4].mxu0 %v1018_v1 }
 0x271   :  { %v1491_v8 = vpop.f32.mrb[4].mxu0 }
 0x272   :  { %v1931_v10 = vadd.f32 %v1491_v8, %v1089_v6  ;;  %v1493_v11 = vpop.f32.mrb[5].mxu0 }
 0x273   :  { %v1932_v9 = vadd.f32 %v1493_v11, %v1093_v7  ;;  %v1495_v12 = vpop.f32.mrb[6].mxu0 }
 0x274   :  { %v1498_v60 = vmax.f32 %v1931_v10, 0.0  ;;  %v1496_v14 = vpop.f32.mrb[7].mxu0 }
 0x275   :  { %v1499_v15 = vmax.f32 %v1932_v9, 0.0 }
 0x276   :  { %v1500_v17 = vpack.c.bf16 %v1498_v60, %v1498_v60 }
 0x277   :  { %v1501_v16 = vpack.c.bf16 %v1499_v15, %v1499_v15 }
 0x279   :  { %1669 = vmatprep.mubr.bf16.mxu1 %v1501_v16 }
 0x27a   :  { %1670 = vmatmul.mubr.bf16.vlgmr.msra.gmra.mrb[8].mxu1 %v1500_v17 }
 0x34d   :  { %v1919_v18 = vpop.f32.mrb[8].mxu1 }
 0x34e   :  { %v1920_v19 = vpop.f32.mrb[9].mxu1 }
 0x34f   :  { %v1921_v44 = vadd.f32 %v1920_v19, %v1919_v18  ;;  %v1922_v50 = vpop.f32.mrb[10].mxu1 }
 0x350   :  { %v1923_v20 = vpop.f32.mrb[11].mxu1 }
 0x351   :  { %v1672_v21 = vadd.f32 %v1921_v44, %v1886_v48 }
 0x353   :  { %1678 = vst.msk [vmem:[#allocation2] sm:$0x3] %vm1677_vm0, %v1672_v21 }
 0x354   :  { %2258 = shalt.err (!%p2255_p4)
}
 0x355   :  { %s2259_s6 = scalar_lea.hbm %s3003_s7, 32 }
 0x356   :  { %p2260_p5 = scmp.ne.s32.totalorder %s3003_s7, %s2259_s6  ;;  %p2263_p6 = scmp.lt.u32.totalorder %s2259_s6, %s3003_s7 }
 0x358   :  { %p2265_p7 = pnand %p2263_p6, %p2260_p5 }
 0x35a   :  { %2268 = shalt.err (!%p2265_p7)
}
 0x35b   :  { %1688 = dma.vmem_to_hbm [thread:$0]  %s1686_s10, 32, %s3003_s7, [#allocation3]  }
 0x35c   :  { %2269 = dma.done.wait [#allocation3], 32  }
 0x35d   :  { %2270 = vsyncadd [#allocation3], 4294967264 }
 0x35e   :  { %1692 = vsyncpa [#allocation3], 1 }

// kernel: icm_forward.9
= control target key start
LH: loop header
LB: loop body
LE: loop exit
PB: predicated region body
PF: predicated region fallthrough
CT: control target
= control target key end

     0   :  { %s4575_s12 = smov 0   ;;  %s4577_s13 = smov 0   ;;  %s5120_s0 = inlined_call_operand.vmem [shape: bf16[4,28800], index: 0, kind: input, shape index: {}]   ;;  %s5121_s1 = inlined_call_operand.vmem [shape: bf16[28800,256], index: 1, kind: input, shape index: {}]   ;;  %s5122_s2 = inlined_call_operand.vmem [shape: f32[1,256], index: 2, kind: input, shape index: {}]   ;;  %s5123_s3 = inlined_call_operand.vmem [shape: bf16[4,256], index: 3, kind: output, shape index: {}]  }
   0x1   :  { %s4579_s14 = smov 0  }
   0x2 LB: > { %s22_s15 = sadd.s32 1, %s4546_s13  ;;  %p3436_p0 = scmp.ge.s32.totalorder %s4550_s14, 1  ;;  %s4550_s14 = sphi %s4579_s14, %s13_s14   ;;  %s4546_s13 = sphi %s4577_s13, %s5125_s13   ;;  %s4542_s12 = sphi %s4575_s12, %s5124_s12  }
   0x3   : > { %p23_p1 = scmp.ge.s32.totalorder %s22_s15, 9  ;;  %p168_p2 = scmp.lt.s32.totalorder %s4550_s14, 10 }
   0x5   : > { %s5127_s15 = smov (%p23_p1, %s22_s15), 0  ;;  %p169_p3 = pnand %p3436_p0, %p168_p2 }
   0x6   : > { %s202_s16 = smul.u32 (!%p169_p3), 25, %s4542_s12  ;;  %p3440_p6 = scmp.ne.s32.totalorder (!%p169_p3), %s4542_s12, 0 }
   0x7   : > { %172 = sbr.rel (%p169_p3) target bundleno = 678 (0x2a6), region = 32 }
   0x8   : > { %s212_s17 = smul.u32 (!%p169_p3), 400, %s4542_s12  ;;  %p205_p4 = scmp.lt.s32.totalorder (!%p169_p3), %s202_s16, 224 }
   0xa   : > { %p213_p5 = scmp.lt.s32.totalorder (!%p169_p3), %s212_s17, 3599 }
   0xe   : > { %s5129_s16 = smov (!%p205_p4, %s202_s16), 224  ;;  %s5131_s17 = smov (!%p213_p5, %s212_s17), 3599 }
   0xf   : > { %s3437_s18 = sshll.u32 %s5129_s16, 1  ;;  %s3848_s22 = sshll.u32 %s5131_s17, 3  ;;  %v4552_v0 = vmov (!%p3440_p6), 0.0  }
  0x10   : > { %s4600_s21 = scalar_lea.vmem %s5120_s0, %s3437_s18  ;;  %s4605_s25 = scalar_lea.vmem %s5121_s1, %s3848_s22  ;;  %229 = vst [vmem:[#allocation2] sm:$0xff] (!%p3440_p6), %v4552_v0 }
  0x11   : > { %228 = sbr.rel (%p3440_p6) target bundleno = 24 (0x18), region = 36 }
  0x18 PF: > { %v3922_v1 = vld [vmem:[%s4605_s25 + $0x4] ss:$8 sps:$4 sm:$0xff]   ;;  %v3926_v3 = vld [vmem:[%s4605_s25] ss:$8 sps:$4 sm:$0xff]   ;;  %v3928_v5 = vld [vmem:[%s4605_s25 + $0x14] ss:$8 sps:$4 sm:$0xff]   ;;  %v649_v39 = vlaneseq }
  0x19   : > { %v3924_v2 = vld [vmem:[%s4605_s25 + $0x604] ss:$8 sps:$4 sm:$0xff]   ;;  %2779 = vmatprep.subr.bf16.mxu1 %v3922_v1  ;;  %v3927_v4 = vld [vmem:[%s4605_s25 + $0x600] ss:$8 sps:$4 sm:$0xff]   ;;  %v3930_v6 = vld [vmem:[%s4605_s25 + $0x614] ss:$8 sps:$4 sm:$0xff]  }
  0x1a   : > { %3025 = vmatprep.subr.bf16.mxu0 %v3924_v2  ;;  %2780 = vmatpush1.bf16.msra.mxu1 %v3926_v3  ;;  %v3932_v7 = vld [vmem:[%s4605_s25 + $0x10] ss:$8 sps:$4 sm:$0xff]   ;;  %v3934_v9 = vld [vmem:[%s4605_s25 + $0x24] ss:$8 sps:$4 sm:$0xff]   ;;  %v3938_v11 = vld [vmem:[%s4605_s25 + $0x20] ss:$8 sps:$4 sm:$0xff]  }
  0x1b   : > { %3026 = vmatpush1.bf16.msra.mxu0 %v3927_v4  ;;  %2781 = vmatprep.subr.bf16.mxu1 %v3928_v5  ;;  %v3933_v8 = vld [vmem:[%s4605_s25 + $0x610] ss:$8 sps:$4 sm:$0xff]   ;;  %v3936_v10 = vld [vmem:[%s4605_s25 + $0x624] ss:$8 sps:$4 sm:$0xff]   ;;  %v3939_v12 = vld [vmem:[%s4605_s25 + $0x620] ss:$8 sps:$4 sm:$0xff]  }
  0x1c   : > { %3027 = vmatprep.subr.bf16.mxu0 %v3930_v6  ;;  %v3940_v13 = vld [vmem:[%s4605_s25 + $0x34] ss:$8 sps:$4 sm:$0xff]   ;;  %v3944_v15 = vld [vmem:[%s4605_s25 + $0x30] ss:$8 sps:$4 sm:$0xff]   ;;  %v3946_v17 = vld [vmem:[%s4605_s25 + $0x44] ss:$8 sps:$4 sm:$0xff]  }
  0x1d   : > { %v3942_v14 = vld [vmem:[%s4605_s25 + $0x634] ss:$8 sps:$4 sm:$0xff]   ;;  %v3945_v16 = vld [vmem:[%s4605_s25 + $0x630] ss:$8 sps:$4 sm:$0xff]   ;;  %v3948_v18 = vld [vmem:[%s4605_s25 + $0x644] ss:$8 sps:$4 sm:$0xff]  }
  0x1e   : > { %2782 = vmatpush1.bf16.msra.mxu1 %v3932_v7  ;;  %v3950_v19 = vld [vmem:[%s4605_s25 + $0x40] ss:$8 sps:$4 sm:$0xff]   ;;  %v3952_v21 = vld [vmem:[%s4605_s25 + $0x54] ss:$8 sps:$4 sm:$0xff]   ;;  %v3956_v23 = vld [vmem:[%s4605_s25 + $0x50] ss:$8 sps:$4 sm:$0xff]  }
  0x1f   : > { %3028 = vmatpush1.bf16.msra.mxu0 %v3933_v8  ;;  %2783 = vmatprep.subr.bf16.mxu1 %v3934_v9  ;;  %v3951_v20 = vld [vmem:[%s4605_s25 + $0x640] ss:$8 sps:$4 sm:$0xff]   ;;  %v3954_v22 = vld [vmem:[%s4605_s25 + $0x654] ss:$8 sps:$4 sm:$0xff]   ;;  %v3957_v24 = vld [vmem:[%s4605_s25 + $0x650] ss:$8 sps:$4 sm:$0xff]  }
  0x20   : > { %3029 = vmatprep.subr.bf16.mxu0 %v3936_v10  ;;  %v3958_v25 = vld [vmem:[%s4605_s25 + $0x64] ss:$8 sps:$4 sm:$0xff]   ;;  %v3962_v27 = vld [vmem:[%s4605_s25 + $0x60] ss:$8 sps:$4 sm:$0xff]   ;;  %v3964_v29 = vld [vmem:[%s4605_s25 + $0x74] ss:$8 sps:$4 sm:$0xff]  }
  0x21   : > { %v3960_v26 = vld [vmem:[%s4605_s25 + $0x664] ss:$8 sps:$4 sm:$0xff]   ;;  %v3963_v28 = vld [vmem:[%s4605_s25 + $0x660] ss:$8 sps:$4 sm:$0xff]   ;;  %v3966_v30 = vld [vmem:[%s4605_s25 + $0x674] ss:$8 sps:$4 sm:$0xff]  }
  0x22   : > { %2784 = vmatpush1.bf16.msra.mxu1 %v3938_v11  ;;  %v3968_v31 = vld [vmem:[%s4605_s25 + $0x70] ss:$8 sps:$4 sm:$0xff]   ;;  %v3970_v33 = vld [vmem:[%s4605_s25 + $0x84] ss:$8 sps:$4 sm:$0xff]   ;;  %v3974_v35 = vld [vmem:[%s4605_s25 + $0x80] ss:$8 sps:$4 sm:$0xff]  }
  0x23   : > { %3030 = vmatpush1.bf16.msra.mxu0 %v3939_v12  ;;  %2785 = vmatprep.subr.bf16.mxu1 %v3940_v13  ;;  %v3969_v32 = vld [vmem:[%s4605_s25 + $0x670] ss:$8 sps:$4 sm:$0xff]   ;;  %v3972_v34 = vld [vmem:[%s4605_s25 + $0x684] ss:$8 sps:$4 sm:$0xff]   ;;  %v3975_v36 = vld [vmem:[%s4605_s25 + $0x680] ss:$8 sps:$4 sm:$0xff]  }
  0x24   : > { %3031 = vmatprep.subr.bf16.mxu0 %v3942_v14  ;;  %v4553_v37 = vmov 1983009808   ;;  %v3976_v40 = vld [vmem:[%s4605_s25 + $0x94] ss:$8 sps:$4 sm:$0xff]   ;;  %v3980_v42 = vld [vmem:[%s4605_s25 + $0x90] ss:$8 sps:$4 sm:$0xff]  }
  0x25   : > { %v647_v38 = vunpack.c.l.s4 %v4553_v37  ;;  %v3978_v41 = vld [vmem:[%s4605_s25 + $0x694] ss:$8 sps:$4 sm:$0xff]   ;;  %v4647_v44 = vshrl.u32 %v649_v39, 7  ;;  %v3981_v45 = vld [vmem:[%s4605_s25 + $0x690] ss:$8 sps:$4 sm:$0xff]   ;;  %v231_v53 = vld [vmem:[%s4600_s21] sm:$0xff] }
  0x26   : > { %2786 = vmatpush1.bf16.msra.mxu1 %v3944_v15  ;;  %v3982_v46 = vld [vmem:[%s4605_s25 + $0xa4] ss:$8 sps:$4 sm:$0xff]   ;;  %v3986_v48 = vld [vmem:[%s4605_s25 + $0xa0] ss:$8 sps:$4 sm:$0xff]   ;;  %v3988_v51 = vld [vmem:[%s4605_s25 + $0xb4] ss:$8 sps:$4 sm:$0xff]   ;;  %v645_v11 = vcombine.high %v231_v53, %v231_v53 }
  0x27   : > { %3032 = vmatpush1.bf16.msra.mxu0 %v3945_v16  ;;  %2787 = vmatprep.subr.bf16.mxu1 %v3946_v17  ;;  %v648_v43 = vunpack.c.0.s8 %v647_v38  ;;  %v3984_v47 = vld [vmem:[%s4605_s25 + $0x6a4] ss:$8 sps:$4 sm:$0xff]   ;;  %v3987_v49 = vld [vmem:[%s4605_s25 + $0x6a0] ss:$8 sps:$4 sm:$0xff]   ;;  %v3990_v52 = vld [vmem:[%s4605_s25 + $0x6b4] ss:$8 sps:$4 sm:$0xff]  }
  0x28   : > { %3033 = vmatprep.subr.bf16.mxu0 %v3948_v18  ;;  %v3992_v54 = vld [vmem:[%s4605_s25 + $0xb0] ss:$8 sps:$4 sm:$0xff]   ;;  %v3994_v58 = vld [vmem:[%s4605_s25 + $0xc4] ss:$8 sps:$4 sm:$0xff]   ;;  %v3998_v63 = vld [vmem:[%s4605_s25 + $0xc0] ss:$8 sps:$4 sm:$0xff]  }
  0x29   : > { %v4655_v50 = vsub.s32 %v648_v43, %v4647_v44  ;;  %v3993_v56 = vld [vmem:[%s4605_s25 + $0x6b0] ss:$8 sps:$4 sm:$0xff]   ;;  %v3996_v59 = vld [vmem:[%s4605_s25 + $0x6c4] ss:$8 sps:$4 sm:$0xff]   ;;  %v3999_v0 = vld [vmem:[%s4605_s25 + $0x6c0] ss:$8 sps:$4 sm:$0xff]  }
  0x2a   : > { %2788 = vmatpush1.bf16.msra.mxu1 %v3950_v19  ;;  %v234_v57 = vld [vmem:[%s4600_s21 + $0x18] sm:$0xff]  ;;  %v4006_v5 = vld [vmem:[%s4605_s25 + $0xe4] ss:$8 sps:$4 sm:$0xff]   ;;  %v4010_v7 = vld [vmem:[%s4605_s25 + $0xe0] ss:$8 sps:$4 sm:$0xff]   ;;  %p3842_p7 = scmp.ne.s32.totalorder %s4542_s12, 8 }
  0x2b   : > { %3034 = vmatpush1.bf16.msra.mxu0 %v3951_v20  ;;  %2789 = vmatprep.subr.bf16.mxu1 %v3952_v21  ;;  %v652_v55 = vrot.slane %v231_v53, %v4655_v50  ;;  %v703_v61 = vrot.slane %v234_v57, %v4655_v50  ;;  %v4000_v1 = vld [vmem:[%s4605_s25 + $0xd4] ss:$8 sps:$4 sm:$0xff]   ;;  %v4004_v3 = vld [vmem:[%s4605_s25 + $0xd0] ss:$8 sps:$4 sm:$0xff]   ;;  %v4008_v6 = vld [vmem:[%s4605_s25 + $0x6e4] ss:$8 sps:$4 sm:$0xff]   ;;  %v696_v12 = vcombine.high %v234_v57, %v234_v57 }
  0x2c   : > { %3035 = vmatprep.subr.bf16.mxu0 %v3954_v22  ;;  %v4002_v2 = vld [vmem:[%s4605_s25 + $0x6d4] ss:$8 sps:$4 sm:$0xff]   ;;  %v4005_v4 = vld [vmem:[%s4605_s25 + $0x6d0] ss:$8 sps:$4 sm:$0xff]   ;;  %v4011_v8 = vld [vmem:[%s4605_s25 + $0x6e0] ss:$8 sps:$4 sm:$0xff]   ;;  %v4684_v17 = vrot.slane %v645_v11, %v4655_v50 }
  0x2d   : > { %v660_v60 = vcombine.high %v652_v55, %v652_v55  ;;  %v711_v62 = vcombine.high %v703_v61, %v703_v61  ;;  %v4012_v9 = vld [vmem:[%s4605_s25 + $0xf4] ss:$8 sps:$4 sm:$0xff]   ;;  %v4016_v13 = vld [vmem:[%s4605_s25 + $0xf0] ss:$8 sps:$4 sm:$0xff]   ;;  %v4021_v15 = vld [vmem:[%s4605_s25 + $0x104] ss:$8 sps:$4 sm:$0xff]   ;;  %v4687_v18 = vrot.slane %v696_v12, %v4655_v50 }
  0x2e   : > { %2790 = vmatpush1.bf16.msra.mxu1 %v3956_v23  ;;  %v4014_v10 = vld [vmem:[%s4605_s25 + $0x6f4] ss:$8 sps:$4 sm:$0xff]   ;;  %v4017_v14 = vld [vmem:[%s4605_s25 + $0x6f0] ss:$8 sps:$4 sm:$0xff]   ;;  %v4025_v16 = vld [vmem:[%s4605_s25 + $0x704] ss:$8 sps:$4 sm:$0xff]   ;;  %v661_v23 = vcombine.high %v4684_v17, %v4684_v17 }
  0x2f   : > { %3036 = vmatpush1.bf16.msra.mxu0 %v3957_v24  ;;  %2791 = vmatprep.subr.bf16.mxu1 %v3958_v25  ;;  %v4019_v19 = vld [vmem:[%s4605_s25 + $0x100] ss:$8 sps:$4 sm:$0xff]   ;;  %v4028_v21 = vld [vmem:[%s4605_s25 + $0x114] ss:$8 sps:$4 sm:$0xff]   ;;  %v712_v24 = vcombine.high %v4687_v18, %v4687_v18  ;;  %v4026_v25 = vld [vmem:[%s4605_s25 + $0x110] ss:$8 sps:$4 sm:$0xff]  }
  0x30   : > { %3037 = vmatprep.subr.bf16.mxu0 %v3960_v26  ;;  %2811 = vmatprep.mubr.bf16.mxu1 %v660_v60  ;;  %v4023_v20 = vld [vmem:[%s4605_s25 + $0x700] ss:$8 sps:$4 sm:$0xff]   ;;  %v4031_v22 = vld [vmem:[%s4605_s25 + $0x714] ss:$8 sps:$4 sm:$0xff]   ;;  %v4029_v26 = vld [vmem:[%s4605_s25 + $0x710] ss:$8 sps:$4 sm:$0xff]  }
  0x31   : > { %3057 = vmatprep.mubr.bf16.mxu0 %v711_v62  ;;  %v4044_v37 = vld [vmem:[%s4605_s25 + $0x140] ss:$8 sps:$4 sm:$0xff]   ;;  %v4052_v39 = vld [vmem:[%s4605_s25 + $0x154] ss:$8 sps:$4 sm:$0xff]   ;;  %v4058_v43 = vld [vmem:[%s4605_s25 + $0x164] ss:$8 sps:$4 sm:$0xff]  }
  0x32   : > { %2792 = vmatpush1.bf16.msra.mxu1 %v3962_v27  ;;  %v4034_v27 = vld [vmem:[%s4605_s25 + $0x124] ss:$8 sps:$4 sm:$0xff]   ;;  %v4047_v38 = vld [vmem:[%s4605_s25 + $0x740] ss:$8 sps:$4 sm:$0xff]   ;;  %v4076_v57 = vld [vmem:[%s4605_s25 + $0x194] ss:$8 sps:$4 sm:$0xff]  }
  0x33   : > { %3038 = vmatpush1.bf16.msra.mxu0 %v3963_v28  ;;  %2793 = vmatprep.subr.bf16.mxu1 %v3964_v29  ;;  %v4037_v28 = vld [vmem:[%s4605_s25 + $0x724] ss:$8 sps:$4 sm:$0xff]   ;;  %v4032_v29 = vld [vmem:[%s4605_s25 + $0x120] ss:$8 sps:$4 sm:$0xff]   ;;  %v4077_v60 = vld [vmem:[%s4605_s25 + $0x790] ss:$8 sps:$4 sm:$0xff]  }
  0x34   : > { %3039 = vmatprep.subr.bf16.mxu0 %v3966_v30  ;;  %v4035_v30 = vld [vmem:[%s4605_s25 + $0x720] ss:$8 sps:$4 sm:$0xff]   ;;  %v4070_v53 = vld [vmem:[%s4605_s25 + $0x184] ss:$8 sps:$4 sm:$0xff]   ;;  %v4098_v11 = vld [vmem:[%s4605_s25 + $0x1d0] ss:$8 sps:$4 sm:$0xff]  }
  0x35   : > { %v4085_v62 = vld [vmem:[%s4605_s25 + $0x7a4] ss:$8 sps:$4 sm:$0xff]   ;;  %v4101_v12 = vld [vmem:[%s4605_s25 + $0x7d0] ss:$8 sps:$4 sm:$0xff]  }
  0x36   : > { %2794 = vmatpush1.bf16.msra.mxu1 %v3968_v31  ;;  %v4040_v31 = vld [vmem:[%s4605_s25 + $0x134] ss:$8 sps:$4 sm:$0xff]  }
  0x37   : > { %3040 = vmatpush1.bf16.msra.mxu0 %v3969_v32  ;;  %2795 = vmatprep.subr.bf16.mxu1 %v3970_v33  ;;  %v4043_v32 = vld [vmem:[%s4605_s25 + $0x734] ss:$8 sps:$4 sm:$0xff]   ;;  %v4038_v33 = vld [vmem:[%s4605_s25 + $0x130] ss:$8 sps:$4 sm:$0xff]  }
  0x38   : > { %3041 = vmatprep.subr.bf16.mxu0 %v3972_v34  ;;  %v4041_v34 = vld [vmem:[%s4605_s25 + $0x730] ss:$8 sps:$4 sm:$0xff]  }
  0x3a   : > { %2796 = vmatpush1.bf16.msra.mxu1 %v3974_v35  ;;  %v4046_v35 = vld [vmem:[%s4605_s25 + $0x144] ss:$8 sps:$4 sm:$0xff]  }
  0x3b   : > { %3042 = vmatpush1.bf16.msra.mxu0 %v3975_v36  ;;  %2797 = vmatprep.subr.bf16.mxu1 %v3976_v40  ;;  %v4049_v36 = vld [vmem:[%s4605_s25 + $0x744] ss:$8 sps:$4 sm:$0xff]   ;;  %v4055_v40 = vld [vmem:[%s4605_s25 + $0x754] ss:$8 sps:$4 sm:$0xff]  }
  0x3c   : > { %3043 = vmatprep.subr.bf16.mxu0 %v3978_v41  ;;  %v4050_v41 = vld [vmem:[%s4605_s25 + $0x150] ss:$8 sps:$4 sm:$0xff]  }
  0x3e   : > { %2798 = vmatpush1.bf16.msra.mxu1 %v3980_v42  ;;  %v4053_v42 = vld [vmem:[%s4605_s25 + $0x750] ss:$8 sps:$4 sm:$0xff]  }
  0x3f   : > { %3044 = vmatpush1.bf16.msra.mxu0 %v3981_v45  ;;  %2799 = vmatprep.subr.bf16.mxu1 %v3982_v46  ;;  %v4061_v45 = vld [vmem:[%s4605_s25 + $0x764] ss:$8 sps:$4 sm:$0xff]   ;;  %v4056_v46 = vld [vmem:[%s4605_s25 + $0x160] ss:$8 sps:$4 sm:$0xff]  }
  0x40   : > { %3045 = vmatprep.subr.bf16.mxu0 %v3984_v47  ;;  %v4059_v47 = vld [vmem:[%s4605_s25 + $0x760] ss:$8 sps:$4 sm:$0xff]  }
  0x42   : > { %2800 = vmatpush1.bf16.msra.mxu1 %v3986_v48  ;;  %v4064_v48 = vld [vmem:[%s4605_s25 + $0x174] ss:$8 sps:$4 sm:$0xff]  }
  0x43   : > { %3046 = vmatpush1.bf16.msra.mxu0 %v3987_v49  ;;  %2801 = vmatprep.subr.bf16.mxu1 %v3988_v51  ;;  %v4067_v49 = vld [vmem:[%s4605_s25 + $0x774] ss:$8 sps:$4 sm:$0xff]   ;;  %v4062_v51 = vld [vmem:[%s4605_s25 + $0x170] ss:$8 sps:$4 sm:$0xff]  }
  0x44   : > { %3047 = vmatprep.subr.bf16.mxu0 %v3990_v52  ;;  %v4065_v52 = vld [vmem:[%s4605_s25 + $0x770] ss:$8 sps:$4 sm:$0xff]  }
  0x46   : > { %2802 = vmatpush1.bf16.msra.mxu1 %v3992_v54  ;;  %v4073_v54 = vld [vmem:[%s4605_s25 + $0x784] ss:$8 sps:$4 sm:$0xff]  }
  0x47   : > { %3048 = vmatpush1.bf16.msra.mxu0 %v3993_v56  ;;  %2803 = vmatprep.subr.bf16.mxu1 %v3994_v58  ;;  %v4071_v56 = vld [vmem:[%s4605_s25 + $0x780] ss:$8 sps:$4 sm:$0xff]   ;;  %v4079_v58 = vld [vmem:[%s4605_s25 + $0x794] ss:$8 sps:$4 sm:$0xff]  }
  0x48   : > { %3049 = vmatprep.subr.bf16.mxu0 %v3996_v59  ;;  %v4074_v59 = vld [vmem:[%s4605_s25 + $0x190] ss:$8 sps:$4 sm:$0xff]  }
  0x4a   : > { %2804 = vmatpush1.bf16.msra.mxu1 %v3998_v63  ;;  %v4080_v63 = vld [vmem:[%s4605_s25 + $0x1a0] ss:$8 sps:$4 sm:$0xff]  }
  0x4b   : > { %3050 = vmatpush1.bf16.msra.mxu0 %v3999_v0  ;;  %2805 = vmatprep.subr.bf16.mxu1 %v4000_v1  ;;  %v4083_v0 = vld [vmem:[%s4605_s25 + $0x7a0] ss:$8 sps:$4 sm:$0xff]   ;;  %v4088_v1 = vld [vmem:[%s4605_s25 + $0x1b4] ss:$8 sps:$4 sm:$0xff]  }
  0x4c   : > { %3051 = vmatprep.subr.bf16.mxu0 %v4002_v2  ;;  %v4091_v2 = vld [vmem:[%s4605_s25 + $0x7b4] ss:$8 sps:$4 sm:$0xff]  }
  0x4e   : > { %2806 = vmatpush1.bf16.msra.mxu1 %v4004_v3  ;;  %v4086_v3 = vld [vmem:[%s4605_s25 + $0x1b0] ss:$8 sps:$4 sm:$0xff]  }
  0x4f   : > { %3052 = vmatpush1.bf16.msra.mxu0 %v4005_v4  ;;  %2807 = vmatprep.subr.bf16.mxu1 %v4006_v5  ;;  %v4089_v4 = vld [vmem:[%s4605_s25 + $0x7b0] ss:$8 sps:$4 sm:$0xff]   ;;  %v4094_v5 = vld [vmem:[%s4605_s25 + $0x1c4] ss:$8 sps:$4 sm:$0xff]  }
  0x50   : > { %3053 = vmatprep.subr.bf16.mxu0 %v4008_v6  ;;  %v4097_v6 = vld [vmem:[%s4605_s25 + $0x7c4] ss:$8 sps:$4 sm:$0xff]  }
  0x52   : > { %2808 = vmatpush1.bf16.msra.mxu1 %v4010_v7  ;;  %v4092_v7 = vld [vmem:[%s4605_s25 + $0x1c0] ss:$8 sps:$4 sm:$0xff]  }
  0x53   : > { %3054 = vmatpush1.bf16.msra.mxu0 %v4011_v8  ;;  %2809 = vmatprep.subr.bf16.mxu1 %v4012_v9  ;;  %v4095_v8 = vld [vmem:[%s4605_s25 + $0x7c0] ss:$8 sps:$4 sm:$0xff]   ;;  %v4100_v9 = vld [vmem:[%s4605_s25 + $0x1d4] ss:$8 sps:$4 sm:$0xff]  }
  0x54   : > { %3055 = vmatprep.subr.bf16.mxu0 %v4014_v10  ;;  %v4103_v10 = vld [vmem:[%s4605_s25 + $0x7d4] ss:$8 sps:$4 sm:$0xff]  }
  0x56   : > { %2810 = vmatpush1.bf16.msra.mxu1 %v4016_v13  ;;  %v4106_v13 = vld [vmem:[%s4605_s25 + $0x1e4] ss:$8 sps:$4 sm:$0xff]  }
  0x57   : > { %3056 = vmatpush1.bf16.msra.mxu0 %v4017_v14  ;;  %2820 = vmatprep.subr.bf16.mxu1 %v4021_v15  ;;  %v4109_v14 = vld [vmem:[%s4605_s25 + $0x7e4] ss:$8 sps:$4 sm:$0xff]   ;;  %v4104_v15 = vld [vmem:[%s4605_s25 + $0x1e0] ss:$8 sps:$4 sm:$0xff]  }
  0x58   : > { %3066 = vmatprep.subr.bf16.mxu0 %v4025_v16  ;;  %v4107_v16 = vld [vmem:[%s4605_s25 + $0x7e0] ss:$8 sps:$4 sm:$0xff]  }
  0x59   : > { %2812 = vmatmul.mubr.bf16.vlgmr.msra.gmra.mrb[0].mxu1 %v652_v55  ;;  %v4068_v55 = vld [vmem:[%s4605_s25 + $0x180] ss:$8 sps:$4 sm:$0xff]  }
  0x5a   : > { %3058 = vmatmul.mubr.bf16.vlgmr.msra.gmra.mrb[0].mxu0 %v703_v61  ;;  %2821 = vmatpush1.bf16.msra.mxu1 %v4019_v19  ;;  %v4082_v61 = vld [vmem:[%s4605_s25 + $0x1a4] ss:$8 sps:$4 sm:$0xff]   ;;  %v4112_v19 = vld [vmem:[%s4605_s25 + $0x1f4] ss:$8 sps:$4 sm:$0xff]  }
  0x5b   : > { %3067 = vmatpush1.bf16.msra.mxu0 %v4023_v20  ;;  %2822 = vmatprep.subr.bf16.mxu1 %v4028_v21  ;;  %v4115_v20 = vld [vmem:[%s4605_s25 + $0x7f4] ss:$8 sps:$4 sm:$0xff]   ;;  %v4110_v21 = vld [vmem:[%s4605_s25 + $0x1f0] ss:$8 sps:$4 sm:$0xff]  }
  0x5c   : > { %3068 = vmatprep.subr.bf16.mxu0 %v4031_v22  ;;  %2852 = vmatprep.mubr.bf16.mxu1 %v661_v23  ;;  %v4113_v22 = vld [vmem:[%s4605_s25 + $0x7f0] ss:$8 sps:$4 sm:$0xff]   ;;  %v4118_v23 = vld [vmem:[%s4605_s25 + $0x204] ss:$8 sps:$4 sm:$0xff]  }
  0x5d   : > { %3098 = vmatprep.mubr.bf16.mxu0 %v712_v24  ;;  %v4121_v24 = vld [vmem:[%s4605_s25 + $0x804] ss:$8 sps:$4 sm:$0xff]  }
  0x5e   : > { %2823 = vmatpush1.bf16.msra.mxu1 %v4026_v25  ;;  %v4116_v25 = vld [vmem:[%s4605_s25 + $0x200] ss:$8 sps:$4 sm:$0xff]  }
  0x5f   : > { %3069 = vmatpush1.bf16.msra.mxu0 %v4029_v26  ;;  %2824 = vmatprep.subr.bf16.mxu1 %v4034_v27  ;;  %v4119_v26 = vld [vmem:[%s4605_s25 + $0x800] ss:$8 sps:$4 sm:$0xff]   ;;  %v4124_v27 = vld [vmem:[%s4605_s25 + $0x214] ss:$8 sps:$4 sm:$0xff]  }
  0x60   : > { %3070 = vmatprep.subr.bf16.mxu0 %v4037_v28  ;;  %v4761_v28 = vld [vmem:[%s4600_s21 + $0x8] sm:$0xff] }
  0x62   : > { %2825 = vmatpush1.bf16.msra.mxu1 %v4032_v29  ;;  %v4127_v29 = vld [vmem:[%s4605_s25 + $0x814] ss:$8 sps:$4 sm:$0xff]  }
  0x63   : > { %3071 = vmatpush1.bf16.msra.mxu0 %v4035_v30  ;;  %2826 = vmatprep.subr.bf16.mxu1 %v4040_v31  ;;  %v4766_v30 = vrot.slane %v4761_v28, %v4655_v50  ;;  %v4769_v31 = vld [vmem:[%s4600_s21 + $0x20] sm:$0xff] }
  0x64   : > { %3072 = vmatprep.subr.bf16.mxu0 %v4043_v32  ;;  %v4122_v32 = vld [vmem:[%s4605_s25 + $0x210] ss:$8 sps:$4 sm:$0xff]  }
  0x66   : > { %2827 = vmatpush1.bf16.msra.mxu1 %v4038_v33  ;;  %v4125_v33 = vld [vmem:[%s4605_s25 + $0x810] ss:$8 sps:$4 sm:$0xff]  }
  0x67   : > { %3073 = vmatpush1.bf16.msra.mxu0 %v4041_v34  ;;  %2828 = vmatprep.subr.bf16.mxu1 %v4046_v35  ;;  %v677_v34 = vcombine.high %v4766_v30, %v4766_v30  ;;  %v4779_v35 = vrot.slane %v4769_v31, %v4655_v50 }
  0x68   : > { %3074 = vmatprep.subr.bf16.mxu0 %v4049_v36  ;;  %v4130_v36 = vld [vmem:[%s4605_s25 + $0x224] ss:$8 sps:$4 sm:$0xff]  }
  0x6a   : > { %2829 = vmatpush1.bf16.msra.mxu1 %v4044_v37  ;;  %v4128_v37 = vld [vmem:[%s4605_s25 + $0x220] ss:$8 sps:$4 sm:$0xff]  }
  0x6b   : > { %3075 = vmatpush1.bf16.msra.mxu0 %v4047_v38  ;;  %2830 = vmatprep.subr.bf16.mxu1 %v4052_v39  ;;  %v4131_v38 = vld [vmem:[%s4605_s25 + $0x820] ss:$8 sps:$4 sm:$0xff]   ;;  %v4136_v39 = vld [vmem:[%s4605_s25 + $0x234] ss:$8 sps:$4 sm:$0xff]  }
  0x6c   : > { %3076 = vmatprep.subr.bf16.mxu0 %v4055_v40  ;;  %v4139_v40 = vld [vmem:[%s4605_s25 + $0x834] ss:$8 sps:$4 sm:$0xff]  }
  0x6e   : > { %2831 = vmatpush1.bf16.msra.mxu1 %v4050_v41  ;;  %v4134_v41 = vld [vmem:[%s4605_s25 + $0x230] ss:$8 sps:$4 sm:$0xff]  }
  0x6f   : > { %3077 = vmatpush1.bf16.msra.mxu0 %v4053_v42  ;;  %2832 = vmatprep.subr.bf16.mxu1 %v4058_v43  ;;  %v4137_v42 = vld [vmem:[%s4605_s25 + $0x830] ss:$8 sps:$4 sm:$0xff]   ;;  %v4142_v43 = vld [vmem:[%s4605_s25 + $0x244] ss:$8 sps:$4 sm:$0xff]  }
  0x70   : > { %3078 = vmatprep.subr.bf16.mxu0 %v4061_v45  ;;  %v4145_v45 = vld [vmem:[%s4605_s25 + $0x844] ss:$8 sps:$4 sm:$0xff]  }
  0x72   : > { %2833 = vmatpush1.bf16.msra.mxu1 %v4056_v46  ;;  %v4140_v46 = vld [vmem:[%s4605_s25 + $0x240] ss:$8 sps:$4 sm:$0xff]  }
  0x73   : > { %3079 = vmatpush1.bf16.msra.mxu0 %v4059_v47  ;;  %2834 = vmatprep.subr.bf16.mxu1 %v4064_v48  ;;  %v4143_v47 = vld [vmem:[%s4605_s25 + $0x840] ss:$8 sps:$4 sm:$0xff]   ;;  %v4148_v48 = vld [vmem:[%s4605_s25 + $0x254] ss:$8 sps:$4 sm:$0xff]  }
  0x74   : > { %3080 = vmatprep.subr.bf16.mxu0 %v4067_v49  ;;  %v4151_v49 = vld [vmem:[%s4605_s25 + $0x854] ss:$8 sps:$4 sm:$0xff]  }
  0x76   : > { %2835 = vmatpush1.bf16.msra.mxu1 %v4062_v51  ;;  %v4146_v51 = vld [vmem:[%s4605_s25 + $0x250] ss:$8 sps:$4 sm:$0xff]  }
  0x77   : > { %3081 = vmatpush1.bf16.msra.mxu0 %v4065_v52  ;;  %2836 = vmatprep.subr.bf16.mxu1 %v4070_v53  ;;  %v4149_v52 = vld [vmem:[%s4605_s25 + $0x850] ss:$8 sps:$4 sm:$0xff]   ;;  %v4154_v53 = vld [vmem:[%s4605_s25 + $0x264] ss:$8 sps:$4 sm:$0xff]  }
  0x78   : > { %3082 = vmatprep.subr.bf16.mxu0 %v4073_v54  ;;  %v4157_v54 = vld [vmem:[%s4605_s25 + $0x864] ss:$8 sps:$4 sm:$0xff]  }
  0x7a   : > { %2837 = vmatpush1.bf16.msra.mxu1 %v4068_v55  ;;  %v4152_v55 = vld [vmem:[%s4605_s25 + $0x260] ss:$8 sps:$4 sm:$0xff]  }
  0x7b   : > { %3083 = vmatpush1.bf16.msra.mxu0 %v4071_v56  ;;  %2838 = vmatprep.subr.bf16.mxu1 %v4076_v57  ;;  %v4155_v56 = vld [vmem:[%s4605_s25 + $0x860] ss:$8 sps:$4 sm:$0xff]   ;;  %v4160_v57 = vld [vmem:[%s4605_s25 + $0x274] ss:$8 sps:$4 sm:$0xff]  }
  0x7c   : > { %3084 = vmatprep.subr.bf16.mxu0 %v4079_v58  ;;  %v4163_v58 = vld [vmem:[%s4605_s25 + $0x874] ss:$8 sps:$4 sm:$0xff]  }
  0x7e   : > { %2839 = vmatpush1.bf16.msra.mxu1 %v4074_v59  ;;  %v4158_v59 = vld [vmem:[%s4605_s25 + $0x270] ss:$8 sps:$4 sm:$0xff]  }
  0x7f   : > { %3085 = vmatpush1.bf16.msra.mxu0 %v4077_v60  ;;  %2840 = vmatprep.subr.bf16.mxu1 %v4082_v61  ;;  %v4161_v60 = vld [vmem:[%s4605_s25 + $0x870] ss:$8 sps:$4 sm:$0xff]   ;;  %v4166_v61 = vld [vmem:[%s4605_s25 + $0x284] ss:$8 sps:$4 sm:$0xff]  }
  0x80   : > { %3086 = vmatprep.subr.bf16.mxu0 %v4085_v62  ;;  %v4169_v62 = vld [vmem:[%s4605_s25 + $0x884] ss:$8 sps:$4 sm:$0xff]  }
  0x82   : > { %2841 = vmatpush1.bf16.msra.mxu1 %v4080_v63  ;;  %v4164_v63 = vld [vmem:[%s4605_s25 + $0x280] ss:$8 sps:$4 sm:$0xff]  }
  0x83   : > { %3087 = vmatpush1.bf16.msra.mxu0 %v4083_v0  ;;  %2842 = vmatprep.subr.bf16.mxu1 %v4088_v1  ;;  %v4167_v0 = vld [vmem:[%s4605_s25 + $0x880] ss:$8 sps:$4 sm:$0xff]   ;;  %v4172_v1 = vld [vmem:[%s4605_s25 + $0x294] ss:$8 sps:$4 sm:$0xff]  }
  0x84   : > { %3088 = vmatprep.subr.bf16.mxu0 %v4091_v2  ;;  %v4175_v2 = vld [vmem:[%s4605_s25 + $0x894] ss:$8 sps:$4 sm:$0xff]  }
  0x86   : > { %2843 = vmatpush1.bf16.msra.mxu1 %v4086_v3  ;;  %v4170_v3 = vld [vmem:[%s4605_s25 + $0x290] ss:$8 sps:$4 sm:$0xff]  }
  0x87   : > { %3089 = vmatpush1.bf16.msra.mxu0 %v4089_v4  ;;  %2844 = vmatprep.subr.bf16.mxu1 %v4094_v5  ;;  %v4173_v4 = vld [vmem:[%s4605_s25 + $0x890] ss:$8 sps:$4 sm:$0xff]   ;;  %v4178_v5 = vld [vmem:[%s4605_s25 + $0x2a4] ss:$8 sps:$4 sm:$0xff]  }
  0x88   : > { %3090 = vmatprep.subr.bf16.mxu0 %v4097_v6  ;;  %v4181_v6 = vld [vmem:[%s4605_s25 + $0x8a4] ss:$8 sps:$4 sm:$0xff]  }
  0x8a   : > { %2845 = vmatpush1.bf16.msra.mxu1 %v4092_v7  ;;  %v4176_v7 = vld [vmem:[%s4605_s25 + $0x2a0] ss:$8 sps:$4 sm:$0xff]  }
  0x8b   : > { %3091 = vmatpush1.bf16.msra.mxu0 %v4095_v8  ;;  %2846 = vmatprep.subr.bf16.mxu1 %v4100_v9  ;;  %v4179_v8 = vld [vmem:[%s4605_s25 + $0x8a0] ss:$8 sps:$4 sm:$0xff]   ;;  %v4184_v9 = vld [vmem:[%s4605_s25 + $0x2b4] ss:$8 sps:$4 sm:$0xff]  }
  0x8c   : > { %3092 = vmatprep.subr.bf16.mxu0 %v4103_v10  ;;  %v4187_v10 = vld [vmem:[%s4605_s25 + $0x8b4] ss:$8 sps:$4 sm:$0xff]  }
  0x8e   : > { %2847 = vmatpush1.bf16.msra.mxu1 %v4098_v11  ;;  %v4182_v11 = vld [vmem:[%s4605_s25 + $0x2b0] ss:$8 sps:$4 sm:$0xff]  }
  0x8f   : > { %3093 = vmatpush1.bf16.msra.mxu0 %v4101_v12  ;;  %2848 = vmatprep.subr.bf16.mxu1 %v4106_v13  ;;  %v4185_v12 = vld [vmem:[%s4605_s25 + $0x8b0] ss:$8 sps:$4 sm:$0xff]   ;;  %v4190_v13 = vld [vmem:[%s4605_s25 + $0x2c4] ss:$8 sps:$4 sm:$0xff]  }
  0x90   : > { %3094 = vmatprep.subr.bf16.mxu0 %v4109_v14  ;;  %v4193_v14 = vld [vmem:[%s4605_s25 + $0x8c4] ss:$8 sps:$4 sm:$0xff]  }
  0x92   : > { %2849 = vmatpush1.bf16.msra.mxu1 %v4104_v15  ;;  %v4188_v15 = vld [vmem:[%s4605_s25 + $0x2c0] ss:$8 sps:$4 sm:$0xff]  }
  0x93   : > { %3095 = vmatpush1.bf16.msra.mxu0 %v4107_v16  ;;  %2850 = vmatprep.subr.bf16.mxu1 %v4112_v19  ;;  %v4191_v16 = vld [vmem:[%s4605_s25 + $0x8c0] ss:$8 sps:$4 sm:$0xff]   ;;  %v4196_v19 = vld [vmem:[%s4605_s25 + $0x2d4] ss:$8 sps:$4 sm:$0xff]  }
  0x94   : > { %3096 = vmatprep.subr.bf16.mxu0 %v4115_v20  ;;  %v4199_v20 = vld [vmem:[%s4605_s25 + $0x8d4] ss:$8 sps:$4 sm:$0xff]  }
  0x96   : > { %2851 = vmatpush1.bf16.msra.mxu1 %v4110_v21  ;;  %v4194_v21 = vld [vmem:[%s4605_s25 + $0x2d0] ss:$8 sps:$4 sm:$0xff]  }
  0x97   : > { %3097 = vmatpush1.bf16.msra.mxu0 %v4113_v22  ;;  %2861 = vmatprep.subr.bf16.mxu1 %v4118_v23  ;;  %v4197_v22 = vld [vmem:[%s4605_s25 + $0x8d0] ss:$8 sps:$4 sm:$0xff]   ;;  %v4202_v23 = vld [vmem:[%s4605_s25 + $0x2e4] ss:$8 sps:$4 sm:$0xff]  }
  0x98   : > { %3107 = vmatprep.subr.bf16.mxu0 %v4121_v24  ;;  %v4205_v24 = vld [vmem:[%s4605_s25 + $0x8e4] ss:$8 sps:$4 sm:$0xff]  }
  0x99   : > { %2853 = vmatmul.mubr.bf16.vlgmr.msra.gmra.mrb[0].mxu1 %v4684_v17  ;;  %v4133_v17 = vld [vmem:[%s4605_s25 + $0x824] ss:$8 sps:$4 sm:$0xff]  }
  0x9a   : > { %3099 = vmatmul.mubr.bf16.vlgmr.msra.gmra.mrb[0].mxu0 %v4687_v18  ;;  %2862 = vmatpush1.bf16.msra.mxu1 %v4116_v25  ;;  %v728_v18 = vcombine.high %v4779_v35, %v4779_v35  ;;  %v4200_v25 = vld [vmem:[%s4605_s25 + $0x2e0] ss:$8 sps:$4 sm:$0xff]  }
  0x9b   : > { %3108 = vmatpush1.bf16.msra.mxu0 %v4119_v26  ;;  %2863 = vmatprep.subr.bf16.mxu1 %v4124_v27  ;;  %v4203_v26 = vld [vmem:[%s4605_s25 + $0x8e0] ss:$8 sps:$4 sm:$0xff]   ;;  %v4208_v27 = vld [vmem:[%s4605_s25 + $0x2f4] ss:$8 sps:$4 sm:$0xff]  }
  0x9c   : > { %3109 = vmatprep.subr.bf16.mxu0 %v4127_v29  ;;  %2893 = vmatprep.mubr.bf16.mxu1 %v677_v34  ;;  %v4211_v29 = vld [vmem:[%s4605_s25 + $0x8f4] ss:$8 sps:$4 sm:$0xff]   ;;  %v4206_v34 = vld [vmem:[%s4605_s25 + $0x2f0] ss:$8 sps:$4 sm:$0xff]  }
  0x9d   : > { %3139 = vmatprep.mubr.bf16.mxu0 %v728_v18  ;;  %v4217_v18 = vld [vmem:[%s4605_s25 + $0x904] ss:$8 sps:$4 sm:$0xff]  }
  0x9e   : > { %2864 = vmatpush1.bf16.msra.mxu1 %v4122_v32  ;;  %v662_v32 = vcombine.high %v4761_v28, %v4761_v28 }
  0x9f   : > { %3110 = vmatpush1.bf16.msra.mxu0 %v4125_v33  ;;  %2865 = vmatprep.subr.bf16.mxu1 %v4130_v36  ;;  %v713_v33 = vcombine.high %v4769_v31, %v4769_v31  ;;  %v4209_v36 = vld [vmem:[%s4605_s25 + $0x8f0] ss:$8 sps:$4 sm:$0xff]   ;;  %v4215_v31 = vld [vmem:[%s4605_s25 + $0x900] ss:$8 sps:$4 sm:$0xff]  }
  0xa0   : > { %3111 = vmatprep.subr.bf16.mxu0 %v4133_v17  ;;  %v4214_v17 = vld [vmem:[%s4605_s25 + $0x304] ss:$8 sps:$4 sm:$0xff]  }
  0xa1   : > { %v4849_v28 = vrot.slane %v713_v33, %v4655_v50  ;;  %v4293_v33 = vld [vmem:[%s4605_s25 + $0x9d0] ss:$8 sps:$4 sm:$0xff]  }
  0xa2   : > { %2866 = vmatpush1.bf16.msra.mxu1 %v4128_v37  ;;  %v4846_v37 = vrot.slane %v662_v32, %v4655_v50  ;;  %v4290_v32 = vld [vmem:[%s4605_s25 + $0x3d0] ss:$8 sps:$4 sm:$0xff]  }
  0xa3   : > { %3112 = vmatpush1.bf16.msra.mxu0 %v4131_v38  ;;  %2867 = vmatprep.subr.bf16.mxu1 %v4136_v39  ;;  %v4212_v38 = vld [vmem:[%s4605_s25 + $0x300] ss:$8 sps:$4 sm:$0xff]   ;;  %v4220_v39 = vld [vmem:[%s4605_s25 + $0x314] ss:$8 sps:$4 sm:$0xff]  }
  0xa4   : > { %3113 = vmatprep.subr.bf16.mxu0 %v4139_v40  ;;  %v4223_v40 = vld [vmem:[%s4605_s25 + $0x914] ss:$8 sps:$4 sm:$0xff]  }
  0xa6   : > { %2868 = vmatpush1.bf16.msra.mxu1 %v4134_v41  ;;  %v678_v41 = vcombine.high %v4846_v37, %v4846_v37 }
  0xa7   : > { %3114 = vmatpush1.bf16.msra.mxu0 %v4137_v42  ;;  %2869 = vmatprep.subr.bf16.mxu1 %v4142_v43  ;;  %v729_v42 = vcombine.high %v4849_v28, %v4849_v28  ;;  %v4218_v43 = vld [vmem:[%s4605_s25 + $0x310] ss:$8 sps:$4 sm:$0xff]  }
  0xa8   : > { %3115 = vmatprep.subr.bf16.mxu0 %v4145_v45  ;;  %v4221_v45 = vld [vmem:[%s4605_s25 + $0x910] ss:$8 sps:$4 sm:$0xff]  }
  0xaa   : > { %2870 = vmatpush1.bf16.msra.mxu1 %v4140_v46  ;;  %v4226_v46 = vld [vmem:[%s4605_s25 + $0x324] ss:$8 sps:$4 sm:$0xff]  }
  0xab   : > { %3116 = vmatpush1.bf16.msra.mxu0 %v4143_v47  ;;  %2871 = vmatprep.subr.bf16.mxu1 %v4148_v48  ;;  %v4229_v47 = vld [vmem:[%s4605_s25 + $0x924] ss:$8 sps:$4 sm:$0xff]   ;;  %v4224_v48 = vld [vmem:[%s4605_s25 + $0x320] ss:$8 sps:$4 sm:$0xff]  }
  0xac   : > { %3117 = vmatprep.subr.bf16.mxu0 %v4151_v49  ;;  %v4235_v49 = vld [vmem:[%s4605_s25 + $0x934] ss:$8 sps:$4 sm:$0xff]  }
  0xae   : > { %2872 = vmatpush1.bf16.msra.mxu1 %v4146_v51  ;;  %v4230_v51 = vld [vmem:[%s4605_s25 + $0x330] ss:$8 sps:$4 sm:$0xff]  }
  0xaf   : > { %3118 = vmatpush1.bf16.msra.mxu0 %v4149_v52  ;;  %2873 = vmatprep.subr.bf16.mxu1 %v4154_v53  ;;  %v4233_v52 = vld [vmem:[%s4605_s25 + $0x930] ss:$8 sps:$4 sm:$0xff]   ;;  %v4238_v53 = vld [vmem:[%s4605_s25 + $0x344] ss:$8 sps:$4 sm:$0xff]  }
  0xb0   : > { %3119 = vmatprep.subr.bf16.mxu0 %v4157_v54  ;;  %v4241_v54 = vld [vmem:[%s4605_s25 + $0x944] ss:$8 sps:$4 sm:$0xff]  }
  0xb2   : > { %2874 = vmatpush1.bf16.msra.mxu1 %v4152_v55  ;;  %v4236_v55 = vld [vmem:[%s4605_s25 + $0x340] ss:$8 sps:$4 sm:$0xff]  }
  0xb3   : > { %3120 = vmatpush1.bf16.msra.mxu0 %v4155_v56  ;;  %2875 = vmatprep.subr.bf16.mxu1 %v4160_v57  ;;  %v4239_v56 = vld [vmem:[%s4605_s25 + $0x940] ss:$8 sps:$4 sm:$0xff]   ;;  %v4244_v57 = vld [vmem:[%s4605_s25 + $0x354] ss:$8 sps:$4 sm:$0xff]  }
  0xb4   : > { %3121 = vmatprep.subr.bf16.mxu0 %v4163_v58  ;;  %v4247_v58 = vld [vmem:[%s4605_s25 + $0x954] ss:$8 sps:$4 sm:$0xff]  }
  0xb6   : > { %2876 = vmatpush1.bf16.msra.mxu1 %v4158_v59  ;;  %v4242_v59 = vld [vmem:[%s4605_s25 + $0x350] ss:$8 sps:$4 sm:$0xff]  }
  0xb7   : > { %3122 = vmatpush1.bf16.msra.mxu0 %v4161_v60  ;;  %2877 = vmatprep.subr.bf16.mxu1 %v4166_v61  ;;  %v4245_v60 = vld [vmem:[%s4605_s25 + $0x950] ss:$8 sps:$4 sm:$0xff]   ;;  %v4250_v61 = vld [vmem:[%s4605_s25 + $0x364] ss:$8 sps:$4 sm:$0xff]  }
  0xb8   : > { %3123 = vmatprep.subr.bf16.mxu0 %v4169_v62  ;;  %v4253_v62 = vld [vmem:[%s4605_s25 + $0x964] ss:$8 sps:$4 sm:$0xff]  }
  0xba   : > { %2878 = vmatpush1.bf16.msra.mxu1 %v4164_v63  ;;  %v4248_v63 = vld [vmem:[%s4605_s25 + $0x360] ss:$8 sps:$4 sm:$0xff]  }
  0xbb   : > { %3124 = vmatpush1.bf16.msra.mxu0 %v4167_v0  ;;  %2879 = vmatprep.subr.bf16.mxu1 %v4172_v1  ;;  %v4251_v0 = vld [vmem:[%s4605_s25 + $0x960] ss:$8 sps:$4 sm:$0xff]   ;;  %v4256_v1 = vld [vmem:[%s4605_s25 + $0x374] ss:$8 sps:$4 sm:$0xff]  }
  0xbc   : > { %3125 = vmatprep.subr.bf16.mxu0 %v4175_v2  ;;  %v4259_v2 = vld [vmem:[%s4605_s25 + $0x974] ss:$8 sps:$4 sm:$0xff]  }
  0xbe   : > { %2880 = vmatpush1.bf16.msra.mxu1 %v4170_v3  ;;  %v4254_v3 = vld [vmem:[%s4605_s25 + $0x370] ss:$8 sps:$4 sm:$0xff]  }
  0xbf   : > { %3126 = vmatpush1.bf16.msra.mxu0 %v4173_v4  ;;  %2881 = vmatprep.subr.bf16.mxu1 %v4178_v5  ;;  %v4257_v4 = vld [vmem:[%s4605_s25 + $0x970] ss:$8 sps:$4 sm:$0xff]   ;;  %v4262_v5 = vld [vmem:[%s4605_s25 + $0x384] ss:$8 sps:$4 sm:$0xff]  }
  0xc0   : > { %3127 = vmatprep.subr.bf16.mxu0 %v4181_v6  ;;  %v4265_v6 = vld [vmem:[%s4605_s25 + $0x984] ss:$8 sps:$4 sm:$0xff]  }
  0xc2   : > { %2882 = vmatpush1.bf16.msra.mxu1 %v4176_v7  ;;  %v4260_v7 = vld [vmem:[%s4605_s25 + $0x380] ss:$8 sps:$4 sm:$0xff]  }
  0xc3   : > { %3128 = vmatpush1.bf16.msra.mxu0 %v4179_v8  ;;  %2883 = vmatprep.subr.bf16.mxu1 %v4184_v9  ;;  %v4263_v8 = vld [vmem:[%s4605_s25 + $0x980] ss:$8 sps:$4 sm:$0xff]   ;;  %v4268_v9 = vld [vmem:[%s4605_s25 + $0x394] ss:$8 sps:$4 sm:$0xff]  }
  0xc4   : > { %3129 = vmatprep.subr.bf16.mxu0 %v4187_v10  ;;  %v4271_v10 = vld [vmem:[%s4605_s25 + $0x994] ss:$8 sps:$4 sm:$0xff]  }
  0xc6   : > { %2884 = vmatpush1.bf16.msra.mxu1 %v4182_v11  ;;  %v4266_v11 = vld [vmem:[%s4605_s25 + $0x390] ss:$8 sps:$4 sm:$0xff]  }
  0xc7   : > { %3130 = vmatpush1.bf16.msra.mxu0 %v4185_v12  ;;  %2885 = vmatprep.subr.bf16.mxu1 %v4190_v13  ;;  %v4269_v12 = vld [vmem:[%s4605_s25 + $0x990] ss:$8 sps:$4 sm:$0xff]   ;;  %v4274_v13 = vld [vmem:[%s4605_s25 + $0x3a4] ss:$8 sps:$4 sm:$0xff]  }
  0xc8   : > { %3131 = vmatprep.subr.bf16.mxu0 %v4193_v14  ;;  %v4277_v14 = vld [vmem:[%s4605_s25 + $0x9a4] ss:$8 sps:$4 sm:$0xff]  }
  0xca   : > { %2886 = vmatpush1.bf16.msra.mxu1 %v4188_v15  ;;  %v4272_v15 = vld [vmem:[%s4605_s25 + $0x3a0] ss:$8 sps:$4 sm:$0xff]  }
  0xcb   : > { %3132 = vmatpush1.bf16.msra.mxu0 %v4191_v16  ;;  %2887 = vmatprep.subr.bf16.mxu1 %v4196_v19  ;;  %v4275_v16 = vld [vmem:[%s4605_s25 + $0x9a0] ss:$8 sps:$4 sm:$0xff]   ;;  %v4280_v19 = vld [vmem:[%s4605_s25 + $0x3b4] ss:$8 sps:$4 sm:$0xff]  }
  0xcc   : > { %3133 = vmatprep.subr.bf16.mxu0 %v4199_v20  ;;  %v4283_v20 = vld [vmem:[%s4605_s25 + $0x9b4] ss:$8 sps:$4 sm:$0xff]  }
  0xce   : > { %2888 = vmatpush1.bf16.msra.mxu1 %v4194_v21  ;;  %v4278_v21 = vld [vmem:[%s4605_s25 + $0x3b0] ss:$8 sps:$4 sm:$0xff]  }
  0xcf   : > { %3134 = vmatpush1.bf16.msra.mxu0 %v4197_v22  ;;  %2889 = vmatprep.subr.bf16.mxu1 %v4202_v23  ;;  %v4281_v22 = vld [vmem:[%s4605_s25 + $0x9b0] ss:$8 sps:$4 sm:$0xff]   ;;  %v4286_v23 = vld [vmem:[%s4605_s25 + $0x3c4] ss:$8 sps:$4 sm:$0xff]  }
  0xd0   : > { %3135 = vmatprep.subr.bf16.mxu0 %v4205_v24  ;;  %v4289_v24 = vld [vmem:[%s4605_s25 + $0x9c4] ss:$8 sps:$4 sm:$0xff]  }
  0xd2   : > { %2890 = vmatpush1.bf16.msra.mxu1 %v4200_v25  ;;  %v4284_v25 = vld [vmem:[%s4605_s25 + $0x3c0] ss:$8 sps:$4 sm:$0xff]  }
  0xd3   : > { %3136 = vmatpush1.bf16.msra.mxu0 %v4203_v26  ;;  %2891 = vmatprep.subr.bf16.mxu1 %v4208_v27  ;;  %v4287_v26 = vld [vmem:[%s4605_s25 + $0x9c0] ss:$8 sps:$4 sm:$0xff]   ;;  %v4292_v27 = vld [vmem:[%s4605_s25 + $0x3d4] ss:$8 sps:$4 sm:$0xff]  }
  0xd4   : > { %3137 = vmatprep.subr.bf16.mxu0 %v4211_v29  ;;  %v4295_v29 = vld [vmem:[%s4605_s25 + $0x9d4] ss:$8 sps:$4 sm:$0xff]  }
  0xd6   : > { %2892 = vmatpush1.bf16.msra.mxu1 %v4206_v34  ;;  %v4298_v34 = vld [vmem:[%s4605_s25 + $0x3e4] ss:$8 sps:$4 sm:$0xff]  }
  0xd7   : > { %3138 = vmatpush1.bf16.msra.mxu0 %v4209_v36  ;;  %2902 = vmatprep.subr.bf16.mxu1 %v4214_v17  ;;  %v4301_v36 = vld [vmem:[%s4605_s25 + $0x9e4] ss:$8 sps:$4 sm:$0xff]   ;;  %v4296_v17 = vld [vmem:[%s4605_s25 + $0x3e0] ss:$8 sps:$4 sm:$0xff]  }
  0xd8   : > { %3148 = vmatprep.subr.bf16.mxu0 %v4217_v18  ;;  %v4299_v18 = vld [vmem:[%s4605_s25 + $0x9e0] ss:$8 sps:$4 sm:$0xff]  }
  0xd9   : > { %2894 = vmatmul.mubr.bf16.vlgmr.msra.gmra.mrb[0].mxu1 %v4766_v30  ;;  %v4227_v30 = vld [vmem:[%s4605_s25 + $0x920] ss:$8 sps:$4 sm:$0xff]  }
  0xda   : > { %3140 = vmatmul.mubr.bf16.vlgmr.msra.gmra.mrb[0].mxu0 %v4779_v35  ;;  %2903 = vmatpush1.bf16.msra.mxu1 %v4212_v38  ;;  %v4232_v35 = vld [vmem:[%s4605_s25 + $0x334] ss:$8 sps:$4 sm:$0xff]  }
  0xdb   : > { %3149 = vmatpush1.bf16.msra.mxu0 %v4215_v31  ;;  %2904 = vmatprep.subr.bf16.mxu1 %v4220_v39  ;;  %v4304_v38 = vld [vmem:[%s4605_s25 + $0x3f4] ss:$8 sps:$4 sm:$0xff]  }
  0xdc   : > { %3150 = vmatprep.subr.bf16.mxu0 %v4223_v40  ;;  %2934 = vmatprep.mubr.bf16.mxu1 %v678_v41  ;;  %v4307_v31 = vld [vmem:[%s4605_s25 + $0x9f4] ss:$8 sps:$4 sm:$0xff]   ;;  %v4921_v40 = vld [vmem:[%s4600_s21 + $0x28] sm:$0xff]  ;;  %v4302_v41 = vld [vmem:[%s4605_s25 + $0x3f0] ss:$8 sps:$4 sm:$0xff]  }
  0xdd   : > { %3180 = vmatprep.mubr.bf16.mxu0 %v729_v42  ;;  %v4918_v39 = vld [vmem:[%s4600_s21 + $0x10] sm:$0xff] }
  0xde   : > { %2905 = vmatpush1.bf16.msra.mxu1 %v4218_v43  ;;  %v4305_v42 = vld [vmem:[%s4605_s25 + $0x9f0] ss:$8 sps:$4 sm:$0xff]   ;;  %v4311_v43 = vld [vmem:[%s4605_s25 + $0x404] ss:$8 sps:$4 sm:$0xff]  }
  0xdf   : > { %3151 = vmatpush1.bf16.msra.mxu0 %v4221_v45  ;;  %2906 = vmatprep.subr.bf16.mxu1 %v4226_v46  ;;  %v4315_v45 = vld [vmem:[%s4605_s25 + $0xa04] ss:$8 sps:$4 sm:$0xff]   ;;  %v4929_v46 = vrot.slane %v4918_v39, %v4655_v50 }
  0xe0   : > { %3152 = vmatprep.subr.bf16.mxu0 %v4229_v47  ;;  %v4933_v47 = vrot.slane %v4921_v40, %v4655_v50 }
  0xe2   : > { %2907 = vmatpush1.bf16.msra.mxu1 %v4224_v48  ;;  %v4309_v48 = vld [vmem:[%s4605_s25 + $0x400] ss:$8 sps:$4 sm:$0xff]  }
  0xe3   : > { %3153 = vmatpush1.bf16.msra.mxu0 %v4227_v30  ;;  %2908 = vmatprep.subr.bf16.mxu1 %v4232_v35  ;;  %v4313_v30 = vld [vmem:[%s4605_s25 + $0xa00] ss:$8 sps:$4 sm:$0xff]   ;;  %v4318_v35 = vld [vmem:[%s4605_s25 + $0x414] ss:$8 sps:$4 sm:$0xff]  }
  0xe4   : > { %3154 = vmatprep.subr.bf16.mxu0 %v4235_v49  ;;  %v4321_v49 = vld [vmem:[%s4605_s25 + $0xa14] ss:$8 sps:$4 sm:$0xff]  }
  0xe6   : > { %2909 = vmatpush1.bf16.msra.mxu1 %v4230_v51  ;;  %v4316_v51 = vld [vmem:[%s4605_s25 + $0x410] ss:$8 sps:$4 sm:$0xff]  }
  0xe7   : > { %3155 = vmatpush1.bf16.msra.mxu0 %v4233_v52  ;;  %2910 = vmatprep.subr.bf16.mxu1 %v4238_v53  ;;  %v694_v52 = vcombine.high %v4929_v46, %v4929_v46  ;;  %v745_v53 = vcombine.high %v4933_v47, %v4933_v47 }
  0xe8   : > { %3156 = vmatprep.subr.bf16.mxu0 %v4241_v54  ;;  %v4319_v54 = vld [vmem:[%s4605_s25 + $0xa10] ss:$8 sps:$4 sm:$0xff]  }
  0xea   : > { %2911 = vmatpush1.bf16.msra.mxu1 %v4236_v55  ;;  %v4324_v55 = vld [vmem:[%s4605_s25 + $0x424] ss:$8 sps:$4 sm:$0xff]  }
  0xeb   : > { %3157 = vmatpush1.bf16.msra.mxu0 %v4239_v56  ;;  %2912 = vmatprep.subr.bf16.mxu1 %v4244_v57  ;;  %v4327_v56 = vld [vmem:[%s4605_s25 + $0xa24] ss:$8 sps:$4 sm:$0xff]   ;;  %v4330_v57 = vld [vmem:[%s4605_s25 + $0x434] ss:$8 sps:$4 sm:$0xff]  }
  0xec   : > { %3158 = vmatprep.subr.bf16.mxu0 %v4247_v58  ;;  %v4333_v58 = vld [vmem:[%s4605_s25 + $0xa34] ss:$8 sps:$4 sm:$0xff]  }
  0xee   : > { %2913 = vmatpush1.bf16.msra.mxu1 %v4242_v59  ;;  %v4328_v59 = vld [vmem:[%s4605_s25 + $0x430] ss:$8 sps:$4 sm:$0xff]  }
  0xef   : > { %3159 = vmatpush1.bf16.msra.mxu0 %v4245_v60  ;;  %2914 = vmatprep.subr.bf16.mxu1 %v4250_v61  ;;  %v4331_v60 = vld [vmem:[%s4605_s25 + $0xa30] ss:$8 sps:$4 sm:$0xff]   ;;  %v4336_v61 = vld [vmem:[%s4605_s25 + $0x444] ss:$8 sps:$4 sm:$0xff]  }
  0xf0   : > { %3160 = vmatprep.subr.bf16.mxu0 %v4253_v62  ;;  %v4339_v62 = vld [vmem:[%s4605_s25 + $0xa44] ss:$8 sps:$4 sm:$0xff]  }
  0xf2   : > { %2915 = vmatpush1.bf16.msra.mxu1 %v4248_v63  ;;  %v4334_v63 = vld [vmem:[%s4605_s25 + $0x440] ss:$8 sps:$4 sm:$0xff]  }
  0xf3   : > { %3161 = vmatpush1.bf16.msra.mxu0 %v4251_v0  ;;  %2916 = vmatprep.subr.bf16.mxu1 %v4256_v1  ;;  %v4337_v0 = vld [vmem:[%s4605_s25 + $0xa40] ss:$8 sps:$4 sm:$0xff]   ;;  %v4342_v1 = vld [vmem:[%s4605_s25 + $0x454] ss:$8 sps:$4 sm:$0xff]  }
  0xf4   : > { %3162 = vmatprep.subr.bf16.mxu0 %v4259_v2  ;;  %v4345_v2 = vld [vmem:[%s4605_s25 + $0xa54] ss:$8 sps:$4 sm:$0xff]  }
  0xf6   : > { %2917 = vmatpush1.bf16.msra.mxu1 %v4254_v3  ;;  %v4340_v3 = vld [vmem:[%s4605_s25 + $0x450] ss:$8 sps:$4 sm:$0xff]  }
  0xf7   : > { %3163 = vmatpush1.bf16.msra.mxu0 %v4257_v4  ;;  %2918 = vmatprep.subr.bf16.mxu1 %v4262_v5  ;;  %v4343_v4 = vld [vmem:[%s4605_s25 + $0xa50] ss:$8 sps:$4 sm:$0xff]   ;;  %v4348_v5 = vld [vmem:[%s4605_s25 + $0x464] ss:$8 sps:$4 sm:$0xff]  }
  0xf8   : > { %3164 = vmatprep.subr.bf16.mxu0 %v4265_v6  ;;  %v4351_v6 = vld [vmem:[%s4605_s25 + $0xa64] ss:$8 sps:$4 sm:$0xff]  }
  0xfa   : > { %2919 = vmatpush1.bf16.msra.mxu1 %v4260_v7  ;;  %v4346_v7 = vld [vmem:[%s4605_s25 + $0x460] ss:$8 sps:$4 sm:$0xff]  }
  0xfb   : > { %3165 = vmatpush1.bf16.msra.mxu0 %v4263_v8  ;;  %2920 = vmatprep.subr.bf16.mxu1 %v4268_v9  ;;  %v4349_v8 = vld [vmem:[%s4605_s25 + $0xa60] ss:$8 sps:$4 sm:$0xff]   ;;  %v4354_v9 = vld [vmem:[%s4605_s25 + $0x474] ss:$8 sps:$4 sm:$0xff]  }
  0xfc   : > { %3166 = vmatprep.subr.bf16.mxu0 %v4271_v10  ;;  %v4357_v10 = vld [vmem:[%s4605_s25 + $0xa74] ss:$8 sps:$4 sm:$0xff]  }
  0xfe   : > { %2921 = vmatpush1.bf16.msra.mxu1 %v4266_v11  ;;  %v4352_v11 = vld [vmem:[%s4605_s25 + $0x470] ss:$8 sps:$4 sm:$0xff]  }
  0xff   : > { %3167 = vmatpush1.bf16.msra.mxu0 %v4269_v12  ;;  %2922 = vmatprep.subr.bf16.mxu1 %v4274_v13  ;;  %v4355_v12 = vld [vmem:[%s4605_s25 + $0xa70] ss:$8 sps:$4 sm:$0xff]   ;;  %v4360_v13 = vld [vmem:[%s4605_s25 + $0x484] ss:$8 sps:$4 sm:$0xff]  }
 0x100   : > { %3168 = vmatprep.subr.bf16.mxu0 %v4277_v14  ;;  %v4363_v14 = vld [vmem:[%s4605_s25 + $0xa84] ss:$8 sps:$4 sm:$0xff]  }
 0x102   : > { %2923 = vmatpush1.bf16.msra.mxu1 %v4272_v15  ;;  %v4358_v15 = vld [vmem:[%s4605_s25 + $0x480] ss:$8 sps:$4 sm:$0xff]  }
 0x103   : > { %3169 = vmatpush1.bf16.msra.mxu0 %v4275_v16  ;;  %2924 = vmatprep.subr.bf16.mxu1 %v4280_v19  ;;  %v4361_v16 = vld [vmem:[%s4605_s25 + $0xa80] ss:$8 sps:$4 sm:$0xff]   ;;  %v4366_v19 = vld [vmem:[%s4605_s25 + $0x494] ss:$8 sps:$4 sm:$0xff]  }
 0x104   : > { %3170 = vmatprep.subr.bf16.mxu0 %v4283_v20  ;;  %v4369_v20 = vld [vmem:[%s4605_s25 + $0xa94] ss:$8 sps:$4 sm:$0xff]  }
 0x106   : > { %2925 = vmatpush1.bf16.msra.mxu1 %v4278_v21  ;;  %v4364_v21 = vld [vmem:[%s4605_s25 + $0x490] ss:$8 sps:$4 sm:$0xff]  }
 0x107   : > { %3171 = vmatpush1.bf16.msra.mxu0 %v4281_v22  ;;  %2926 = vmatprep.subr.bf16.mxu1 %v4286_v23  ;;  %v4367_v22 = vld [vmem:[%s4605_s25 + $0xa90] ss:$8 sps:$4 sm:$0xff]   ;;  %v4372_v23 = vld [vmem:[%s4605_s25 + $0x4a4] ss:$8 sps:$4 sm:$0xff]  }
 0x108   : > { %3172 = vmatprep.subr.bf16.mxu0 %v4289_v24  ;;  %v4375_v24 = vld [vmem:[%s4605_s25 + $0xaa4] ss:$8 sps:$4 sm:$0xff]  }
 0x10a   : > { %2927 = vmatpush1.bf16.msra.mxu1 %v4284_v25  ;;  %v4370_v25 = vld [vmem:[%s4605_s25 + $0x4a0] ss:$8 sps:$4 sm:$0xff]  }
 0x10b   : > { %3173 = vmatpush1.bf16.msra.mxu0 %v4287_v26  ;;  %2928 = vmatprep.subr.bf16.mxu1 %v4292_v27  ;;  %v4373_v26 = vld [vmem:[%s4605_s25 + $0xaa0] ss:$8 sps:$4 sm:$0xff]   ;;  %v4378_v27 = vld [vmem:[%s4605_s25 + $0x4b4] ss:$8 sps:$4 sm:$0xff]  }
 0x10c   : > { %3174 = vmatprep.subr.bf16.mxu0 %v4295_v29  ;;  %v4381_v29 = vld [vmem:[%s4605_s25 + $0xab4] ss:$8 sps:$4 sm:$0xff]  }
 0x10e   : > { %2929 = vmatpush1.bf16.msra.mxu1 %v4290_v32  ;;  %v4376_v32 = vld [vmem:[%s4605_s25 + $0x4b0] ss:$8 sps:$4 sm:$0xff]  }
 0x10f   : > { %3175 = vmatpush1.bf16.msra.mxu0 %v4293_v33  ;;  %2930 = vmatprep.subr.bf16.mxu1 %v4298_v34  ;;  %v4379_v33 = vld [vmem:[%s4605_s25 + $0xab0] ss:$8 sps:$4 sm:$0xff]   ;;  %v4384_v34 = vld [vmem:[%s4605_s25 + $0x4c4] ss:$8 sps:$4 sm:$0xff]  }
 0x110   : > { %3176 = vmatprep.subr.bf16.mxu0 %v4301_v36  ;;  %v4387_v36 = vld [vmem:[%s4605_s25 + $0xac4] ss:$8 sps:$4 sm:$0xff]  }
 0x112   : > { %2931 = vmatpush1.bf16.msra.mxu1 %v4296_v17  ;;  %v4382_v17 = vld [vmem:[%s4605_s25 + $0x4c0] ss:$8 sps:$4 sm:$0xff]  }
 0x113   : > { %3177 = vmatpush1.bf16.msra.mxu0 %v4299_v18  ;;  %2932 = vmatprep.subr.bf16.mxu1 %v4304_v38  ;;  %v4385_v18 = vld [vmem:[%s4605_s25 + $0xac0] ss:$8 sps:$4 sm:$0xff]   ;;  %v4390_v38 = vld [vmem:[%s4605_s25 + $0x4d4] ss:$8 sps:$4 sm:$0xff]  }
 0x114   : > { %3178 = vmatprep.subr.bf16.mxu0 %v4307_v31  ;;  %v4393_v31 = vld [vmem:[%s4605_s25 + $0xad4] ss:$8 sps:$4 sm:$0xff]  }
 0x116   : > { %2933 = vmatpush1.bf16.msra.mxu1 %v4302_v41  ;;  %v4388_v41 = vld [vmem:[%s4605_s25 + $0x4d0] ss:$8 sps:$4 sm:$0xff]  }
 0x117   : > { %3179 = vmatpush1.bf16.msra.mxu0 %v4305_v42  ;;  %2943 = vmatprep.subr.bf16.mxu1 %v4311_v43  ;;  %v4391_v42 = vld [vmem:[%s4605_s25 + $0xad0] ss:$8 sps:$4 sm:$0xff]   ;;  %v4396_v43 = vld [vmem:[%s4605_s25 + $0x4e4] ss:$8 sps:$4 sm:$0xff]  }
 0x118   : > { %3189 = vmatprep.subr.bf16.mxu0 %v4315_v45  ;;  %v4399_v45 = vld [vmem:[%s4605_s25 + $0xae4] ss:$8 sps:$4 sm:$0xff]  }
 0x119   : > { %2935 = vmatmul.mubr.bf16.vlgmr.msra.gmra.mrb[0].mxu1 %v4846_v37  ;;  %v4322_v37 = vld [vmem:[%s4605_s25 + $0x420] ss:$8 sps:$4 sm:$0xff]  }
 0x11a   : > { %3181 = vmatmul.mubr.bf16.vlgmr.msra.gmra.mrb[0].mxu0 %v4849_v28  ;;  %2944 = vmatpush1.bf16.msra.mxu1 %v4309_v48  ;;  %v4325_v28 = vld [vmem:[%s4605_s25 + $0xa20] ss:$8 sps:$4 sm:$0xff]  }
 0x11b   : > { %3190 = vmatpush1.bf16.msra.mxu0 %v4313_v30  ;;  %2945 = vmatprep.subr.bf16.mxu1 %v4318_v35  ;;  %v4394_v48 = vld [vmem:[%s4605_s25 + $0x4e0] ss:$8 sps:$4 sm:$0xff]   ;;  %v4402_v35 = vld [vmem:[%s4605_s25 + $0x4f4] ss:$8 sps:$4 sm:$0xff]  }
 0x11c   : > { %3191 = vmatprep.subr.bf16.mxu0 %v4321_v49  ;;  %2975 = vmatprep.mubr.bf16.mxu1 %v694_v52  ;;  %v4397_v30 = vld [vmem:[%s4605_s25 + $0xae0] ss:$8 sps:$4 sm:$0xff]   ;;  %v4405_v49 = vld [vmem:[%s4605_s25 + $0xaf4] ss:$8 sps:$4 sm:$0xff]   ;;  %v730_v52 = vcombine.high %v4921_v40, %v4921_v40 }
 0x11d   : > { %3221 = vmatprep.mubr.bf16.mxu0 %v745_v53  ;;  %v4400_v53 = vld [vmem:[%s4605_s25 + $0x4f0] ss:$8 sps:$4 sm:$0xff]   ;;  %v4409_v40 = vld [vmem:[%s4605_s25 + $0xb00] ss:$8 sps:$4 sm:$0xff]  }
 0x11e   : > { %2946 = vmatpush1.bf16.msra.mxu1 %v4316_v51  ;;  %v679_v51 = vcombine.high %v4918_v39, %v4918_v39  ;;  %v4406_v39 = vld [vmem:[%s4605_s25 + $0x500] ss:$8 sps:$4 sm:$0xff]  }
 0x11f   : > { %3192 = vmatpush1.bf16.msra.mxu0 %v4319_v54  ;;  %2947 = vmatprep.subr.bf16.mxu1 %v4324_v55  ;;  %v4403_v54 = vld [vmem:[%s4605_s25 + $0xaf0] ss:$8 sps:$4 sm:$0xff]   ;;  %v4408_v55 = vld [vmem:[%s4605_s25 + $0x504] ss:$8 sps:$4 sm:$0xff]  }
 0x120   : > { %3193 = vmatprep.subr.bf16.mxu0 %v4327_v56  ;;  %v4411_v56 = vld [vmem:[%s4605_s25 + $0xb04] ss:$8 sps:$4 sm:$0xff]  }
 0x122   : > { %2948 = vmatpush1.bf16.msra.mxu1 %v4322_v37  ;;  %v5010_v37 = vrot.slane %v679_v51, %v4655_v50  ;;  %v4487_v51 = vld [vmem:[%s4605_s25 + $0xbd0] ss:$8 sps:$4 sm:$0xff]  }
 0x123   : > { %3194 = vmatpush1.bf16.msra.mxu0 %v4325_v28  ;;  %2949 = vmatprep.subr.bf16.mxu1 %v4330_v57  ;;  %v5013_v28 = vrot.slane %v730_v52, %v4655_v50  ;;  %v4414_v57 = vld [vmem:[%s4605_s25 + $0x514] ss:$8 sps:$4 sm:$0xff]   ;;  %v4412_v50 = vld [vmem:[%s4605_s25 + $0x510] ss:$8 sps:$4 sm:$0xff]   ;;  %v4492_v52 = vld [vmem:[%s4605_s25 + $0x5e4] ss:$8 sps:$4 sm:$0xff]  }
 0x124   : > { %3195 = vmatprep.subr.bf16.mxu0 %v4333_v58  ;;  %v4417_v58 = vld [vmem:[%s4605_s25 + $0xb14] ss:$8 sps:$4 sm:$0xff]  }
 0x126   : > { %2950 = vmatpush1.bf16.msra.mxu1 %v4328_v59  ;;  %v695_v59 = vcombine.high %v5010_v37, %v5010_v37 }
 0x127   : > { %3196 = vmatpush1.bf16.msra.mxu0 %v4331_v60  ;;  %2951 = vmatprep.subr.bf16.mxu1 %v4336_v61  ;;  %v746_v60 = vcombine.high %v5013_v28, %v5013_v28  ;;  %v4415_v61 = vld [vmem:[%s4605_s25 + $0xb10] ss:$8 sps:$4 sm:$0xff]  }
 0x128   : > { %3197 = vmatprep.subr.bf16.mxu0 %v4339_v62  ;;  %v4420_v62 = vld [vmem:[%s4605_s25 + $0x524] ss:$8 sps:$4 sm:$0xff]  }
 0x12a   : > { %2952 = vmatpush1.bf16.msra.mxu1 %v4334_v63  ;;  %v4423_v63 = vld [vmem:[%s4605_s25 + $0xb24] ss:$8 sps:$4 sm:$0xff]  }
 0x12b   : > { %3198 = vmatpush1.bf16.msra.mxu0 %v4337_v0  ;;  %2953 = vmatprep.subr.bf16.mxu1 %v4342_v1  ;;  %v4426_v0 = vld [vmem:[%s4605_s25 + $0x534] ss:$8 sps:$4 sm:$0xff]  }
 0x12c   : > { %3199 = vmatprep.subr.bf16.mxu0 %v4345_v2  ;;  %v4429_v1 = vld [vmem:[%s4605_s25 + $0xb34] ss:$8 sps:$4 sm:$0xff]   ;;  %v4424_v2 = vld [vmem:[%s4605_s25 + $0x530] ss:$8 sps:$4 sm:$0xff]  }
 0x12e   : > { %2954 = vmatpush1.bf16.msra.mxu1 %v4340_v3  ;;  %v4427_v3 = vld [vmem:[%s4605_s25 + $0xb30] ss:$8 sps:$4 sm:$0xff]  }
 0x12f   : > { %3200 = vmatpush1.bf16.msra.mxu0 %v4343_v4  ;;  %2955 = vmatprep.subr.bf16.mxu1 %v4348_v5  ;;  %v4432_v4 = vld [vmem:[%s4605_s25 + $0x544] ss:$8 sps:$4 sm:$0xff]  }
 0x130   : > { %3201 = vmatprep.subr.bf16.mxu0 %v4351_v6  ;;  %v4435_v5 = vld [vmem:[%s4605_s25 + $0xb44] ss:$8 sps:$4 sm:$0xff]   ;;  %v4430_v6 = vld [vmem:[%s4605_s25 + $0x540] ss:$8 sps:$4 sm:$0xff]  }
 0x132   : > { %2956 = vmatpush1.bf16.msra.mxu1 %v4346_v7  ;;  %v4433_v7 = vld [vmem:[%s4605_s25 + $0xb40] ss:$8 sps:$4 sm:$0xff]  }
 0x133   : > { %3202 = vmatpush1.bf16.msra.mxu0 %v4349_v8  ;;  %2957 = vmatprep.subr.bf16.mxu1 %v4354_v9  ;;  %v4438_v8 = vld [vmem:[%s4605_s25 + $0x554] ss:$8 sps:$4 sm:$0xff]  }
 0x134   : > { %3203 = vmatprep.subr.bf16.mxu0 %v4357_v10  ;;  %v4441_v9 = vld [vmem:[%s4605_s25 + $0xb54] ss:$8 sps:$4 sm:$0xff]   ;;  %v4436_v10 = vld [vmem:[%s4605_s25 + $0x550] ss:$8 sps:$4 sm:$0xff]  }
 0x136   : > { %2958 = vmatpush1.bf16.msra.mxu1 %v4352_v11  ;;  %v4439_v11 = vld [vmem:[%s4605_s25 + $0xb50] ss:$8 sps:$4 sm:$0xff]  }
 0x137   : > { %3204 = vmatpush1.bf16.msra.mxu0 %v4355_v12  ;;  %2959 = vmatprep.subr.bf16.mxu1 %v4360_v13  ;;  %v4444_v12 = vld [vmem:[%s4605_s25 + $0x564] ss:$8 sps:$4 sm:$0xff]  }
 0x138   : > { %3205 = vmatprep.subr.bf16.mxu0 %v4363_v14  ;;  %v4447_v13 = vld [vmem:[%s4605_s25 + $0xb64] ss:$8 sps:$4 sm:$0xff]   ;;  %v4442_v14 = vld [vmem:[%s4605_s25 + $0x560] ss:$8 sps:$4 sm:$0xff]  }
 0x13a   : > { %2960 = vmatpush1.bf16.msra.mxu1 %v4358_v15  ;;  %v4445_v15 = vld [vmem:[%s4605_s25 + $0xb60] ss:$8 sps:$4 sm:$0xff]  }
 0x13b   : > { %3206 = vmatpush1.bf16.msra.mxu0 %v4361_v16  ;;  %2961 = vmatprep.subr.bf16.mxu1 %v4366_v19  ;;  %v4450_v16 = vld [vmem:[%s4605_s25 + $0x574] ss:$8 sps:$4 sm:$0xff]  }
 0x13c   : > { %3207 = vmatprep.subr.bf16.mxu0 %v4369_v20  ;;  %v4453_v19 = vld [vmem:[%s4605_s25 + $0xb74] ss:$8 sps:$4 sm:$0xff]   ;;  %v4448_v20 = vld [vmem:[%s4605_s25 + $0x570] ss:$8 sps:$4 sm:$0xff]  }
 0x13e   : > { %2962 = vmatpush1.bf16.msra.mxu1 %v4364_v21  ;;  %v4451_v21 = vld [vmem:[%s4605_s25 + $0xb70] ss:$8 sps:$4 sm:$0xff]  }
 0x13f   : > { %3208 = vmatpush1.bf16.msra.mxu0 %v4367_v22  ;;  %2963 = vmatprep.subr.bf16.mxu1 %v4372_v23  ;;  %v4456_v22 = vld [vmem:[%s4605_s25 + $0x584] ss:$8 sps:$4 sm:$0xff]  }
 0x140   : > { %3209 = vmatprep.subr.bf16.mxu0 %v4375_v24  ;;  %v4459_v23 = vld [vmem:[%s4605_s25 + $0xb84] ss:$8 sps:$4 sm:$0xff]   ;;  %v4454_v24 = vld [vmem:[%s4605_s25 + $0x580] ss:$8 sps:$4 sm:$0xff]  }
 0x142   : > { %2964 = vmatpush1.bf16.msra.mxu1 %v4370_v25  ;;  %v4457_v25 = vld [vmem:[%s4605_s25 + $0xb80] ss:$8 sps:$4 sm:$0xff]  }
 0x143   : > { %3210 = vmatpush1.bf16.msra.mxu0 %v4373_v26  ;;  %2965 = vmatprep.subr.bf16.mxu1 %v4378_v27  ;;  %v4462_v26 = vld [vmem:[%s4605_s25 + $0x594] ss:$8 sps:$4 sm:$0xff]  }
 0x144   : > { %3211 = vmatprep.subr.bf16.mxu0 %v4381_v29  ;;  %v4465_v27 = vld [vmem:[%s4605_s25 + $0xb94] ss:$8 sps:$4 sm:$0xff]   ;;  %v4460_v29 = vld [vmem:[%s4605_s25 + $0x590] ss:$8 sps:$4 sm:$0xff]  }
 0x146   : > { %2966 = vmatpush1.bf16.msra.mxu1 %v4376_v32  ;;  %v4463_v32 = vld [vmem:[%s4605_s25 + $0xb90] ss:$8 sps:$4 sm:$0xff]  }
 0x147   : > { %3212 = vmatpush1.bf16.msra.mxu0 %v4379_v33  ;;  %2967 = vmatprep.subr.bf16.mxu1 %v4384_v34  ;;  %v4468_v33 = vld [vmem:[%s4605_s25 + $0x5a4] ss:$8 sps:$4 sm:$0xff]  }
 0x148   : > { %3213 = vmatprep.subr.bf16.mxu0 %v4387_v36  ;;  %v4471_v34 = vld [vmem:[%s4605_s25 + $0xba4] ss:$8 sps:$4 sm:$0xff]   ;;  %v4466_v36 = vld [vmem:[%s4605_s25 + $0x5a0] ss:$8 sps:$4 sm:$0xff]  }
 0x14a   : > { %2968 = vmatpush1.bf16.msra.mxu1 %v4382_v17  ;;  %v4469_v17 = vld [vmem:[%s4605_s25 + $0xba0] ss:$8 sps:$4 sm:$0xff]  }
 0x14b   : > { %3214 = vmatpush1.bf16.msra.mxu0 %v4385_v18  ;;  %2969 = vmatprep.subr.bf16.mxu1 %v4390_v38  ;;  %v4474_v18 = vld [vmem:[%s4605_s25 + $0x5b4] ss:$8 sps:$4 sm:$0xff]  }
 0x14c   : > { %3215 = vmatprep.subr.bf16.mxu0 %v4393_v31  ;;  %v4477_v38 = vld [vmem:[%s4605_s25 + $0xbb4] ss:$8 sps:$4 sm:$0xff]   ;;  %v4472_v31 = vld [vmem:[%s4605_s25 + $0x5b0] ss:$8 sps:$4 sm:$0xff]  }
 0x14e   : > { %2970 = vmatpush1.bf16.msra.mxu1 %v4388_v41  ;;  %v4475_v41 = vld [vmem:[%s4605_s25 + $0xbb0] ss:$8 sps:$4 sm:$0xff]  }
 0x14f   : > { %3216 = vmatpush1.bf16.msra.mxu0 %v4391_v42  ;;  %2971 = vmatprep.subr.bf16.mxu1 %v4396_v43  ;;  %v4480_v42 = vld [vmem:[%s4605_s25 + $0x5c4] ss:$8 sps:$4 sm:$0xff]  }
 0x150   : > { %3217 = vmatprep.subr.bf16.mxu0 %v4399_v45  ;;  %v4483_v43 = vld [vmem:[%s4605_s25 + $0xbc4] ss:$8 sps:$4 sm:$0xff]   ;;  %v4478_v45 = vld [vmem:[%s4605_s25 + $0x5c0] ss:$8 sps:$4 sm:$0xff]  }
 0x152   : > { %2972 = vmatpush1.bf16.msra.mxu1 %v4394_v48  ;;  %v4481_v48 = vld [vmem:[%s4605_s25 + $0xbc0] ss:$8 sps:$4 sm:$0xff]  }
 0x153   : > { %3218 = vmatpush1.bf16.msra.mxu0 %v4397_v30  ;;  %2973 = vmatprep.subr.bf16.mxu1 %v4402_v35  ;;  %v4486_v30 = vld [vmem:[%s4605_s25 + $0x5d4] ss:$8 sps:$4 sm:$0xff]  }
 0x154   : > { %3219 = vmatprep.subr.bf16.mxu0 %v4405_v49  ;;  %v4489_v35 = vld [vmem:[%s4605_s25 + $0xbd4] ss:$8 sps:$4 sm:$0xff]   ;;  %v4484_v49 = vld [vmem:[%s4605_s25 + $0x5d0] ss:$8 sps:$4 sm:$0xff]  }
 0x156   : > { %2974 = vmatpush1.bf16.msra.mxu1 %v4400_v53  ;;  %v4495_v53 = vld [vmem:[%s4605_s25 + $0xbe4] ss:$8 sps:$4 sm:$0xff]  }
 0x157   : > { %3220 = vmatpush1.bf16.msra.mxu0 %v4403_v54  ;;  %2984 = vmatprep.subr.bf16.mxu1 %v4408_v55  ;;  %v4490_v54 = vld [vmem:[%s4605_s25 + $0x5e0] ss:$8 sps:$4 sm:$0xff]  }
 0x158   : > { %3230 = vmatprep.subr.bf16.mxu0 %v4411_v56  ;;  %v4493_v55 = vld [vmem:[%s4605_s25 + $0xbe0] ss:$8 sps:$4 sm:$0xff]   ;;  %v4498_v56 = vld [vmem:[%s4605_s25 + $0x5f4] ss:$8 sps:$4 sm:$0xff]  }
 0x159   : > { %2976 = vmatmul.mubr.bf16.vlgmr.msra.gmra.mrb[0].mxu1 %v4929_v46  ;;  %v4418_v46 = vld [vmem:[%s4605_s25 + $0x520] ss:$8 sps:$4 sm:$0xff]  }
 0x15a   : > { %3222 = vmatmul.mubr.bf16.vlgmr.msra.gmra.mrb[0].mxu0 %v4933_v47  ;;  %2985 = vmatpush1.bf16.msra.mxu1 %v4406_v39  ;;  %v4421_v47 = vld [vmem:[%s4605_s25 + $0xb20] ss:$8 sps:$4 sm:$0xff]   ;;  %v4501_v39 = vld [vmem:[%s4605_s25 + $0xbf4] ss:$8 sps:$4 sm:$0xff]  }
 0x15b   : > { %3231 = vmatpush1.bf16.msra.mxu0 %v4409_v40  ;;  %2986 = vmatprep.subr.bf16.mxu1 %v4414_v57  ;;  %v4496_v40 = vld [vmem:[%s4605_s25 + $0x5f0] ss:$8 sps:$4 sm:$0xff]  }
 0x15c   : > { %3232 = vmatprep.subr.bf16.mxu0 %v4417_v58  ;;  %3016 = vmatprep.mubr.bf16.mxu1 %v695_v59  ;;  %v4499_v57 = vld [vmem:[%s4605_s25 + $0xbf0] ss:$8 sps:$4 sm:$0xff]   ;;  %v4506_v58 = vld [vmem:[%s4605_s25 + $0xc04] ss:$8 sps:$4 sm:$0xff]   ;;  %v4504_v59 = vld [vmem:[%s4605_s25 + $0xc00] ss:$8 sps:$4 sm:$0xff]  }
 0x15d   : > { %3262 = vmatprep.mubr.bf16.mxu0 %v746_v60  ;;  %v4509_v60 = vld [vmem:[%s4605_s25 + $0xc14] ss:$8 sps:$4 sm:$0xff]  }
 0x15e   : > { %2987 = vmatpush1.bf16.msra.mxu1 %v4412_v50  ;;  %v4507_v50 = vld [vmem:[%s4605_s25 + $0xc10] ss:$8 sps:$4 sm:$0xff]  }
 0x15f   : > { %3233 = vmatpush1.bf16.msra.mxu0 %v4415_v61  ;;  %2988 = vmatprep.subr.bf16.mxu1 %v4420_v62  ;;  %v4554_v61 = vmov 0   ;;  %v4512_v62 = vld [vmem:[%s4605_s25 + $0xc24] ss:$8 sps:$4 sm:$0xff]  }
 0x160   : > { %3234 = vmatprep.subr.bf16.mxu0 %v4423_v63  ;;  %v4510_v63 = vld [vmem:[%s4605_s25 + $0xc20] ss:$8 sps:$4 sm:$0xff]  }
 0x162   : > { %2989 = vmatpush1.bf16.msra.mxu1 %v4418_v46  ;;  %v4515_v46 = vld [vmem:[%s4605_s25 + $0xc34] ss:$8 sps:$4 sm:$0xff]  }
 0x163   : > { %3235 = vmatpush1.bf16.msra.mxu0 %v4421_v47  ;;  %2990 = vmatprep.subr.bf16.mxu1 %v4426_v0  ;;  %v4516_v47 = vld [vmem:[%s4605_s25 + $0xc40] ss:$8 sps:$4 sm:$0xff]   ;;  %v4521_v0 = vld [vmem:[%s4605_s25 + $0xc54] ss:$8 sps:$4 sm:$0xff]  }
 0x164   : > { %3236 = vmatprep.subr.bf16.mxu0 %v4429_v1  ;;  %v4519_v1 = vld [vmem:[%s4605_s25 + $0xc50] ss:$8 sps:$4 sm:$0xff]  }
 0x166   : > { %2991 = vmatpush1.bf16.msra.mxu1 %v4424_v2  ;;  %v4524_v2 = vld [vmem:[%s4605_s25 + $0xc64] ss:$8 sps:$4 sm:$0xff]  }
 0x167   : > { %3237 = vmatpush1.bf16.msra.mxu0 %v4427_v3  ;;  %2992 = vmatprep.subr.bf16.mxu1 %v4432_v4  ;;  %v4522_v3 = vld [vmem:[%s4605_s25 + $0xc60] ss:$8 sps:$4 sm:$0xff]   ;;  %v4527_v4 = vld [vmem:[%s4605_s25 + $0xc74] ss:$8 sps:$4 sm:$0xff]  }
 0x168   : > { %3238 = vmatprep.subr.bf16.mxu0 %v4435_v5  ;;  %v4525_v5 = vld [vmem:[%s4605_s25 + $0xc70] ss:$8 sps:$4 sm:$0xff]  }
 0x16a   : > { %2993 = vmatpush1.bf16.msra.mxu1 %v4430_v6  ;;  %v3441_v6 = vld.sshfl [vmem:[%s4600_s21 + $0x30] sm:$0x3 pattern:$0x76325410] }
 0x16b   : > { %3239 = vmatpush1.bf16.msra.mxu0 %v4433_v7  ;;  %2994 = vmatprep.subr.bf16.mxu1 %v4438_v8 }
 0x16c   : > { %3240 = vmatprep.subr.bf16.mxu0 %v4441_v9 }
 0x16e   : > { %2995 = vmatpush1.bf16.msra.mxu1 %v4436_v10 }
 0x16f   : > { %3241 = vmatpush1.bf16.msra.mxu0 %v4439_v11  ;;  %2996 = vmatprep.subr.bf16.mxu1 %v4444_v12 }
 0x170   : > { %3242 = vmatprep.subr.bf16.mxu0 %v4447_v13 }
 0x172   : > { %2997 = vmatpush1.bf16.msra.mxu1 %v4442_v14 }
 0x173   : > { %3243 = vmatpush1.bf16.msra.mxu0 %v4445_v15  ;;  %2998 = vmatprep.subr.bf16.mxu1 %v4450_v16  ;;  %v230_v16 = vld [vmem:[#allocation2] sm:$0xff] }
 0x174   : > { %3244 = vmatprep.subr.bf16.mxu0 %v4453_v19 }
 0x176   : > { %2999 = vmatpush1.bf16.msra.mxu1 %v4448_v20 }
 0x177   : > { %3245 = vmatpush1.bf16.msra.mxu0 %v4451_v21  ;;  %3000 = vmatprep.subr.bf16.mxu1 %v4456_v22  ;;  %v3323_v22 = vld [vmem:[%s5122_s2] sm:$0x3] (!%p3842_p7) }
 0x178   : > { %3246 = vmatprep.subr.bf16.mxu0 %v4459_v23  ;;  %v3327_v23 = vsub.s32 (!%p3842_p7), 0, %v4647_v44 }
 0x17a   : > { %3001 = vmatpush1.bf16.msra.mxu1 %v4454_v24  ;;  %v3331_v24 = vsub.s32 (!%p3842_p7), 1, %v4647_v44 }
 0x17b   : > { %3247 = vmatpush1.bf16.msra.mxu0 %v4457_v25  ;;  %3002 = vmatprep.subr.bf16.mxu1 %v4462_v26  ;;  %v3328_v25 = vrot.slane (!%p3842_p7), %v3323_v22, %v3327_v23 }
 0x17c   : > { %3248 = vmatprep.subr.bf16.mxu0 %v4465_v27  ;;  %v3332_v26 = vrot.slane (!%p3842_p7), %v3323_v22, %v3331_v24 }
 0x17e   : > { %3003 = vmatpush1.bf16.msra.mxu1 %v4460_v29  ;;  %v3333_v29 = vcombine.low (!%p3842_p7), %v3328_v25, %v3332_v26 }
 0x17f   : > { %3249 = vmatpush1.bf16.msra.mxu0 %v4463_v32  ;;  %3004 = vmatprep.subr.bf16.mxu1 %v4468_v33 }
 0x180   : > { %3250 = vmatprep.subr.bf16.mxu0 %v4471_v34 }
 0x182   : > { %3005 = vmatpush1.bf16.msra.mxu1 %v4466_v36 }
 0x183   : > { %3251 = vmatpush1.bf16.msra.mxu0 %v4469_v17  ;;  %3006 = vmatprep.subr.bf16.mxu1 %v4474_v18 }
 0x184   : > { %3252 = vmatprep.subr.bf16.mxu0 %v4477_v38 }
 0x186   : > { %3007 = vmatpush1.bf16.msra.mxu1 %v4472_v31 }
 0x187   : > { %3253 = vmatpush1.bf16.msra.mxu0 %v4475_v41  ;;  %3008 = vmatprep.subr.bf16.mxu1 %v4480_v42 }
 0x188   : > { %3254 = vmatprep.subr.bf16.mxu0 %v4483_v43 }
 0x18a   : > { %3009 = vmatpush1.bf16.msra.mxu1 %v4478_v45 }
 0x18b   : > { %3255 = vmatpush1.bf16.msra.mxu0 %v4481_v48  ;;  %3010 = vmatprep.subr.bf16.mxu1 %v4486_v30 }
 0x18c   : > { %3256 = vmatprep.subr.bf16.mxu0 %v4489_v35 }
 0x18e   : > { %3011 = vmatpush1.bf16.msra.mxu1 %v4484_v49 }
 0x18f   : > { %3257 = vmatpush1.bf16.msra.mxu0 %v4487_v51  ;;  %3012 = vmatprep.subr.bf16.mxu1 %v4492_v52 }
 0x190   : > { %3258 = vmatprep.subr.bf16.mxu0 %v4495_v53 }
 0x192   : > { %3013 = vmatpush1.bf16.msra.mxu1 %v4490_v54 }
 0x193   : > { %3259 = vmatpush1.bf16.msra.mxu0 %v4493_v55  ;;  %3014 = vmatprep.subr.bf16.mxu1 %v4498_v56 }
 0x194   : > { %3260 = vmatprep.subr.bf16.mxu0 %v4501_v39 }
 0x196   : > { %3015 = vmatpush1.bf16.msra.mxu1 %v4496_v40 }
 0x197   : > { %3261 = vmatpush1.bf16.msra.mxu0 %v4499_v57 }
 0x198   : > { %3271 = vmatprep.subr.bf16.mxu0 %v4506_v58 }
 0x199   : > { %3017 = vmatmul.mubr.bf16.vlgmr.msra.gmra.mrb[0].mxu1 %v5010_v37  ;;  %v4513_v37 = vld [vmem:[%s4605_s25 + $0xc30] ss:$8 sps:$4 sm:$0xff]  }
 0x19a   : > { %3263 = vmatmul.mubr.bf16.vlgmr.msra.gmra.mrb[0].mxu0 %v5013_v28  ;;  %v4518_v28 = vld [vmem:[%s4605_s25 + $0xc44] ss:$8 sps:$4 sm:$0xff]  }
 0x19b   : > { %3272 = vmatpush1.bf16.msra.mxu0 %v4504_v59  ;;  %3303 = vmatprep.mubr.bf16.mxu0 %v4554_v61 }
 0x19c   : > { %3273 = vmatprep.subr.bf16.mxu0 %v4509_v60 }
 0x19f   : > { %3274 = vmatpush1.bf16.msra.mxu0 %v4507_v50 }
 0x1a0   : > { %3275 = vmatprep.subr.bf16.mxu0 %v4512_v62 }
 0x1a3   : > { %3276 = vmatpush1.bf16.msra.mxu0 %v4510_v63 }
 0x1a4   : > { %3277 = vmatprep.subr.bf16.mxu0 %v4515_v46 }
 0x1a7   : > { %3278 = vmatpush1.bf16.msra.mxu0 %v4513_v37 }
 0x1a8   : > { %3279 = vmatprep.subr.bf16.mxu0 %v4518_v28 }
 0x1ab   : > { %3280 = vmatpush1.bf16.msra.mxu0 %v4516_v47 }
 0x1ac   : > { %3281 = vmatprep.subr.bf16.mxu0 %v4521_v0 }
 0x1af   : > { %3282 = vmatpush1.bf16.msra.mxu0 %v4519_v1 }
 0x1b0   : > { %3283 = vmatprep.subr.bf16.mxu0 %v4524_v2 }
 0x1b3   : > { %3284 = vmatpush1.bf16.msra.mxu0 %v4522_v3 }
 0x1b4   : > { %3285 = vmatprep.subr.bf16.mxu0 %v4527_v4 }
 0x1b7   : > { %3286 = vmatpush1.bf16.msra.mxu0 %v4525_v5 }
 0x1ba   : > { %3304 = vmatmul.mubr.bf16.vlgmr.msra.gmra.mrb[0].mxu0 %v3441_v6 }
 0x26c   : > { %v3018_v7 = vpop.f32.mrb[0].mxu1 }
 0x26d   : > { %v3020_v8 = vpop.f32.mrb[1].mxu1 }
 0x26e   : > { %v3022_v9 = vpop.f32.mrb[2].mxu1 }
 0x26f   : > { %v3023_v10 = vpop.f32.mrb[3].mxu1 }
 0x28d   : > { %v3305_v11 = vpop.f32.mrb[0].mxu0 }
 0x28e   : > { %v3849_v12 = vadd.f32 %v3305_v11, %v3018_v7  ;;  %v3307_v13 = vpop.f32.mrb[1].mxu0 }
 0x28f   : > { %v3850_v14 = vadd.f32 %v3307_v13, %v3020_v8  ;;  %v3309_v15 = vpop.f32.mrb[2].mxu0  ;;  %3321 = sbr.rel (%p3842_p7) target bundleno = 678 (0x2a6), region = 40 }
 0x290   : > { %v3310_v19 = vpop.f32.mrb[3].mxu0 }
 0x291   : > { %v3314_v20 = vcombine.low %v3849_v12, %v3850_v14 }
 0x293   : > { %v3316_v21 = vadd.f32 %v3314_v20, %v230_v16 }
 0x295   : > { %3317 = vst [vmem:[#allocation2] sm:$0xff] %v3316_v21 }
 0x29c   : > { %v3322_v27 = vld [vmem:[#allocation2] sm:$0xff] }
 0x29d   : > { %v3335_v32 = vadd.f32 %v3333_v29, %v3322_v27 }
 0x29f   : > { %v3336_v33 = vmax.f32 %v3335_v32, 0.0 }
 0x2a1   : > { %v3338_v34 = vcombine.high %v3336_v33, %v3336_v33 }
 0x2a3   : > { %v3843_v36 = vpack.c.bf16 %v3338_v34, %v3336_v33 }
 0x2a5   : > { %3844 = vst.sshfl [vmem:[%s5123_s3] sm:$0x33 pattern:$0x76325410] %v3843_v36 }
 0x2a6 PF: > { %s13_s14 = sadd.s32 1, %s4550_s14   ;;  %s5124_s12 = smov %s4546_s13 }
 0x2a7   : > { %p10_p8 = scmp.ge.s32.totalorder %s13_s14, 11   ;;  %s5125_s13 = smov %s5127_s15 }
 0x2a9   :  { %12 = sbr.rel (!%p10_p8) target bundleno = 2 (0x2), region = 73 }

// kernel: icm_forward.11
= control target key start
LH: loop header
LB: loop body
LE: loop exit
PB: predicated region body
PF: predicated region fallthrough
CT: control target
= control target key end

     0   :  { %v2104_v2 = vmov 0   ;;  %v127_v21 = vlaneseq  ;;  %v2105_v22 = vmov 1966171168   ;;  %s2782_s0 = inlined_call_operand.vmem [shape: bf16[2,384], index: 0, kind: input, shape index: {}]   ;;  %s2783_s1 = inlined_call_operand.vmem [shape: bf16[384,512], index: 1, kind: input, shape index: {}]   ;;  %s2784_s2 = inlined_call_operand.vmem [shape: f32[1,512], index: 2, kind: input, shape index: {}]   ;;  %s2785_s3 = inlined_call_operand.vmem [shape: bf16[512,256], index: 3, kind: input, shape index: {}]   ;;  %s2786_s4 = inlined_call_operand.vmem [shape: f32[1,256], index: 4, kind: input, shape index: {}]   ;;  %s2787_s5 = inlined_call_operand.vmem [shape: bf16[256,256], index: 5, kind: input, shape index: {}]   ;;  %s2788_s6 = inlined_call_operand.vmem [shape: f32[1,256], index: 6, kind: input, shape index: {}]   ;;  %s2789_s7 = inlined_call_operand.hbm [shape: f32[2,256], index: 7, kind: output, shape index: {}]  }
   0x1   :  { %v1792_v0 = vld [vmem:[%s2783_s1 + $0x4] ss:$16 sps:$4 sm:$0xff]   ;;  %727 = vmatprep.mubr.bf16.mxu1 %v2104_v2  ;;  %v1796_v3 = vld [vmem:[%s2783_s1] ss:$16 sps:$4 sm:$0xff]   ;;  %v157_v23 = vunpack.c.l.s4 %v2105_v22  ;;  %v1844_v44 = vld [vmem:[%s2783_s1 + $0xc] ss:$16 sps:$4 sm:$0xff]  }
   0x2   :  { %v1794_v1 = vld [vmem:[%s2783_s1 + $0x204] ss:$16 sps:$4 sm:$0xff]   ;;  %654 = vmatprep.subr.bf16.mxu0 %v1792_v0  ;;  %v1797_v4 = vld [vmem:[%s2783_s1 + $0x200] ss:$16 sps:$4 sm:$0xff]   ;;  %v2217_v27 = vshrl.u32 %v127_v21, 7 }
   0x3   :  { %695 = vmatprep.subr.bf16.mxu1 %v1794_v1  ;;  %v1798_v5 = vld [vmem:[%s2783_s1 + $0x24] ss:$16 sps:$4 sm:$0xff]   ;;  %655 = vmatpush1.bf16.msra.mxu0 %v1796_v3  ;;  %v1802_v7 = vld [vmem:[%s2783_s1 + $0x20] ss:$16 sps:$4 sm:$0xff]   ;;  %v158_v28 = vunpack.c.0.s8 %v157_v23  ;;  %v1842_v46 = vld [vmem:[%s2783_s1 + $0x8] ss:$16 sps:$4 sm:$0xff]  }
   0x4   :  { %696 = vmatpush1.bf16.msra.mxu1 %v1797_v4  ;;  %v1800_v6 = vld [vmem:[%s2783_s1 + $0x224] ss:$16 sps:$4 sm:$0xff]   ;;  %656 = vmatprep.subr.bf16.mxu0 %v1798_v5  ;;  %v1803_v8 = vld [vmem:[%s2783_s1 + $0x220] ss:$16 sps:$4 sm:$0xff]   ;;  %v1850_v49 = vld [vmem:[%s2783_s1 + $0x2c] ss:$16 sps:$4 sm:$0xff]  }
   0x5   :  { %697 = vmatprep.subr.bf16.mxu1 %v1800_v6  ;;  %v1804_v9 = vld [vmem:[%s2783_s1 + $0x44] ss:$16 sps:$4 sm:$0xff]   ;;  %v1808_v11 = vld [vmem:[%s2783_s1 + $0x40] ss:$16 sps:$4 sm:$0xff]   ;;  %v161_v34 = vsub.s32 %v158_v28, %v2217_v27  ;;  %v1848_v50 = vld [vmem:[%s2783_s1 + $0x28] ss:$16 sps:$4 sm:$0xff]  }
   0x6   :  { %v1806_v10 = vld [vmem:[%s2783_s1 + $0x244] ss:$16 sps:$4 sm:$0xff]   ;;  %v1809_v12 = vld [vmem:[%s2783_s1 + $0x240] ss:$16 sps:$4 sm:$0xff]   ;;  %v1856_v53 = vld [vmem:[%s2783_s1 + $0x4c] ss:$16 sps:$4 sm:$0xff]  }
   0x7   :  { %657 = vmatpush1.bf16.msra.mxu0 %v1802_v7  ;;  %v1810_v13 = vld [vmem:[%s2783_s1 + $0x64] ss:$16 sps:$4 sm:$0xff]   ;;  %v1814_v15 = vld [vmem:[%s2783_s1 + $0x60] ss:$16 sps:$4 sm:$0xff]   ;;  %v1854_v54 = vld [vmem:[%s2783_s1 + $0x48] ss:$16 sps:$4 sm:$0xff]  }
   0x8   :  { %698 = vmatpush1.bf16.msra.mxu1 %v1803_v8  ;;  %658 = vmatprep.subr.bf16.mxu0 %v1804_v9  ;;  %v1812_v14 = vld [vmem:[%s2783_s1 + $0x264] ss:$16 sps:$4 sm:$0xff]   ;;  %v1815_v16 = vld [vmem:[%s2783_s1 + $0x260] ss:$16 sps:$4 sm:$0xff]   ;;  %v1862_v57 = vld [vmem:[%s2783_s1 + $0x6c] ss:$16 sps:$4 sm:$0xff]  }
   0x9   :  { %699 = vmatprep.subr.bf16.mxu1 %v1806_v10  ;;  %v1816_v17 = vld [vmem:[%s2783_s1 + $0x84] ss:$16 sps:$4 sm:$0xff]   ;;  %v1820_v19 = vld [vmem:[%s2783_s1 + $0x80] ss:$16 sps:$4 sm:$0xff]   ;;  %v1860_v58 = vld [vmem:[%s2783_s1 + $0x68] ss:$16 sps:$4 sm:$0xff]  }
   0xa   :  { %v1818_v18 = vld [vmem:[%s2783_s1 + $0x284] ss:$16 sps:$4 sm:$0xff]   ;;  %v1821_v20 = vld [vmem:[%s2783_s1 + $0x280] ss:$16 sps:$4 sm:$0xff]   ;;  %v1868_v61 = vld [vmem:[%s2783_s1 + $0x8c] ss:$16 sps:$4 sm:$0xff]  }
   0xb   :  { %659 = vmatpush1.bf16.msra.mxu0 %v1808_v11  ;;  %v1822_v24 = vld [vmem:[%s2783_s1 + $0xa4] ss:$16 sps:$4 sm:$0xff]   ;;  %v1826_v26 = vld [vmem:[%s2783_s1 + $0xa0] ss:$16 sps:$4 sm:$0xff]   ;;  %v1866_v62 = vld [vmem:[%s2783_s1 + $0x88] ss:$16 sps:$4 sm:$0xff]  }
   0xc   :  { %700 = vmatpush1.bf16.msra.mxu1 %v1809_v12  ;;  %660 = vmatprep.subr.bf16.mxu0 %v1810_v13  ;;  %v1824_v25 = vld [vmem:[%s2783_s1 + $0x2a4] ss:$16 sps:$4 sm:$0xff]   ;;  %v1827_v29 = vld [vmem:[%s2783_s1 + $0x2a0] ss:$16 sps:$4 sm:$0xff]   ;;  %v1874_v1 = vld [vmem:[%s2783_s1 + $0xac] ss:$16 sps:$4 sm:$0xff]  }
   0xd   :  { %701 = vmatprep.subr.bf16.mxu1 %v1812_v14  ;;  %v1828_v30 = vld [vmem:[%s2783_s1 + $0xc4] ss:$16 sps:$4 sm:$0xff]   ;;  %v1579_v32 = vld.sshfl [vmem:[%s2782_s0] sm:$0x13 pattern:$0x75316420] }
   0xe   :  { %v1830_v31 = vld [vmem:[%s2783_s1 + $0x2c4] ss:$16 sps:$4 sm:$0xff]   ;;  %v1832_v33 = vld [vmem:[%s2783_s1 + $0xc0] ss:$16 sps:$4 sm:$0xff]   ;;  %v155_v35 = vcombine.high %v1579_v32, %v1579_v32  ;;  %v2247_v41 = vrot.slane %v1579_v32, %v161_v34  ;;  %v1872_v3 = vld [vmem:[%s2783_s1 + $0xa8] ss:$16 sps:$4 sm:$0xff]  }
   0xf   :  { %661 = vmatpush1.bf16.msra.mxu0 %v1814_v15  ;;  %v1833_v36 = vld [vmem:[%s2783_s1 + $0x2c0] ss:$16 sps:$4 sm:$0xff]   ;;  %v1834_v37 = vld [vmem:[%s2783_s1 + $0xe4] ss:$16 sps:$4 sm:$0xff]   ;;  %v1880_v6 = vld [vmem:[%s2783_s1 + $0xcc] ss:$16 sps:$4 sm:$0xff]  }
  0x10   :  { %702 = vmatpush1.bf16.msra.mxu1 %v1815_v16  ;;  %662 = vmatprep.subr.bf16.mxu0 %v1816_v17  ;;  %v1836_v38 = vld [vmem:[%s2783_s1 + $0x2e4] ss:$16 sps:$4 sm:$0xff]   ;;  %v169_v39 = vrot.slane %v155_v35, %v161_v34  ;;  %v1838_v40 = vld [vmem:[%s2783_s1 + $0xe0] ss:$16 sps:$4 sm:$0xff]   ;;  %v2260_v45 = vcombine.high %v2247_v41, %v2247_v41  ;;  %v1878_v7 = vld [vmem:[%s2783_s1 + $0xc8] ss:$16 sps:$4 sm:$0xff]  }
  0x11   :  { %703 = vmatprep.subr.bf16.mxu1 %v1818_v18  ;;  %v1839_v42 = vld [vmem:[%s2783_s1 + $0x2e0] ss:$16 sps:$4 sm:$0xff]   ;;  %v1840_v43 = vld [vmem:[%s2783_s1 + $0x104] ss:$16 sps:$4 sm:$0xff]   ;;  %v1886_v10 = vld [vmem:[%s2783_s1 + $0xec] ss:$16 sps:$4 sm:$0xff]  }
  0x12   :  { %686 = vmatprep.mubr.bf16.mxu0 %v169_v39  ;;  %v1845_v47 = vld [vmem:[%s2783_s1 + $0x100] ss:$16 sps:$4 sm:$0xff]   ;;  %v1846_v48 = vld [vmem:[%s2783_s1 + $0x124] ss:$16 sps:$4 sm:$0xff]   ;;  %v1884_v11 = vld [vmem:[%s2783_s1 + $0xe8] ss:$16 sps:$4 sm:$0xff]  }
  0x13   :  { %663 = vmatpush1.bf16.msra.mxu0 %v1820_v19  ;;  %v1851_v51 = vld [vmem:[%s2783_s1 + $0x120] ss:$16 sps:$4 sm:$0xff]   ;;  %v1852_v52 = vld [vmem:[%s2783_s1 + $0x144] ss:$16 sps:$4 sm:$0xff]   ;;  %v1890_v13 = vld [vmem:[%s2783_s1 + $0x10c] ss:$16 sps:$4 sm:$0xff]  }
  0x14   :  { %704 = vmatpush1.bf16.msra.mxu1 %v1821_v20  ;;  %664 = vmatprep.subr.bf16.mxu0 %v1822_v24  ;;  %v1857_v55 = vld [vmem:[%s2783_s1 + $0x140] ss:$16 sps:$4 sm:$0xff]   ;;  %v1858_v56 = vld [vmem:[%s2783_s1 + $0x164] ss:$16 sps:$4 sm:$0xff]   ;;  %v1888_v14 = vld [vmem:[%s2783_s1 + $0x108] ss:$16 sps:$4 sm:$0xff]  }
  0x15   :  { %705 = vmatprep.subr.bf16.mxu1 %v1824_v25  ;;  %v1863_v59 = vld [vmem:[%s2783_s1 + $0x160] ss:$16 sps:$4 sm:$0xff]   ;;  %v1864_v60 = vld [vmem:[%s2783_s1 + $0x184] ss:$16 sps:$4 sm:$0xff]   ;;  %v1893_v15 = vld [vmem:[%s2783_s1 + $0x12c] ss:$16 sps:$4 sm:$0xff]  }
  0x16   :  { %v1869_v63 = vld [vmem:[%s2783_s1 + $0x180] ss:$16 sps:$4 sm:$0xff]   ;;  %v1870_v0 = vld [vmem:[%s2783_s1 + $0x1a4] ss:$16 sps:$4 sm:$0xff]   ;;  %v1891_v19 = vld [vmem:[%s2783_s1 + $0x128] ss:$16 sps:$4 sm:$0xff]  }
  0x17   :  { %665 = vmatpush1.bf16.msra.mxu0 %v1826_v26  ;;  %v1875_v4 = vld [vmem:[%s2783_s1 + $0x1a0] ss:$16 sps:$4 sm:$0xff]   ;;  %v1876_v5 = vld [vmem:[%s2783_s1 + $0x1c4] ss:$16 sps:$4 sm:$0xff]   ;;  %v1896_v21 = vld [vmem:[%s2783_s1 + $0x14c] ss:$16 sps:$4 sm:$0xff]  }
  0x18   :  { %706 = vmatpush1.bf16.msra.mxu1 %v1827_v29  ;;  %666 = vmatprep.subr.bf16.mxu0 %v1828_v30  ;;  %v1881_v8 = vld [vmem:[%s2783_s1 + $0x1c0] ss:$16 sps:$4 sm:$0xff]   ;;  %v1882_v9 = vld [vmem:[%s2783_s1 + $0x1e4] ss:$16 sps:$4 sm:$0xff]   ;;  %v1894_v23 = vld [vmem:[%s2783_s1 + $0x148] ss:$16 sps:$4 sm:$0xff]  }
  0x19   :  { %707 = vmatprep.subr.bf16.mxu1 %v1830_v31  ;;  %v1887_v12 = vld [vmem:[%s2783_s1 + $0x1e0] ss:$16 sps:$4 sm:$0xff]   ;;  %v1938_v17 = vld [vmem:[%s2785_s3 + $0x4] ss:$8 sps:$4 sm:$0xff]   ;;  %v1941_v18 = vld [vmem:[%s2785_s3 + $0x14] ss:$8 sps:$4 sm:$0xff]  }
  0x1a   :  { %v1936_v16 = vld [vmem:[%s2785_s3] ss:$8 sps:$4 sm:$0xff]   ;;  %v1939_v20 = vld [vmem:[%s2785_s3 + $0x10] ss:$8 sps:$4 sm:$0xff]   ;;  %v1944_v22 = vld [vmem:[%s2785_s3 + $0x24] ss:$8 sps:$4 sm:$0xff]  }
  0x1b   :  { %667 = vmatpush1.bf16.msra.mxu0 %v1832_v33  ;;  %v1899_v24 = vld [vmem:[%s2783_s1 + $0x16c] ss:$16 sps:$4 sm:$0xff]   ;;  %v1942_v25 = vld [vmem:[%s2785_s3 + $0x20] ss:$8 sps:$4 sm:$0xff]   ;;  %v1945_v29 = vld [vmem:[%s2785_s3 + $0x30] ss:$8 sps:$4 sm:$0xff]  }
  0x1c   :  { %708 = vmatpush1.bf16.msra.mxu1 %v1833_v36  ;;  %668 = vmatprep.subr.bf16.mxu0 %v1834_v37  ;;  %v1947_v26 = vld [vmem:[%s2785_s3 + $0x34] ss:$8 sps:$4 sm:$0xff]   ;;  %v1897_v28 = vld [vmem:[%s2783_s1 + $0x168] ss:$16 sps:$4 sm:$0xff]   ;;  %v1950_v31 = vld [vmem:[%s2785_s3 + $0x44] ss:$8 sps:$4 sm:$0xff]  }
  0x1d   :  { %709 = vmatprep.subr.bf16.mxu1 %v1836_v38  ;;  %v1902_v30 = vld [vmem:[%s2783_s1 + $0x18c] ss:$16 sps:$4 sm:$0xff]   ;;  %v1900_v32 = vld [vmem:[%s2783_s1 + $0x188] ss:$16 sps:$4 sm:$0xff]  }
  0x1e   :  { %v1948_v33 = vld [vmem:[%s2785_s3 + $0x40] ss:$8 sps:$4 sm:$0xff]   ;;  %v1905_v34 = vld [vmem:[%s2783_s1 + $0x1ac] ss:$16 sps:$4 sm:$0xff]   ;;  %v1951_v37 = vld [vmem:[%s2785_s3 + $0x50] ss:$8 sps:$4 sm:$0xff]  }
  0x1f   :  { %669 = vmatpush1.bf16.msra.mxu0 %v1838_v40  ;;  %v1953_v35 = vld [vmem:[%s2785_s3 + $0x54] ss:$8 sps:$4 sm:$0xff]   ;;  %v1903_v36 = vld [vmem:[%s2783_s1 + $0x1a8] ss:$16 sps:$4 sm:$0xff]  }
  0x20   :  { %710 = vmatpush1.bf16.msra.mxu1 %v1839_v42  ;;  %670 = vmatprep.subr.bf16.mxu0 %v1840_v43  ;;  %v1908_v38 = vld [vmem:[%s2783_s1 + $0x1cc] ss:$16 sps:$4 sm:$0xff]   ;;  %v1909_v42 = vld [vmem:[%s2783_s1 + $0x1e8] ss:$16 sps:$4 sm:$0xff]  }
  0x21   :  { %736 = vmatprep.subr.bf16.mxu1 %v1844_v44  ;;  %v1911_v40 = vld [vmem:[%s2783_s1 + $0x1ec] ss:$16 sps:$4 sm:$0xff]   ;;  %v1912_v44 = vld [vmem:[%s2783_s1 + $0x208] ss:$16 sps:$4 sm:$0xff]  }
  0x22   :  { %v1914_v43 = vld [vmem:[%s2783_s1 + $0x20c] ss:$16 sps:$4 sm:$0xff]  }
  0x23   :  { %728 = vmatmul.mubr.bf16.vlgmr.msra.gmra.mrb[0].mxu1 %v2260_v45  ;;  %671 = vmatpush1.bf16.msra.mxu0 %v1845_v47  ;;  %v1915_v47 = vld [vmem:[%s2783_s1 + $0x228] ss:$16 sps:$4 sm:$0xff]  }
  0x24   :  { %737 = vmatpush1.bf16.msra.mxu1 %v1842_v46  ;;  %672 = vmatprep.subr.bf16.mxu0 %v1846_v48  ;;  %v1917_v46 = vld [vmem:[%s2783_s1 + $0x22c] ss:$16 sps:$4 sm:$0xff]  }
  0x25   :  { %738 = vmatprep.subr.bf16.mxu1 %v1850_v49  ;;  %768 = vmatprep.mubr.bf16.mxu1 %v169_v39  ;;  %v1906_v39 = vld [vmem:[%s2783_s1 + $0x1c8] ss:$16 sps:$4 sm:$0xff]  }
  0x27   :  { %673 = vmatpush1.bf16.msra.mxu0 %v1851_v51 }
  0x28   :  { %739 = vmatpush1.bf16.msra.mxu1 %v1848_v50  ;;  %674 = vmatprep.subr.bf16.mxu0 %v1852_v52 }
  0x29   :  { %740 = vmatprep.subr.bf16.mxu1 %v1856_v53 }
  0x2b   :  { %675 = vmatpush1.bf16.msra.mxu0 %v1857_v55 }
  0x2c   :  { %741 = vmatpush1.bf16.msra.mxu1 %v1854_v54  ;;  %676 = vmatprep.subr.bf16.mxu0 %v1858_v56 }
  0x2d   :  { %742 = vmatprep.subr.bf16.mxu1 %v1862_v57 }
  0x2f   :  { %677 = vmatpush1.bf16.msra.mxu0 %v1863_v59 }
  0x30   :  { %743 = vmatpush1.bf16.msra.mxu1 %v1860_v58  ;;  %678 = vmatprep.subr.bf16.mxu0 %v1864_v60 }
  0x31   :  { %744 = vmatprep.subr.bf16.mxu1 %v1868_v61 }
  0x33   :  { %679 = vmatpush1.bf16.msra.mxu0 %v1869_v63 }
  0x34   :  { %745 = vmatpush1.bf16.msra.mxu1 %v1866_v62  ;;  %680 = vmatprep.subr.bf16.mxu0 %v1870_v0 }
  0x35   :  { %746 = vmatprep.subr.bf16.mxu1 %v1874_v1 }
  0x37   :  { %681 = vmatpush1.bf16.msra.mxu0 %v1875_v4 }
  0x38   :  { %747 = vmatpush1.bf16.msra.mxu1 %v1872_v3  ;;  %682 = vmatprep.subr.bf16.mxu0 %v1876_v5 }
  0x39   :  { %748 = vmatprep.subr.bf16.mxu1 %v1880_v6 }
  0x3b   :  { %683 = vmatpush1.bf16.msra.mxu0 %v1881_v8 }
  0x3c   :  { %749 = vmatpush1.bf16.msra.mxu1 %v1878_v7  ;;  %684 = vmatprep.subr.bf16.mxu0 %v1882_v9 }
  0x3d   :  { %750 = vmatprep.subr.bf16.mxu1 %v1886_v10 }
  0x3f   :  { %685 = vmatpush1.bf16.msra.mxu0 %v1887_v12 }
  0x40   :  { %751 = vmatpush1.bf16.msra.mxu1 %v1884_v11  ;;  %1222 = vmatprep.subr.bf16.mxu0 %v1938_v17 }
  0x41   :  { %752 = vmatprep.subr.bf16.mxu1 %v1890_v13 }
  0x42   :  { %687 = vmatmul.mubr.bf16.vlgmr.msra.gmra.mrb[0].mxu0 %v2247_v41 }
  0x43   :  { %1223 = vmatpush1.bf16.msra.mxu0 %v1936_v16 }
  0x44   :  { %753 = vmatpush1.bf16.msra.mxu1 %v1888_v14  ;;  %1224 = vmatprep.subr.bf16.mxu0 %v1941_v18 }
  0x45   :  { %754 = vmatprep.subr.bf16.mxu1 %v1893_v15 }
  0x47   :  { %1225 = vmatpush1.bf16.msra.mxu0 %v1939_v20 }
  0x48   :  { %755 = vmatpush1.bf16.msra.mxu1 %v1891_v19  ;;  %1226 = vmatprep.subr.bf16.mxu0 %v1944_v22 }
  0x49   :  { %756 = vmatprep.subr.bf16.mxu1 %v1896_v21 }
  0x4b   :  { %1227 = vmatpush1.bf16.msra.mxu0 %v1942_v25 }
  0x4c   :  { %757 = vmatpush1.bf16.msra.mxu1 %v1894_v23  ;;  %1228 = vmatprep.subr.bf16.mxu0 %v1947_v26 }
  0x4d   :  { %758 = vmatprep.subr.bf16.mxu1 %v1899_v24 }
  0x4f   :  { %1229 = vmatpush1.bf16.msra.mxu0 %v1945_v29 }
  0x50   :  { %759 = vmatpush1.bf16.msra.mxu1 %v1897_v28  ;;  %1230 = vmatprep.subr.bf16.mxu0 %v1950_v31 }
  0x51   :  { %760 = vmatprep.subr.bf16.mxu1 %v1902_v30 }
  0x53   :  { %1231 = vmatpush1.bf16.msra.mxu0 %v1948_v33 }
  0x54   :  { %761 = vmatpush1.bf16.msra.mxu1 %v1900_v32  ;;  %1232 = vmatprep.subr.bf16.mxu0 %v1953_v35 }
  0x55   :  { %762 = vmatprep.subr.bf16.mxu1 %v1905_v34 }
  0x57   :  { %1233 = vmatpush1.bf16.msra.mxu0 %v1951_v37 }
  0x58   :  { %763 = vmatpush1.bf16.msra.mxu1 %v1903_v36 }
  0x59   :  { %764 = vmatprep.subr.bf16.mxu1 %v1908_v38 }
  0x5c   :  { %765 = vmatpush1.bf16.msra.mxu1 %v1906_v39 }
  0x5d   :  { %766 = vmatprep.subr.bf16.mxu1 %v1911_v40 }
  0x60   :  { %767 = vmatpush1.bf16.msra.mxu1 %v1909_v42 }
  0x61   :  { %777 = vmatprep.subr.bf16.mxu1 %v1914_v43 }
  0x63   :  { %769 = vmatmul.mubr.bf16.vlgmr.msra.gmra.mrb[4].mxu1 %v2247_v41 }
  0x64   :  { %778 = vmatpush1.bf16.msra.mxu1 %v1912_v44  ;;  %809 = vmatprep.mubr.bf16.mxu1 %v2104_v2 }
  0x65   :  { %12 = vsyncpa [#allocation3], 0  ;;  %779 = vmatprep.subr.bf16.mxu1 %v1917_v46  ;;  %v1920_v48 = vld [vmem:[%s2783_s1 + $0x24c] ss:$16 sps:$4 sm:$0xff]   ;;  %v1918_v49 = vld [vmem:[%s2783_s1 + $0x248] ss:$16 sps:$4 sm:$0xff]  }
  0x66   :  { %v1923_v50 = vld [vmem:[%s2783_s1 + $0x26c] ss:$16 sps:$4 sm:$0xff]   ;;  %v1921_v2 = vld [vmem:[%s2783_s1 + $0x268] ss:$16 sps:$4 sm:$0xff]  }
  0x67   :  { %v1926_v41 = vld [vmem:[%s2783_s1 + $0x28c] ss:$16 sps:$4 sm:$0xff]   ;;  %v1924_v51 = vld [vmem:[%s2783_s1 + $0x288] ss:$16 sps:$4 sm:$0xff]  }
  0x68   :  { %780 = vmatpush1.bf16.msra.mxu1 %v1915_v47  ;;  %v1929_v52 = vld [vmem:[%s2783_s1 + $0x2ac] ss:$16 sps:$4 sm:$0xff]   ;;  %v1927_v53 = vld [vmem:[%s2783_s1 + $0x2a8] ss:$16 sps:$4 sm:$0xff]   ;;  %v2628_v47 = vsub.s32 0, %v2217_v27 }
  0x69   :  { %781 = vmatprep.subr.bf16.mxu1 %v1920_v48  ;;  %v1932_v54 = vld [vmem:[%s2783_s1 + $0x2cc] ss:$16 sps:$4 sm:$0xff]   ;;  %v1954_v56 = vld [vmem:[%s2785_s3 + $0x60] ss:$8 sps:$4 sm:$0xff]   ;;  %v1957_v59 = vld [vmem:[%s2785_s3 + $0x70] ss:$8 sps:$4 sm:$0xff]  }
  0x6a   :  { %v1956_v55 = vld [vmem:[%s2785_s3 + $0x64] ss:$8 sps:$4 sm:$0xff]   ;;  %v1930_v57 = vld [vmem:[%s2783_s1 + $0x2c8] ss:$16 sps:$4 sm:$0xff]   ;;  %v1959_v60 = vld [vmem:[%s2785_s3 + $0x74] ss:$8 sps:$4 sm:$0xff]  }
  0x6b   :  { %1234 = vmatprep.subr.bf16.mxu0 %v1956_v55  ;;  %v1935_v58 = vld [vmem:[%s2783_s1 + $0x2ec] ss:$16 sps:$4 sm:$0xff]   ;;  %v1933_v62 = vld [vmem:[%s2783_s1 + $0x2e8] ss:$16 sps:$4 sm:$0xff]   ;;  %v2633_v48 = vld [vmem:[%s2784_s2] sm:$0xf] }
  0x6c   :  { %782 = vmatpush1.bf16.msra.mxu1 %v1918_v49  ;;  %1235 = vmatpush1.bf16.msra.mxu0 %v1954_v56  ;;  %v1962_v61 = vld [vmem:[%s2785_s3 + $0x84] ss:$8 sps:$4 sm:$0xff]   ;;  %v1960_v63 = vld [vmem:[%s2785_s3 + $0x80] ss:$8 sps:$4 sm:$0xff]   ;;  %v1965_v0 = vld [vmem:[%s2785_s3 + $0x94] ss:$8 sps:$4 sm:$0xff]  }
  0x6d   :  { %783 = vmatprep.subr.bf16.mxu1 %v1923_v50  ;;  %1236 = vmatprep.subr.bf16.mxu0 %v1959_v60  ;;  %v1963_v1 = vld [vmem:[%s2785_s3 + $0x90] ss:$8 sps:$4 sm:$0xff]   ;;  %v1968_v3 = vld [vmem:[%s2785_s3 + $0xa4] ss:$8 sps:$4 sm:$0xff]   ;;  %v1966_v4 = vld [vmem:[%s2785_s3 + $0xa0] ss:$8 sps:$4 sm:$0xff]  }
  0x6e   :  { %v1971_v5 = vld [vmem:[%s2785_s3 + $0xb4] ss:$8 sps:$4 sm:$0xff]   ;;  %v1969_v6 = vld [vmem:[%s2785_s3 + $0xb0] ss:$8 sps:$4 sm:$0xff]   ;;  %v1972_v7 = vld [vmem:[%s2785_s3 + $0xc0] ss:$8 sps:$4 sm:$0xff]  }
  0x6f   :  { %v1977_v8 = vld [vmem:[%s2785_s3 + $0xd4] ss:$8 sps:$4 sm:$0xff]   ;;  %v1975_v9 = vld [vmem:[%s2785_s3 + $0xd0] ss:$8 sps:$4 sm:$0xff]   ;;  %v1980_v10 = vld [vmem:[%s2785_s3 + $0xe4] ss:$8 sps:$4 sm:$0xff]  }
  0x70   :  { %784 = vmatpush1.bf16.msra.mxu1 %v1921_v2  ;;  %1237 = vmatpush1.bf16.msra.mxu0 %v1957_v59  ;;  %v1978_v11 = vld [vmem:[%s2785_s3 + $0xe0] ss:$8 sps:$4 sm:$0xff]   ;;  %v1983_v12 = vld [vmem:[%s2785_s3 + $0xf4] ss:$8 sps:$4 sm:$0xff]   ;;  %v1981_v13 = vld [vmem:[%s2785_s3 + $0xf0] ss:$8 sps:$4 sm:$0xff]  }
  0x71   :  { %785 = vmatprep.subr.bf16.mxu1 %v1926_v41  ;;  %1238 = vmatprep.subr.bf16.mxu0 %v1962_v61  ;;  %v1986_v14 = vld [vmem:[%s2785_s3 + $0x104] ss:$8 sps:$4 sm:$0xff]   ;;  %v2032_v15 = vld [vmem:[%s2787_s5] ss:$8 sps:$4 sm:$0xff]   ;;  %v2037_v17 = vld [vmem:[%s2787_s5 + $0x14] ss:$8 sps:$4 sm:$0xff]   ;;  %v130_v41 = vrot.slane %v2633_v48, %v2628_v47 }
  0x72   :  { %v2034_v16 = vld [vmem:[%s2787_s5 + $0x4] ss:$8 sps:$4 sm:$0xff]   ;;  %v2035_v18 = vld [vmem:[%s2787_s5 + $0x10] ss:$8 sps:$4 sm:$0xff]   ;;  %v2038_v20 = vld [vmem:[%s2787_s5 + $0x20] ss:$8 sps:$4 sm:$0xff]  }
  0x73   :  { %v2040_v19 = vld [vmem:[%s2787_s5 + $0x24] ss:$8 sps:$4 sm:$0xff]   ;;  %v2043_v21 = vld [vmem:[%s2787_s5 + $0x34] ss:$8 sps:$4 sm:$0xff]   ;;  %v2041_v22 = vld [vmem:[%s2787_s5 + $0x30] ss:$8 sps:$4 sm:$0xff]  }
  0x74   :  { %786 = vmatpush1.bf16.msra.mxu1 %v1924_v51  ;;  %1239 = vmatpush1.bf16.msra.mxu0 %v1960_v63  ;;  %v2046_v23 = vld [vmem:[%s2787_s5 + $0x44] ss:$8 sps:$4 sm:$0xff]   ;;  %v2044_v24 = vld [vmem:[%s2787_s5 + $0x40] ss:$8 sps:$4 sm:$0xff]   ;;  %v2049_v25 = vld [vmem:[%s2787_s5 + $0x54] ss:$8 sps:$4 sm:$0xff]  }
  0x75   :  { %787 = vmatprep.subr.bf16.mxu1 %v1929_v52  ;;  %1240 = vmatprep.subr.bf16.mxu0 %v1965_v0  ;;  %v2047_v26 = vld [vmem:[%s2787_s5 + $0x50] ss:$8 sps:$4 sm:$0xff]   ;;  %v2052_v28 = vld [vmem:[%s2787_s5 + $0x64] ss:$8 sps:$4 sm:$0xff]   ;;  %v2050_v32 = vld [vmem:[%s2787_s5 + $0x60] ss:$8 sps:$4 sm:$0xff]  }
  0x76   :  { %v2055_v34 = vld [vmem:[%s2787_s5 + $0x74] ss:$8 sps:$4 sm:$0xff]   ;;  %v2053_v35 = vld [vmem:[%s2787_s5 + $0x70] ss:$8 sps:$4 sm:$0xff]   ;;  %v2058_v36 = vld [vmem:[%s2787_s5 + $0x84] ss:$8 sps:$4 sm:$0xff]  }
  0x77   :  { %v2056_v37 = vld [vmem:[%s2787_s5 + $0x80] ss:$8 sps:$4 sm:$0xff]   ;;  %v2061_v38 = vld [vmem:[%s2787_s5 + $0x94] ss:$8 sps:$4 sm:$0xff]   ;;  %v2059_v39 = vld [vmem:[%s2787_s5 + $0x90] ss:$8 sps:$4 sm:$0xff]  }
  0x78   :  { %788 = vmatpush1.bf16.msra.mxu1 %v1927_v53  ;;  %1241 = vmatpush1.bf16.msra.mxu0 %v1963_v1  ;;  %v2064_v40 = vld [vmem:[%s2787_s5 + $0xa4] ss:$8 sps:$4 sm:$0xff]   ;;  %v2062_v42 = vld [vmem:[%s2787_s5 + $0xa0] ss:$8 sps:$4 sm:$0xff]   ;;  %v2067_v43 = vld [vmem:[%s2787_s5 + $0xb4] ss:$8 sps:$4 sm:$0xff]  }
  0x79   :  { %789 = vmatprep.subr.bf16.mxu1 %v1932_v54  ;;  %1242 = vmatprep.subr.bf16.mxu0 %v1968_v3  ;;  %v2065_v44 = vld [vmem:[%s2787_s5 + $0xb0] ss:$8 sps:$4 sm:$0xff]   ;;  %v2070_v46 = vld [vmem:[%s2787_s5 + $0xc4] ss:$8 sps:$4 sm:$0xff]   ;;  %v2636_v49 = vsub.s32 1, %v2217_v27 }
  0x7a   :  { %v2068_v50 = vld [vmem:[%s2787_s5 + $0xc0] ss:$8 sps:$4 sm:$0xff]   ;;  %v2073_v2 = vld [vmem:[%s2787_s5 + $0xd4] ss:$8 sps:$4 sm:$0xff]   ;;  %v2071_v52 = vld [vmem:[%s2787_s5 + $0xd0] ss:$8 sps:$4 sm:$0xff]  }
  0x7b   :  { %v134_v51 = vrot.slane %v2633_v48, %v2636_v49  ;;  %v1984_v0 = vld [vmem:[%s2785_s3 + $0x100] ss:$8 sps:$4 sm:$0xff]   ;;  %v1989_v3 = vld [vmem:[%s2785_s3 + $0x114] ss:$8 sps:$4 sm:$0xff]  }
  0x7c   :  { %790 = vmatpush1.bf16.msra.mxu1 %v1930_v57  ;;  %1243 = vmatpush1.bf16.msra.mxu0 %v1966_v4  ;;  %v1987_v4 = vld [vmem:[%s2785_s3 + $0x110] ss:$8 sps:$4 sm:$0xff]  }
  0x7d   :  { %791 = vmatprep.subr.bf16.mxu1 %v1935_v58  ;;  %1244 = vmatprep.subr.bf16.mxu0 %v1971_v5  ;;  %v1992_v5 = vld [vmem:[%s2785_s3 + $0x124] ss:$8 sps:$4 sm:$0xff]  }
  0x80   :  { %792 = vmatpush1.bf16.msra.mxu1 %v1933_v62  ;;  %1245 = vmatpush1.bf16.msra.mxu0 %v1969_v6  ;;  %v1990_v6 = vld [vmem:[%s2785_s3 + $0x120] ss:$8 sps:$4 sm:$0xff]  }
  0x81   :  { %1512 = vmatprep.subr.bf16.mxu1 %v2034_v16  ;;  %v2010_v16 = vld [vmem:[%s2785_s3 + $0x184] ss:$8 sps:$4 sm:$0xff]  }
  0x83   :  { %810 = vmatmul.mubr.bf16.vlgmr.msra.gmra.mrb[4].mxu1 %v2260_v45  ;;  %v1974_v45 = vld [vmem:[%s2785_s3 + $0xc4] ss:$8 sps:$4 sm:$0xff]  }
  0x84   :  { %1246 = vmatprep.subr.bf16.mxu0 %v1974_v45  ;;  %1513 = vmatpush1.bf16.msra.mxu1 %v2032_v15  ;;  %v1995_v45 = vld [vmem:[%s2785_s3 + $0x134] ss:$8 sps:$4 sm:$0xff]   ;;  %v2005_v15 = vld [vmem:[%s2785_s3 + $0x170] ss:$8 sps:$4 sm:$0xff]  }
  0x85   :  { %1247 = vmatpush1.bf16.msra.mxu0 %v1972_v7  ;;  %1514 = vmatprep.subr.bf16.mxu1 %v2037_v17  ;;  %v1993_v7 = vld [vmem:[%s2785_s3 + $0x130] ss:$8 sps:$4 sm:$0xff]   ;;  %v2008_v17 = vld [vmem:[%s2785_s3 + $0x180] ss:$8 sps:$4 sm:$0xff]  }
  0x86   :  { %1248 = vmatprep.subr.bf16.mxu0 %v1977_v8  ;;  %v1998_v8 = vld [vmem:[%s2785_s3 + $0x144] ss:$8 sps:$4 sm:$0xff]  }
  0x88   :  { %1515 = vmatpush1.bf16.msra.mxu1 %v2035_v18  ;;  %v2013_v18 = vld [vmem:[%s2785_s3 + $0x194] ss:$8 sps:$4 sm:$0xff]  }
  0x89   :  { %1249 = vmatpush1.bf16.msra.mxu0 %v1975_v9  ;;  %1516 = vmatprep.subr.bf16.mxu1 %v2040_v19  ;;  %v1996_v9 = vld [vmem:[%s2785_s3 + $0x140] ss:$8 sps:$4 sm:$0xff]   ;;  %v2011_v19 = vld [vmem:[%s2785_s3 + $0x190] ss:$8 sps:$4 sm:$0xff]  }
  0x8a   :  { %1250 = vmatprep.subr.bf16.mxu0 %v1980_v10  ;;  %v2001_v10 = vld [vmem:[%s2785_s3 + $0x154] ss:$8 sps:$4 sm:$0xff]  }
  0x8c   :  { %1517 = vmatpush1.bf16.msra.mxu1 %v2038_v20  ;;  %v2016_v20 = vld [vmem:[%s2785_s3 + $0x1a4] ss:$8 sps:$4 sm:$0xff]  }
  0x8d   :  { %1251 = vmatpush1.bf16.msra.mxu0 %v1978_v11  ;;  %1518 = vmatprep.subr.bf16.mxu1 %v2043_v21  ;;  %v1999_v11 = vld [vmem:[%s2785_s3 + $0x150] ss:$8 sps:$4 sm:$0xff]   ;;  %v2014_v21 = vld [vmem:[%s2785_s3 + $0x1a0] ss:$8 sps:$4 sm:$0xff]  }
  0x8e   :  { %1252 = vmatprep.subr.bf16.mxu0 %v1983_v12  ;;  %v2004_v12 = vld [vmem:[%s2785_s3 + $0x164] ss:$8 sps:$4 sm:$0xff]  }
  0x90   :  { %1519 = vmatpush1.bf16.msra.mxu1 %v2041_v22  ;;  %v2019_v22 = vld [vmem:[%s2785_s3 + $0x1b4] ss:$8 sps:$4 sm:$0xff]  }
  0x91   :  { %1253 = vmatpush1.bf16.msra.mxu0 %v1981_v13  ;;  %1520 = vmatprep.subr.bf16.mxu1 %v2046_v23  ;;  %v2002_v13 = vld [vmem:[%s2785_s3 + $0x160] ss:$8 sps:$4 sm:$0xff]   ;;  %v2017_v23 = vld [vmem:[%s2785_s3 + $0x1b0] ss:$8 sps:$4 sm:$0xff]  }
  0x92   :  { %1263 = vmatprep.subr.bf16.mxu0 %v1986_v14  ;;  %v2007_v14 = vld [vmem:[%s2785_s3 + $0x174] ss:$8 sps:$4 sm:$0xff]  }
  0x94   :  { %1521 = vmatpush1.bf16.msra.mxu1 %v2044_v24  ;;  %v2022_v24 = vld [vmem:[%s2785_s3 + $0x1c4] ss:$8 sps:$4 sm:$0xff]  }
  0x95   :  { %1522 = vmatprep.subr.bf16.mxu1 %v2049_v25  ;;  %v2020_v25 = vld [vmem:[%s2785_s3 + $0x1c0] ss:$8 sps:$4 sm:$0xff]  }
  0x98   :  { %1523 = vmatpush1.bf16.msra.mxu1 %v2047_v26  ;;  %v2025_v26 = vld [vmem:[%s2785_s3 + $0x1d4] ss:$8 sps:$4 sm:$0xff]  }
  0x99   :  { %1524 = vmatprep.subr.bf16.mxu1 %v2052_v28  ;;  %v137_v28 = vsub.s32 2, %v2217_v27 }
  0x9c   :  { %1525 = vmatpush1.bf16.msra.mxu1 %v2050_v32  ;;  %v2028_v32 = vld [vmem:[%s2785_s3 + $0x1e4] ss:$8 sps:$4 sm:$0xff]  }
  0x9d   :  { %1526 = vmatprep.subr.bf16.mxu1 %v2055_v34 }
  0xa0   :  { %1527 = vmatpush1.bf16.msra.mxu1 %v2053_v35 }
  0xa1   :  { %1528 = vmatprep.subr.bf16.mxu1 %v2058_v36 }
  0xa4   :  { %1529 = vmatpush1.bf16.msra.mxu1 %v2056_v37  ;;  %v2031_v37 = vld [vmem:[%s2785_s3 + $0x1f4] ss:$8 sps:$4 sm:$0xff]  }
  0xa5   :  { %1530 = vmatprep.subr.bf16.mxu1 %v2061_v38 }
  0xa8   :  { %1531 = vmatpush1.bf16.msra.mxu1 %v2059_v39 }
  0xa9   :  { %1532 = vmatprep.subr.bf16.mxu1 %v2064_v40 }
  0xac   :  { %1533 = vmatpush1.bf16.msra.mxu1 %v2062_v42 }
  0xad   :  { %1534 = vmatprep.subr.bf16.mxu1 %v2067_v43  ;;  %v2029_v43 = vld [vmem:[%s2785_s3 + $0x1f0] ss:$8 sps:$4 sm:$0xff]  }
  0xb0   :  { %1535 = vmatpush1.bf16.msra.mxu1 %v2065_v44 }
  0xb1   :  { %1536 = vmatprep.subr.bf16.mxu1 %v2070_v46 }
  0xb4   :  { %1537 = vmatpush1.bf16.msra.mxu1 %v2068_v50  ;;  %v2076_v50 = vld [vmem:[%s2787_s5 + $0xe4] ss:$8 sps:$4 sm:$0xff]  }
  0xb5   :  { %1538 = vmatprep.subr.bf16.mxu1 %v2073_v2  ;;  %v2074_v2 = vld [vmem:[%s2787_s5 + $0xe0] ss:$8 sps:$4 sm:$0xff]  }
  0xb8   :  { %1539 = vmatpush1.bf16.msra.mxu1 %v2071_v52  ;;  %v890_v52 = vld [vmem:[%s2786_s4] sm:$0x3]  ;;  %s2106_s4 = smov [#allocation2]  }
  0xb9   :  { %1540 = vmatprep.subr.bf16.mxu1 %v2076_v50  ;;  %s1571_s22 = sshll.u32 %s2106_s4, 4  ;;  %s1572_s22 = int_to_ptr.vmem [resolvable:$true] %s1571_s22 }
  0xba   :  { %s2080_s23 = scalar_lea.vmem %s1572_s22, 64  ;;  %p2085_p1 = scmp.lt.s32.totalorder %s1572_s22, %s1572_s22 }
  0xbb   :  { %p2081_p0 = scmp.ne.s32.totalorder %s1572_s22, %s2080_s23  ;;  %p2086_p2 = scmp.lt.s32.totalorder %s2080_s23, %s2080_s23 }
  0xbc   :  { %1541 = vmatpush1.bf16.msra.mxu1 %v2074_v2 }
  0xbd   :  { %p2087_p3 = por %p2086_p2, %p2085_p1 }
  0xbf   :  { %p2088_p4 = pnand %p2087_p3, %p2081_p0 }
  0xf6   :  { %v729_v29 = vpop.f32.mrb[0].mxu1 }
  0xf7   :  { %v731_v30 = vpop.f32.mrb[1].mxu1 }
  0xf8   :  { %v733_v31 = vpop.f32.mrb[2].mxu1 }
  0xf9   :  { %v734_v33 = vpop.f32.mrb[3].mxu1  ;;  %v138_v31 = vrot.slane %v2633_v48, %v137_v28 }
 0x115   :  { %v688_v53 = vpop.f32.mrb[0].mxu0 }
 0x116   :  { %v689_v54 = vadd.f32 %v688_v53, %v130_v41  ;;  %v690_v55 = vpop.f32.mrb[1].mxu0  ;;  %v2079_v41 = vld [vmem:[%s2787_s5 + $0xf4] ss:$8 sps:$4 sm:$0xff]   ;;  %v895_v53 = vrot.slane %v890_v52, %v2628_v47 }
 0x117   :  { %v691_v56 = vadd.f32 %v690_v55, %v134_v51  ;;  %v692_v57 = vpop.f32.mrb[2].mxu0  ;;  %v2077_v51 = vld [vmem:[%s2787_s5 + $0xf0] ss:$8 sps:$4 sm:$0xff]   ;;  %1542 = vmatprep.subr.bf16.mxu1 %v2079_v41 }
 0x118   :  { %v730_v58 = vadd.f32 %v729_v29, %v689_v54  ;;  %v693_v59 = vpop.f32.mrb[3].mxu0  ;;  %v141_v29 = vsub.s32 3, %v2217_v27  ;;  %v2026_v27 = vld [vmem:[%s2785_s3 + $0x1e0] ss:$8 sps:$4 sm:$0xff]   ;;  %1543 = vmatpush1.bf16.msra.mxu1 %v2077_v51  ;;  %v899_v54 = vrot.slane %v890_v52, %v2636_v49 }
 0x119   :  { %v732_v60 = vadd.f32 %v731_v30, %v691_v56  ;;  %v2023_v30 = vld [vmem:[%s2785_s3 + $0x1d0] ss:$8 sps:$4 sm:$0xff]  }
 0x11a   :  { %v818_v61 = vmax.f32 %v730_v58, 0.0  ;;  %v142_v33 = vrot.slane %v2633_v48, %v141_v29 }
 0x11b   :  { %v819_v62 = vmax.f32 %v732_v60, 0.0 }
 0x11c   :  { %v822_v1 = vpack.c.bf16 %v818_v61, %v818_v61 }
 0x11d   :  { %v823_v63 = vpack.c.bf16 %v819_v62, %v819_v62 }
 0x11f   :  { %1254 = vmatprep.mubr.bf16.mxu0 %v823_v63 }
 0x120   :  { %1255 = vmatmul.mubr.bf16.vlgmr.msra.gmra.mrb[4].mxu0 %v822_v1  ;;  %v1340_v1 = vld [vmem:[%s2788_s6] sm:$0x3] }
 0x121   :  { %1264 = vmatpush1.bf16.msra.mxu0 %v1984_v0 }
 0x122   :  { %1265 = vmatprep.subr.bf16.mxu0 %v1989_v3  ;;  %v1345_v3 = vrot.slane %v1340_v1, %v2628_v47 }
 0x125   :  { %1266 = vmatpush1.bf16.msra.mxu0 %v1987_v4  ;;  %v1349_v4 = vrot.slane %v1340_v1, %v2636_v49 }
 0x126   :  { %1267 = vmatprep.subr.bf16.mxu0 %v1992_v5 }
 0x129   :  { %1268 = vmatpush1.bf16.msra.mxu0 %v1990_v6 }
 0x12a   :  { %1269 = vmatprep.subr.bf16.mxu0 %v1995_v45 }
 0x12d   :  { %1270 = vmatpush1.bf16.msra.mxu0 %v1993_v7 }
 0x12e   :  { %1271 = vmatprep.subr.bf16.mxu0 %v1998_v8 }
 0x131   :  { %1272 = vmatpush1.bf16.msra.mxu0 %v1996_v9 }
 0x132   :  { %1273 = vmatprep.subr.bf16.mxu0 %v2001_v10 }
 0x135   :  { %1274 = vmatpush1.bf16.msra.mxu0 %v1999_v11 }
 0x136   :  { %1275 = vmatprep.subr.bf16.mxu0 %v2004_v12 }
 0x139   :  { %1276 = vmatpush1.bf16.msra.mxu0 %v2002_v13 }
 0x13a   :  { %1277 = vmatprep.subr.bf16.mxu0 %v2007_v14 }
 0x13d   :  { %1278 = vmatpush1.bf16.msra.mxu0 %v2005_v15 }
 0x13e   :  { %1279 = vmatprep.subr.bf16.mxu0 %v2010_v16 }
 0x141   :  { %1280 = vmatpush1.bf16.msra.mxu0 %v2008_v17 }
 0x142   :  { %1281 = vmatprep.subr.bf16.mxu0 %v2013_v18 }
 0x145   :  { %1282 = vmatpush1.bf16.msra.mxu0 %v2011_v19 }
 0x146   :  { %1283 = vmatprep.subr.bf16.mxu0 %v2016_v20 }
 0x149   :  { %1284 = vmatpush1.bf16.msra.mxu0 %v2014_v21 }
 0x14a   :  { %1285 = vmatprep.subr.bf16.mxu0 %v2019_v22 }
 0x14d   :  { %1286 = vmatpush1.bf16.msra.mxu0 %v2017_v23 }
 0x14e   :  { %1287 = vmatprep.subr.bf16.mxu0 %v2022_v24 }
 0x151   :  { %1288 = vmatpush1.bf16.msra.mxu0 %v2020_v25 }
 0x152   :  { %1289 = vmatprep.subr.bf16.mxu0 %v2025_v26 }
 0x155   :  { %1290 = vmatpush1.bf16.msra.mxu0 %v2023_v30 }
 0x156   :  { %v811_v34 = vpop.f32.mrb[4].mxu1  ;;  %1291 = vmatprep.subr.bf16.mxu0 %v2028_v32 }
 0x157   :  { %v1777_v35 = vadd.f32 %v811_v34, %v138_v31  ;;  %v813_v36 = vpop.f32.mrb[5].mxu1 }
 0x158   :  { %v1778_v38 = vadd.f32 %v813_v36, %v142_v33  ;;  %v815_v39 = vpop.f32.mrb[6].mxu1 }
 0x159   :  { %v816_v40 = vpop.f32.mrb[7].mxu1  ;;  %1292 = vmatpush1.bf16.msra.mxu0 %v2026_v27  ;;  %v820_v44 = vmax.f32 %v1777_v35, 0.0 }
 0x15a   :  { %v821_v42 = vmax.f32 %v1778_v38, 0.0  ;;  %1293 = vmatprep.subr.bf16.mxu0 %v2031_v37 }
 0x15b   :  { %v824_v48 = vpack.c.bf16 %v820_v44, %v820_v44 }
 0x15c   :  { %v825_v46 = vpack.c.bf16 %v821_v42, %v821_v42 }
 0x15d   :  { %1294 = vmatpush1.bf16.msra.mxu0 %v2029_v43 }
 0x15e   :  { %1295 = vmatprep.mubr.bf16.mxu0 %v825_v46 }
 0x160   :  { %1296 = vmatmul.mubr.bf16.vlgmr.msra.gmra.mrb[4].mxu0 %v824_v48 }
 0x233   :  { %v1297_v55 = vpop.f32.mrb[4].mxu0 }
 0x234   :  { %v1779_v56 = vadd.f32 %v1297_v55, %v895_v53  ;;  %v1299_v57 = vpop.f32.mrb[5].mxu0 }
 0x235   :  { %v1780_v58 = vadd.f32 %v1299_v57, %v899_v54  ;;  %v1301_v59 = vpop.f32.mrb[6].mxu0 }
 0x236   :  { %v1304_v60 = vmax.f32 %v1779_v56, 0.0  ;;  %v1302_v61 = vpop.f32.mrb[7].mxu0 }
 0x237   :  { %v1305_v62 = vmax.f32 %v1780_v58, 0.0 }
 0x238   :  { %v1306_v0 = vpack.c.bf16 %v1304_v60, %v1304_v60 }
 0x239   :  { %v1307_v63 = vpack.c.bf16 %v1305_v62, %v1305_v62 }
 0x23b   :  { %1544 = vmatprep.mubr.bf16.mxu1 %v1307_v63 }
 0x23c   :  { %1545 = vmatmul.mubr.bf16.vlgmr.msra.gmra.mrb[8].mxu1 %v1306_v0 }
 0x30f   :  { %v1546_v5 = vpop.f32.mrb[8].mxu1 }
 0x310   :  { %v1547_v6 = vadd.f32 %v1546_v5, %v1345_v3  ;;  %v1548_v45 = vpop.f32.mrb[9].mxu1 }
 0x311   :  { %v1549_v7 = vadd.f32 %v1548_v45, %v1349_v4  ;;  %v1550_v8 = vpop.f32.mrb[10].mxu1 }
 0x312   :  { %v1551_v9 = vpop.f32.mrb[11].mxu1 }
 0x313   :  { %v1555_v10 = vcombine.low %v1547_v6, %v1549_v7 }
 0x315   :  { %1772 = vst.sshfl [vmem:[#allocation2] sm:$0x33 pattern:$0x76325410] %v1555_v10 }
 0x316   :  { %2091 = shalt.err (!%p2088_p4)
}
 0x317   :  { %s2092_s25 = scalar_lea.hbm %s2789_s7, 64 }
 0x318   :  { %p2093_p5 = scmp.ne.s32.totalorder %s2789_s7, %s2092_s25  ;;  %p2096_p6 = scmp.lt.u32.totalorder %s2092_s25, %s2789_s7 }
 0x31a   :  { %p2098_p7 = pnand %p2096_p6, %p2093_p5 }
 0x31c   :  { %2101 = shalt.err (!%p2098_p7)
}
 0x31d   :  { %1574 = dma.vmem_to_hbm [thread:$0]  %s1572_s22, 64, %s2789_s7, [#allocation3]  }
 0x31e   :  { %2102 = dma.done.wait [#allocation3], 64  }
 0x31f   :  { %2103 = vsyncadd [#allocation3], 4294967232 }
 0x320   :  { %1578 = vsyncpa [#allocation3], 1 }

</bundles_post_ra>
